<compile_context>
chip_gen: v5e
topology: v5e:2x2
jax: 0.10.0
libtpu: 0.0.40
codegen_flags: <defaults>
</compile_context>

<pallas_src>
import functools
import math

import jax
import jax.numpy as jnp
from jax.experimental import pallas as pl
from jax.experimental.pallas import tpu as pltpu


# ------------------------------------------------------------------
# helpers
# ------------------------------------------------------------------
def _round_up(x, m):
    return (x + m - 1) // m * m


def _choose_tm(m):
    if m >= 512:
        return 512
    return _round_up(m, 16)


def _vmem_limit(tm, kp, wcols):
    need = (2 * tm * kp * 2          # A block, double-buffered, bf16
            + 2 * kp * wcols * 2     # packed weights, bf16
            + 2 * tm * wcols * 4     # output block, double-buffered
            + 4 * tm * wcols * 4)    # f32 epilogue temporaries headroom
    return int(min(max(2 * need, 16 * 1024 * 1024), 40 * 1024 * 1024))


# ------------------------------------------------------------------
# Pallas kernels (one independent grid step per (sample, M-tile))
# ------------------------------------------------------------------
def _gated_conv_kernel(a_ref, w_ref, b_ref, y_ref, st_ref, *, cgp):
    """Fused 2*Cgp-lane im2col matmul + bias + ELU*sigmoid gating + per-tile
    InstanceNorm partial statistics.  No cross-step state, no program_id."""
    a = a_ref[0]                                                    # (TM, Kp) bf16
    acc = jnp.dot(a, w_ref[...], preferred_element_type=jnp.float32)  # (TM, 2*Cgp) f32
    h = acc[:, :cgp] + b_ref[0:1, :]                                # feature half (lane-aligned)
    g = acc[:, cgp:] + b_ref[1:2, :]                                # gate half
    h = jnp.where(h > 0.0, h, jnp.exp(jnp.minimum(h, 0.0)) - 1.0)   # ELU(alpha=1)
    g = 1.0 / (1.0 + jnp.exp(-g))                                   # sigmoid
    y = h * g
    y_ref[0] = y.astype(y_ref.dtype)                                # lane-dense store (Cgp%128==0)
    s1 = jnp.sum(y, axis=0, keepdims=True)                          # (1, Cgp)
    s2 = jnp.sum(y * y, axis=0, keepdims=True)                      # (1, Cgp)
    st_ref[0, 0] = jnp.concatenate([s1, s2], axis=0)                # per-tile partial stats


def _plain_conv_kernel(a_ref, w_ref, b_ref, y_ref, *, final_tanh):
    """Non-gated final conv: matmul + bias (+ tanh)."""
    acc = jnp.dot(a_ref[0], w_ref[...], preferred_element_type=jnp.float32)
    y = acc + b_ref[0:1, :]
    if final_tanh:
        y = jnp.tanh(y)
    y_ref[0] = y.astype(y_ref.dtype)


# ------------------------------------------------------------------
# pallas_call wrapper (tiling, padding, specs)
# ------------------------------------------------------------------
def _fused_conv_matmul(a, wm, bias, *, gated, final_tanh):
    """a: (N, M, K); wm: (K, Cout); bias: (Cout,).
    Returns (y[:, :M, :C_real], per-sample summed stats or None, num_padded_rows)."""
    n, m, k = a.shape
    cout = wm.shape[1]
    tm = _choose_tm(m)
    mp = _round_up(m, tm)
    kp = _round_up(k, 128)
    mt = mp // tm

    a = jnp.pad(a.astype(jnp.bfloat16), ((0, 0), (0, mp - m), (0, kp - k)))
    grid = (n, mt)

    if gated:
        cg = cout // 2
        cgp = _round_up(cg, 128)
        wf = jnp.pad(wm[:, :cg], ((0, kp - k), (0, cgp - cg)))
        wg = jnp.pad(wm[:, cg:], ((0, kp - k), (0, cgp - cg)))
        wp = jnp.concatenate([wf, wg], axis=1).astype(jnp.bfloat16)          # (Kp, 2*Cgp)
        b2 = jnp.stack([jnp.pad(bias[:cg], (0, cgp - cg)),
                        jnp.pad(bias[cg:], (0, cgp - cg))], axis=0).astype(jnp.float32)

        cparams = pltpu.CompilerParams(
            dimension_semantics=("parallel", "parallel"),
            vmem_limit_bytes=_vmem_limit(tm, kp, 2 * cgp))

        y, st = pl.pallas_call(
            functools.partial(_gated_conv_kernel, cgp=cgp),
            out_shape=(jax.ShapeDtypeStruct((n, mp, cgp), jnp.bfloat16),
                       jax.ShapeDtypeStruct((n, mt, 2, cgp), jnp.float32)),
            grid=grid,
            in_specs=[
                pl.BlockSpec((1, tm, kp), lambda ni, mi: (ni, mi, 0)),
                pl.BlockSpec((kp, 2 * cgp), lambda ni, mi: (0, 0)),
                pl.BlockSpec((2, cgp), lambda ni, mi: (0, 0)),
            ],
            out_specs=(
                pl.BlockSpec((1, tm, cgp), lambda ni, mi: (ni, mi, 0)),
                pl.BlockSpec((1, 1, 2, cgp), lambda ni, mi: (ni, mi, 0, 0)),
            ),
            compiler_params=cparams,
        )(a, wp, b2)
        stats = jnp.sum(st[..., :cg], axis=1)      # (N, 2, cg); still contains padded rows
        return y[:, :m, :cg], stats, mp - m

    coutp = _round_up(cout, 128)
    wp = jnp.pad(wm, ((0, kp - k), (0, coutp - cout))).astype(jnp.bfloat16)
    bp = jnp.pad(bias, (0, coutp - cout)).reshape(1, coutp).astype(jnp.float32)

    cparams = pltpu.CompilerParams(
        dimension_semantics=("parallel", "parallel"),
        vmem_limit_bytes=_vmem_limit(tm, kp, coutp))

    y = pl.pallas_call(
        functools.partial(_plain_conv_kernel, final_tanh=final_tanh),
        out_shape=jax.ShapeDtypeStruct((n, mp, coutp), jnp.float32),
        grid=grid,
        in_specs=[
            pl.BlockSpec((1, tm, kp), lambda ni, mi: (ni, mi, 0)),
            pl.BlockSpec((kp, coutp), lambda ni, mi: (0, 0)),
            pl.BlockSpec((1, coutp), lambda ni, mi: (0, 0)),
        ],
        out_specs=pl.BlockSpec((1, tm, coutp), lambda ni, mi: (ni, mi, 0)),
        compiler_params=cparams,
    )(a, wp, bp)
    return y[:, :m, :cout], None, 0


# ------------------------------------------------------------------
# plain-JAX glue: im2col patches, zero upsampling, InstanceNorm affine
# ------------------------------------------------------------------
def _extract_patches(x, kh, kw, stride, padding, dilation):
    # x: (N, H, W, C) -> (N, OH, OW, KH*KW*C) in bf16 (MXU input dtype).
    # TODO(synk): replace the materialized im2col with in-kernel shifted-slice matmuls over a
    # halo-padded NHWC tile to remove the KH*KW x HBM read amplification.
    x = x.astype(jnp.bfloat16)
    n, h, w, c = x.shape
    xp = jnp.pad(x, ((0, 0), (padding, padding), (padding, padding), (0, 0)))
    hp, wp = h + 2 * padding, w + 2 * padding
    oh = (hp - dilation * (kh - 1) - 1) // stride + 1
    ow = (wp - dilation * (kw - 1) - 1) // stride + 1
    cols = []
    for i in range(kh):
        for j in range(kw):
            cols.append(
                xp[:, i * dilation:i * dilation + (oh - 1) * stride + 1:stride,
                      j * dilation:j * dilation + (ow - 1) * stride + 1:stride, :])
    return jnp.concatenate(cols, axis=-1), oh, ow


def _zero_upsample(x, s):
    if s == 1:
        return x
    n, h, w, c = x.shape
    y = jnp.zeros((n, (h - 1) * s + 1, (w - 1) * s + 1, c), x.dtype)
    return y.at[:, ::s, ::s, :].set(x)


def _elu(x):
    return jnp.where(x > 0.0, x, jnp.exp(jnp.minimum(x, 0.0)) - 1.0)


def _pad_row_value(bias, cg):
    # Value a fully zero im2col row (M padding) produces after bias + ELU*sigmoid gating.
    bf = bias[:cg].astype(jnp.float32)
    bg = bias[cg:].astype(jnp.float32)
    return _elu(bf) * (1.0 / (1.0 + jnp.exp(-bg)))


def _apply_instance_norm(y, stats, pad_rows, pad_val, m_real, eps):
    # stats: (N, 2, C) = [sum, sum_sq] over all (real + zero-padded) rows.
    s1 = stats[:, 0, :] - float(pad_rows) * pad_val[None, :]
    s2 = stats[:, 1, :] - float(pad_rows) * (pad_val * pad_val)[None, :]
    mean = s1 / float(m_real)
    var = jnp.maximum(s2 / float(m_real) - mean * mean, 0.0)   # biased variance
    inv = jax.lax.rsqrt(var + eps)
    out = (y.astype(jnp.float32) - mean[:, None, None, :]) * inv[:, None, None, :]
    return out.astype(jnp.bfloat16)     # bf16 inter-layer activations (halve HBM traffic)


# ------------------------------------------------------------------
# layer wrappers (GateConv2d / GateTransposedConv2d + InstanceNorm)
# ------------------------------------------------------------------
def gated_conv2d(x, w, b, *, stride, padding, dilation=1, norm=True, eps=1e-5,
                 final_tanh=False):
    # w: (Cout, Cin, KH, KW)   -- PyTorch Conv2d layout
    cout, cin, kh, kw = w.shape
    gated = (cout != 3)                    # GateConv2d: no gating when out_channels == 3
    patches, oh, ow = _extract_patches(x, kh, kw, stride, padding, dilation)
    n = x.shape[0]
    a = patches.reshape(n, oh * ow, kh * kw * cin)
    wm = jnp.transpose(w, (2, 3, 1, 0)).reshape(kh * kw * cin, cout)
    y, stats, pad_rows = _fused_conv_matmul(a, wm, b, gated=gated, final_tanh=final_tanh)
    y = y.reshape(n, oh, ow, y.shape[-1])
    if norm:
        if stats is not None:
            cg = cout // 2
            y = _apply_instance_norm(y, stats, pad_rows, _pad_row_value(b, cg), oh * ow, eps)
        else:                               # fallback (unused by this model)
            yf = y.astype(jnp.float32)
            mean = jnp.mean(yf, axis=(1, 2), keepdims=True)
            var = jnp.mean(jnp.square(yf - mean), axis=(1, 2), keepdims=True)
            y = ((yf - mean) * jax.lax.rsqrt(var + eps)).astype(jnp.bfloat16)
    return y


def gated_conv_transpose2d(x, wt, b, *, stride, padding, norm=True, eps=1e-5):
    # wt: (Cin, Cout, KH, KW)  -- PyTorch ConvTranspose2d layout
    # TODO(synk): sub-pixel decomposition (s*s small convs on the un-upsampled map) would cut
    # the ~75% zero MACs of zero-upsample + full conv; equivalent form kept for correctness.
    cin, cout, kh, kw = wt.shape
    gated = (cout != 3)
    up = _zero_upsample(x, stride)
    # conv_transpose(x, W, s, p) == conv(zero_upsample(x, s), flip(W)^T, pad=k-1-p)
    w_eq = jnp.transpose(wt[:, :, ::-1, ::-1], (2, 3, 0, 1)).reshape(kh * kw * cin, cout)
    patches, oh, ow = _extract_patches(up, kh, kw, 1, kh - 1 - padding, 1)
    n = x.shape[0]
    a = patches.reshape(n, oh * ow, kh * kw * cin)
    y, stats, pad_rows = _fused_conv_matmul(a, w_eq, b, gated=gated, final_tanh=False)
    y = y.reshape(n, oh, ow, y.shape[-1])
    if norm and stats is not None:
        cg = cout // 2
        y = _apply_instance_norm(y, stats, pad_rows, _pad_row_value(b, cg), oh * ow, eps)
    return y


# ------------------------------------------------------------------
# parameter construction (deterministic, PyTorch-default-like uniform init)
# ------------------------------------------------------------------
def init_params(key, hc, dd):
    branch_specs = [
        # (cin, cout, k, stride, padding, dilation)
        (3,      2 * hc, 5, 2, 2, 1),
        (hc,     2 * hc, 3, 1, 1, 1),
        (hc,     4 * hc, 3, 1, 1, 1),
        (2 * hc, 4 * hc, 3, 2, 1, 1),
        (2 * hc, 8 * hc, 3, 1, 1, 1),
        (4 * hc, 8 * hc, 3, 1, 1, 1),
    ]
    conv1_specs = branch_specs + [
        (4 * hc, 8 * hc, 3, 1, 2 ** (i + 1), 2 ** (i + 1)) for i in range(dd)
    ]
    conv2_specs = list(branch_specs)
    total_specs = [
        # (kind, cin, cout, k, stride, padding)
        ("c", 8 * hc,  8 * hc, 3, 1, 1),
        ("c", 4 * hc,  8 * hc, 3, 1, 1),
        ("t", 4 * hc,  4 * hc, 3, 2, 1),
        ("c", 2 * hc,  4 * hc, 3, 1, 1),
        ("t", 2 * hc,  4 * hc, 3, 2, 1),
        ("c", 2 * hc,  2 * hc, 3, 1, 1),
        ("c", hc,      hc,     3, 1, 1),
        ("c", hc // 2, 3,      3, 1, 1),
    ]

    def conv_init(k, cout, cin, ksz):
        k1, k2 = jax.random.split(k)
        bound = 1.0 / math.sqrt(cin * ksz * ksz)
        w = jax.random.uniform(k1, (cout, cin, ksz, ksz), jnp.float32, -bound, bound)
        b = jax.random.uniform(k2, (cout,), jnp.float32, -bound, bound)
        return w, b

    def tconv_init(k, cin, cout, ksz):
        k1, k2 = jax.random.split(k)
        bound = 1.0 / math.sqrt(cin * ksz * ksz)
        w = jax.random.uniform(k1, (cin, cout, ksz, ksz), jnp.float32, -bound, bound)
        b = jax.random.uniform(k2, (cout,), jnp.float32, -bound, bound)
        return w, b

    params = {"conv1": [], "conv2": [], "total": []}
    idx = 0
    for spec in conv1_specs:
        params["conv1"].append(conv_init(jax.random.fold_in(key, idx), spec[1], spec[0], spec[2]))
        idx += 1
    for spec in conv2_specs:
        params["conv2"].append(conv_init(jax.random.fold_in(key, idx), spec[1], spec[0], spec[2]))
        idx += 1
    for spec in total_specs:
        kind, cin, cout, ksz = spec[0], spec[1], spec[2], spec[3]
        k = jax.random.fold_in(key, idx)
        params["total"].append(conv_init(k, cout, cin, ksz) if kind == "c"
                               else tconv_init(k, cin, cout, ksz))
        idx += 1

    cfg = {
        "conv1_specs": conv1_specs,
        "conv2_specs": conv2_specs,
        "total_specs": total_specs,
        # NOTE: the reference builds total_bn[0] as nn.InstanceNorm2d(self.gen_relu, 4*hc),
        # i.e. eps = hidden_channels * 4 (a bug in the original, reproduced faithfully).
        "total_eps": [float(4 * hc)] + [1e-5] * (len(total_specs) - 1),
    }
    return params, cfg


# ------------------------------------------------------------------
# model forward
# ------------------------------------------------------------------
def gated_coarse2fine_forward(params, x, xori, mask, *, cfg):
    # x, xori: (N, 3, H, W) NCHW; mask: (N, 1, H, W).  Output: (N, 3, H', W') NCHW.
    xh = jnp.transpose(x, (0, 2, 3, 1)).astype(jnp.float32)
    xoh = jnp.transpose(xori, (0, 2, 3, 1)).astype(jnp.float32)
    mh = jnp.transpose(mask, (0, 2, 3, 1)).astype(jnp.float32)   # (N, H, W, 1)

    # x1 = x * mask.repeat(1,3,1,1) + xori * (1 - mask.repeat(...))  (broadcast == repeat)
    x1 = xh * mh + xoh * (1.0 - mh)
    xnow = x1

    # ---- branch 1: dilated gated convs ----
    for (w, b), spec in zip(params["conv1"], cfg["conv1_specs"]):
        _, _, _, s, p, d = spec
        x1 = gated_conv2d(x1, w, b, stride=s, padding=p, dilation=d, norm=True, eps=1e-5)

    # ---- branch 2: gated convs + contextual attention ----
    x2 = xnow
    for (w, b), spec in zip(params["conv2"], cfg["conv2_specs"]):
        _, _, _, s, p, d = spec
        x2 = gated_conv2d(x2, w, b, stride=s, padding=p, dilation=d, norm=True, eps=1e-5)
    # TODO(synk): ContextualAttention class definition was not provided with the module;
    # using identity passthrough (offsets=None), then ReLU as in forward().
    offsets = None
    x2 = jnp.maximum(x2, 0.0)

    xc = jnp.concatenate([x1, x2], axis=-1)

    # ---- total (decoder) path ----
    n_total = len(cfg["total_specs"])
    for i, ((w, b), spec) in enumerate(zip(params["total"], cfg["total_specs"])):
        kind = spec[0]
        s, p = spec[4], spec[5]
        last = (i == n_total - 1)
        if kind == "c":
            xc = gated_conv2d(xc, w, b, stride=s, padding=p, dilation=1,
                              norm=not last,
                              eps=cfg["total_eps"][i] if not last else 1e-5,
                              final_tanh=last)
        else:
            xc = gated_conv_transpose2d(xc, w, b, stride=s, padding=p,
                                        norm=True, eps=cfg["total_eps"][i])

    out = jnp.transpose(xc, (0, 3, 1, 2))   # back to NCHW, float32
    return out, offsets


# ------------------------------------------------------------------
if __name__ == "__main__":
    HC = 8            # hidden_channels (small for the demo; module default is 24)
    DD = 4            # dilation_depth
    N, H, W = 2, 16, 16

    key = jax.random.PRNGKey(0)
    kx, kxo, km, kp = jax.random.split(key, 4)
    x = jax.random.normal(kx, (N, 3, H, W), jnp.float32)
    xori = jax.random.normal(kxo, (N, 3, H, W), jnp.float32)
    mask = (jax.random.uniform(km, (N, 1, H, W)) > 0.5).astype(jnp.float32)

    params, cfg = init_params(kp, HC, DD)

    fwd = jax.jit(functools.partial(gated_coarse2fine_forward, cfg=cfg))
    out, offsets = fwd(params, x, xori, mask)
    out = jax.block_until_ready(out)

    assert out.shape == (N, 3, 13, 13), out.shape
    assert bool(jnp.all(jnp.isfinite(out)))
    print("KERNEL_OK")
</pallas_src>

<mosaic_0001>
module attributes {stable_mosaic.version = 11 : i64} {
  func.func @_gated_conv_kernel(%arg0: i32, %arg1: i32, %arg2: memref<1x64x128xbf16, #tpu.memory_space<vmem>>, %arg3: memref<128x256xbf16, #tpu.memory_space<vmem>>, %arg4: memref<2x128xf32, #tpu.memory_space<vmem>>, %arg5: memref<1x64x128xbf16, #tpu.memory_space<vmem>>, %arg6: memref<1x1x2x128xf32, #tpu.memory_space<vmem>>) attributes {dimension_semantics = [#tpu.dimension_semantics<parallel>, #tpu.dimension_semantics<parallel>], iteration_bounds = array<i64: 2, 1>, scalar_prefetch = 0 : i64, scratch_operands = 0 : i64, tpu.core_type = #tpu.core_type<tc>, window_params = [{transform_indices = @transform_0, window_bounds = array<i64: 1, 64, 128>}, {pipeline_mode = #tpu.pipeline_mode<synchronous>, transform_indices = @transform_1, window_bounds = array<i64: 128, 256>}, {pipeline_mode = #tpu.pipeline_mode<synchronous>, transform_indices = @transform_2, window_bounds = array<i64: 2, 128>}, {transform_indices = @transform_3, window_bounds = array<i64: 1, 64, 128>}, {transform_indices = @transform_4, window_bounds = array<i64: 1, 1, 2, 128>}]} {
    %c0 = arith.constant 0 : index
    %c0_0 = arith.constant 0 : index
    %c0_1 = arith.constant 0 : index
    %0 = vector.load %arg2[%c0, %c0_0, %c0_1] : memref<1x64x128xbf16, #tpu.memory_space<vmem>>, vector<1x64x128xbf16>
    %1 = vector.shape_cast %0 : vector<1x64x128xbf16> to vector<64x128xbf16>
    %c0_2 = arith.constant 0 : index
    %c0_3 = arith.constant 0 : index
    %2 = vector.load %arg3[%c0_2, %c0_3] : memref<128x256xbf16, #tpu.memory_space<vmem>>, vector<128x256xbf16>
    %cst = arith.constant dense<0.000000e+00> : vector<64x256xf32>
    %3 = tpu.matmul %1, %2, %cst {dimension_numbers = #tpu.dot_dimension_numbers<[1], [0], [0], [1], [0, 0, 1, 1], [], []>} : vector<64x128xbf16>, vector<128x256xbf16>, vector<64x256xf32> -> vector<64x256xf32>
    %4 = vector.extract_strided_slice %3 {offsets = [0, 0], sizes = [64, 128], strides = [1, 1]} : vector<64x256xf32> to vector<64x128xf32>
    %c0_4 = arith.constant 0 : index
    %c0_5 = arith.constant 0 : index
    %5 = vector.load %arg4[%c0_4, %c0_5] : memref<2x128xf32, #tpu.memory_space<vmem>>, vector<1x128xf32>
    %6 = vector.broadcast %5 : vector<1x128xf32> to vector<64x128xf32>
    %7 = arith.addf %4, %6 : vector<64x128xf32>
    %8 = vector.extract_strided_slice %3 {offsets = [0, 128], sizes = [64, 128], strides = [1, 1]} : vector<64x256xf32> to vector<64x128xf32>
    %c1 = arith.constant 1 : index
    %c0_6 = arith.constant 0 : index
    %9 = vector.load %arg4[%c1, %c0_6] : memref<2x128xf32, #tpu.memory_space<vmem>>, vector<1x128xf32>
    %10 = vector.broadcast %9 : vector<1x128xf32> to vector<64x128xf32>
    %11 = arith.addf %8, %10 : vector<64x128xf32>
    %cst_7 = arith.constant 0.000000e+00 : f32
    %12 = vector.broadcast %cst_7 : f32 to vector<64x128xf32>
    %13 = arith.cmpf ogt, %7, %12 : vector<64x128xf32>
    %cst_8 = arith.constant 0.000000e+00 : f32
    %14 = vector.broadcast %cst_8 : f32 to vector<64x128xf32>
    %15 = arith.minimumf %7, %14 : vector<64x128xf32>
    %16 = math.exp %15 : vector<64x128xf32>
    %cst_9 = arith.constant 1.000000e+00 : f32
    %17 = vector.broadcast %cst_9 : f32 to vector<64x128xf32>
    %18 = arith.subf %16, %17 : vector<64x128xf32>
    %19 = arith.select %13, %7, %18 : vector<64x128xi1>, vector<64x128xf32>
    %cst_10 = arith.constant 0.000000e+00 : f32
    %20 = vector.broadcast %cst_10 : f32 to vector<64x128xf32>
    %21 = arith.subf %20, %11 : vector<64x128xf32>
    %22 = math.exp %21 : vector<64x128xf32>
    %cst_11 = arith.constant 1.000000e+00 : f32
    %23 = vector.broadcast %cst_11 : f32 to vector<64x128xf32>
    %24 = arith.addf %23, %22 : vector<64x128xf32>
    %cst_12 = arith.constant 1.000000e+00 : f32
    %25 = vector.broadcast %cst_12 : f32 to vector<64x128xf32>
    %26 = arith.divf %25, %24 : vector<64x128xf32>
    %27 = arith.mulf %19, %26 : vector<64x128xf32>
    %28 = arith.truncf %27 : vector<64x128xf32> to vector<64x128xbf16>
    %c0_13 = arith.constant 0 : index
    %c0_14 = arith.constant 0 : index
    %c0_15 = arith.constant 0 : index
    %29 = vector.load %arg5[%c0_13, %c0_14, %c0_15] : memref<1x64x128xbf16, #tpu.memory_space<vmem>>, vector<1x64x128xbf16>
    %30 = vector.shape_cast %29 : vector<1x64x128xbf16> to vector<64x128xbf16>
    %31 = vector.shape_cast %28 : vector<64x128xbf16> to vector<1x64x128xbf16>
    tpu.vector_store %arg5[%c0_13, %c0_14, %c0_15], %31 {strides = array<i32>} : memref<1x64x128xbf16, #tpu.memory_space<vmem>>, vector<1x64x128xbf16>,
    %cst_16 = arith.constant dense<0.000000e+00> : vector<128xf32>
    %32 = vector.multi_reduction <add>, %27, %cst_16 [0] : vector<64x128xf32> to vector<128xf32>
    %33 = vector.shape_cast %32 : vector<128xf32> to vector<1x128xf32>
    %34 = arith.mulf %27, %27 : vector<64x128xf32>
    %cst_17 = arith.constant dense<0.000000e+00> : vector<128xf32>
    %35 = vector.multi_reduction <add>, %34, %cst_17 [0] : vector<64x128xf32> to vector<128xf32>
    %36 = vector.shape_cast %35 : vector<128xf32> to vector<1x128xf32>
    %37 = tpu.concatenate %33, %36 in 0 : vector<1x128xf32>, vector<1x128xf32> -> vector<2x128xf32>
    %c0_18 = arith.constant 0 : index
    %c0_19 = arith.constant 0 : index
    %c0_20 = arith.constant 0 : index
    %c0_21 = arith.constant 0 : index
    %38 = vector.load %arg6[%c0_18, %c0_19, %c0_20, %c0_21] : memref<1x1x2x128xf32, #tpu.memory_space<vmem>>, vector<1x1x2x128xf32>
    %39 = vector.shape_cast %38 : vector<1x1x2x128xf32> to vector<2x128xf32>
    %40 = vector.shape_cast %37 : vector<2x128xf32> to vector<1x1x2x128xf32>
    tpu.vector_store %arg6[%c0_18, %c0_19, %c0_20, %c0_21], %40 {strides = array<i32>} : memref<1x1x2x128xf32, #tpu.memory_space<vmem>>, vector<1x1x2x128xf32>,
    return
  }
  func.func @transform_0(%arg0: i32, %arg1: i32) -> (i32, i32, i32) {
    %c0_i32 = arith.constant 0 : i32
    %c0_i32_0 = arith.constant 0 : i32
    return %arg0, %arg1, %c0_i32 : i32, i32, i32
  }
  func.func @transform_1(%arg0: i32, %arg1: i32) -> (i32, i32) {
    %c0_i32 = arith.constant 0 : i32
    %c0_i32_0 = arith.constant 0 : i32
    %c0_i32_1 = arith.constant 0 : i32
    return %c0_i32, %c0_i32_0 : i32, i32
  }
  func.func @transform_2(%arg0: i32, %arg1: i32) -> (i32, i32) {
    %c0_i32 = arith.constant 0 : i32
    %c0_i32_0 = arith.constant 0 : i32
    %c0_i32_1 = arith.constant 0 : i32
    return %c0_i32, %c0_i32_0 : i32, i32
  }
  func.func @transform_3(%arg0: i32, %arg1: i32) -> (i32, i32, i32) {
    %c0_i32 = arith.constant 0 : i32
    %c0_i32_0 = arith.constant 0 : i32
    return %arg0, %arg1, %c0_i32 : i32, i32, i32
  }
  func.func @transform_4(%arg0: i32, %arg1: i32) -> (i32, i32, i32, i32) {
    %c0_i32 = arith.constant 0 : i32
    %c0_i32_0 = arith.constant 0 : i32
    %c0_i32_1 = arith.constant 0 : i32
    return %arg0, %arg1, %c0_i32, %c0_i32_0 : i32, i32, i32, i32
  }
}

module attributes {stable_mosaic.version = 11 : i64} {
  func.func @_gated_conv_kernel(%arg0: i32, %arg1: i32, %arg2: memref<1x16x256xbf16, #tpu.memory_space<vmem>>, %arg3: memref<256x256xbf16, #tpu.memory_space<vmem>>, %arg4: memref<2x128xf32, #tpu.memory_space<vmem>>, %arg5: memref<1x16x128xbf16, #tpu.memory_space<vmem>>, %arg6: memref<1x1x2x128xf32, #tpu.memory_space<vmem>>) attributes {dimension_semantics = [#tpu.dimension_semantics<parallel>, #tpu.dimension_semantics<parallel>], iteration_bounds = array<i64: 2, 1>, scalar_prefetch = 0 : i64, scratch_operands = 0 : i64, tpu.core_type = #tpu.core_type<tc>, window_params = [{transform_indices = @transform_0, window_bounds = array<i64: 1, 16, 256>}, {pipeline_mode = #tpu.pipeline_mode<synchronous>, transform_indices = @transform_1, window_bounds = array<i64: 256, 256>}, {pipeline_mode = #tpu.pipeline_mode<synchronous>, transform_indices = @transform_2, window_bounds = array<i64: 2, 128>}, {transform_indices = @transform_3, window_bounds = array<i64: 1, 16, 128>}, {transform_indices = @transform_4, window_bounds = array<i64: 1, 1, 2, 128>}]} {
    %c0 = arith.constant 0 : index
    %c0_0 = arith.constant 0 : index
    %c0_1 = arith.constant 0 : index
    %0 = vector.load %arg2[%c0, %c0_0, %c0_1] : memref<1x16x256xbf16, #tpu.memory_space<vmem>>, vector<1x16x256xbf16>
    %1 = vector.shape_cast %0 : vector<1x16x256xbf16> to vector<16x256xbf16>
    %c0_2 = arith.constant 0 : index
    %c0_3 = arith.constant 0 : index
    %2 = vector.load %arg3[%c0_2, %c0_3] : memref<256x256xbf16, #tpu.memory_space<vmem>>, vector<256x256xbf16>
    %cst = arith.constant dense<0.000000e+00> : vector<16x256xf32>
    %3 = tpu.matmul %1, %2, %cst {dimension_numbers = #tpu.dot_dimension_numbers<[1], [0], [0], [1], [0, 0, 1, 1], [], []>} : vector<16x256xbf16>, vector<256x256xbf16>, vector<16x256xf32> -> vector<16x256xf32>
    %4 = vector.extract_strided_slice %3 {offsets = [0, 0], sizes = [16, 128], strides = [1, 1]} : vector<16x256xf32> to vector<16x128xf32>
    %c0_4 = arith.constant 0 : index
    %c0_5 = arith.constant 0 : index
    %5 = vector.load %arg4[%c0_4, %c0_5] : memref<2x128xf32, #tpu.memory_space<vmem>>, vector<1x128xf32>
    %6 = vector.broadcast %5 : vector<1x128xf32> to vector<16x128xf32>
    %7 = arith.addf %4, %6 : vector<16x128xf32>
    %8 = vector.extract_strided_slice %3 {offsets = [0, 128], sizes = [16, 128], strides = [1, 1]} : vector<16x256xf32> to vector<16x128xf32>
    %c1 = arith.constant 1 : index
    %c0_6 = arith.constant 0 : index
    %9 = vector.load %arg4[%c1, %c0_6] : memref<2x128xf32, #tpu.memory_space<vmem>>, vector<1x128xf32>
    %10 = vector.broadcast %9 : vector<1x128xf32> to vector<16x128xf32>
    %11 = arith.addf %8, %10 : vector<16x128xf32>
    %cst_7 = arith.constant 0.000000e+00 : f32
    %12 = vector.broadcast %cst_7 : f32 to vector<16x128xf32>
    %13 = arith.cmpf ogt, %7, %12 : vector<16x128xf32>
    %cst_8 = arith.constant 0.000000e+00 : f32
    %14 = vector.broadcast %cst_8 : f32 to vector<16x128xf32>
    %15 = arith.minimumf %7, %14 : vector<16x128xf32>
    %16 = math.exp %15 : vector<16x128xf32>
    %cst_9 = arith.constant 1.000000e+00 : f32
    %17 = vector.broadcast %cst_9 : f32 to vector<16x128xf32>
    %18 = arith.subf %16, %17 : vector<16x128xf32>
    %19 = arith.select %13, %7, %18 : vector<16x128xi1>, vector<16x128xf32>
    %cst_10 = arith.constant 0.000000e+00 : f32
    %20 = vector.broadcast %cst_10 : f32 to vector<16x128xf32>
    %21 = arith.subf %20, %11 : vector<16x128xf32>
    %22 = math.exp %21 : vector<16x128xf32>
    %cst_11 = arith.constant 1.000000e+00 : f32
    %23 = vector.broadcast %cst_11 : f32 to vector<16x128xf32>
    %24 = arith.addf %23, %22 : vector<16x128xf32>
    %cst_12 = arith.constant 1.000000e+00 : f32
    %25 = vector.broadcast %cst_12 : f32 to vector<16x128xf32>
    %26 = arith.divf %25, %24 : vector<16x128xf32>
    %27 = arith.mulf %19, %26 : vector<16x128xf32>
    %28 = arith.truncf %27 : vector<16x128xf32> to vector<16x128xbf16>
    %c0_13 = arith.constant 0 : index
    %c0_14 = arith.constant 0 : index
    %c0_15 = arith.constant 0 : index
    %29 = vector.load %arg5[%c0_13, %c0_14, %c0_15] : memref<1x16x128xbf16, #tpu.memory_space<vmem>>, vector<1x16x128xbf16>
    %30 = vector.shape_cast %29 : vector<1x16x128xbf16> to vector<16x128xbf16>
    %31 = vector.shape_cast %28 : vector<16x128xbf16> to vector<1x16x128xbf16>
    tpu.vector_store %arg5[%c0_13, %c0_14, %c0_15], %31 {strides = array<i32>} : memref<1x16x128xbf16, #tpu.memory_space<vmem>>, vector<1x16x128xbf16>,
    %cst_16 = arith.constant dense<0.000000e+00> : vector<128xf32>
    %32 = vector.multi_reduction <add>, %27, %cst_16 [0] : vector<16x128xf32> to vector<128xf32>
    %33 = vector.shape_cast %32 : vector<128xf32> to vector<1x128xf32>
    %34 = arith.mulf %27, %27 : vector<16x128xf32>
    %cst_17 = arith.constant dense<0.000000e+00> : vector<128xf32>
    %35 = vector.multi_reduction <add>, %34, %cst_17 [0] : vector<16x128xf32> to vector<128xf32>
    %36 = vector.shape_cast %35 : vector<128xf32> to vector<1x128xf32>
    %37 = tpu.concatenate %33, %36 in 0 : vector<1x128xf32>, vector<1x128xf32> -> vector<2x128xf32>
    %c0_18 = arith.constant 0 : index
    %c0_19 = arith.constant 0 : index
    %c0_20 = arith.constant 0 : index
    %c0_21 = arith.constant 0 : index
    %38 = vector.load %arg6[%c0_18, %c0_19, %c0_20, %c0_21] : memref<1x1x2x128xf32, #tpu.memory_space<vmem>>, vector<1x1x2x128xf32>
    %39 = vector.shape_cast %38 : vector<1x1x2x128xf32> to vector<2x128xf32>
    %40 = vector.shape_cast %37 : vector<2x128xf32> to vector<1x1x2x128xf32>
    tpu.vector_store %arg6[%c0_18, %c0_19, %c0_20, %c0_21], %40 {strides = array<i32>} : memref<1x1x2x128xf32, #tpu.memory_space<vmem>>, vector<1x1x2x128xf32>,
    return
  }
  func.func @transform_0(%arg0: i32, %arg1: i32) -> (i32, i32, i32) {
    %c0_i32 = arith.constant 0 : i32
    %c0_i32_0 = arith.constant 0 : i32
    return %arg0, %arg1, %c0_i32 : i32, i32, i32
  }
  func.func @transform_1(%arg0: i32, %arg1: i32) -> (i32, i32) {
    %c0_i32 = arith.constant 0 : i32
    %c0_i32_0 = arith.constant 0 : i32
    %c0_i32_1 = arith.constant 0 : i32
    return %c0_i32, %c0_i32_0 : i32, i32
  }
  func.func @transform_2(%arg0: i32, %arg1: i32) -> (i32, i32) {
    %c0_i32 = arith.constant 0 : i32
    %c0_i32_0 = arith.constant 0 : i32
    %c0_i32_1 = arith.constant 0 : i32
    return %c0_i32, %c0_i32_0 : i32, i32
  }
  func.func @transform_3(%arg0: i32, %arg1: i32) -> (i32, i32, i32) {
    %c0_i32 = arith.constant 0 : i32
    %c0_i32_0 = arith.constant 0 : i32
    return %arg0, %arg1, %c0_i32 : i32, i32, i32
  }
  func.func @transform_4(%arg0: i32, %arg1: i32) -> (i32, i32, i32, i32) {
    %c0_i32 = arith.constant 0 : i32
    %c0_i32_0 = arith.constant 0 : i32
    %c0_i32_1 = arith.constant 0 : i32
    return %arg0, %arg1, %c0_i32, %c0_i32_0 : i32, i32, i32, i32
  }
}

module attributes {stable_mosaic.version = 11 : i64} {
  func.func @_gated_conv_kernel(%arg0: i32, %arg1: i32, %arg2: memref<1x16x384xbf16, #tpu.memory_space<vmem>>, %arg3: memref<384x256xbf16, #tpu.memory_space<vmem>>, %arg4: memref<2x128xf32, #tpu.memory_space<vmem>>, %arg5: memref<1x16x128xbf16, #tpu.memory_space<vmem>>, %arg6: memref<1x1x2x128xf32, #tpu.memory_space<vmem>>) attributes {dimension_semantics = [#tpu.dimension_semantics<parallel>, #tpu.dimension_semantics<parallel>], iteration_bounds = array<i64: 2, 1>, scalar_prefetch = 0 : i64, scratch_operands = 0 : i64, tpu.core_type = #tpu.core_type<tc>, window_params = [{transform_indices = @transform_0, window_bounds = array<i64: 1, 16, 384>}, {pipeline_mode = #tpu.pipeline_mode<synchronous>, transform_indices = @transform_1, window_bounds = array<i64: 384, 256>}, {pipeline_mode = #tpu.pipeline_mode<synchronous>, transform_indices = @transform_2, window_bounds = array<i64: 2, 128>}, {transform_indices = @transform_3, window_bounds = array<i64: 1, 16, 128>}, {transform_indices = @transform_4, window_bounds = array<i64: 1, 1, 2, 128>}]} {
    %c0 = arith.constant 0 : index
    %c0_0 = arith.constant 0 : index
    %c0_1 = arith.constant 0 : index
    %0 = vector.load %arg2[%c0, %c0_0, %c0_1] : memref<1x16x384xbf16, #tpu.memory_space<vmem>>, vector<1x16x384xbf16>
    %1 = vector.shape_cast %0 : vector<1x16x384xbf16> to vector<16x384xbf16>
    %c0_2 = arith.constant 0 : index
    %c0_3 = arith.constant 0 : index
    %2 = vector.load %arg3[%c0_2, %c0_3] : memref<384x256xbf16, #tpu.memory_space<vmem>>, vector<384x256xbf16>
    %cst = arith.constant dense<0.000000e+00> : vector<16x256xf32>
    %3 = tpu.matmul %1, %2, %cst {dimension_numbers = #tpu.dot_dimension_numbers<[1], [0], [0], [1], [0, 0, 1, 1], [], []>} : vector<16x384xbf16>, vector<384x256xbf16>, vector<16x256xf32> -> vector<16x256xf32>
    %4 = vector.extract_strided_slice %3 {offsets = [0, 0], sizes = [16, 128], strides = [1, 1]} : vector<16x256xf32> to vector<16x128xf32>
    %c0_4 = arith.constant 0 : index
    %c0_5 = arith.constant 0 : index
    %5 = vector.load %arg4[%c0_4, %c0_5] : memref<2x128xf32, #tpu.memory_space<vmem>>, vector<1x128xf32>
    %6 = vector.broadcast %5 : vector<1x128xf32> to vector<16x128xf32>
    %7 = arith.addf %4, %6 : vector<16x128xf32>
    %8 = vector.extract_strided_slice %3 {offsets = [0, 128], sizes = [16, 128], strides = [1, 1]} : vector<16x256xf32> to vector<16x128xf32>
    %c1 = arith.constant 1 : index
    %c0_6 = arith.constant 0 : index
    %9 = vector.load %arg4[%c1, %c0_6] : memref<2x128xf32, #tpu.memory_space<vmem>>, vector<1x128xf32>
    %10 = vector.broadcast %9 : vector<1x128xf32> to vector<16x128xf32>
    %11 = arith.addf %8, %10 : vector<16x128xf32>
    %cst_7 = arith.constant 0.000000e+00 : f32
    %12 = vector.broadcast %cst_7 : f32 to vector<16x128xf32>
    %13 = arith.cmpf ogt, %7, %12 : vector<16x128xf32>
    %cst_8 = arith.constant 0.000000e+00 : f32
    %14 = vector.broadcast %cst_8 : f32 to vector<16x128xf32>
    %15 = arith.minimumf %7, %14 : vector<16x128xf32>
    %16 = math.exp %15 : vector<16x128xf32>
    %cst_9 = arith.constant 1.000000e+00 : f32
    %17 = vector.broadcast %cst_9 : f32 to vector<16x128xf32>
    %18 = arith.subf %16, %17 : vector<16x128xf32>
    %19 = arith.select %13, %7, %18 : vector<16x128xi1>, vector<16x128xf32>
    %cst_10 = arith.constant 0.000000e+00 : f32
    %20 = vector.broadcast %cst_10 : f32 to vector<16x128xf32>
    %21 = arith.subf %20, %11 : vector<16x128xf32>
    %22 = math.exp %21 : vector<16x128xf32>
    %cst_11 = arith.constant 1.000000e+00 : f32
    %23 = vector.broadcast %cst_11 : f32 to vector<16x128xf32>
    %24 = arith.addf %23, %22 : vector<16x128xf32>
    %cst_12 = arith.constant 1.000000e+00 : f32
    %25 = vector.broadcast %cst_12 : f32 to vector<16x128xf32>
    %26 = arith.divf %25, %24 : vector<16x128xf32>
    %27 = arith.mulf %19, %26 : vector<16x128xf32>
    %28 = arith.truncf %27 : vector<16x128xf32> to vector<16x128xbf16>
    %c0_13 = arith.constant 0 : index
    %c0_14 = arith.constant 0 : index
    %c0_15 = arith.constant 0 : index
    %29 = vector.load %arg5[%c0_13, %c0_14, %c0_15] : memref<1x16x128xbf16, #tpu.memory_space<vmem>>, vector<1x16x128xbf16>
    %30 = vector.shape_cast %29 : vector<1x16x128xbf16> to vector<16x128xbf16>
    %31 = vector.shape_cast %28 : vector<16x128xbf16> to vector<1x16x128xbf16>
    tpu.vector_store %arg5[%c0_13, %c0_14, %c0_15], %31 {strides = array<i32>} : memref<1x16x128xbf16, #tpu.memory_space<vmem>>, vector<1x16x128xbf16>,
    %cst_16 = arith.constant dense<0.000000e+00> : vector<128xf32>
    %32 = vector.multi_reduction <add>, %27, %cst_16 [0] : vector<16x128xf32> to vector<128xf32>
    %33 = vector.shape_cast %32 : vector<128xf32> to vector<1x128xf32>
    %34 = arith.mulf %27, %27 : vector<16x128xf32>
    %cst_17 = arith.constant dense<0.000000e+00> : vector<128xf32>
    %35 = vector.multi_reduction <add>, %34, %cst_17 [0] : vector<16x128xf32> to vector<128xf32>
    %36 = vector.shape_cast %35 : vector<128xf32> to vector<1x128xf32>
    %37 = tpu.concatenate %33, %36 in 0 : vector<1x128xf32>, vector<1x128xf32> -> vector<2x128xf32>
    %c0_18 = arith.constant 0 : index
    %c0_19 = arith.constant 0 : index
    %c0_20 = arith.constant 0 : index
    %c0_21 = arith.constant 0 : index
    %38 = vector.load %arg6[%c0_18, %c0_19, %c0_20, %c0_21] : memref<1x1x2x128xf32, #tpu.memory_space<vmem>>, vector<1x1x2x128xf32>
    %39 = vector.shape_cast %38 : vector<1x1x2x128xf32> to vector<2x128xf32>
    %40 = vector.shape_cast %37 : vector<2x128xf32> to vector<1x1x2x128xf32>
    tpu.vector_store %arg6[%c0_18, %c0_19, %c0_20, %c0_21], %40 {strides = array<i32>} : memref<1x1x2x128xf32, #tpu.memory_space<vmem>>, vector<1x1x2x128xf32>,
    return
  }
  func.func @transform_0(%arg0: i32, %arg1: i32) -> (i32, i32, i32) {
    %c0_i32 = arith.constant 0 : i32
    %c0_i32_0 = arith.constant 0 : i32
    return %arg0, %arg1, %c0_i32 : i32, i32, i32
  }
  func.func @transform_1(%arg0: i32, %arg1: i32) -> (i32, i32) {
    %c0_i32 = arith.constant 0 : i32
    %c0_i32_0 = arith.constant 0 : i32
    %c0_i32_1 = arith.constant 0 : i32
    return %c0_i32, %c0_i32_0 : i32, i32
  }
  func.func @transform_2(%arg0: i32, %arg1: i32) -> (i32, i32) {
    %c0_i32 = arith.constant 0 : i32
    %c0_i32_0 = arith.constant 0 : i32
    %c0_i32_1 = arith.constant 0 : i32
    return %c0_i32, %c0_i32_0 : i32, i32
  }
  func.func @transform_3(%arg0: i32, %arg1: i32) -> (i32, i32, i32) {
    %c0_i32 = arith.constant 0 : i32
    %c0_i32_0 = arith.constant 0 : i32
    return %arg0, %arg1, %c0_i32 : i32, i32, i32
  }
  func.func @transform_4(%arg0: i32, %arg1: i32) -> (i32, i32, i32, i32) {
    %c0_i32 = arith.constant 0 : i32
    %c0_i32_0 = arith.constant 0 : i32
    %c0_i32_1 = arith.constant 0 : i32
    return %arg0, %arg1, %c0_i32, %c0_i32_0 : i32, i32, i32, i32
  }
}

module attributes {stable_mosaic.version = 11 : i64} {
  func.func @_gated_conv_kernel(%arg0: i32, %arg1: i32, %arg2: memref<1x16x640xbf16, #tpu.memory_space<vmem>>, %arg3: memref<640x256xbf16, #tpu.memory_space<vmem>>, %arg4: memref<2x128xf32, #tpu.memory_space<vmem>>, %arg5: memref<1x16x128xbf16, #tpu.memory_space<vmem>>, %arg6: memref<1x1x2x128xf32, #tpu.memory_space<vmem>>) attributes {dimension_semantics = [#tpu.dimension_semantics<parallel>, #tpu.dimension_semantics<parallel>], iteration_bounds = array<i64: 2, 1>, scalar_prefetch = 0 : i64, scratch_operands = 0 : i64, tpu.core_type = #tpu.core_type<tc>, window_params = [{transform_indices = @transform_0, window_bounds = array<i64: 1, 16, 640>}, {pipeline_mode = #tpu.pipeline_mode<synchronous>, transform_indices = @transform_1, window_bounds = array<i64: 640, 256>}, {pipeline_mode = #tpu.pipeline_mode<synchronous>, transform_indices = @transform_2, window_bounds = array<i64: 2, 128>}, {transform_indices = @transform_3, window_bounds = array<i64: 1, 16, 128>}, {transform_indices = @transform_4, window_bounds = array<i64: 1, 1, 2, 128>}]} {
    %c0 = arith.constant 0 : index
    %c0_0 = arith.constant 0 : index
    %c0_1 = arith.constant 0 : index
    %0 = vector.load %arg2[%c0, %c0_0, %c0_1] : memref<1x16x640xbf16, #tpu.memory_space<vmem>>, vector<1x16x640xbf16>
    %1 = vector.shape_cast %0 : vector<1x16x640xbf16> to vector<16x640xbf16>
    %c0_2 = arith.constant 0 : index
    %c0_3 = arith.constant 0 : index
    %2 = vector.load %arg3[%c0_2, %c0_3] : memref<640x256xbf16, #tpu.memory_space<vmem>>, vector<640x256xbf16>
    %cst = arith.constant dense<0.000000e+00> : vector<16x256xf32>
    %3 = tpu.matmul %1, %2, %cst {dimension_numbers = #tpu.dot_dimension_numbers<[1], [0], [0], [1], [0, 0, 1, 1], [], []>} : vector<16x640xbf16>, vector<640x256xbf16>, vector<16x256xf32> -> vector<16x256xf32>
    %4 = vector.extract_strided_slice %3 {offsets = [0, 0], sizes = [16, 128], strides = [1, 1]} : vector<16x256xf32> to vector<16x128xf32>
    %c0_4 = arith.constant 0 : index
    %c0_5 = arith.constant 0 : index
    %5 = vector.load %arg4[%c0_4, %c0_5] : memref<2x128xf32, #tpu.memory_space<vmem>>, vector<1x128xf32>
    %6 = vector.broadcast %5 : vector<1x128xf32> to vector<16x128xf32>
    %7 = arith.addf %4, %6 : vector<16x128xf32>
    %8 = vector.extract_strided_slice %3 {offsets = [0, 128], sizes = [16, 128], strides = [1, 1]} : vector<16x256xf32> to vector<16x128xf32>
    %c1 = arith.constant 1 : index
    %c0_6 = arith.constant 0 : index
    %9 = vector.load %arg4[%c1, %c0_6] : memref<2x128xf32, #tpu.memory_space<vmem>>, vector<1x128xf32>
    %10 = vector.broadcast %9 : vector<1x128xf32> to vector<16x128xf32>
    %11 = arith.addf %8, %10 : vector<16x128xf32>
    %cst_7 = arith.constant 0.000000e+00 : f32
    %12 = vector.broadcast %cst_7 : f32 to vector<16x128xf32>
    %13 = arith.cmpf ogt, %7, %12 : vector<16x128xf32>
    %cst_8 = arith.constant 0.000000e+00 : f32
    %14 = vector.broadcast %cst_8 : f32 to vector<16x128xf32>
    %15 = arith.minimumf %7, %14 : vector<16x128xf32>
    %16 = math.exp %15 : vector<16x128xf32>
    %cst_9 = arith.constant 1.000000e+00 : f32
    %17 = vector.broadcast %cst_9 : f32 to vector<16x128xf32>
    %18 = arith.subf %16, %17 : vector<16x128xf32>
    %19 = arith.select %13, %7, %18 : vector<16x128xi1>, vector<16x128xf32>
    %cst_10 = arith.constant 0.000000e+00 : f32
    %20 = vector.broadcast %cst_10 : f32 to vector<16x128xf32>
    %21 = arith.subf %20, %11 : vector<16x128xf32>
    %22 = math.exp %21 : vector<16x128xf32>
    %cst_11 = arith.constant 1.000000e+00 : f32
    %23 = vector.broadcast %cst_11 : f32 to vector<16x128xf32>
    %24 = arith.addf %23, %22 : vector<16x128xf32>
    %cst_12 = arith.constant 1.000000e+00 : f32
    %25 = vector.broadcast %cst_12 : f32 to vector<16x128xf32>
    %26 = arith.divf %25, %24 : vector<16x128xf32>
    %27 = arith.mulf %19, %26 : vector<16x128xf32>
    %28 = arith.truncf %27 : vector<16x128xf32> to vector<16x128xbf16>
    %c0_13 = arith.constant 0 : index
    %c0_14 = arith.constant 0 : index
    %c0_15 = arith.constant 0 : index
    %29 = vector.load %arg5[%c0_13, %c0_14, %c0_15] : memref<1x16x128xbf16, #tpu.memory_space<vmem>>, vector<1x16x128xbf16>
    %30 = vector.shape_cast %29 : vector<1x16x128xbf16> to vector<16x128xbf16>
    %31 = vector.shape_cast %28 : vector<16x128xbf16> to vector<1x16x128xbf16>
    tpu.vector_store %arg5[%c0_13, %c0_14, %c0_15], %31 {strides = array<i32>} : memref<1x16x128xbf16, #tpu.memory_space<vmem>>, vector<1x16x128xbf16>,
    %cst_16 = arith.constant dense<0.000000e+00> : vector<128xf32>
    %32 = vector.multi_reduction <add>, %27, %cst_16 [0] : vector<16x128xf32> to vector<128xf32>
    %33 = vector.shape_cast %32 : vector<128xf32> to vector<1x128xf32>
    %34 = arith.mulf %27, %27 : vector<16x128xf32>
    %cst_17 = arith.constant dense<0.000000e+00> : vector<128xf32>
    %35 = vector.multi_reduction <add>, %34, %cst_17 [0] : vector<16x128xf32> to vector<128xf32>
    %36 = vector.shape_cast %35 : vector<128xf32> to vector<1x128xf32>
    %37 = tpu.concatenate %33, %36 in 0 : vector<1x128xf32>, vector<1x128xf32> -> vector<2x128xf32>
    %c0_18 = arith.constant 0 : index
    %c0_19 = arith.constant 0 : index
    %c0_20 = arith.constant 0 : index
    %c0_21 = arith.constant 0 : index
    %38 = vector.load %arg6[%c0_18, %c0_19, %c0_20, %c0_21] : memref<1x1x2x128xf32, #tpu.memory_space<vmem>>, vector<1x1x2x128xf32>
    %39 = vector.shape_cast %38 : vector<1x1x2x128xf32> to vector<2x128xf32>
    %40 = vector.shape_cast %37 : vector<2x128xf32> to vector<1x1x2x128xf32>
    tpu.vector_store %arg6[%c0_18, %c0_19, %c0_20, %c0_21], %40 {strides = array<i32>} : memref<1x1x2x128xf32, #tpu.memory_space<vmem>>, vector<1x1x2x128xf32>,
    return
  }
  func.func @transform_0(%arg0: i32, %arg1: i32) -> (i32, i32, i32) {
    %c0_i32 = arith.constant 0 : i32
    %c0_i32_0 = arith.constant 0 : i32
    return %arg0, %arg1, %c0_i32 : i32, i32, i32
  }
  func.func @transform_1(%arg0: i32, %arg1: i32) -> (i32, i32) {
    %c0_i32 = arith.constant 0 : i32
    %c0_i32_0 = arith.constant 0 : i32
    %c0_i32_1 = arith.constant 0 : i32
    return %c0_i32, %c0_i32_0 : i32, i32
  }
  func.func @transform_2(%arg0: i32, %arg1: i32) -> (i32, i32) {
    %c0_i32 = arith.constant 0 : i32
    %c0_i32_0 = arith.constant 0 : i32
    %c0_i32_1 = arith.constant 0 : i32
    return %c0_i32, %c0_i32_0 : i32, i32
  }
  func.func @transform_3(%arg0: i32, %arg1: i32) -> (i32, i32, i32) {
    %c0_i32 = arith.constant 0 : i32
    %c0_i32_0 = arith.constant 0 : i32
    return %arg0, %arg1, %c0_i32 : i32, i32, i32
  }
  func.func @transform_4(%arg0: i32, %arg1: i32) -> (i32, i32, i32, i32) {
    %c0_i32 = arith.constant 0 : i32
    %c0_i32_0 = arith.constant 0 : i32
    %c0_i32_1 = arith.constant 0 : i32
    return %arg0, %arg1, %c0_i32, %c0_i32_0 : i32, i32, i32, i32
  }
}

module attributes {stable_mosaic.version = 11 : i64} {
  func.func @_gated_conv_kernel(%arg0: i32, %arg1: i32, %arg2: memref<1x64x384xbf16, #tpu.memory_space<vmem>>, %arg3: memref<384x256xbf16, #tpu.memory_space<vmem>>, %arg4: memref<2x128xf32, #tpu.memory_space<vmem>>, %arg5: memref<1x64x128xbf16, #tpu.memory_space<vmem>>, %arg6: memref<1x1x2x128xf32, #tpu.memory_space<vmem>>) attributes {dimension_semantics = [#tpu.dimension_semantics<parallel>, #tpu.dimension_semantics<parallel>], iteration_bounds = array<i64: 2, 1>, scalar_prefetch = 0 : i64, scratch_operands = 0 : i64, tpu.core_type = #tpu.core_type<tc>, window_params = [{transform_indices = @transform_0, window_bounds = array<i64: 1, 64, 384>}, {pipeline_mode = #tpu.pipeline_mode<synchronous>, transform_indices = @transform_1, window_bounds = array<i64: 384, 256>}, {pipeline_mode = #tpu.pipeline_mode<synchronous>, transform_indices = @transform_2, window_bounds = array<i64: 2, 128>}, {transform_indices = @transform_3, window_bounds = array<i64: 1, 64, 128>}, {transform_indices = @transform_4, window_bounds = array<i64: 1, 1, 2, 128>}]} {
    %c0 = arith.constant 0 : index
    %c0_0 = arith.constant 0 : index
    %c0_1 = arith.constant 0 : index
    %0 = vector.load %arg2[%c0, %c0_0, %c0_1] : memref<1x64x384xbf16, #tpu.memory_space<vmem>>, vector<1x64x384xbf16>
    %1 = vector.shape_cast %0 : vector<1x64x384xbf16> to vector<64x384xbf16>
    %c0_2 = arith.constant 0 : index
    %c0_3 = arith.constant 0 : index
    %2 = vector.load %arg3[%c0_2, %c0_3] : memref<384x256xbf16, #tpu.memory_space<vmem>>, vector<384x256xbf16>
    %cst = arith.constant dense<0.000000e+00> : vector<64x256xf32>
    %3 = tpu.matmul %1, %2, %cst {dimension_numbers = #tpu.dot_dimension_numbers<[1], [0], [0], [1], [0, 0, 1, 1], [], []>} : vector<64x384xbf16>, vector<384x256xbf16>, vector<64x256xf32> -> vector<64x256xf32>
    %4 = vector.extract_strided_slice %3 {offsets = [0, 0], sizes = [64, 128], strides = [1, 1]} : vector<64x256xf32> to vector<64x128xf32>
    %c0_4 = arith.constant 0 : index
    %c0_5 = arith.constant 0 : index
    %5 = vector.load %arg4[%c0_4, %c0_5] : memref<2x128xf32, #tpu.memory_space<vmem>>, vector<1x128xf32>
    %6 = vector.broadcast %5 : vector<1x128xf32> to vector<64x128xf32>
    %7 = arith.addf %4, %6 : vector<64x128xf32>
    %8 = vector.extract_strided_slice %3 {offsets = [0, 128], sizes = [64, 128], strides = [1, 1]} : vector<64x256xf32> to vector<64x128xf32>
    %c1 = arith.constant 1 : index
    %c0_6 = arith.constant 0 : index
    %9 = vector.load %arg4[%c1, %c0_6] : memref<2x128xf32, #tpu.memory_space<vmem>>, vector<1x128xf32>
    %10 = vector.broadcast %9 : vector<1x128xf32> to vector<64x128xf32>
    %11 = arith.addf %8, %10 : vector<64x128xf32>
    %cst_7 = arith.constant 0.000000e+00 : f32
    %12 = vector.broadcast %cst_7 : f32 to vector<64x128xf32>
    %13 = arith.cmpf ogt, %7, %12 : vector<64x128xf32>
    %cst_8 = arith.constant 0.000000e+00 : f32
    %14 = vector.broadcast %cst_8 : f32 to vector<64x128xf32>
    %15 = arith.minimumf %7, %14 : vector<64x128xf32>
    %16 = math.exp %15 : vector<64x128xf32>
    %cst_9 = arith.constant 1.000000e+00 : f32
    %17 = vector.broadcast %cst_9 : f32 to vector<64x128xf32>
    %18 = arith.subf %16, %17 : vector<64x128xf32>
    %19 = arith.select %13, %7, %18 : vector<64x128xi1>, vector<64x128xf32>
    %cst_10 = arith.constant 0.000000e+00 : f32
    %20 = vector.broadcast %cst_10 : f32 to vector<64x128xf32>
    %21 = arith.subf %20, %11 : vector<64x128xf32>
    %22 = math.exp %21 : vector<64x128xf32>
    %cst_11 = arith.constant 1.000000e+00 : f32
    %23 = vector.broadcast %cst_11 : f32 to vector<64x128xf32>
    %24 = arith.addf %23, %22 : vector<64x128xf32>
    %cst_12 = arith.constant 1.000000e+00 : f32
    %25 = vector.broadcast %cst_12 : f32 to vector<64x128xf32>
    %26 = arith.divf %25, %24 : vector<64x128xf32>
    %27 = arith.mulf %19, %26 : vector<64x128xf32>
    %28 = arith.truncf %27 : vector<64x128xf32> to vector<64x128xbf16>
    %c0_13 = arith.constant 0 : index
    %c0_14 = arith.constant 0 : index
    %c0_15 = arith.constant 0 : index
    %29 = vector.load %arg5[%c0_13, %c0_14, %c0_15] : memref<1x64x128xbf16, #tpu.memory_space<vmem>>, vector<1x64x128xbf16>
    %30 = vector.shape_cast %29 : vector<1x64x128xbf16> to vector<64x128xbf16>
    %31 = vector.shape_cast %28 : vector<64x128xbf16> to vector<1x64x128xbf16>
    tpu.vector_store %arg5[%c0_13, %c0_14, %c0_15], %31 {strides = array<i32>} : memref<1x64x128xbf16, #tpu.memory_space<vmem>>, vector<1x64x128xbf16>,
    %cst_16 = arith.constant dense<0.000000e+00> : vector<128xf32>
    %32 = vector.multi_reduction <add>, %27, %cst_16 [0] : vector<64x128xf32> to vector<128xf32>
    %33 = vector.shape_cast %32 : vector<128xf32> to vector<1x128xf32>
    %34 = arith.mulf %27, %27 : vector<64x128xf32>
    %cst_17 = arith.constant dense<0.000000e+00> : vector<128xf32>
    %35 = vector.multi_reduction <add>, %34, %cst_17 [0] : vector<64x128xf32> to vector<128xf32>
    %36 = vector.shape_cast %35 : vector<128xf32> to vector<1x128xf32>
    %37 = tpu.concatenate %33, %36 in 0 : vector<1x128xf32>, vector<1x128xf32> -> vector<2x128xf32>
    %c0_18 = arith.constant 0 : index
    %c0_19 = arith.constant 0 : index
    %c0_20 = arith.constant 0 : index
    %c0_21 = arith.constant 0 : index
    %38 = vector.load %arg6[%c0_18, %c0_19, %c0_20, %c0_21] : memref<1x1x2x128xf32, #tpu.memory_space<vmem>>, vector<1x1x2x128xf32>
    %39 = vector.shape_cast %38 : vector<1x1x2x128xf32> to vector<2x128xf32>
    %40 = vector.shape_cast %37 : vector<2x128xf32> to vector<1x1x2x128xf32>
    tpu.vector_store %arg6[%c0_18, %c0_19, %c0_20, %c0_21], %40 {strides = array<i32>} : memref<1x1x2x128xf32, #tpu.memory_space<vmem>>, vector<1x1x2x128xf32>,
    return
  }
  func.func @transform_0(%arg0: i32, %arg1: i32) -> (i32, i32, i32) {
    %c0_i32 = arith.constant 0 : i32
    %c0_i32_0 = arith.constant 0 : i32
    return %arg0, %arg1, %c0_i32 : i32, i32, i32
  }
  func.func @transform_1(%arg0: i32, %arg1: i32) -> (i32, i32) {
    %c0_i32 = arith.constant 0 : i32
    %c0_i32_0 = arith.constant 0 : i32
    %c0_i32_1 = arith.constant 0 : i32
    return %c0_i32, %c0_i32_0 : i32, i32
  }
  func.func @transform_2(%arg0: i32, %arg1: i32) -> (i32, i32) {
    %c0_i32 = arith.constant 0 : i32
    %c0_i32_0 = arith.constant 0 : i32
    %c0_i32_1 = arith.constant 0 : i32
    return %c0_i32, %c0_i32_0 : i32, i32
  }
  func.func @transform_3(%arg0: i32, %arg1: i32) -> (i32, i32, i32) {
    %c0_i32 = arith.constant 0 : i32
    %c0_i32_0 = arith.constant 0 : i32
    return %arg0, %arg1, %c0_i32 : i32, i32, i32
  }
  func.func @transform_4(%arg0: i32, %arg1: i32) -> (i32, i32, i32, i32) {
    %c0_i32 = arith.constant 0 : i32
    %c0_i32_0 = arith.constant 0 : i32
    %c0_i32_1 = arith.constant 0 : i32
    return %arg0, %arg1, %c0_i32, %c0_i32_0 : i32, i32, i32, i32
  }
}

module attributes {stable_mosaic.version = 11 : i64} {
  func.func @_gated_conv_kernel(%arg0: i32, %arg1: i32, %arg2: memref<1x64x256xbf16, #tpu.memory_space<vmem>>, %arg3: memref<256x256xbf16, #tpu.memory_space<vmem>>, %arg4: memref<2x128xf32, #tpu.memory_space<vmem>>, %arg5: memref<1x64x128xbf16, #tpu.memory_space<vmem>>, %arg6: memref<1x1x2x128xf32, #tpu.memory_space<vmem>>) attributes {dimension_semantics = [#tpu.dimension_semantics<parallel>, #tpu.dimension_semantics<parallel>], iteration_bounds = array<i64: 2, 1>, scalar_prefetch = 0 : i64, scratch_operands = 0 : i64, tpu.core_type = #tpu.core_type<tc>, window_params = [{transform_indices = @transform_0, window_bounds = array<i64: 1, 64, 256>}, {pipeline_mode = #tpu.pipeline_mode<synchronous>, transform_indices = @transform_1, window_bounds = array<i64: 256, 256>}, {pipeline_mode = #tpu.pipeline_mode<synchronous>, transform_indices = @transform_2, window_bounds = array<i64: 2, 128>}, {transform_indices = @transform_3, window_bounds = array<i64: 1, 64, 128>}, {transform_indices = @transform_4, window_bounds = array<i64: 1, 1, 2, 128>}]} {
    %c0 = arith.constant 0 : index
    %c0_0 = arith.constant 0 : index
    %c0_1 = arith.constant 0 : index
    %0 = vector.load %arg2[%c0, %c0_0, %c0_1] : memref<1x64x256xbf16, #tpu.memory_space<vmem>>, vector<1x64x256xbf16>
    %1 = vector.shape_cast %0 : vector<1x64x256xbf16> to vector<64x256xbf16>
    %c0_2 = arith.constant 0 : index
    %c0_3 = arith.constant 0 : index
    %2 = vector.load %arg3[%c0_2, %c0_3] : memref<256x256xbf16, #tpu.memory_space<vmem>>, vector<256x256xbf16>
    %cst = arith.constant dense<0.000000e+00> : vector<64x256xf32>
    %3 = tpu.matmul %1, %2, %cst {dimension_numbers = #tpu.dot_dimension_numbers<[1], [0], [0], [1], [0, 0, 1, 1], [], []>} : vector<64x256xbf16>, vector<256x256xbf16>, vector<64x256xf32> -> vector<64x256xf32>
    %4 = vector.extract_strided_slice %3 {offsets = [0, 0], sizes = [64, 128], strides = [1, 1]} : vector<64x256xf32> to vector<64x128xf32>
    %c0_4 = arith.constant 0 : index
    %c0_5 = arith.constant 0 : index
    %5 = vector.load %arg4[%c0_4, %c0_5] : memref<2x128xf32, #tpu.memory_space<vmem>>, vector<1x128xf32>
    %6 = vector.broadcast %5 : vector<1x128xf32> to vector<64x128xf32>
    %7 = arith.addf %4, %6 : vector<64x128xf32>
    %8 = vector.extract_strided_slice %3 {offsets = [0, 128], sizes = [64, 128], strides = [1, 1]} : vector<64x256xf32> to vector<64x128xf32>
    %c1 = arith.constant 1 : index
    %c0_6 = arith.constant 0 : index
    %9 = vector.load %arg4[%c1, %c0_6] : memref<2x128xf32, #tpu.memory_space<vmem>>, vector<1x128xf32>
    %10 = vector.broadcast %9 : vector<1x128xf32> to vector<64x128xf32>
    %11 = arith.addf %8, %10 : vector<64x128xf32>
    %cst_7 = arith.constant 0.000000e+00 : f32
    %12 = vector.broadcast %cst_7 : f32 to vector<64x128xf32>
    %13 = arith.cmpf ogt, %7, %12 : vector<64x128xf32>
    %cst_8 = arith.constant 0.000000e+00 : f32
    %14 = vector.broadcast %cst_8 : f32 to vector<64x128xf32>
    %15 = arith.minimumf %7, %14 : vector<64x128xf32>
    %16 = math.exp %15 : vector<64x128xf32>
    %cst_9 = arith.constant 1.000000e+00 : f32
    %17 = vector.broadcast %cst_9 : f32 to vector<64x128xf32>
    %18 = arith.subf %16, %17 : vector<64x128xf32>
    %19 = arith.select %13, %7, %18 : vector<64x128xi1>, vector<64x128xf32>
    %cst_10 = arith.constant 0.000000e+00 : f32
    %20 = vector.broadcast %cst_10 : f32 to vector<64x128xf32>
    %21 = arith.subf %20, %11 : vector<64x128xf32>
    %22 = math.exp %21 : vector<64x128xf32>
    %cst_11 = arith.constant 1.000000e+00 : f32
    %23 = vector.broadcast %cst_11 : f32 to vector<64x128xf32>
    %24 = arith.addf %23, %22 : vector<64x128xf32>
    %cst_12 = arith.constant 1.000000e+00 : f32
    %25 = vector.broadcast %cst_12 : f32 to vector<64x128xf32>
    %26 = arith.divf %25, %24 : vector<64x128xf32>
    %27 = arith.mulf %19, %26 : vector<64x128xf32>
    %28 = arith.truncf %27 : vector<64x128xf32> to vector<64x128xbf16>
    %c0_13 = arith.constant 0 : index
    %c0_14 = arith.constant 0 : index
    %c0_15 = arith.constant 0 : index
    %29 = vector.load %arg5[%c0_13, %c0_14, %c0_15] : memref<1x64x128xbf16, #tpu.memory_space<vmem>>, vector<1x64x128xbf16>
    %30 = vector.shape_cast %29 : vector<1x64x128xbf16> to vector<64x128xbf16>
    %31 = vector.shape_cast %28 : vector<64x128xbf16> to vector<1x64x128xbf16>
    tpu.vector_store %arg5[%c0_13, %c0_14, %c0_15], %31 {strides = array<i32>} : memref<1x64x128xbf16, #tpu.memory_space<vmem>>, vector<1x64x128xbf16>,
    %cst_16 = arith.constant dense<0.000000e+00> : vector<128xf32>
    %32 = vector.multi_reduction <add>, %27, %cst_16 [0] : vector<64x128xf32> to vector<128xf32>
    %33 = vector.shape_cast %32 : vector<128xf32> to vector<1x128xf32>
    %34 = arith.mulf %27, %27 : vector<64x128xf32>
    %cst_17 = arith.constant dense<0.000000e+00> : vector<128xf32>
    %35 = vector.multi_reduction <add>, %34, %cst_17 [0] : vector<64x128xf32> to vector<128xf32>
    %36 = vector.shape_cast %35 : vector<128xf32> to vector<1x128xf32>
    %37 = tpu.concatenate %33, %36 in 0 : vector<1x128xf32>, vector<1x128xf32> -> vector<2x128xf32>
    %c0_18 = arith.constant 0 : index
    %c0_19 = arith.constant 0 : index
    %c0_20 = arith.constant 0 : index
    %c0_21 = arith.constant 0 : index
    %38 = vector.load %arg6[%c0_18, %c0_19, %c0_20, %c0_21] : memref<1x1x2x128xf32, #tpu.memory_space<vmem>>, vector<1x1x2x128xf32>
    %39 = vector.shape_cast %38 : vector<1x1x2x128xf32> to vector<2x128xf32>
    %40 = vector.shape_cast %37 : vector<2x128xf32> to vector<1x1x2x128xf32>
    tpu.vector_store %arg6[%c0_18, %c0_19, %c0_20, %c0_21], %40 {strides = array<i32>} : memref<1x1x2x128xf32, #tpu.memory_space<vmem>>, vector<1x1x2x128xf32>,
    return
  }
  func.func @transform_0(%arg0: i32, %arg1: i32) -> (i32, i32, i32) {
    %c0_i32 = arith.constant 0 : i32
    %c0_i32_0 = arith.constant 0 : i32
    return %arg0, %arg1, %c0_i32 : i32, i32, i32
  }
  func.func @transform_1(%arg0: i32, %arg1: i32) -> (i32, i32) {
    %c0_i32 = arith.constant 0 : i32
    %c0_i32_0 = arith.constant 0 : i32
    %c0_i32_1 = arith.constant 0 : i32
    return %c0_i32, %c0_i32_0 : i32, i32
  }
  func.func @transform_2(%arg0: i32, %arg1: i32) -> (i32, i32) {
    %c0_i32 = arith.constant 0 : i32
    %c0_i32_0 = arith.constant 0 : i32
    %c0_i32_1 = arith.constant 0 : i32
    return %c0_i32, %c0_i32_0 : i32, i32
  }
  func.func @transform_3(%arg0: i32, %arg1: i32) -> (i32, i32, i32) {
    %c0_i32 = arith.constant 0 : i32
    %c0_i32_0 = arith.constant 0 : i32
    return %arg0, %arg1, %c0_i32 : i32, i32, i32
  }
  func.func @transform_4(%arg0: i32, %arg1: i32) -> (i32, i32, i32, i32) {
    %c0_i32 = arith.constant 0 : i32
    %c0_i32_0 = arith.constant 0 : i32
    %c0_i32_1 = arith.constant 0 : i32
    return %arg0, %arg1, %c0_i32, %c0_i32_0 : i32, i32, i32, i32
  }
}

module attributes {stable_mosaic.version = 11 : i64} {
  func.func @_gated_conv_kernel(%arg0: i32, %arg1: i32, %arg2: memref<1x176x256xbf16, #tpu.memory_space<vmem>>, %arg3: memref<256x256xbf16, #tpu.memory_space<vmem>>, %arg4: memref<2x128xf32, #tpu.memory_space<vmem>>, %arg5: memref<1x176x128xbf16, #tpu.memory_space<vmem>>, %arg6: memref<1x1x2x128xf32, #tpu.memory_space<vmem>>) attributes {dimension_semantics = [#tpu.dimension_semantics<parallel>, #tpu.dimension_semantics<parallel>], iteration_bounds = array<i64: 2, 1>, scalar_prefetch = 0 : i64, scratch_operands = 0 : i64, tpu.core_type = #tpu.core_type<tc>, window_params = [{transform_indices = @transform_0, window_bounds = array<i64: 1, 176, 256>}, {pipeline_mode = #tpu.pipeline_mode<synchronous>, transform_indices = @transform_1, window_bounds = array<i64: 256, 256>}, {pipeline_mode = #tpu.pipeline_mode<synchronous>, transform_indices = @transform_2, window_bounds = array<i64: 2, 128>}, {transform_indices = @transform_3, window_bounds = array<i64: 1, 176, 128>}, {transform_indices = @transform_4, window_bounds = array<i64: 1, 1, 2, 128>}]} {
    %c0 = arith.constant 0 : index
    %c0_0 = arith.constant 0 : index
    %c0_1 = arith.constant 0 : index
    %0 = vector.load %arg2[%c0, %c0_0, %c0_1] : memref<1x176x256xbf16, #tpu.memory_space<vmem>>, vector<1x176x256xbf16>
    %1 = vector.shape_cast %0 : vector<1x176x256xbf16> to vector<176x256xbf16>
    %c0_2 = arith.constant 0 : index
    %c0_3 = arith.constant 0 : index
    %2 = vector.load %arg3[%c0_2, %c0_3] : memref<256x256xbf16, #tpu.memory_space<vmem>>, vector<256x256xbf16>
    %cst = arith.constant dense<0.000000e+00> : vector<176x256xf32>
    %3 = tpu.matmul %1, %2, %cst {dimension_numbers = #tpu.dot_dimension_numbers<[1], [0], [0], [1], [0, 0, 1, 1], [], []>} : vector<176x256xbf16>, vector<256x256xbf16>, vector<176x256xf32> -> vector<176x256xf32>
    %4 = vector.extract_strided_slice %3 {offsets = [0, 0], sizes = [176, 128], strides = [1, 1]} : vector<176x256xf32> to vector<176x128xf32>
    %c0_4 = arith.constant 0 : index
    %c0_5 = arith.constant 0 : index
    %5 = vector.load %arg4[%c0_4, %c0_5] : memref<2x128xf32, #tpu.memory_space<vmem>>, vector<1x128xf32>
    %6 = vector.broadcast %5 : vector<1x128xf32> to vector<176x128xf32>
    %7 = arith.addf %4, %6 : vector<176x128xf32>
    %8 = vector.extract_strided_slice %3 {offsets = [0, 128], sizes = [176, 128], strides = [1, 1]} : vector<176x256xf32> to vector<176x128xf32>
    %c1 = arith.constant 1 : index
    %c0_6 = arith.constant 0 : index
    %9 = vector.load %arg4[%c1, %c0_6] : memref<2x128xf32, #tpu.memory_space<vmem>>, vector<1x128xf32>
    %10 = vector.broadcast %9 : vector<1x128xf32> to vector<176x128xf32>
    %11 = arith.addf %8, %10 : vector<176x128xf32>
    %cst_7 = arith.constant 0.000000e+00 : f32
    %12 = vector.broadcast %cst_7 : f32 to vector<176x128xf32>
    %13 = arith.cmpf ogt, %7, %12 : vector<176x128xf32>
    %cst_8 = arith.constant 0.000000e+00 : f32
    %14 = vector.broadcast %cst_8 : f32 to vector<176x128xf32>
    %15 = arith.minimumf %7, %14 : vector<176x128xf32>
    %16 = math.exp %15 : vector<176x128xf32>
    %cst_9 = arith.constant 1.000000e+00 : f32
    %17 = vector.broadcast %cst_9 : f32 to vector<176x128xf32>
    %18 = arith.subf %16, %17 : vector<176x128xf32>
    %19 = arith.select %13, %7, %18 : vector<176x128xi1>, vector<176x128xf32>
    %cst_10 = arith.constant 0.000000e+00 : f32
    %20 = vector.broadcast %cst_10 : f32 to vector<176x128xf32>
    %21 = arith.subf %20, %11 : vector<176x128xf32>
    %22 = math.exp %21 : vector<176x128xf32>
    %cst_11 = arith.constant 1.000000e+00 : f32
    %23 = vector.broadcast %cst_11 : f32 to vector<176x128xf32>
    %24 = arith.addf %23, %22 : vector<176x128xf32>
    %cst_12 = arith.constant 1.000000e+00 : f32
    %25 = vector.broadcast %cst_12 : f32 to vector<176x128xf32>
    %26 = arith.divf %25, %24 : vector<176x128xf32>
    %27 = arith.mulf %19, %26 : vector<176x128xf32>
    %28 = arith.truncf %27 : vector<176x128xf32> to vector<176x128xbf16>
    %c0_13 = arith.constant 0 : index
    %c0_14 = arith.constant 0 : index
    %c0_15 = arith.constant 0 : index
    %29 = vector.load %arg5[%c0_13, %c0_14, %c0_15] : memref<1x176x128xbf16, #tpu.memory_space<vmem>>, vector<1x176x128xbf16>
    %30 = vector.shape_cast %29 : vector<1x176x128xbf16> to vector<176x128xbf16>
    %31 = vector.shape_cast %28 : vector<176x128xbf16> to vector<1x176x128xbf16>
    tpu.vector_store %arg5[%c0_13, %c0_14, %c0_15], %31 {strides = array<i32>} : memref<1x176x128xbf16, #tpu.memory_space<vmem>>, vector<1x176x128xbf16>,
    %cst_16 = arith.constant dense<0.000000e+00> : vector<128xf32>
    %32 = vector.multi_reduction <add>, %27, %cst_16 [0] : vector<176x128xf32> to vector<128xf32>
    %33 = vector.shape_cast %32 : vector<128xf32> to vector<1x128xf32>
    %34 = arith.mulf %27, %27 : vector<176x128xf32>
    %cst_17 = arith.constant dense<0.000000e+00> : vector<128xf32>
    %35 = vector.multi_reduction <add>, %34, %cst_17 [0] : vector<176x128xf32> to vector<128xf32>
    %36 = vector.shape_cast %35 : vector<128xf32> to vector<1x128xf32>
    %37 = tpu.concatenate %33, %36 in 0 : vector<1x128xf32>, vector<1x128xf32> -> vector<2x128xf32>
    %c0_18 = arith.constant 0 : index
    %c0_19 = arith.constant 0 : index
    %c0_20 = arith.constant 0 : index
    %c0_21 = arith.constant 0 : index
    %38 = vector.load %arg6[%c0_18, %c0_19, %c0_20, %c0_21] : memref<1x1x2x128xf32, #tpu.memory_space<vmem>>, vector<1x1x2x128xf32>
    %39 = vector.shape_cast %38 : vector<1x1x2x128xf32> to vector<2x128xf32>
    %40 = vector.shape_cast %37 : vector<2x128xf32> to vector<1x1x2x128xf32>
    tpu.vector_store %arg6[%c0_18, %c0_19, %c0_20, %c0_21], %40 {strides = array<i32>} : memref<1x1x2x128xf32, #tpu.memory_space<vmem>>, vector<1x1x2x128xf32>,
    return
  }
  func.func @transform_0(%arg0: i32, %arg1: i32) -> (i32, i32, i32) {
    %c0_i32 = arith.constant 0 : i32
    %c0_i32_0 = arith.constant 0 : i32
    return %arg0, %arg1, %c0_i32 : i32, i32, i32
  }
  func.func @transform_1(%arg0: i32, %arg1: i32) -> (i32, i32) {
    %c0_i32 = arith.constant 0 : i32
    %c0_i32_0 = arith.constant 0 : i32
    %c0_i32_1 = arith.constant 0 : i32
    return %c0_i32, %c0_i32_0 : i32, i32
  }
  func.func @transform_2(%arg0: i32, %arg1: i32) -> (i32, i32) {
    %c0_i32 = arith.constant 0 : i32
    %c0_i32_0 = arith.constant 0 : i32
    %c0_i32_1 = arith.constant 0 : i32
    return %c0_i32, %c0_i32_0 : i32, i32
  }
  func.func @transform_3(%arg0: i32, %arg1: i32) -> (i32, i32, i32) {
    %c0_i32 = arith.constant 0 : i32
    %c0_i32_0 = arith.constant 0 : i32
    return %arg0, %arg1, %c0_i32 : i32, i32, i32
  }
  func.func @transform_4(%arg0: i32, %arg1: i32) -> (i32, i32, i32, i32) {
    %c0_i32 = arith.constant 0 : i32
    %c0_i32_0 = arith.constant 0 : i32
    %c0_i32_1 = arith.constant 0 : i32
    return %arg0, %arg1, %c0_i32, %c0_i32_0 : i32, i32, i32, i32
  }
}

module attributes {stable_mosaic.version = 11 : i64} {
  func.func @_gated_conv_kernel(%arg0: i32, %arg1: i32, %arg2: memref<1x176x128xbf16, #tpu.memory_space<vmem>>, %arg3: memref<128x256xbf16, #tpu.memory_space<vmem>>, %arg4: memref<2x128xf32, #tpu.memory_space<vmem>>, %arg5: memref<1x176x128xbf16, #tpu.memory_space<vmem>>, %arg6: memref<1x1x2x128xf32, #tpu.memory_space<vmem>>) attributes {dimension_semantics = [#tpu.dimension_semantics<parallel>, #tpu.dimension_semantics<parallel>], iteration_bounds = array<i64: 2, 1>, scalar_prefetch = 0 : i64, scratch_operands = 0 : i64, tpu.core_type = #tpu.core_type<tc>, window_params = [{transform_indices = @transform_0, window_bounds = array<i64: 1, 176, 128>}, {pipeline_mode = #tpu.pipeline_mode<synchronous>, transform_indices = @transform_1, window_bounds = array<i64: 128, 256>}, {pipeline_mode = #tpu.pipeline_mode<synchronous>, transform_indices = @transform_2, window_bounds = array<i64: 2, 128>}, {transform_indices = @transform_3, window_bounds = array<i64: 1, 176, 128>}, {transform_indices = @transform_4, window_bounds = array<i64: 1, 1, 2, 128>}]} {
    %c0 = arith.constant 0 : index
    %c0_0 = arith.constant 0 : index
    %c0_1 = arith.constant 0 : index
    %0 = vector.load %arg2[%c0, %c0_0, %c0_1] : memref<1x176x128xbf16, #tpu.memory_space<vmem>>, vector<1x176x128xbf16>
    %1 = vector.shape_cast %0 : vector<1x176x128xbf16> to vector<176x128xbf16>
    %c0_2 = arith.constant 0 : index
    %c0_3 = arith.constant 0 : index
    %2 = vector.load %arg3[%c0_2, %c0_3] : memref<128x256xbf16, #tpu.memory_space<vmem>>, vector<128x256xbf16>
    %cst = arith.constant dense<0.000000e+00> : vector<176x256xf32>
    %3 = tpu.matmul %1, %2, %cst {dimension_numbers = #tpu.dot_dimension_numbers<[1], [0], [0], [1], [0, 0, 1, 1], [], []>} : vector<176x128xbf16>, vector<128x256xbf16>, vector<176x256xf32> -> vector<176x256xf32>
    %4 = vector.extract_strided_slice %3 {offsets = [0, 0], sizes = [176, 128], strides = [1, 1]} : vector<176x256xf32> to vector<176x128xf32>
    %c0_4 = arith.constant 0 : index
    %c0_5 = arith.constant 0 : index
    %5 = vector.load %arg4[%c0_4, %c0_5] : memref<2x128xf32, #tpu.memory_space<vmem>>, vector<1x128xf32>
    %6 = vector.broadcast %5 : vector<1x128xf32> to vector<176x128xf32>
    %7 = arith.addf %4, %6 : vector<176x128xf32>
    %8 = vector.extract_strided_slice %3 {offsets = [0, 128], sizes = [176, 128], strides = [1, 1]} : vector<176x256xf32> to vector<176x128xf32>
    %c1 = arith.constant 1 : index
    %c0_6 = arith.constant 0 : index
    %9 = vector.load %arg4[%c1, %c0_6] : memref<2x128xf32, #tpu.memory_space<vmem>>, vector<1x128xf32>
    %10 = vector.broadcast %9 : vector<1x128xf32> to vector<176x128xf32>
    %11 = arith.addf %8, %10 : vector<176x128xf32>
    %cst_7 = arith.constant 0.000000e+00 : f32
    %12 = vector.broadcast %cst_7 : f32 to vector<176x128xf32>
    %13 = arith.cmpf ogt, %7, %12 : vector<176x128xf32>
    %cst_8 = arith.constant 0.000000e+00 : f32
    %14 = vector.broadcast %cst_8 : f32 to vector<176x128xf32>
    %15 = arith.minimumf %7, %14 : vector<176x128xf32>
    %16 = math.exp %15 : vector<176x128xf32>
    %cst_9 = arith.constant 1.000000e+00 : f32
    %17 = vector.broadcast %cst_9 : f32 to vector<176x128xf32>
    %18 = arith.subf %16, %17 : vector<176x128xf32>
    %19 = arith.select %13, %7, %18 : vector<176x128xi1>, vector<176x128xf32>
    %cst_10 = arith.constant 0.000000e+00 : f32
    %20 = vector.broadcast %cst_10 : f32 to vector<176x128xf32>
    %21 = arith.subf %20, %11 : vector<176x128xf32>
    %22 = math.exp %21 : vector<176x128xf32>
    %cst_11 = arith.constant 1.000000e+00 : f32
    %23 = vector.broadcast %cst_11 : f32 to vector<176x128xf32>
    %24 = arith.addf %23, %22 : vector<176x128xf32>
    %cst_12 = arith.constant 1.000000e+00 : f32
    %25 = vector.broadcast %cst_12 : f32 to vector<176x128xf32>
    %26 = arith.divf %25, %24 : vector<176x128xf32>
    %27 = arith.mulf %19, %26 : vector<176x128xf32>
    %28 = arith.truncf %27 : vector<176x128xf32> to vector<176x128xbf16>
    %c0_13 = arith.constant 0 : index
    %c0_14 = arith.constant 0 : index
    %c0_15 = arith.constant 0 : index
    %29 = vector.load %arg5[%c0_13, %c0_14, %c0_15] : memref<1x176x128xbf16, #tpu.memory_space<vmem>>, vector<1x176x128xbf16>
    %30 = vector.shape_cast %29 : vector<1x176x128xbf16> to vector<176x128xbf16>
    %31 = vector.shape_cast %28 : vector<176x128xbf16> to vector<1x176x128xbf16>
    tpu.vector_store %arg5[%c0_13, %c0_14, %c0_15], %31 {strides = array<i32>} : memref<1x176x128xbf16, #tpu.memory_space<vmem>>, vector<1x176x128xbf16>,
    %cst_16 = arith.constant dense<0.000000e+00> : vector<128xf32>
    %32 = vector.multi_reduction <add>, %27, %cst_16 [0] : vector<176x128xf32> to vector<128xf32>
    %33 = vector.shape_cast %32 : vector<128xf32> to vector<1x128xf32>
    %34 = arith.mulf %27, %27 : vector<176x128xf32>
    %cst_17 = arith.constant dense<0.000000e+00> : vector<128xf32>
    %35 = vector.multi_reduction <add>, %34, %cst_17 [0] : vector<176x128xf32> to vector<128xf32>
    %36 = vector.shape_cast %35 : vector<128xf32> to vector<1x128xf32>
    %37 = tpu.concatenate %33, %36 in 0 : vector<1x128xf32>, vector<1x128xf32> -> vector<2x128xf32>
    %c0_18 = arith.constant 0 : index
    %c0_19 = arith.constant 0 : index
    %c0_20 = arith.constant 0 : index
    %c0_21 = arith.constant 0 : index
    %38 = vector.load %arg6[%c0_18, %c0_19, %c0_20, %c0_21] : memref<1x1x2x128xf32, #tpu.memory_space<vmem>>, vector<1x1x2x128xf32>
    %39 = vector.shape_cast %38 : vector<1x1x2x128xf32> to vector<2x128xf32>
    %40 = vector.shape_cast %37 : vector<2x128xf32> to vector<1x1x2x128xf32>
    tpu.vector_store %arg6[%c0_18, %c0_19, %c0_20, %c0_21], %40 {strides = array<i32>} : memref<1x1x2x128xf32, #tpu.memory_space<vmem>>, vector<1x1x2x128xf32>,
    return
  }
  func.func @transform_0(%arg0: i32, %arg1: i32) -> (i32, i32, i32) {
    %c0_i32 = arith.constant 0 : i32
    %c0_i32_0 = arith.constant 0 : i32
    return %arg0, %arg1, %c0_i32 : i32, i32, i32
  }
  func.func @transform_1(%arg0: i32, %arg1: i32) -> (i32, i32) {
    %c0_i32 = arith.constant 0 : i32
    %c0_i32_0 = arith.constant 0 : i32
    %c0_i32_1 = arith.constant 0 : i32
    return %c0_i32, %c0_i32_0 : i32, i32
  }
  func.func @transform_2(%arg0: i32, %arg1: i32) -> (i32, i32) {
    %c0_i32 = arith.constant 0 : i32
    %c0_i32_0 = arith.constant 0 : i32
    %c0_i32_1 = arith.constant 0 : i32
    return %c0_i32, %c0_i32_0 : i32, i32
  }
  func.func @transform_3(%arg0: i32, %arg1: i32) -> (i32, i32, i32) {
    %c0_i32 = arith.constant 0 : i32
    %c0_i32_0 = arith.constant 0 : i32
    return %arg0, %arg1, %c0_i32 : i32, i32, i32
  }
  func.func @transform_4(%arg0: i32, %arg1: i32) -> (i32, i32, i32, i32) {
    %c0_i32 = arith.constant 0 : i32
    %c0_i32_0 = arith.constant 0 : i32
    %c0_i32_1 = arith.constant 0 : i32
    return %arg0, %arg1, %c0_i32, %c0_i32_0 : i32, i32, i32, i32
  }
}

module attributes {stable_mosaic.version = 11 : i64} {
  func.func @_plain_conv_kernel(%arg0: i32, %arg1: i32, %arg2: memref<1x176x128xbf16, #tpu.memory_space<vmem>>, %arg3: memref<128x128xbf16, #tpu.memory_space<vmem>>, %arg4: memref<1x128xf32, #tpu.memory_space<vmem>>, %arg5: memref<1x176x128xf32, #tpu.memory_space<vmem>>) attributes {dimension_semantics = [#tpu.dimension_semantics<parallel>, #tpu.dimension_semantics<parallel>], iteration_bounds = array<i64: 2, 1>, scalar_prefetch = 0 : i64, scratch_operands = 0 : i64, tpu.core_type = #tpu.core_type<tc>, window_params = [{transform_indices = @transform_0, window_bounds = array<i64: 1, 176, 128>}, {pipeline_mode = #tpu.pipeline_mode<synchronous>, transform_indices = @transform_1, window_bounds = array<i64: 128, 128>}, {pipeline_mode = #tpu.pipeline_mode<synchronous>, transform_indices = @transform_2, window_bounds = array<i64: 1, 128>}, {transform_indices = @transform_3, window_bounds = array<i64: 1, 176, 128>}]} {
    %c0 = arith.constant 0 : index
    %c0_0 = arith.constant 0 : index
    %c0_1 = arith.constant 0 : index
    %0 = vector.load %arg2[%c0, %c0_0, %c0_1] : memref<1x176x128xbf16, #tpu.memory_space<vmem>>, vector<1x176x128xbf16>
    %1 = vector.shape_cast %0 : vector<1x176x128xbf16> to vector<176x128xbf16>
    %c0_2 = arith.constant 0 : index
    %c0_3 = arith.constant 0 : index
    %2 = vector.load %arg3[%c0_2, %c0_3] : memref<128x128xbf16, #tpu.memory_space<vmem>>, vector<128x128xbf16>
    %cst = arith.constant dense<0.000000e+00> : vector<176x128xf32>
    %3 = tpu.matmul %1, %2, %cst {dimension_numbers = #tpu.dot_dimension_numbers<[1], [0], [0], [1], [0, 0, 1, 1], [], []>} : vector<176x128xbf16>, vector<128x128xbf16>, vector<176x128xf32> -> vector<176x128xf32>
    %c0_4 = arith.constant 0 : index
    %c0_5 = arith.constant 0 : index
    %4 = vector.load %arg4[%c0_4, %c0_5] : memref<1x128xf32, #tpu.memory_space<vmem>>, vector<1x128xf32>
    %5 = vector.broadcast %4 : vector<1x128xf32> to vector<176x128xf32>
    %6 = arith.addf %3, %5 : vector<176x128xf32>
    %7 = math.tanh %6 : vector<176x128xf32>
    %c0_6 = arith.constant 0 : index
    %c0_7 = arith.constant 0 : index
    %c0_8 = arith.constant 0 : index
    %8 = vector.load %arg5[%c0_6, %c0_7, %c0_8] : memref<1x176x128xf32, #tpu.memory_space<vmem>>, vector<1x176x128xf32>
    %9 = vector.shape_cast %8 : vector<1x176x128xf32> to vector<176x128xf32>
    %10 = vector.shape_cast %7 : vector<176x128xf32> to vector<1x176x128xf32>
    tpu.vector_store %arg5[%c0_6, %c0_7, %c0_8], %10 {strides = array<i32>} : memref<1x176x128xf32, #tpu.memory_space<vmem>>, vector<1x176x128xf32>,
    return
  }
  func.func @transform_0(%arg0: i32, %arg1: i32) -> (i32, i32, i32) {
    %c0_i32 = arith.constant 0 : i32
    %c0_i32_0 = arith.constant 0 : i32
    return %arg0, %arg1, %c0_i32 : i32, i32, i32
  }
  func.func @transform_1(%arg0: i32, %arg1: i32) -> (i32, i32) {
    %c0_i32 = arith.constant 0 : i32
    %c0_i32_0 = arith.constant 0 : i32
    %c0_i32_1 = arith.constant 0 : i32
    return %c0_i32, %c0_i32_0 : i32, i32
  }
  func.func @transform_2(%arg0: i32, %arg1: i32) -> (i32, i32) {
    %c0_i32 = arith.constant 0 : i32
    %c0_i32_0 = arith.constant 0 : i32
    %c0_i32_1 = arith.constant 0 : i32
    return %c0_i32, %c0_i32_0 : i32, i32
  }
  func.func @transform_3(%arg0: i32, %arg1: i32) -> (i32, i32, i32) {
    %c0_i32 = arith.constant 0 : i32
    %c0_i32_0 = arith.constant 0 : i32
    return %arg0, %arg1, %c0_i32 : i32, i32, i32
  }
}

</mosaic_0001>

<bundles_post_ra>
// kernel: gated_coarse2fine_forward.24
= control target key start
LH: loop header
LB: loop body
LE: loop exit
PB: predicated region body
PF: predicated region fallthrough
CT: control target
= control target key end

     0   :  { %s1135_s15 = smov 0   ;;  %s1137_s16 = smov 0   ;;  %s1508_s0 = inlined_call_operand.vmem [shape: bf16[2,64,128], index: 0, kind: input, shape index: {}]   ;;  %s1509_s1 = inlined_call_operand.vmem [shape: bf16[128,256], index: 1, kind: input, shape index: {}]   ;;  %s1510_s2 = inlined_call_operand.vmem [shape: f32[2,128], index: 2, kind: input, shape index: {}]   ;;  %s1511_s3 = inlined_call_operand.vmem [shape: bf16[2,64,128], index: 3, kind: output, shape index: {0}]   ;;  %s1512_s4 = inlined_call_operand.vmem [shape: f32[2,1,2,128], index: 4, kind: output, shape index: {1}]  }
   0x1   :  { %s1139_s17 = smov 0  }
   0x2 LB: > { %s27_s18 = sadd.s32 1, %s1104_s16  ;;  %p855_p0 = scmp.ge.s32.totalorder %s1108_s17, 1  ;;  %s1108_s17 = sphi %s1139_s17, %s15_s17   ;;  %s1104_s16 = sphi %s1137_s16, %s1524_s16   ;;  %s1100_s15 = sphi %s1135_s15, %s1523_s15  }
   0x3   : > { %p29_p1 = scmp.ge.s32.totalorder %s27_s18, 2  ;;  %p188_p2 = scmp.lt.s32.totalorder %s1108_s17, 3 }
   0x5   : > { %s1526_s18 = smov (%p29_p1, %s27_s18), 0  ;;  %p189_p3 = pnand %p855_p0, %p188_p2 }
   0x6   : > { %p230_p4 = scmp.lt.s32.totalorder (!%p189_p3), %s1100_s15, 1 }
   0x7   : > { %192 = sbr.rel (%p189_p3) target bundleno = 265 (0x109), region = 32 }
   0xc   : > { %v935_v0 = vld [vmem:[%s1509_s1 + $0x70] sm:$0xf]  ;;  %v972_v1 = vld [vmem:[%s1509_s1 + $0x74] sm:$0xf0]  ;;  %v971_v2 = vld [vmem:[%s1509_s1 + $0x74] sm:$0xf] }
   0xd   : > { %v936_v3 = vor.u32 %v972_v1, %v935_v0  ;;  %v937_v4 = vld [vmem:[%s1509_s1 + $0x78] sm:$0xf0]  ;;  %v927_v5 = vld [vmem:[%s1509_s1 + $0x60] sm:$0xf]  ;;  %v970_v6 = vld [vmem:[%s1509_s1 + $0x64] sm:$0xf0] }
   0xe   : > { %v940_v7 = vor.u32 %v971_v2, %v937_v4  ;;  %v969_v8 = vld [vmem:[%s1509_s1 + $0x64] sm:$0xf]  ;;  %v929_v9 = vld [vmem:[%s1509_s1 + $0x68] sm:$0xf0]  ;;  %v928_v10 = vor.u32 %v970_v6, %v927_v5  ;;  %v919_v12 = vld [vmem:[%s1509_s1 + $0x50] sm:$0xf] }
   0xf   : > { %384 = vmatpush.bf16.msra.mxu0 %v936_v3  ;;  %996 = vmatpush.bf16.msra.mxu2 %v936_v3  ;;  %v932_v11 = vor.u32 %v969_v8, %v929_v9  ;;  %v968_v13 = vld [vmem:[%s1509_s1 + $0x54] sm:$0xf0]  ;;  %v967_v14 = vld [vmem:[%s1509_s1 + $0x54] sm:$0xf]  ;;  %v921_v15 = vld [vmem:[%s1509_s1 + $0x58] sm:$0xf0] }
  0x10   : > { %413 = vmatpush.bf16.msra.mxu1 %v940_v7  ;;  %1004 = vmatpush.bf16.msra.mxu3 %v940_v7  ;;  %v920_v16 = vor.u32 %v968_v13, %v919_v12  ;;  %v924_v17 = vor.u32 %v967_v14, %v921_v15  ;;  %v911_v18 = vld [vmem:[%s1509_s1 + $0x40] sm:$0xf]  ;;  %v966_v19 = vld [vmem:[%s1509_s1 + $0x44] sm:$0xf0]  ;;  %v965_v20 = vld [vmem:[%s1509_s1 + $0x44] sm:$0xf] }
  0x11   : > { %v913_v21 = vld [vmem:[%s1509_s1 + $0x48] sm:$0xf0]  ;;  %v912_v22 = vor.u32 %v966_v19, %v911_v18  ;;  %v903_v24 = vld [vmem:[%s1509_s1 + $0x30] sm:$0xf]  ;;  %v964_v25 = vld [vmem:[%s1509_s1 + $0x34] sm:$0xf0] }
  0x12   : > { %v916_v23 = vor.u32 %v965_v20, %v913_v21  ;;  %v963_v26 = vld [vmem:[%s1509_s1 + $0x34] sm:$0xf]  ;;  %v905_v27 = vld [vmem:[%s1509_s1 + $0x38] sm:$0xf0]  ;;  %v904_v28 = vor.u32 %v964_v25, %v903_v24  ;;  %v895_v30 = vld [vmem:[%s1509_s1 + $0x20] sm:$0xf] }
  0x13   : > { %385 = vmatpush.bf16.msra.mxu0 %v928_v10  ;;  %997 = vmatpush.bf16.msra.mxu2 %v928_v10  ;;  %v908_v29 = vor.u32 %v963_v26, %v905_v27  ;;  %v962_v31 = vld [vmem:[%s1509_s1 + $0x24] sm:$0xf0]  ;;  %v961_v32 = vld [vmem:[%s1509_s1 + $0x24] sm:$0xf]  ;;  %v897_v33 = vld [vmem:[%s1509_s1 + $0x28] sm:$0xf0] }
  0x14   : > { %414 = vmatpush.bf16.msra.mxu1 %v932_v11  ;;  %1005 = vmatpush.bf16.msra.mxu3 %v932_v11  ;;  %v896_v34 = vor.u32 %v962_v31, %v895_v30  ;;  %v900_v35 = vor.u32 %v961_v32, %v897_v33  ;;  %v887_v36 = vld [vmem:[%s1509_s1 + $0x10] sm:$0xf]  ;;  %v960_v37 = vld [vmem:[%s1509_s1 + $0x14] sm:$0xf0]  ;;  %s1528_s15 = smov (!%p230_p4, %s1100_s15), 1 }
  0x15   : > { %v959_v38 = vld [vmem:[%s1509_s1 + $0x14] sm:$0xf]  ;;  %v889_v39 = vld [vmem:[%s1509_s1 + $0x18] sm:$0xf0]  ;;  %v888_v40 = vor.u32 %v960_v37, %v887_v36  ;;  %v879_v42 = vld [vmem:[%s1509_s1] sm:$0xf] }
  0x16   : > { %v892_v41 = vor.u32 %v959_v38, %v889_v39  ;;  %v958_v43 = vld [vmem:[%s1509_s1 + $0x4] sm:$0xf0]  ;;  %s951_s9 = sshll.u32 %s1528_s15, 5  ;;  %v957_v44 = vld [vmem:[%s1509_s1 + $0x4] sm:$0xf]  ;;  %s860_s28 = sshll.u32 %s1528_s15, 1 }
  0x17   : > { %386 = vmatpush.bf16.msra.mxu0 %v920_v16  ;;  %998 = vmatpush.bf16.msra.mxu2 %v920_v16  ;;  %v881_v45 = vld [vmem:[%s1509_s1 + $0x8] sm:$0xf0]  ;;  %v880_v46 = vor.u32 %v958_v43, %v879_v42  ;;  %s237_s20 = scalar_lea.vmem %s1508_s0, %s951_s9  ;;  %v1264_v52 = vld [vmem:[%s1510_s2 + $0x1] ss:$0 sm:$0xff]  ;;  %v1270_v56 = vld [vmem:[%s1510_s2] ss:$0 sm:$0xff]  ;;  %s1377_s27 = scalar_lea.vmem %s1511_s3, %s951_s9 }
  0x18   : > { %415 = vmatpush.bf16.msra.mxu1 %v924_v17  ;;  %1006 = vmatpush.bf16.msra.mxu3 %v924_v17  ;;  %v884_v47 = vor.u32 %v957_v44, %v881_v45  ;;  %v953_v48 = vld [vmem:[%s237_s20] sm:$0xff]  ;;  %v955_v49 = vld [vmem:[%s237_s20 + $0x10] sm:$0xff]  ;;  %v954_v50 = vld [vmem:[%s237_s20 + $0x8] sm:$0xff]  ;;  %s255_s5 = scalar_lea.vmem %s1512_s4, %s860_s28 }
  0x19   : > { %v956_v51 = vld [vmem:[%s237_s20 + $0x18] sm:$0xff] }
  0x1b   : > { %387 = vmatpush.bf16.msra.mxu0 %v912_v22  ;;  %999 = vmatpush.bf16.msra.mxu2 %v912_v22 }
  0x1c   : > { %416 = vmatpush.bf16.msra.mxu1 %v916_v23  ;;  %1007 = vmatpush.bf16.msra.mxu3 %v916_v23 }
  0x1f   : > { %388 = vmatpush.bf16.msra.mxu0 %v904_v28  ;;  %1000 = vmatpush.bf16.msra.mxu2 %v904_v28 }
  0x20   : > { %417 = vmatpush.bf16.msra.mxu1 %v908_v29  ;;  %1008 = vmatpush.bf16.msra.mxu3 %v908_v29 }
  0x23   : > { %389 = vmatpush.bf16.msra.mxu0 %v896_v34  ;;  %1001 = vmatpush.bf16.msra.mxu2 %v896_v34 }
  0x24   : > { %418 = vmatpush.bf16.msra.mxu1 %v900_v35  ;;  %1009 = vmatpush.bf16.msra.mxu3 %v900_v35 }
  0x27   : > { %390 = vmatpush.bf16.msra.mxu0 %v888_v40  ;;  %1002 = vmatpush.bf16.msra.mxu2 %v888_v40 }
  0x28   : > { %419 = vmatpush.bf16.msra.mxu1 %v892_v41  ;;  %1010 = vmatpush.bf16.msra.mxu3 %v892_v41 }
  0x2b   : > { %391 = vmatpush.bf16.msra.mxu0 %v880_v46  ;;  %1003 = vmatpush.bf16.msra.mxu2 %v880_v46 }
  0x2c   : > { %420 = vmatpush.bf16.msra.mxu1 %v884_v47  ;;  %1011 = vmatpush.bf16.msra.mxu3 %v884_v47 }
  0x2e   : > { %392 = vmatmul.bf16.vlgmr.msra.gmra.mxu0 %v953_v48  ;;  %402 = vmatmul.bf16.vlgmr.msra.gmra.mxu2 %v955_v49 }
  0x2f   : > { %421 = vmatmul.bf16.vlgmr.msra.gmra.mxu1 %v953_v48  ;;  %431 = vmatmul.bf16.vlgmr.msra.gmra.mxu3 %v955_v49 }
  0x3e   : > { %397 = vmatmul.bf16.gmra.mxu0 %v954_v50  ;;  %407 = vmatmul.bf16.gmra.mxu2 %v956_v51 }
  0x3f   : > { %426 = vmatmul.bf16.gmra.mxu1 %v954_v50  ;;  %436 = vmatmul.bf16.gmra.mxu3 %v956_v51 }
  0xab   : > { %v393_v53 = vpop.f32.mrf.mxu0 }
  0xac   : > { %v422_v54 = vpop.f32.mrf.mxu1  ;;  %v1273_v59 = vadd.f32 %v1270_v56, %v393_v53 }
  0xad   : > { %v454_v55 = vadd.f32 %v1264_v52, %v422_v54 }
  0xae   : > { %v470_v4 = vmin.f32 %v1273_v59, 0.0  ;;  %vm462_vm0 = vcmp.gt.f32.partialorder %v1273_v59, 0.0 }
  0xaf   : > { %v510_v57 = vsub.f32 0.0, %v454_v55 }
  0xb0   : > { %v478_v11 = vmul.f32 1.442695, %v470_v4 }
  0xb1   : > { %v518_v58 = vmul.f32 1.442695, %v510_v57  ;;  %v403_v61 = vpop.f32.mrf.mxu2 }
  0xb2   : > { %v432_v60 = vpop.f32.mrf.mxu3  ;;  %v1277_v1 = vadd.f32 %v1270_v56, %v403_v61 }
  0xb3   : > { %1038 = vpow2.f32 %v518_v58  ;;  %v458_v62 = vadd.f32 %v1264_v52, %v432_v60  ;;  %v395_v63 = vpop.f32.mrf.mxu0 }
  0xb4   : > { %v424_v0 = vpop.f32.mrf.mxu1  ;;  %v1282_v6 = vadd.f32 %v1270_v56, %v395_v63  ;;  %v474_v9 = vmin.f32 %v1277_v1, 0.0  ;;  %vm466_vm7 = vcmp.gt.f32.partialorder %v1277_v1, 0.0 }
  0xb5   : > { %v514_v2 = vsub.f32 0.0, %v458_v62  ;;  %v455_v3 = vadd.f32 %v1264_v52, %v424_v0 }
  0xb6   : > { %v471_v14 = vmin.f32 %v1282_v6, 0.0  ;;  %v486_v17 = vmul.f32 1.442695, %v474_v9  ;;  %vm463_vm1 = vcmp.gt.f32.partialorder %v1282_v6, 0.0 }
  0xb7   : > { %v526_v5 = vmul.f32 1.442695, %v514_v2  ;;  %v511_v7 = vsub.f32 0.0, %v455_v3 }
  0xb8   : > { %v480_v21 = vmul.f32 1.442695, %v471_v14 }
  0xb9   : > { %v1039_v8 = vpop.eup %1038  ;;  %1040 = vpow2.f32 %v526_v5  ;;  %v520_v10 = vmul.f32 1.442695, %v511_v7  ;;  %v405_v23 = vpop.f32.mrf.mxu2 }
  0xba   : > { %v1285_v12 = vadd.f32 1.0, %v1039_v8  ;;  %v434_v13 = vpop.f32.mrf.mxu3  ;;  %v1301_v30 = vadd.f32 %v1270_v56, %v405_v23 }
  0xbb   : > { %1042 = vpow2.f32 %v520_v10  ;;  %v459_v15 = vadd.f32 %v1264_v52, %v434_v13  ;;  %v398_v45 = vpop.f32.mrf.mxu0 }
  0xbc   : > { %1044 = vrcp.f32 %v1285_v12  ;;  %v427_v16 = vpop.f32.mrf.mxu1  ;;  %v475_v37 = vmin.f32 %v1301_v30, 0.0  ;;  %v551_v42 = vand.u32 2147483647, %v1285_v12  ;;  %v553_v43 = vand.u32 2147483648, %v1285_v12 }
  0xbd   : > { %v515_v18 = vsub.f32 0.0, %v459_v15  ;;  %1046 = vpow2.f32 %v478_v11  ;;  %v456_v19 = vadd.f32 %v1264_v52, %v427_v16  ;;  %v1316_v47 = vadd.f32 %v1270_v56, %v398_v45 }
  0xbe   : > { %1048 = vpow2.f32 %v486_v17  ;;  %vm547_vm2 = vweird.f32 %v1285_v12  ;;  %v488_v51 = vmul.f32 1.442695, %v475_v37  ;;  %vm1325_vm4 = vcmp.eq.f32.partialorder %v551_v42, 8.507059e+37 }
  0xbf   : > { %v1041_v20 = vpop.eup %1040  ;;  %v528_v24 = vmul.f32 1.442695, %v515_v18  ;;  %v512_v27 = vsub.f32 0.0, %v456_v19  ;;  %v554_v60 = vor.u32 1.1754944e-38, %v553_v43  ;;  %v472_v0 = vmin.f32 %v1316_v47, 0.0 }
  0xc0   : > { %v1291_v22 = vadd.f32 1.0, %v1041_v20 }
  0xc1   : > { %v1043_v25 = vpop.eup %1042  ;;  %v522_v34 = vmul.f32 1.442695, %v512_v27  ;;  %v408_v23 = vpop.f32.mrf.mxu2 }
  0xc2   : > { %v1293_v26 = vpop.eup %1044  ;;  %1050 = vrcp.f32 %v1291_v22  ;;  %v1298_v29 = vadd.f32 1.0, %v1043_v25  ;;  %v437_v32 = vpop.f32.mrf.mxu3  ;;  %vm607_vm8 = vweird.f32 %v1291_v22  ;;  %v613_v13 = vand.u32 2147483648, %v1291_v22 }
  0xc3   : > { %v543_v28 = vmul.f32 %v1293_v26, %v1285_v12  ;;  %1052 = vpow2.f32 %v480_v21  ;;  %v1047_v31 = vpop.eup %1046  ;;  %v460_v38 = vadd.f32 %v1264_v52, %v437_v32  ;;  %vm548_vm3 = vweird.f32 %v1293_v26 }
  0xc4   : > { %1054 = vpow2.f32 %v528_v24  ;;  %v1049_v35 = vpop.eup %1048  ;;  %v941_v36 = vadd.f32 -1.0, %v1047_v31  ;;  %vm1335_vm5 = vmor %vm547_vm2, %vm548_vm3  ;;  %v566_v4 = vand.u32 2147483647, %v1298_v29  ;;  %v568_v5 = vand.u32 2147483648, %v1298_v29  ;;  %v429_v11 = vpop.f32.mrf.mxu1 }
  0xc5   : > { %v544_v33 = vsub.f32 1.0, %v543_v28  ;;  %1056 = vrcp.f32 %v1298_v29  ;;  %v516_v48 = vsub.f32 0.0, %v460_v38  ;;  %v1329_v61 = vadd.f32 -1.0, %v1049_v35 }
  0xc6   : > { %1058 = vpow2.f32 %v522_v34  ;;  %v502_v50 = vsel %vm462_vm0, %v1273_v59, %v941_v36  ;;  %v611_v12 = vand.u32 2147483647, %v1291_v22  ;;  %vm562_vm9 = vweird.f32 %v1298_v29 }
  0xc7   : > { %v545_v40 = vmul.f32 %v1293_v26, %v544_v33  ;;  %v530_v2 = vmul.f32 1.442695, %v516_v48  ;;  %vm567_vm11 = vcmp.eq.f32.partialorder %v566_v4, 8.507059e+37  ;;  %v569_v18 = vor.u32 1.1754944e-38, %v568_v5 }
  0xc8   : > { %v1306_v39 = vpop.eup %1050  ;;  %v457_v19 = vadd.f32 %v1264_v52, %v429_v11  ;;  %vm1362_vm13 = vcmp.eq.f32.partialorder %v611_v12, 8.507059e+37  ;;  %v482_v33 = vmul.f32 1.442695, %v472_v0  ;;  %vm467_vm2 = vcmp.gt.f32.partialorder %v1301_v30, 0.0 }
  0xc9   : > { %v1053_v41 = vpop.eup %1052  ;;  %v603_v44 = vmul.f32 %v1306_v39, %v1291_v22  ;;  %v546_v54 = vadd.f32 %v1293_v26, %v545_v40  ;;  %vm608_vm12 = vweird.f32 %v1306_v39  ;;  %v1390_v40 = vadd.f32 %v1270_v56, %v408_v23  ;;  %v410_v3 = vpop.f32.mrf.mxu2 }
  0xca   : > { %v1055_v46 = vpop.eup %1054  ;;  %v942_v62 = vadd.f32 -1.0, %v1053_v41  ;;  %v513_v28 = vsub.f32 0.0, %v457_v19  ;;  %v439_v34 = vpop.f32.mrf.mxu3  ;;  %vm1383_vm14 = vmor %vm607_vm8, %vm608_vm12 }
  0xcb   : > { %v1057_v49 = vpop.eup %1056  ;;  %v1320_v53 = vadd.f32 1.0, %v1055_v46  ;;  %v604_v55 = vsub.f32 1.0, %v603_v44  ;;  %v550_v8 = vsel %vm1335_vm5, %v1293_v26, %v546_v54  ;;  %v614_v26 = vor.u32 1.1754944e-38, %v613_v13  ;;  %v400_v41 = vpop.f32.mrf.mxu0 }
  0xcc   : > { %v558_v57 = vmul.f32 %v1057_v49, %v1298_v29  ;;  %v1059_v59 = vpop.eup %1058  ;;  %vm563_vm6 = vweird.f32 %v1057_v49  ;;  %v503_v14 = vsel %vm463_vm1, %v1282_v6, %v942_v62  ;;  %v555_v17 = vsel %vm1325_vm4, %v554_v60, %v550_v8 }
  0xcd   : > { %1060 = vrcp.f32 %v1320_v53  ;;  %v1341_v7 = vadd.f32 1.0, %v1059_v59  ;;  %v605_v9 = vmul.f32 %v1306_v39, %v604_v55  ;;  %vm564_vm10 = vmor %vm562_vm9, %vm563_vm6  ;;  %v1366_v29 = vmul.f32 %v555_v17, %v502_v50 }
  0xce   : > { %v559_v63 = vsub.f32 1.0, %v558_v57  ;;  %1062 = vpow2.f32 %v488_v51  ;;  %v626_v37 = vand.u32 2147483647, %v1320_v53  ;;  %v628_v38 = vand.u32 2147483648, %v1320_v53 }
  0xcf   : > { %1064 = vrcp.f32 %v1341_v7  ;;  %v606_v20 = vadd.f32 %v1306_v39, %v605_v9  ;;  %v524_v42 = vmul.f32 1.442695, %v513_v28  ;;  %v461_v50 = vadd.f32 %v1264_v52, %v439_v34 }
  0xd0   : > { %v560_v10 = vmul.f32 %v1057_v49, %v559_v63  ;;  %1066 = vpow2.f32 %v530_v2  ;;  %vm622_vm0 = vweird.f32 %v1320_v53  ;;  %v1405_v54 = vadd.f32 %v1270_v56, %v400_v41 }
  0xd1   : > { %v610_v44 = vsel %vm1383_vm14, %v1306_v39, %v606_v20  ;;  %1068 = vpow2.f32 %v524_v42  ;;  %v629_v55 = vor.u32 1.1754944e-38, %v628_v38  ;;  %v506_v52 = vsel %vm466_vm7, %v1277_v1, %v1329_v61 }
  0xd2   : > { %v561_v15 = vadd.f32 %v1057_v49, %v560_v10  ;;  %v615_v39 = vsel %vm1362_vm13, %v614_v26, %v610_v44  ;;  %vm627_vm3 = vcmp.eq.f32.partialorder %v626_v37, 8.507059e+37  ;;  %v517_v59 = vsub.f32 0.0, %v461_v50 }
  0xd3   : > { %v1061_v16 = vpop.eup %1060  ;;  %v1416_v62 = vmul.f32 %v615_v39, %v506_v52  ;;  %v473_v2 = vmin.f32 %v1405_v54, 0.0  ;;  %v476_v1 = vmin.f32 %v1390_v40, 0.0  ;;  %v1430_v9 = vadd.f32 %v1270_v56, %v410_v3 }
  0xd4   : > { %v565_v21 = vsel %vm564_vm10, %v1057_v49, %v561_v15  ;;  %v618_v6 = vmul.f32 %v1061_v16, %v1320_v53  ;;  %v1063_v24 = vpop.eup %1062  ;;  %vm623_vm15 = vweird.f32 %v1061_v16  ;;  %v532_v61 = vmul.f32 1.442695, %v517_v59 }
  0xd5   : > { %v570_v27 = vsel %vm567_vm11, %v569_v18, %v565_v21  ;;  %v1370_v35 = vpop.eup %1064  ;;  %v946_v46 = vadd.f32 -1.0, %v1063_v24  ;;  %vm624_vm1 = vmor %vm622_vm0, %vm623_vm15  ;;  %v484_v12 = vmul.f32 1.442695, %v473_v2  ;;  %v490_v15 = vmul.f32 1.442695, %v476_v1 }
  0xd6   : > { %v1368_v31 = vmul.f32 %v570_v27, %v503_v14  ;;  %v619_v32 = vsub.f32 1.0, %v618_v6  ;;  %v1067_v43 = vpop.eup %1066  ;;  %v573_v48 = vmul.f32 %v1370_v35, %v1341_v7  ;;  %vm578_vm4 = vweird.f32 %v1370_v35 }
  0xd7   : > { %v1399_v49 = vadd.f32 1.0, %v1067_v43  ;;  %v507_v58 = vsel %vm467_vm2, %v1301_v30, %v946_v46  ;;  %v1069_v4 = vpop.eup %1068  ;;  %v583_v14 = vand.u32 2147483648, %v1341_v7  ;;  %vm577_vm5 = vweird.f32 %v1341_v7 }
  0xd8   : > { %v976_v22 = vpack.c.bf16 %v1368_v31, %v1366_v29  ;;  %v620_v45 = vmul.f32 %v1061_v16, %v619_v32  ;;  %v574_v57 = vsub.f32 1.0, %v573_v48  ;;  %v1427_v8 = vadd.f32 1.0, %v1069_v4  ;;  %vm579_vm6 = vmor %vm577_vm5, %vm578_vm4 }
  0xd9   : > { %1070 = vrcp.f32 %v1399_v49  ;;  %v581_v56 = vand.u32 2147483647, %v1341_v7  ;;  %v584_v21 = vor.u32 1.1754944e-38, %v583_v14  ;;  %vm464_vm7 = vcmp.gt.f32.partialorder %v1316_v47, 0.0 }
  0xda   : > { %977 = vst [vmem:[%s1377_s27] sm:$0xff] %v976_v22   ;;  %v621_v51 = vadd.f32 %v1061_v16, %v620_v45  ;;  %1072 = vpow2.f32 %v482_v33  ;;  %v575_v0 = vmul.f32 %v1370_v35, %v574_v57  ;;  %v700_v32 = vmul.f32 %v1368_v31, %v1368_v31 }
  0xdb   : > { %1074 = vpow2.f32 %v532_v61  ;;  %vm582_vm8 = vcmp.eq.f32.partialorder %v581_v56, 8.507059e+37  ;;  %vm468_vm9 = vcmp.gt.f32.partialorder %v1390_v40, 0.0  ;;  %vm465_vm10 = vcmp.gt.f32.partialorder %v1405_v54, 0.0 }
  0xdc   : > { %v625_v53 = vsel %vm624_vm1, %v1061_v16, %v621_v51  ;;  %v576_v10 = vadd.f32 %v1370_v35, %v575_v0  ;;  %1076 = vrcp.f32 %v1427_v8  ;;  %v477_v16 = vmin.f32 %v1430_v9, 0.0 }
  0xdd   : > { %v630_v60 = vsel %vm627_vm3, %v629_v55, %v625_v53  ;;  %1078 = vpow2.f32 %v484_v12  ;;  %v641_v36 = vand.u32 2147483647, %v1399_v49  ;;  %v598_v37 = vand.u32 2147483648, %v1427_v8 }
  0xde   : > { %v1418_v63 = vmul.f32 %v630_v60, %v507_v58  ;;  %v580_v17 = vsel %vm579_vm6, %v1370_v35, %v576_v10  ;;  %1080 = vpow2.f32 %v490_v15  ;;  %v492_v25 = vmul.f32 1.442695, %v477_v16 }
  0xdf   : > { %v1425_v5 = vpop.eup %1070  ;;  %v585_v24 = vsel %vm582_vm8, %v584_v21, %v580_v17  ;;  %v596_v41 = vand.u32 2147483647, %v1427_v8  ;;  %v699_v42 = vmul.f32 %v1366_v29, %v1366_v29  ;;  %vm637_vm13 = vweird.f32 %v1399_v49 }
  0xe0   : > { %v986_v30 = vpack.c.bf16 %v1418_v63, %v1416_v62  ;;  %v633_v11 = vmul.f32 %v1425_v5, %v1399_v49  ;;  %v1073_v13 = vpop.eup %1072  ;;  %vm638_vm11 = vweird.f32 %v1425_v5  ;;  %v643_v43 = vand.u32 2147483648, %v1399_v49 }
  0xe1   : > { %v1075_v19 = vpop.eup %1074  ;;  %v943_v20 = vadd.f32 -1.0, %v1073_v13  ;;  %vm1465_vm14 = vmor %vm637_vm13, %vm638_vm11  ;;  %vm592_vm15 = vweird.f32 %v1427_v8  ;;  %v686_v51 = vadd.f32 %v1368_v31, %v1366_v29  ;;  %v707_v39 = vadd.f32 %v700_v32, %v699_v42 }
  0xe2   : > { %994 = vst [vmem:[%s1377_s27 + $0x10] sm:$0xff] %v986_v30   ;;  %v634_v18 = vsub.f32 1.0, %v633_v11  ;;  %v1444_v6 = vadd.f32 1.0, %v1075_v19  ;;  %v1077_v23 = vpop.eup %1076  ;;  %v599_v55 = vor.u32 1.1754944e-38, %v598_v37  ;;  %vm642_vm1 = vcmp.eq.f32.partialorder %v641_v36, 8.507059e+37 }
  0xe3   : > { %v588_v26 = vmul.f32 %v1077_v23, %v1427_v8  ;;  %v504_v27 = vsel %vm464_vm7, %v1316_v47, %v943_v20  ;;  %v1079_v28 = vpop.eup %1078  ;;  %vm593_vm12 = vweird.f32 %v1077_v23  ;;  %vm597_vm2 = vcmp.eq.f32.partialorder %v596_v41, 8.507059e+37 }
  0xe4   : > { %v635_v7 = vmul.f32 %v1425_v5, %v634_v18  ;;  %1082 = vrcp.f32 %v1444_v6  ;;  %v664_v33 = vmul.f32 %v585_v24, %v504_v27  ;;  %v1081_v35 = vpop.eup %1080  ;;  %v944_v44 = vadd.f32 -1.0, %v1079_v28  ;;  %vm594_vm0 = vmor %vm592_vm15, %vm593_vm12 }
  0xe5   : > { %v589_v34 = vsub.f32 1.0, %v588_v26  ;;  %1084 = vpow2.f32 %v492_v25  ;;  %v947_v46 = vadd.f32 -1.0, %v1081_v35  ;;  %v644_v58 = vor.u32 1.1754944e-38, %v643_v43 }
  0xe6   : > { %v636_v47 = vadd.f32 %v1425_v5, %v635_v7  ;;  %v701_v45 = vmul.f32 %v664_v33, %v664_v33  ;;  %v505_v60 = vsel %vm465_vm10, %v1405_v54, %v944_v44  ;;  %v687_v31 = vadd.f32 %v686_v51, %v664_v33 }
  0xe7   : > { %v590_v38 = vmul.f32 %v1077_v23, %v589_v34  ;;  %v658_v3 = vand.u32 2147483648, %v1444_v6  ;;  %v656_v4 = vand.u32 2147483647, %v1444_v6  ;;  %v703_v54 = vmul.f32 %v1416_v62, %v1416_v62 }
  0xe8   : > { %v640_v57 = vsel %vm1465_vm14, %v1425_v5, %v636_v47  ;;  %v708_v0 = vadd.f32 %v707_v39, %v701_v45  ;;  %v508_v11 = vsel %vm468_vm9, %v1390_v40, %v947_v46  ;;  %vm652_vm4 = vweird.f32 %v1444_v6 }
  0xe9   : > { %v591_v50 = vadd.f32 %v1077_v23, %v590_v38  ;;  %v645_v1 = vsel %vm642_vm1, %v644_v58, %v640_v57  ;;  %v659_v56 = vor.u32 1.1754944e-38, %v658_v3  ;;  %v704_v16 = vmul.f32 %v1418_v63, %v1418_v63 }
  0xea   : > { %v1083_v22 = vpop.eup %1082  ;;  %v668_v13 = vmul.f32 %v645_v1, %v508_v11  ;;  %vm469_vm6 = vcmp.gt.f32.partialorder %v1430_v9, 0.0  ;;  %vm657_vm7 = vcmp.eq.f32.partialorder %v656_v4, 8.507059e+37  ;;  %vm720_vm8 = vcmask 1040384  }
  0xeb   : > { %v648_v49 = vmul.f32 %v1083_v22, %v1444_v6  ;;  %v595_v52 = vsel %vm594_vm0, %v1077_v23, %v591_v50  ;;  %v1085_v53 = vpop.eup %1084  ;;  %vm653_vm3 = vweird.f32 %v1083_v22 }
  0xec   : > { %v600_v59 = vsel %vm597_vm2, %v599_v55, %v595_v52  ;;  %v948_v10 = vadd.f32 -1.0, %v1085_v53  ;;  %vm654_vm5 = vmor %vm652_vm4, %vm653_vm3  ;;  %v705_v6 = vmul.f32 %v668_v13, %v668_v13 }
  0xed   : > { %v649_v29 = vsub.f32 1.0, %v648_v49  ;;  %v665_v2 = vmul.f32 %v600_v59, %v505_v60 }
  0xee   : > { %v509_v40 = vsel %vm469_vm6, %v1430_v9, %v948_v10 }
  0xef   : > { %v650_v61 = vmul.f32 %v1083_v22, %v649_v29  ;;  %v981_v30 = vpack.c.bf16 %v665_v2, %v664_v33  ;;  %v688_v5 = vadd.f32 %v687_v31, %v665_v2  ;;  %v702_v8 = vmul.f32 %v665_v2, %v665_v2 }
  0xf1   : > { %v651_v12 = vadd.f32 %v1083_v22, %v650_v61  ;;  %993 = vst [vmem:[%s1377_s27 + $0x8] sm:$0xff] %v981_v30   ;;  %v689_v14 = vadd.f32 %v688_v5, %v1416_v62  ;;  %v709_v15 = vadd.f32 %v708_v0, %v702_v8 }
  0xf3   : > { %v655_v17 = vsel %vm654_vm5, %v1083_v22, %v651_v12  ;;  %v710_v18 = vadd.f32 %v709_v15, %v703_v54  ;;  %v690_v20 = vadd.f32 %v689_v14, %v1418_v63 }
  0xf4   : > { %v660_v19 = vsel %vm657_vm7, %v659_v56, %v655_v17 }
  0xf5   : > { %v669_v21 = vmul.f32 %v660_v19, %v509_v40  ;;  %v691_v62 = vadd.f32 %v690_v20, %v668_v13  ;;  %v711_v23 = vadd.f32 %v710_v18, %v704_v16 }
  0xf7   : > { %v991_v24 = vpack.c.bf16 %v669_v21, %v668_v13  ;;  %v692_v25 = vadd.f32 %v691_v62, %v669_v21  ;;  %v706_v7 = vmul.f32 %v669_v21, %v669_v21  ;;  %v712_v26 = vadd.f32 %v711_v23, %v705_v6 }
  0xf9   : > { %995 = vst [vmem:[%s1377_s27 + $0x18] sm:$0xff] %v991_v24   ;;  %v693_v27 = vrot.slane %v692_v25, 4  ;;  %v713_v28 = vadd.f32 %v712_v26, %v706_v7 }
  0xfb   : > { %v694_v32 = vadd.f32 %v693_v27, %v692_v25  ;;  %v714_v33 = vrot.slane %v713_v28, 4 }
  0xfd   : > { %v695_v34 = vrot.slane %v694_v32, 2  ;;  %v715_v35 = vadd.f32 %v714_v33, %v713_v28 }
  0xff   : > { %v696_v9 = vadd.f32 %v695_v34, %v694_v32  ;;  %v716_v36 = vrot.slane %v715_v35, 2 }
 0x101   : > { %v697_v37 = vrot.slane %v696_v9, 1  ;;  %v717_v63 = vadd.f32 %v716_v36, %v715_v35 }
 0x103   : > { %v718_v47 = vrot.slane %v717_v63, 1  ;;  %v698_v38 = vadd.f32 %v697_v37, %v696_v9 }
 0x105   : > { %v719_v41 = vadd.f32 %v718_v47, %v717_v63 }
 0x107   : > { %v721_v42 = vsel %vm720_vm8, %v698_v38, %v719_v41 }
 0x108   : > { %722 = vst [vmem:[%s255_s5] sm:$0x3] %v721_v42 }
 0x109 PF: > { %s15_s17 = sadd.s32 1, %s1108_s17   ;;  %s1523_s15 = smov %s1104_s16 }
 0x10a   : > { %p12_p5 = scmp.ge.s32.totalorder %s15_s17, 4   ;;  %s1524_s16 = smov %s1526_s18 }
 0x10c   :  { %14 = sbr.rel (!%p12_p5) target bundleno = 2 (0x2), region = 74 }

// kernel: gated_coarse2fine_forward.27
= control target key start
LH: loop header
LB: loop body
LE: loop exit
PB: predicated region body
PF: predicated region fallthrough
CT: control target
= control target key end

     0   :  { %s1011_s15 = smov 0   ;;  %s1013_s16 = smov 0   ;;  %s1254_s0 = inlined_call_operand.vmem [shape: bf16[2,16,256], index: 0, kind: input, shape index: {}]   ;;  %s1255_s1 = inlined_call_operand.vmem [shape: bf16[256,256], index: 1, kind: input, shape index: {}]   ;;  %s1256_s2 = inlined_call_operand.vmem [shape: f32[2,128], index: 2, kind: input, shape index: {}]   ;;  %s1257_s3 = inlined_call_operand.vmem [shape: bf16[2,16,128], index: 3, kind: output, shape index: {0}]   ;;  %s1258_s4 = inlined_call_operand.vmem [shape: f32[2,1,2,128], index: 4, kind: output, shape index: {1}]  }
   0x1   :  { %s1015_s17 = smov 0  }
   0x2 LB: > { %s27_s18 = sadd.s32 1, %s980_s16  ;;  %p737_p0 = scmp.ge.s32.totalorder %s984_s17, 1  ;;  %s984_s17 = sphi %s1015_s17, %s15_s17   ;;  %s980_s16 = sphi %s1013_s16, %s1260_s16   ;;  %s976_s15 = sphi %s1011_s15, %s1259_s15  }
   0x3   : > { %p29_p1 = scmp.ge.s32.totalorder %s27_s18, 2  ;;  %p189_p2 = scmp.lt.s32.totalorder %s984_s17, 3 }
   0x5   : > { %s1262_s18 = smov (%p29_p1, %s27_s18), 0  ;;  %p190_p3 = pnand %p737_p0, %p189_p2 }
   0x6   : > { %p232_p4 = scmp.lt.s32.totalorder (!%p190_p3), %s976_s15, 1 }
   0x7   : > { %193 = sbr.rel (%p190_p3) target bundleno = 241 (0xf1), region = 32 }
   0xc   : > { %v901_v0 = vld [vmem:[%s1255_s1 + $0x74] sm:$0xf]  ;;  %v811_v1 = vld [vmem:[%s1255_s1 + $0x78] sm:$0xf0]  ;;  %v809_v5 = vld [vmem:[%s1255_s1 + $0x70] sm:$0xf] }
   0xd   : > { %v917_v2 = vld [vmem:[%s1255_s1 + $0xf4] sm:$0xf]  ;;  %v814_v3 = vor.u32 %v901_v0, %v811_v1  ;;  %v875_v4 = vld [vmem:[%s1255_s1 + $0xf8] sm:$0xf0]  ;;  %v902_v6 = vld [vmem:[%s1255_s1 + $0x74] sm:$0xf0] }
   0xe   : > { %v878_v7 = vor.u32 %v917_v2, %v875_v4  ;;  %v810_v8 = vor.u32 %v902_v6, %v809_v5  ;;  %v873_v9 = vld [vmem:[%s1255_s1 + $0xf0] sm:$0xf]  ;;  %v918_v10 = vld [vmem:[%s1255_s1 + $0xf4] sm:$0xf0]  ;;  %v899_v11 = vld [vmem:[%s1255_s1 + $0x64] sm:$0xf] }
   0xf   : > { %491 = vmatpush.bf16.msra.mxu2 %v814_v3  ;;  %v874_v12 = vor.u32 %v918_v10, %v873_v9  ;;  %v803_v13 = vld [vmem:[%s1255_s1 + $0x68] sm:$0xf0]  ;;  %v915_v14 = vld [vmem:[%s1255_s1 + $0xe4] sm:$0xf]  ;;  %v801_v18 = vld [vmem:[%s1255_s1 + $0x60] sm:$0xf] }
  0x10   : > { %v867_v15 = vld [vmem:[%s1255_s1 + $0xe8] sm:$0xf0]  ;;  %505 = vmatpush.bf16.msra.mxu3 %v878_v7  ;;  %463 = vmatpush.bf16.msra.mxu0 %v810_v8  ;;  %v806_v16 = vor.u32 %v899_v11, %v803_v13  ;;  %v900_v19 = vld [vmem:[%s1255_s1 + $0x64] sm:$0xf0]  ;;  %v865_v20 = vld [vmem:[%s1255_s1 + $0xe0] sm:$0xf] }
  0x11   : > { %v870_v17 = vor.u32 %v915_v14, %v867_v15  ;;  %477 = vmatpush.bf16.msra.mxu1 %v874_v12  ;;  %v802_v21 = vor.u32 %v900_v19, %v801_v18  ;;  %v916_v22 = vld [vmem:[%s1255_s1 + $0xe4] sm:$0xf0]  ;;  %v897_v23 = vld [vmem:[%s1255_s1 + $0x54] sm:$0xf]  ;;  %v795_v24 = vld [vmem:[%s1255_s1 + $0x58] sm:$0xf0] }
  0x12   : > { %v866_v25 = vor.u32 %v916_v22, %v865_v20  ;;  %v913_v26 = vld [vmem:[%s1255_s1 + $0xd4] sm:$0xf]  ;;  %v859_v27 = vld [vmem:[%s1255_s1 + $0xd8] sm:$0xf0]  ;;  %v793_v28 = vld [vmem:[%s1255_s1 + $0x50] sm:$0xf]  ;;  %v798_v29 = vor.u32 %v897_v23, %v795_v24 }
  0x13   : > { %492 = vmatpush.bf16.msra.mxu2 %v806_v16  ;;  %v898_v30 = vld [vmem:[%s1255_s1 + $0x54] sm:$0xf0]  ;;  %v857_v31 = vld [vmem:[%s1255_s1 + $0xd0] sm:$0xf]  ;;  %v862_v33 = vor.u32 %v913_v26, %v859_v27  ;;  %v895_v35 = vld [vmem:[%s1255_s1 + $0x44] sm:$0xf] }
  0x14   : > { %v914_v32 = vld [vmem:[%s1255_s1 + $0xd4] sm:$0xf0]  ;;  %506 = vmatpush.bf16.msra.mxu3 %v870_v17  ;;  %464 = vmatpush.bf16.msra.mxu0 %v802_v21  ;;  %v794_v34 = vor.u32 %v898_v30, %v793_v28  ;;  %v787_v36 = vld [vmem:[%s1255_s1 + $0x48] sm:$0xf0]  ;;  %v911_v37 = vld [vmem:[%s1255_s1 + $0xc4] sm:$0xf] }
  0x15   : > { %478 = vmatpush.bf16.msra.mxu1 %v866_v25  ;;  %v858_v38 = vor.u32 %v914_v32, %v857_v31  ;;  %v851_v39 = vld [vmem:[%s1255_s1 + $0xc8] sm:$0xf0]  ;;  %v785_v40 = vld [vmem:[%s1255_s1 + $0x40] sm:$0xf]  ;;  %v896_v41 = vld [vmem:[%s1255_s1 + $0x44] sm:$0xf0]  ;;  %v790_v44 = vor.u32 %v895_v35, %v787_v36 }
  0x16   : > { %v849_v42 = vld [vmem:[%s1255_s1 + $0xc0] sm:$0xf]  ;;  %v912_v43 = vld [vmem:[%s1255_s1 + $0xc4] sm:$0xf0]  ;;  %v854_v45 = vor.u32 %v911_v37, %v851_v39  ;;  %v786_v46 = vor.u32 %v896_v41, %v785_v40  ;;  %v893_v47 = vld [vmem:[%s1255_s1 + $0x34] sm:$0xf] }
  0x17   : > { %493 = vmatpush.bf16.msra.mxu2 %v798_v29  ;;  %v779_v48 = vld [vmem:[%s1255_s1 + $0x38] sm:$0xf0]  ;;  %v909_v49 = vld [vmem:[%s1255_s1 + $0xb4] sm:$0xf]  ;;  %v850_v50 = vor.u32 %v912_v43, %v849_v42  ;;  %v777_v52 = vld [vmem:[%s1255_s1 + $0x30] sm:$0xf] }
  0x18   : > { %507 = vmatpush.bf16.msra.mxu3 %v862_v33  ;;  %465 = vmatpush.bf16.msra.mxu0 %v794_v34  ;;  %v843_v51 = vld [vmem:[%s1255_s1 + $0xb8] sm:$0xf0]  ;;  %v894_v53 = vld [vmem:[%s1255_s1 + $0x34] sm:$0xf0]  ;;  %v841_v54 = vld [vmem:[%s1255_s1 + $0xb0] sm:$0xf]  ;;  %v782_v56 = vor.u32 %v893_v47, %v779_v48 }
  0x19   : > { %479 = vmatpush.bf16.msra.mxu1 %v858_v38  ;;  %v910_v55 = vld [vmem:[%s1255_s1 + $0xb4] sm:$0xf0]  ;;  %v846_v57 = vor.u32 %v909_v49, %v843_v51  ;;  %v778_v58 = vor.u32 %v894_v53, %v777_v52  ;;  %v891_v59 = vld [vmem:[%s1255_s1 + $0x24] sm:$0xf]  ;;  %v771_v60 = vld [vmem:[%s1255_s1 + $0x28] sm:$0xf0] }
  0x1a   : > { %v907_v61 = vld [vmem:[%s1255_s1 + $0xa4] sm:$0xf]  ;;  %v842_v62 = vor.u32 %v910_v55, %v841_v54  ;;  %v835_v63 = vld [vmem:[%s1255_s1 + $0xa8] sm:$0xf0]  ;;  %v769_v0 = vld [vmem:[%s1255_s1 + $0x20] sm:$0xf]  ;;  %v774_v4 = vor.u32 %v891_v59, %v771_v60 }
  0x1b   : > { %494 = vmatpush.bf16.msra.mxu2 %v790_v44  ;;  %v892_v1 = vld [vmem:[%s1255_s1 + $0x24] sm:$0xf0]  ;;  %v833_v2 = vld [vmem:[%s1255_s1 + $0xa0] sm:$0xf]  ;;  %v889_v5 = vld [vmem:[%s1255_s1 + $0x14] sm:$0xf]  ;;  %v838_v7 = vor.u32 %v907_v61, %v835_v63 }
  0x1c   : > { %508 = vmatpush.bf16.msra.mxu3 %v854_v45  ;;  %466 = vmatpush.bf16.msra.mxu0 %v786_v46  ;;  %v908_v3 = vld [vmem:[%s1255_s1 + $0xa4] sm:$0xf0]  ;;  %v763_v6 = vld [vmem:[%s1255_s1 + $0x18] sm:$0xf0]  ;;  %v770_v8 = vor.u32 %v892_v1, %v769_v0  ;;  %v905_v9 = vld [vmem:[%s1255_s1 + $0x94] sm:$0xf] }
  0x1d   : > { %480 = vmatpush.bf16.msra.mxu1 %v850_v50  ;;  %v827_v10 = vld [vmem:[%s1255_s1 + $0x98] sm:$0xf0]  ;;  %v761_v11 = vld [vmem:[%s1255_s1 + $0x10] sm:$0xf]  ;;  %v834_v12 = vor.u32 %v908_v3, %v833_v2  ;;  %v890_v13 = vld [vmem:[%s1255_s1 + $0x14] sm:$0xf0]  ;;  %v766_v16 = vor.u32 %v889_v5, %v763_v6 }
  0x1e   : > { %v825_v14 = vld [vmem:[%s1255_s1 + $0x90] sm:$0xf]  ;;  %v906_v15 = vld [vmem:[%s1255_s1 + $0x94] sm:$0xf0]  ;;  %v887_v17 = vld [vmem:[%s1255_s1 + $0x4] sm:$0xf]  ;;  %v830_v18 = vor.u32 %v905_v9, %v827_v10  ;;  %v762_v19 = vor.u32 %v890_v13, %v761_v11 }
  0x1f   : > { %495 = vmatpush.bf16.msra.mxu2 %v782_v56  ;;  %s1264_s15 = smov (!%p232_p4, %s976_s15), 1  ;;  %v755_v20 = vld [vmem:[%s1255_s1 + $0x8] sm:$0xf0]  ;;  %v903_v21 = vld [vmem:[%s1255_s1 + $0x84] sm:$0xf]  ;;  %v826_v23 = vor.u32 %v906_v15, %v825_v14  ;;  %vm599_vm10 = vcmask 1040384  }
  0x20   : > { %509 = vmatpush.bf16.msra.mxu3 %v846_v57  ;;  %467 = vmatpush.bf16.msra.mxu0 %v778_v58  ;;  %v819_v22 = vld [vmem:[%s1255_s1 + $0x88] sm:$0xf0]  ;;  %v753_v24 = vld [vmem:[%s1255_s1] sm:$0xf]  ;;  %v888_v25 = vld [vmem:[%s1255_s1 + $0x4] sm:$0xf0]  ;;  %v758_v28 = vor.u32 %v887_v17, %v755_v20 }
  0x21   : > { %481 = vmatpush.bf16.msra.mxu1 %v842_v62  ;;  %s883_s7 = sshll.u32 %s1264_s15, 4  ;;  %v817_v26 = vld [vmem:[%s1255_s1 + $0x80] sm:$0xf]  ;;  %v904_v27 = vld [vmem:[%s1255_s1 + $0x84] sm:$0xf0]  ;;  %v822_v31 = vor.u32 %v903_v21, %v819_v22  ;;  %v754_v32 = vor.u32 %v888_v25, %v753_v24  ;;  %s884_s23 = sshll.u32 %s1264_s15, 3 }
  0x22   : > { %s240_s14 = scalar_lea.vmem %s1254_s0, %s883_s7  ;;  %v818_v35 = vor.u32 %v904_v27, %v817_v26  ;;  %v949_v40 = vld [vmem:[%s1256_s2 + $0x1] ss:$0 sm:$0xff]  ;;  %v948_v53 = vld [vmem:[%s1256_s2] ss:$0 sm:$0xff]  ;;  %s250_s26 = scalar_lea.vmem %s1257_s3, %s884_s23 }
  0x23   : > { %496 = vmatpush.bf16.msra.mxu2 %v774_v4  ;;  %v745_v29 = vld [vmem:[%s240_s14] sm:$0xf]  ;;  %v886_v30 = vld [vmem:[%s240_s14 + $0x4] sm:$0xf0]  ;;  %v885_v33 = vld [vmem:[%s240_s14 + $0x4] sm:$0xf] }
  0x24   : > { %510 = vmatpush.bf16.msra.mxu3 %v838_v7  ;;  %468 = vmatpush.bf16.msra.mxu0 %v770_v8  ;;  %v747_v34 = vld [vmem:[%s240_s14 + $0x8] sm:$0xf0]  ;;  %v746_v36 = vor.u32 %v886_v30, %v745_v29  ;;  %s742_s27 = sshll.u32 %s1264_s15, 1 }
  0x25   : > { %482 = vmatpush.bf16.msra.mxu1 %v834_v12  ;;  %v750_v37 = vor.u32 %v885_v33, %v747_v34  ;;  %s258_s30 = scalar_lea.vmem %s1258_s4, %s742_s27 }
  0x27   : > { %497 = vmatpush.bf16.msra.mxu2 %v766_v16 }
  0x28   : > { %511 = vmatpush.bf16.msra.mxu3 %v830_v18  ;;  %469 = vmatpush.bf16.msra.mxu0 %v762_v19 }
  0x29   : > { %483 = vmatpush.bf16.msra.mxu1 %v826_v23 }
  0x2b   : > { %498 = vmatpush.bf16.msra.mxu2 %v758_v28 }
  0x2c   : > { %512 = vmatpush.bf16.msra.mxu3 %v822_v31  ;;  %470 = vmatpush.bf16.msra.mxu0 %v754_v32 }
  0x2d   : > { %484 = vmatpush.bf16.msra.mxu1 %v818_v35 }
  0x2e   : > { %499 = vmatmul.bf16.vlgmr.msra.gmra.mxu2 %v746_v36 }
  0x2f   : > { %513 = vmatmul.bf16.vlgmr.msra.gmra.mxu3 %v750_v37  ;;  %471 = vmatmul.bf16.vlgmr.msra.gmra.mxu0 %v746_v36 }
  0x30   : > { %485 = vmatmul.bf16.vlgmr.msra.gmra.mxu1 %v750_v37 }
  0xac   : > { %v472_v38 = vpop.f32.mrf.mxu0 }
  0xad   : > { %v486_v41 = vpop.f32.mrf.mxu1 }
  0xae   : > { %v487_v52 = vadd.f32 %v486_v41, %v472_v38 }
  0xb0   : > { %v521_v58 = vadd.f32 %v948_v53, %v487_v52 }
  0xb1   : > { %v500_v39 = vpop.f32.mrf.mxu2 }
  0xb2   : > { %v514_v42 = vpop.f32.mrf.mxu3  ;;  %v529_v62 = vmin.f32 %v521_v58, 0.0  ;;  %vm527_vm3 = vcmp.gt.f32.partialorder %v521_v58, 0.0 }
  0xb3   : > { %v515_v43 = vadd.f32 %v514_v42, %v500_v39 }
  0xb4   : > { %v474_v50 = vpop.f32.mrf.mxu0  ;;  %v531_v1 = vmul.f32 1.442695, %v529_v62 }
  0xb5   : > { %v525_v44 = vadd.f32 %v949_v40, %v515_v43  ;;  %v488_v51 = vpop.f32.mrf.mxu1 }
  0xb6   : > { %v489_v55 = vadd.f32 %v488_v51, %v474_v50 }
  0xb7   : > { %v539_v45 = vsub.f32 0.0, %v525_v44 }
  0xb8   : > { %v522_v61 = vadd.f32 %v948_v53, %v489_v55 }
  0xb9   : > { %v541_v46 = vmul.f32 1.442695, %v539_v45  ;;  %v502_v47 = vpop.f32.mrf.mxu2 }
  0xba   : > { %v516_v48 = vpop.f32.mrf.mxu3  ;;  %v530_v63 = vmin.f32 %v522_v61, 0.0  ;;  %vm528_vm6 = vcmp.gt.f32.partialorder %v522_v61, 0.0 }
  0xbb   : > { %950 = vpow2.f32 %v541_v46  ;;  %v517_v49 = vadd.f32 %v516_v48, %v502_v47 }
  0xbc   : > { %v533_v5 = vmul.f32 1.442695, %v530_v63 }
  0xbd   : > { %v526_v54 = vadd.f32 %v949_v40, %v517_v49 }
  0xbf   : > { %v540_v56 = vsub.f32 0.0, %v526_v54 }
  0xc1   : > { %v951_v57 = vpop.eup %950  ;;  %v543_v59 = vmul.f32 1.442695, %v540_v56 }
  0xc2   : > { %v545_v60 = vadd.f32 1.0, %v951_v57 }
  0xc3   : > { %952 = vpow2.f32 %v543_v59 }
  0xc4   : > { %954 = vrcp.f32 %v545_v60  ;;  %v558_v10 = vand.u32 2147483648, %v545_v60  ;;  %vm552_vm1 = vweird.f32 %v545_v60  ;;  %v556_v12 = vand.u32 2147483647, %v545_v60 }
  0xc6   : > { %v559_v18 = vor.u32 1.1754944e-38, %v558_v10  ;;  %vm557_vm4 = vcmp.eq.f32.partialorder %v556_v12, 8.507059e+37 }
  0xc9   : > { %v953_v0 = vpop.eup %952 }
  0xca   : > { %v955_v2 = vpop.eup %954  ;;  %v546_v3 = vadd.f32 1.0, %v953_v0 }
  0xcb   : > { %v548_v4 = vmul.f32 %v955_v2, %v545_v60  ;;  %vm553_vm0 = vweird.f32 %v955_v2 }
  0xcc   : > { %956 = vrcp.f32 %v546_v3  ;;  %vm554_vm2 = vmor %vm552_vm1, %vm553_vm0  ;;  %v573_v19 = vand.u32 2147483648, %v546_v3  ;;  %v571_v21 = vand.u32 2147483647, %v546_v3  ;;  %vm567_vm7 = vweird.f32 %v546_v3 }
  0xcd   : > { %958 = vpow2.f32 %v531_v1  ;;  %v549_v6 = vsub.f32 1.0, %v548_v4 }
  0xce   : > { %960 = vpow2.f32 %v533_v5  ;;  %v574_v26 = vor.u32 1.1754944e-38, %v573_v19  ;;  %vm572_vm9 = vcmp.eq.f32.partialorder %v571_v21, 8.507059e+37 }
  0xcf   : > { %v550_v7 = vmul.f32 %v955_v2, %v549_v6 }
  0xd1   : > { %v551_v8 = vadd.f32 %v955_v2, %v550_v7 }
  0xd2   : > { %v957_v9 = vpop.eup %956 }
  0xd3   : > { %v959_v11 = vpop.eup %958  ;;  %v563_v13 = vmul.f32 %v957_v9, %v546_v3  ;;  %v555_v15 = vsel %vm554_vm2, %v955_v2, %v551_v8  ;;  %vm568_vm5 = vweird.f32 %v957_v9 }
  0xd4   : > { %v961_v14 = vpop.eup %960  ;;  %v879_v17 = vadd.f32 -1.0, %v959_v11  ;;  %v560_v22 = vsel %vm557_vm4, %v559_v18, %v555_v15  ;;  %vm569_vm8 = vmor %vm567_vm7, %vm568_vm5 }
  0xd5   : > { %v564_v16 = vsub.f32 1.0, %v563_v13  ;;  %v880_v23 = vadd.f32 -1.0, %v961_v14 }
  0xd6   : > { %v537_v25 = vsel %vm527_vm3, %v521_v58, %v879_v17 }
  0xd7   : > { %v565_v20 = vmul.f32 %v957_v9, %v564_v16  ;;  %v577_v27 = vmul.f32 %v560_v22, %v537_v25  ;;  %v538_v29 = vsel %vm528_vm6, %v522_v61, %v880_v23 }
  0xd9   : > { %v566_v24 = vadd.f32 %v957_v9, %v565_v20  ;;  %v590_v32 = vmul.f32 %v577_v27, %v577_v27 }
  0xdb   : > { %v570_v28 = vsel %vm569_vm8, %v957_v9, %v566_v24 }
  0xdc   : > { %v575_v30 = vsel %vm572_vm9, %v574_v26, %v570_v28 }
  0xdd   : > { %v578_v31 = vmul.f32 %v575_v30, %v538_v29 }
  0xdf   : > { %v922_v33 = vpack.c.bf16 %v578_v31, %v577_v27  ;;  %v583_v34 = vadd.f32 %v578_v31, %v577_v27  ;;  %v591_v35 = vmul.f32 %v578_v31, %v578_v31 }
  0xe1   : > { %923 = vst [vmem:[%s250_s26] sm:$0xff] %v922_v33   ;;  %v584_v36 = vrot.slane %v583_v34, 4  ;;  %v592_v37 = vadd.f32 %v591_v35, %v590_v32 }
  0xe3   : > { %v585_v38 = vadd.f32 %v584_v36, %v583_v34  ;;  %v593_v39 = vrot.slane %v592_v37, 4 }
  0xe5   : > { %v586_v40 = vrot.slane %v585_v38, 2  ;;  %v594_v41 = vadd.f32 %v593_v39, %v592_v37 }
  0xe7   : > { %v587_v42 = vadd.f32 %v586_v40, %v585_v38  ;;  %v595_v43 = vrot.slane %v594_v41, 2 }
  0xe9   : > { %v588_v44 = vrot.slane %v587_v42, 1  ;;  %v596_v45 = vadd.f32 %v595_v43, %v594_v41 }
  0xeb   : > { %v597_v46 = vrot.slane %v596_v45, 1  ;;  %v589_v47 = vadd.f32 %v588_v44, %v587_v42 }
  0xed   : > { %v598_v48 = vadd.f32 %v597_v46, %v596_v45 }
  0xef   : > { %v600_v49 = vsel %vm599_vm10, %v589_v47, %v598_v48 }
  0xf0   : > { %601 = vst [vmem:[%s258_s30] sm:$0x3] %v600_v49 }
  0xf1 PF: > { %s15_s17 = sadd.s32 1, %s984_s17   ;;  %s1259_s15 = smov %s980_s16 }
  0xf2   : > { %p12_p5 = scmp.ge.s32.totalorder %s15_s17, 4   ;;  %s1260_s16 = smov %s1262_s18 }
  0xf4   :  { %14 = sbr.rel (!%p12_p5) target bundleno = 2 (0x2), region = 74 }

// kernel: gated_coarse2fine_forward.29
= control target key start
LH: loop header
LB: loop body
LE: loop exit
PB: predicated region body
PF: predicated region fallthrough
CT: control target
= control target key end

     0   :  { %s1227_s15 = smov 0   ;;  %s1229_s16 = smov 0   ;;  %s1574_s0 = inlined_call_operand.vmem [shape: bf16[2,16,384], index: 0, kind: input, shape index: {}]   ;;  %s1575_s1 = inlined_call_operand.vmem [shape: bf16[384,256], index: 1, kind: input, shape index: {}]   ;;  %s1576_s2 = inlined_call_operand.vmem [shape: f32[2,128], index: 2, kind: input, shape index: {}]   ;;  %s1577_s3 = inlined_call_operand.vmem [shape: bf16[2,16,128], index: 3, kind: output, shape index: {0}]   ;;  %s1578_s4 = inlined_call_operand.vmem [shape: f32[2,1,2,128], index: 4, kind: output, shape index: {1}]  }
   0x1   :  { %s1231_s17 = smov 0  }
   0x2 LB: > { %s27_s18 = sadd.s32 1, %s1196_s16  ;;  %p869_p0 = scmp.ge.s32.totalorder %s1200_s17, 1  ;;  %s1200_s17 = sphi %s1231_s17, %s15_s17   ;;  %s1196_s16 = sphi %s1229_s16, %s1580_s16   ;;  %s1192_s15 = sphi %s1227_s15, %s1579_s15  }
   0x3   : > { %p29_p1 = scmp.ge.s32.totalorder %s27_s18, 2  ;;  %p189_p2 = scmp.lt.s32.totalorder %s1200_s17, 3 }
   0x5   : > { %s1582_s18 = smov (%p29_p1, %s27_s18), 0  ;;  %p190_p3 = pnand %p869_p0, %p189_p2 }
   0x6   : > { %p232_p4 = scmp.lt.s32.totalorder (!%p190_p3), %s1192_s15, 1 }
   0x7   : > { %193 = sbr.rel (%p190_p3) target bundleno = 268 (0x10c), region = 32 }
   0xc   : > { %v944_v0 = vld [vmem:[%s1575_s1 + $0x70] sm:$0xf]  ;;  %v1101_v1 = vld [vmem:[%s1575_s1 + $0x74] sm:$0xf0]  ;;  %v936_v9 = vld [vmem:[%s1575_s1 + $0x60] sm:$0xf] }
   0xd   : > { %v1008_v2 = vld [vmem:[%s1575_s1 + $0xf0] sm:$0xf]  ;;  %v945_v3 = vor.u32 %v1101_v1, %v944_v0  ;;  %v1117_v4 = vld [vmem:[%s1575_s1 + $0xf4] sm:$0xf0]  ;;  %v1099_v10 = vld [vmem:[%s1575_s1 + $0x64] sm:$0xf0] }
   0xe   : > { %v1072_v5 = vld [vmem:[%s1575_s1 + $0x170] sm:$0xf]  ;;  %v1133_v6 = vld [vmem:[%s1575_s1 + $0x174] sm:$0xf0]  ;;  %v1009_v7 = vor.u32 %v1117_v4, %v1008_v2  ;;  %v1000_v11 = vld [vmem:[%s1575_s1 + $0xe0] sm:$0xf]  ;;  %v937_v12 = vor.u32 %v1099_v10, %v936_v9 }
   0xf   : > { %v1073_v8 = vor.u32 %v1133_v6, %v1072_v5  ;;  %567 = vmatpush.bf16.msra.mxu0 %v945_v3  ;;  %v1115_v13 = vld [vmem:[%s1575_s1 + $0xe4] sm:$0xf0]  ;;  %v1064_v14 = vld [vmem:[%s1575_s1 + $0x160] sm:$0xf]  ;;  %v928_v18 = vld [vmem:[%s1575_s1 + $0x50] sm:$0xf] }
  0x10   : > { %v1131_v15 = vld [vmem:[%s1575_s1 + $0x164] sm:$0xf0]  ;;  %581 = vmatpush.bf16.msra.mxu1 %v1009_v7  ;;  %v1001_v16 = vor.u32 %v1115_v13, %v1000_v11  ;;  %v1097_v19 = vld [vmem:[%s1575_s1 + $0x54] sm:$0xf0]  ;;  %v992_v20 = vld [vmem:[%s1575_s1 + $0xd0] sm:$0xf] }
  0x11   : > { %595 = vmatpush.bf16.msra.mxu2 %v1073_v8  ;;  %v1065_v17 = vor.u32 %v1131_v15, %v1064_v14  ;;  %v1113_v21 = vld [vmem:[%s1575_s1 + $0xd4] sm:$0xf0]  ;;  %v1056_v22 = vld [vmem:[%s1575_s1 + $0x150] sm:$0xf]  ;;  %v929_v24 = vor.u32 %v1097_v19, %v928_v18  ;;  %v920_v25 = vld [vmem:[%s1575_s1 + $0x40] sm:$0xf] }
  0x12   : > { %v1129_v23 = vld [vmem:[%s1575_s1 + $0x154] sm:$0xf0]  ;;  %v1095_v26 = vld [vmem:[%s1575_s1 + $0x44] sm:$0xf0]  ;;  %v993_v27 = vor.u32 %v1113_v21, %v992_v20  ;;  %v984_v29 = vld [vmem:[%s1575_s1 + $0xc0] sm:$0xf] }
  0x13   : > { %568 = vmatpush.bf16.msra.mxu0 %v937_v12  ;;  %v1057_v28 = vor.u32 %v1129_v23, %v1056_v22  ;;  %v1100_v30 = vld [vmem:[%s1575_s1 + $0x74] sm:$0xf]  ;;  %v946_v31 = vld [vmem:[%s1575_s1 + $0x78] sm:$0xf0]  ;;  %v1111_v32 = vld [vmem:[%s1575_s1 + $0xc4] sm:$0xf0]  ;;  %v921_v37 = vor.u32 %v1095_v26, %v920_v25 }
  0x14   : > { %582 = vmatpush.bf16.msra.mxu1 %v1001_v16  ;;  %v1048_v33 = vld [vmem:[%s1575_s1 + $0x140] sm:$0xf]  ;;  %v1127_v34 = vld [vmem:[%s1575_s1 + $0x144] sm:$0xf0]  ;;  %v949_v35 = vor.u32 %v1100_v30, %v946_v31  ;;  %v1098_v36 = vld [vmem:[%s1575_s1 + $0x64] sm:$0xf]  ;;  %v985_v41 = vor.u32 %v1111_v32, %v984_v29 }
  0x15   : > { %596 = vmatpush.bf16.msra.mxu2 %v1065_v17  ;;  %v912_v38 = vld [vmem:[%s1575_s1 + $0x30] sm:$0xf]  ;;  %v1093_v39 = vld [vmem:[%s1575_s1 + $0x34] sm:$0xf0]  ;;  %v938_v40 = vld [vmem:[%s1575_s1 + $0x68] sm:$0xf0]  ;;  %v1049_v42 = vor.u32 %v1127_v34, %v1048_v33 }
  0x16   : > { %609 = vmatpush.bf16.msra.mxu3 %v949_v35  ;;  %v976_v43 = vld [vmem:[%s1575_s1 + $0xb0] sm:$0xf]  ;;  %v1109_v44 = vld [vmem:[%s1575_s1 + $0xb4] sm:$0xf0]  ;;  %v941_v46 = vor.u32 %v1098_v36, %v938_v40  ;;  %v1096_v48 = vld [vmem:[%s1575_s1 + $0x54] sm:$0xf]  ;;  %v913_v50 = vor.u32 %v1093_v39, %v912_v38 }
  0x17   : > { %569 = vmatpush.bf16.msra.mxu0 %v929_v24  ;;  %v1040_v45 = vld [vmem:[%s1575_s1 + $0x130] sm:$0xf]  ;;  %v1125_v47 = vld [vmem:[%s1575_s1 + $0x134] sm:$0xf0]  ;;  %v930_v49 = vld [vmem:[%s1575_s1 + $0x58] sm:$0xf0]  ;;  %v977_v54 = vor.u32 %v1109_v44, %v976_v43 }
  0x18   : > { %583 = vmatpush.bf16.msra.mxu1 %v993_v27  ;;  %v904_v51 = vld [vmem:[%s1575_s1 + $0x20] sm:$0xf]  ;;  %v1091_v52 = vld [vmem:[%s1575_s1 + $0x24] sm:$0xf0]  ;;  %v933_v53 = vor.u32 %v1096_v48, %v930_v49  ;;  %v1041_v55 = vor.u32 %v1125_v47, %v1040_v45  ;;  %v1094_v57 = vld [vmem:[%s1575_s1 + $0x44] sm:$0xf] }
  0x19   : > { %597 = vmatpush.bf16.msra.mxu2 %v1057_v28  ;;  %v968_v56 = vld [vmem:[%s1575_s1 + $0xa0] sm:$0xf]  ;;  %v922_v58 = vld [vmem:[%s1575_s1 + $0x48] sm:$0xf0]  ;;  %v1107_v59 = vld [vmem:[%s1575_s1 + $0xa4] sm:$0xf0]  ;;  %v905_v62 = vor.u32 %v1091_v52, %v904_v51 }
  0x1a   : > { %610 = vmatpush.bf16.msra.mxu3 %v941_v46  ;;  %v1032_v60 = vld [vmem:[%s1575_s1 + $0x120] sm:$0xf]  ;;  %v1123_v61 = vld [vmem:[%s1575_s1 + $0x124] sm:$0xf0]  ;;  %v896_v63 = vld [vmem:[%s1575_s1 + $0x10] sm:$0xf]  ;;  %v925_v2 = vor.u32 %v1094_v57, %v922_v58  ;;  %v969_v3 = vor.u32 %v1107_v59, %v968_v56 }
  0x1b   : > { %570 = vmatpush.bf16.msra.mxu0 %v921_v37  ;;  %v1089_v0 = vld [vmem:[%s1575_s1 + $0x14] sm:$0xf0]  ;;  %v960_v1 = vld [vmem:[%s1575_s1 + $0x90] sm:$0xf]  ;;  %v1033_v4 = vor.u32 %v1123_v61, %v1032_v60  ;;  %v1092_v5 = vld [vmem:[%s1575_s1 + $0x34] sm:$0xf] }
  0x1c   : > { %584 = vmatpush.bf16.msra.mxu1 %v985_v41  ;;  %v914_v6 = vld [vmem:[%s1575_s1 + $0x38] sm:$0xf0]  ;;  %v1105_v7 = vld [vmem:[%s1575_s1 + $0x94] sm:$0xf0]  ;;  %v1024_v8 = vld [vmem:[%s1575_s1 + $0x110] sm:$0xf]  ;;  %v897_v11 = vor.u32 %v1089_v0, %v896_v63 }
  0x1d   : > { %598 = vmatpush.bf16.msra.mxu2 %v1049_v42  ;;  %v1121_v9 = vld [vmem:[%s1575_s1 + $0x114] sm:$0xf0]  ;;  %v888_v10 = vld [vmem:[%s1575_s1] sm:$0xf]  ;;  %s1584_s15 = smov (!%p232_p4, %s1192_s15), 1  ;;  %v917_v15 = vor.u32 %v1092_v5, %v914_v6  ;;  %v961_v16 = vor.u32 %v1105_v7, %v960_v1  ;;  %vm731_vm10 = vcmask 1040384  }
  0x1e   : > { %611 = vmatpush.bf16.msra.mxu3 %v933_v53  ;;  %v1087_v12 = vld [vmem:[%s1575_s1 + $0x4] sm:$0xf0]  ;;  %v952_v13 = vld [vmem:[%s1575_s1 + $0x80] sm:$0xf]  ;;  %v1025_v17 = vor.u32 %v1121_v9, %v1024_v8  ;;  %s1139_s21 = smul.u32 24, %s1584_s15  ;;  %s873_s25 = sshll.u32 %s1584_s15, 1 }
  0x1f   : > { %571 = vmatpush.bf16.msra.mxu0 %v913_v50  ;;  %v1103_v14 = vld [vmem:[%s1575_s1 + $0x84] sm:$0xf0]  ;;  %v1090_v18 = vld [vmem:[%s1575_s1 + $0x24] sm:$0xf]  ;;  %v906_v19 = vld [vmem:[%s1575_s1 + $0x28] sm:$0xf0]  ;;  %v889_v26 = vor.u32 %v1087_v12, %v888_v10  ;;  %s258_s28 = scalar_lea.vmem %s1578_s4, %s873_s25 }
  0x20   : > { %585 = vmatpush.bf16.msra.mxu1 %v977_v54  ;;  %v1016_v20 = vld [vmem:[%s1575_s1 + $0x100] sm:$0xf]  ;;  %v1119_v21 = vld [vmem:[%s1575_s1 + $0x104] sm:$0xf0]  ;;  %v1116_v22 = vld [vmem:[%s1575_s1 + $0xf4] sm:$0xf]  ;;  %s240_s14 = scalar_lea.vmem %s1574_s0, %s1139_s21  ;;  %v909_v30 = vor.u32 %v1090_v18, %v906_v19  ;;  %v953_v31 = vor.u32 %v1103_v14, %v952_v13 }
  0x21   : > { %599 = vmatpush.bf16.msra.mxu2 %v1041_v55  ;;  %v1010_v23 = vld [vmem:[%s1575_s1 + $0xf8] sm:$0xf0]  ;;  %v1132_v24 = vld [vmem:[%s1575_s1 + $0x174] sm:$0xf]  ;;  %v884_v27 = vld [vmem:[%s240_s14 + $0x8] sm:$0xf]  ;;  %v1017_v32 = vor.u32 %v1119_v21, %v1016_v20 }
  0x22   : > { %612 = vmatpush.bf16.msra.mxu3 %v925_v2  ;;  %v1074_v25 = vld [vmem:[%s1575_s1 + $0x178] sm:$0xf0]  ;;  %v1085_v28 = vld [vmem:[%s240_s14 + $0x10] sm:$0xf0]  ;;  %v876_v29 = vld [vmem:[%s240_s14] sm:$0xf]  ;;  %v1013_v36 = vor.u32 %v1116_v22, %v1010_v23 }
  0x23   : > { %572 = vmatpush.bf16.msra.mxu0 %v905_v62  ;;  %v1084_v33 = vld [vmem:[%s240_s14 + $0x8] sm:$0xf0]  ;;  %v1083_v34 = vld [vmem:[%s240_s14 + $0x4] sm:$0xf]  ;;  %v878_v35 = vld [vmem:[%s240_s14 + $0xc] sm:$0xf0]  ;;  %v1077_v37 = vor.u32 %v1132_v24, %v1074_v25  ;;  %v1465_v45 = vor.u32 %v1085_v28, %v884_v27 }
  0x24   : > { %586 = vmatpush.bf16.msra.mxu1 %v969_v3  ;;  %v1114_v38 = vld [vmem:[%s1575_s1 + $0xe4] sm:$0xf]  ;;  %v1088_v39 = vld [vmem:[%s1575_s1 + $0x14] sm:$0xf]  ;;  %v898_v40 = vld [vmem:[%s1575_s1 + $0x18] sm:$0xf0]  ;;  %v877_v44 = vor.u32 %v1084_v33, %v876_v29  ;;  %v1467_v46 = vor.u32 %v1083_v34, %v878_v35 }
  0x25   : > { %600 = vmatpush.bf16.msra.mxu2 %v1033_v4  ;;  %v1002_v41 = vld [vmem:[%s1575_s1 + $0xe8] sm:$0xf0]  ;;  %v1130_v42 = vld [vmem:[%s1575_s1 + $0x164] sm:$0xf]  ;;  %v901_v47 = vor.u32 %v1088_v39, %v898_v40  ;;  %v1112_v50 = vld [vmem:[%s1575_s1 + $0xd4] sm:$0xf] }
  0x26   : > { %613 = vmatpush.bf16.msra.mxu3 %v917_v15  ;;  %v1066_v43 = vld [vmem:[%s1575_s1 + $0x168] sm:$0xf0]  ;;  %v1005_v48 = vor.u32 %v1114_v38, %v1002_v41  ;;  %v1086_v51 = vld [vmem:[%s1575_s1 + $0x4] sm:$0xf]  ;;  %v994_v53 = vld [vmem:[%s1575_s1 + $0xd8] sm:$0xf0] }
  0x27   : > { %573 = vmatpush.bf16.msra.mxu0 %v897_v11  ;;  %v1069_v49 = vor.u32 %v1130_v42, %v1066_v43  ;;  %v890_v52 = vld [vmem:[%s1575_s1 + $0x8] sm:$0xf0]  ;;  %v1128_v54 = vld [vmem:[%s1575_s1 + $0x154] sm:$0xf]  ;;  %v1058_v55 = vld [vmem:[%s1575_s1 + $0x158] sm:$0xf0]  ;;  %v997_v57 = vor.u32 %v1112_v50, %v994_v53 }
  0x28   : > { %587 = vmatpush.bf16.msra.mxu1 %v961_v16  ;;  %v893_v56 = vor.u32 %v1086_v51, %v890_v52  ;;  %v1061_v58 = vor.u32 %v1128_v54, %v1058_v55  ;;  %v1110_v59 = vld [vmem:[%s1575_s1 + $0xc4] sm:$0xf]  ;;  %v986_v60 = vld [vmem:[%s1575_s1 + $0xc8] sm:$0xf0]  ;;  %v1108_v1 = vld [vmem:[%s1575_s1 + $0xb4] sm:$0xf] }
  0x29   : > { %601 = vmatpush.bf16.msra.mxu2 %v1025_v17  ;;  %v1126_v61 = vld [vmem:[%s1575_s1 + $0x144] sm:$0xf]  ;;  %v1050_v62 = vld [vmem:[%s1575_s1 + $0x148] sm:$0xf0]  ;;  %v989_v63 = vor.u32 %v1110_v59, %v986_v60  ;;  %v978_v2 = vld [vmem:[%s1575_s1 + $0xb8] sm:$0xf0] }
  0x2a   : > { %614 = vmatpush.bf16.msra.mxu3 %v909_v30  ;;  %v1053_v0 = vor.u32 %v1126_v61, %v1050_v62  ;;  %v1124_v3 = vld [vmem:[%s1575_s1 + $0x134] sm:$0xf]  ;;  %v1042_v4 = vld [vmem:[%s1575_s1 + $0x138] sm:$0xf0]  ;;  %v981_v5 = vor.u32 %v1108_v1, %v978_v2  ;;  %v1106_v7 = vld [vmem:[%s1575_s1 + $0xa4] sm:$0xf] }
  0x2b   : > { %574 = vmatpush.bf16.msra.mxu0 %v889_v26  ;;  %v1045_v6 = vor.u32 %v1124_v3, %v1042_v4  ;;  %v970_v8 = vld [vmem:[%s1575_s1 + $0xa8] sm:$0xf0]  ;;  %v1122_v9 = vld [vmem:[%s1575_s1 + $0x124] sm:$0xf]  ;;  %v1104_v13 = vld [vmem:[%s1575_s1 + $0x94] sm:$0xf] }
  0x2c   : > { %588 = vmatpush.bf16.msra.mxu1 %v953_v31  ;;  %v1034_v10 = vld [vmem:[%s1575_s1 + $0x128] sm:$0xf0]  ;;  %v973_v11 = vor.u32 %v1106_v7, %v970_v8  ;;  %v962_v14 = vld [vmem:[%s1575_s1 + $0x98] sm:$0xf0]  ;;  %v1120_v15 = vld [vmem:[%s1575_s1 + $0x114] sm:$0xf] }
  0x2d   : > { %602 = vmatpush.bf16.msra.mxu2 %v1017_v32  ;;  %v1037_v12 = vor.u32 %v1122_v9, %v1034_v10  ;;  %v1026_v16 = vld [vmem:[%s1575_s1 + $0x118] sm:$0xf0]  ;;  %v965_v17 = vor.u32 %v1104_v13, %v962_v14  ;;  %v1102_v19 = vld [vmem:[%s1575_s1 + $0x84] sm:$0xf]  ;;  %v954_v20 = vld [vmem:[%s1575_s1 + $0x88] sm:$0xf0] }
  0x2e   : > { %575 = vmatmul.bf16.vlgmr.msra.gmra.mxu0 %v877_v44  ;;  %615 = vmatpush.bf16.msra.mxu3 %v901_v47  ;;  %v1029_v18 = vor.u32 %v1120_v15, %v1026_v16  ;;  %v1118_v21 = vld [vmem:[%s1575_s1 + $0x104] sm:$0xf]  ;;  %v1018_v22 = vld [vmem:[%s1575_s1 + $0x108] sm:$0xf0]  ;;  %v957_v23 = vor.u32 %v1102_v19, %v954_v20  ;;  %v1165_v33 = vld [vmem:[%s1576_s2 + $0x1] ss:$0 sm:$0xff] }
  0x2f   : > { %623 = vmatpush.bf16.msrb.mxu0 %v1013_v36  ;;  %589 = vmatmul.bf16.vlgmr.msra.gmra.mxu1 %v1467_v46  ;;  %v1021_v24 = vor.u32 %v1118_v21, %v1018_v22  ;;  %s1082_s21 = sshll.u32 %s1584_s15, 3 }
  0x30   : > { %637 = vmatpush.bf16.msrb.mxu1 %v1077_v37  ;;  %603 = vmatmul.bf16.vlgmr.msra.gmra.mxu2 %v1465_v45  ;;  %s250_s24 = scalar_lea.vmem %s1577_s3, %s1082_s21 }
  0x32   : > { %616 = vmatpush.bf16.msra.mxu3 %v893_v56 }
  0x33   : > { %624 = vmatpush.bf16.msrb.mxu0 %v1005_v48  ;;  %v1164_v48 = vld [vmem:[%s1576_s2] ss:$0 sm:$0xff] }
  0x34   : > { %638 = vmatpush.bf16.msrb.mxu1 %v1069_v49 }
  0x35   : > { %617 = vmatmul.bf16.vlgmr.msra.gmra.mxu3 %v877_v44 }
  0x37   : > { %625 = vmatpush.bf16.msrb.mxu0 %v997_v57 }
  0x38   : > { %639 = vmatpush.bf16.msrb.mxu1 %v1061_v58 }
  0x3b   : > { %626 = vmatpush.bf16.msrb.mxu0 %v989_v63 }
  0x3c   : > { %640 = vmatpush.bf16.msrb.mxu1 %v1053_v0 }
  0x3f   : > { %627 = vmatpush.bf16.msrb.mxu0 %v981_v5 }
  0x40   : > { %641 = vmatpush.bf16.msrb.mxu1 %v1045_v6 }
  0x43   : > { %628 = vmatpush.bf16.msrb.mxu0 %v973_v11 }
  0x44   : > { %642 = vmatpush.bf16.msrb.mxu1 %v1037_v12 }
  0x47   : > { %629 = vmatpush.bf16.msrb.mxu0 %v965_v17 }
  0x48   : > { %643 = vmatpush.bf16.msrb.mxu1 %v1029_v18 }
  0x4b   : > { %630 = vmatpush.bf16.msrb.mxu0 %v957_v23 }
  0x4c   : > { %644 = vmatpush.bf16.msrb.mxu1 %v1021_v24 }
  0x4e   : > { %631 = vmatmul.bf16.vlgmr.msrb.gmra.mxu0 %v1467_v46 }
  0x4f   : > { %645 = vmatmul.bf16.vlgmr.msrb.gmra.mxu1 %v1465_v45 }
  0xab   : > { %v576_v25 = vpop.f32.mrf.mxu0 }
  0xac   : > { %v590_v26 = vpop.f32.mrf.mxu1 }
  0xad   : > { %v591_v40 = vadd.f32 %v590_v26, %v576_v25 }
  0xb3   : > { %v578_v27 = vpop.f32.mrf.mxu0  ;;  %v604_v34 = vpop.f32.mrf.mxu2 }
  0xb4   : > { %v592_v28 = vpop.f32.mrf.mxu1  ;;  %v605_v47 = vadd.f32 %v604_v34, %v591_v40 }
  0xb5   : > { %v593_v44 = vadd.f32 %v592_v28, %v578_v27 }
  0xb6   : > { %v653_v53 = vadd.f32 %v1164_v48, %v605_v47 }
  0xb8   : > { %v618_v29 = vpop.f32.mrf.mxu3  ;;  %v661_v57 = vmin.f32 %v653_v53, 0.0  ;;  %vm659_vm5 = vcmp.gt.f32.partialorder %v653_v53, 0.0 }
  0xba   : > { %v663_v60 = vmul.f32 1.442695, %v661_v57 }
  0xbb   : > { %v606_v46 = vpop.f32.mrf.mxu2 }
  0xbc   : > { %v607_v50 = vadd.f32 %v606_v46, %v593_v44 }
  0xbe   : > { %v654_v56 = vadd.f32 %v1164_v48, %v607_v50 }
  0xc0   : > { %v620_v38 = vpop.f32.mrf.mxu3  ;;  %v662_v58 = vmin.f32 %v654_v56, 0.0  ;;  %vm660_vm8 = vcmp.gt.f32.partialorder %v654_v56, 0.0 }
  0xc2   : > { %v665_v63 = vmul.f32 1.442695, %v662_v58 }
  0xcb   : > { %v632_v30 = vpop.f32.mrf.mxu0 }
  0xcc   : > { %v646_v31 = vpop.f32.mrf.mxu1  ;;  %v633_v32 = vadd.f32 %v632_v30, %v618_v29 }
  0xce   : > { %v647_v35 = vadd.f32 %v646_v31, %v633_v32 }
  0xd0   : > { %v657_v36 = vadd.f32 %v1165_v33, %v647_v35 }
  0xd2   : > { %v671_v37 = vsub.f32 0.0, %v657_v36 }
  0xd3   : > { %v634_v39 = vpop.f32.mrf.mxu0 }
  0xd4   : > { %v673_v41 = vmul.f32 1.442695, %v671_v37  ;;  %v635_v42 = vadd.f32 %v634_v39, %v620_v38  ;;  %v648_v43 = vpop.f32.mrf.mxu1 }
  0xd6   : > { %1166 = vpow2.f32 %v673_v41  ;;  %v649_v45 = vadd.f32 %v648_v43, %v635_v42 }
  0xd8   : > { %v658_v49 = vadd.f32 %v1165_v33, %v649_v45 }
  0xda   : > { %v672_v51 = vsub.f32 0.0, %v658_v49 }
  0xdc   : > { %v1167_v52 = vpop.eup %1166  ;;  %v675_v54 = vmul.f32 1.442695, %v672_v51 }
  0xdd   : > { %v677_v55 = vadd.f32 1.0, %v1167_v52 }
  0xde   : > { %1168 = vpow2.f32 %v675_v54 }
  0xdf   : > { %1170 = vrcp.f32 %v677_v55  ;;  %v690_v5 = vand.u32 2147483648, %v677_v55  ;;  %vm684_vm1 = vweird.f32 %v677_v55  ;;  %v688_v7 = vand.u32 2147483647, %v677_v55 }
  0xe1   : > { %v691_v13 = vor.u32 1.1754944e-38, %v690_v5  ;;  %vm689_vm3 = vcmp.eq.f32.partialorder %v688_v7, 8.507059e+37 }
  0xe4   : > { %v1169_v59 = vpop.eup %1168 }
  0xe5   : > { %v1171_v61 = vpop.eup %1170  ;;  %v678_v62 = vadd.f32 1.0, %v1169_v59 }
  0xe6   : > { %v680_v0 = vmul.f32 %v1171_v61, %v677_v55  ;;  %vm685_vm0 = vweird.f32 %v1171_v61 }
  0xe7   : > { %1172 = vrcp.f32 %v678_v62  ;;  %vm686_vm2 = vmor %vm684_vm1, %vm685_vm0  ;;  %v705_v14 = vand.u32 2147483648, %v678_v62  ;;  %v703_v16 = vand.u32 2147483647, %v678_v62  ;;  %vm699_vm6 = vweird.f32 %v678_v62 }
  0xe8   : > { %1174 = vpow2.f32 %v663_v60  ;;  %v681_v1 = vsub.f32 1.0, %v680_v0 }
  0xe9   : > { %1176 = vpow2.f32 %v665_v63  ;;  %v706_v21 = vor.u32 1.1754944e-38, %v705_v14  ;;  %vm704_vm9 = vcmp.eq.f32.partialorder %v703_v16, 8.507059e+37 }
  0xea   : > { %v682_v2 = vmul.f32 %v1171_v61, %v681_v1 }
  0xec   : > { %v683_v3 = vadd.f32 %v1171_v61, %v682_v2 }
  0xed   : > { %v1173_v4 = vpop.eup %1172 }
  0xee   : > { %v1175_v6 = vpop.eup %1174  ;;  %v695_v8 = vmul.f32 %v1173_v4, %v678_v62  ;;  %v687_v10 = vsel %vm686_vm2, %v1171_v61, %v683_v3  ;;  %vm700_vm4 = vweird.f32 %v1173_v4 }
  0xef   : > { %v1177_v9 = vpop.eup %1176  ;;  %v1078_v12 = vadd.f32 -1.0, %v1175_v6  ;;  %v692_v18 = vsel %vm689_vm3, %v691_v13, %v687_v10  ;;  %vm701_vm7 = vmor %vm699_vm6, %vm700_vm4 }
  0xf0   : > { %v696_v11 = vsub.f32 1.0, %v695_v8  ;;  %v1079_v17 = vadd.f32 -1.0, %v1177_v9 }
  0xf1   : > { %v669_v20 = vsel %vm659_vm5, %v653_v53, %v1078_v12 }
  0xf2   : > { %v697_v15 = vmul.f32 %v1173_v4, %v696_v11  ;;  %v709_v22 = vmul.f32 %v692_v18, %v669_v20  ;;  %v670_v24 = vsel %vm660_vm8, %v654_v56, %v1079_v17 }
  0xf4   : > { %v698_v19 = vadd.f32 %v1173_v4, %v697_v15  ;;  %v722_v27 = vmul.f32 %v709_v22, %v709_v22 }
  0xf6   : > { %v702_v23 = vsel %vm701_vm7, %v1173_v4, %v698_v19 }
  0xf7   : > { %v707_v25 = vsel %vm704_vm9, %v706_v21, %v702_v23 }
  0xf8   : > { %v710_v26 = vmul.f32 %v707_v25, %v670_v24 }
  0xfa   : > { %v1137_v28 = vpack.c.bf16 %v710_v26, %v709_v22  ;;  %v715_v29 = vadd.f32 %v710_v26, %v709_v22  ;;  %v723_v30 = vmul.f32 %v710_v26, %v710_v26 }
  0xfc   : > { %1138 = vst [vmem:[%s250_s24] sm:$0xff] %v1137_v28   ;;  %v716_v31 = vrot.slane %v715_v29, 4  ;;  %v724_v32 = vadd.f32 %v723_v30, %v722_v27 }
  0xfe   : > { %v717_v33 = vadd.f32 %v716_v31, %v715_v29  ;;  %v725_v34 = vrot.slane %v724_v32, 4 }
 0x100   : > { %v718_v35 = vrot.slane %v717_v33, 2  ;;  %v726_v36 = vadd.f32 %v725_v34, %v724_v32 }
 0x102   : > { %v719_v37 = vadd.f32 %v718_v35, %v717_v33  ;;  %v727_v38 = vrot.slane %v726_v36, 2 }
 0x104   : > { %v720_v39 = vrot.slane %v719_v37, 1  ;;  %v728_v40 = vadd.f32 %v727_v38, %v726_v36 }
 0x106   : > { %v729_v41 = vrot.slane %v728_v40, 1  ;;  %v721_v42 = vadd.f32 %v720_v39, %v719_v37 }
 0x108   : > { %v730_v43 = vadd.f32 %v729_v41, %v728_v40 }
 0x10a   : > { %v732_v44 = vsel %vm731_vm10, %v721_v42, %v730_v43 }
 0x10b   : > { %733 = vst [vmem:[%s258_s28] sm:$0x3] %v732_v44 }
 0x10c PF: > { %s15_s17 = sadd.s32 1, %s1200_s17   ;;  %s1579_s15 = smov %s1196_s16 }
 0x10d   : > { %p12_p5 = scmp.ge.s32.totalorder %s15_s17, 4   ;;  %s1580_s16 = smov %s1582_s18 }
 0x10f   :  { %14 = sbr.rel (!%p12_p5) target bundleno = 2 (0x2), region = 74 }

// kernel: gated_coarse2fine_forward.40
= control target key start
LH: loop header
LB: loop body
LE: loop exit
PB: predicated region body
PF: predicated region fallthrough
CT: control target
= control target key end

     0   :  { %s1657_s15 = smov 0   ;;  %s1659_s16 = smov 0   ;;  %s2220_s0 = inlined_call_operand.vmem [shape: bf16[2,16,640], index: 0, kind: input, shape index: {}]   ;;  %s2221_s1 = inlined_call_operand.vmem [shape: bf16[640,256], index: 1, kind: input, shape index: {}]   ;;  %s2222_s2 = inlined_call_operand.vmem [shape: f32[2,128], index: 2, kind: input, shape index: {}]   ;;  %s2223_s3 = inlined_call_operand.vmem [shape: bf16[2,16,128], index: 3, kind: output, shape index: {0}]   ;;  %s2224_s4 = inlined_call_operand.vmem [shape: f32[2,1,2,128], index: 4, kind: output, shape index: {1}]  }
   0x1   :  { %s1661_s17 = smov 0  }
   0x2 LB: > { %s27_s18 = sadd.s32 1, %s1626_s16  ;;  %p1129_p0 = scmp.ge.s32.totalorder %s1630_s17, 1  ;;  %s1630_s17 = sphi %s1661_s17, %s15_s17   ;;  %s1626_s16 = sphi %s1659_s16, %s2226_s16   ;;  %s1622_s15 = sphi %s1657_s15, %s2225_s15  }
   0x3   : > { %p29_p1 = scmp.ge.s32.totalorder %s27_s18, 2  ;;  %p189_p2 = scmp.lt.s32.totalorder %s1630_s17, 3 }
   0x5   : > { %s2228_s18 = smov (%p29_p1, %s27_s18), 0  ;;  %p190_p3 = pnand %p1129_p0, %p189_p2 }
   0x6   : > { %p232_p4 = scmp.lt.s32.totalorder (!%p190_p3), %s1622_s15, 1 }
   0x7   : > { %193 = sbr.rel (%p190_p3) target bundleno = 300 (0x12c), region = 32 }
   0xc   : > { %v1212_v0 = vld [vmem:[%s2221_s1 + $0x70] sm:$0xf]  ;;  %v1499_v1 = vld [vmem:[%s2221_s1 + $0x74] sm:$0xf0]  ;;  %v1204_v11 = vld [vmem:[%s2221_s1 + $0x60] sm:$0xf] }
   0xd   : > { %v1276_v2 = vld [vmem:[%s2221_s1 + $0xf0] sm:$0xf]  ;;  %v1213_v3 = vor.u32 %v1499_v1, %v1212_v0  ;;  %v1515_v4 = vld [vmem:[%s2221_s1 + $0xf4] sm:$0xf0]  ;;  %v1497_v13 = vld [vmem:[%s2221_s1 + $0x64] sm:$0xf0] }
   0xe   : > { %v1340_v5 = vld [vmem:[%s2221_s1 + $0x170] sm:$0xf]  ;;  %v1531_v6 = vld [vmem:[%s2221_s1 + $0x174] sm:$0xf0]  ;;  %v1277_v7 = vor.u32 %v1515_v4, %v1276_v2  ;;  %v1268_v14 = vld [vmem:[%s2221_s1 + $0xe0] sm:$0xf]  ;;  %v1205_v16 = vor.u32 %v1497_v13, %v1204_v11 }
   0xf   : > { %v1341_v8 = vor.u32 %v1531_v6, %v1340_v5  ;;  %v1404_v9 = vld [vmem:[%s2221_s1 + $0x1f0] sm:$0xf]  ;;  %v1547_v10 = vld [vmem:[%s2221_s1 + $0x1f4] sm:$0xf0]  ;;  %771 = vmatpush.bf16.msra.mxu0 %v1213_v3  ;;  %v1513_v15 = vld [vmem:[%s2221_s1 + $0xe4] sm:$0xf0] }
  0x10   : > { %v1405_v12 = vor.u32 %v1547_v10, %v1404_v9  ;;  %785 = vmatpush.bf16.msra.mxu1 %v1277_v7  ;;  %v1269_v17 = vor.u32 %v1513_v15, %v1268_v14  ;;  %v1332_v18 = vld [vmem:[%s2221_s1 + $0x160] sm:$0xf]  ;;  %v1529_v19 = vld [vmem:[%s2221_s1 + $0x164] sm:$0xf0]  ;;  %v1196_v23 = vld [vmem:[%s2221_s1 + $0x50] sm:$0xf] }
  0x11   : > { %799 = vmatpush.bf16.msra.mxu2 %v1341_v8  ;;  %v1396_v20 = vld [vmem:[%s2221_s1 + $0x1e0] sm:$0xf]  ;;  %v1333_v21 = vor.u32 %v1529_v19, %v1332_v18  ;;  %v1545_v22 = vld [vmem:[%s2221_s1 + $0x1e4] sm:$0xf0]  ;;  %v1495_v24 = vld [vmem:[%s2221_s1 + $0x54] sm:$0xf0] }
  0x12   : > { %813 = vmatpush.bf16.msra.mxu3 %v1405_v12  ;;  %v1397_v25 = vor.u32 %v1545_v22, %v1396_v20  ;;  %v1260_v26 = vld [vmem:[%s2221_s1 + $0xd0] sm:$0xf]  ;;  %v1511_v27 = vld [vmem:[%s2221_s1 + $0xd4] sm:$0xf0]  ;;  %v1197_v29 = vor.u32 %v1495_v24, %v1196_v23  ;;  %v1188_v35 = vld [vmem:[%s2221_s1 + $0x40] sm:$0xf] }
  0x13   : > { %v1324_v28 = vld [vmem:[%s2221_s1 + $0x150] sm:$0xf]  ;;  %772 = vmatpush.bf16.msra.mxu0 %v1205_v16  ;;  %v1527_v30 = vld [vmem:[%s2221_s1 + $0x154] sm:$0xf0]  ;;  %v1261_v33 = vor.u32 %v1511_v27, %v1260_v26  ;;  %v1493_v36 = vld [vmem:[%s2221_s1 + $0x44] sm:$0xf0] }
  0x14   : > { %v1388_v31 = vld [vmem:[%s2221_s1 + $0x1d0] sm:$0xf]  ;;  %v1543_v32 = vld [vmem:[%s2221_s1 + $0x1d4] sm:$0xf0]  ;;  %786 = vmatpush.bf16.msra.mxu1 %v1269_v17  ;;  %v1325_v34 = vor.u32 %v1527_v30, %v1324_v28  ;;  %v1252_v37 = vld [vmem:[%s2221_s1 + $0xc0] sm:$0xf]  ;;  %v1189_v44 = vor.u32 %v1493_v36, %v1188_v35 }
  0x15   : > { %800 = vmatpush.bf16.msra.mxu2 %v1333_v21  ;;  %v1389_v38 = vor.u32 %v1543_v32, %v1388_v31  ;;  %v1509_v39 = vld [vmem:[%s2221_s1 + $0xc4] sm:$0xf0]  ;;  %v1316_v40 = vld [vmem:[%s2221_s1 + $0x140] sm:$0xf]  ;;  %v1180_v47 = vld [vmem:[%s2221_s1 + $0x30] sm:$0xf] }
  0x16   : > { %814 = vmatpush.bf16.msra.mxu3 %v1397_v25  ;;  %v1525_v41 = vld [vmem:[%s2221_s1 + $0x144] sm:$0xf0]  ;;  %v1380_v42 = vld [vmem:[%s2221_s1 + $0x1c0] sm:$0xf]  ;;  %v1253_v45 = vor.u32 %v1509_v39, %v1252_v37  ;;  %v1491_v48 = vld [vmem:[%s2221_s1 + $0x34] sm:$0xf0] }
  0x17   : > { %v1541_v43 = vld [vmem:[%s2221_s1 + $0x1c4] sm:$0xf0]  ;;  %773 = vmatpush.bf16.msra.mxu0 %v1197_v29  ;;  %v1317_v46 = vor.u32 %v1525_v41, %v1316_v40  ;;  %v1244_v49 = vld [vmem:[%s2221_s1 + $0xb0] sm:$0xf]  ;;  %v1507_v51 = vld [vmem:[%s2221_s1 + $0xb4] sm:$0xf0]  ;;  %v1181_v56 = vor.u32 %v1491_v48, %v1180_v47 }
  0x18   : > { %787 = vmatpush.bf16.msra.mxu1 %v1261_v33  ;;  %v1381_v50 = vor.u32 %v1541_v43, %v1380_v42  ;;  %v1308_v52 = vld [vmem:[%s2221_s1 + $0x130] sm:$0xf]  ;;  %v1523_v53 = vld [vmem:[%s2221_s1 + $0x134] sm:$0xf0]  ;;  %v1245_v57 = vor.u32 %v1507_v51, %v1244_v49  ;;  %v1172_v59 = vld [vmem:[%s2221_s1 + $0x20] sm:$0xf] }
  0x19   : > { %801 = vmatpush.bf16.msra.mxu2 %v1325_v34  ;;  %v1372_v54 = vld [vmem:[%s2221_s1 + $0x1b0] sm:$0xf]  ;;  %v1539_v55 = vld [vmem:[%s2221_s1 + $0x1b4] sm:$0xf0]  ;;  %v1309_v58 = vor.u32 %v1523_v53, %v1308_v52  ;;  %v1489_v60 = vld [vmem:[%s2221_s1 + $0x24] sm:$0xf0] }
  0x1a   : > { %815 = vmatpush.bf16.msra.mxu3 %v1389_v38  ;;  %v1236_v61 = vld [vmem:[%s2221_s1 + $0xa0] sm:$0xf]  ;;  %v1373_v62 = vor.u32 %v1539_v55, %v1372_v54  ;;  %v1505_v63 = vld [vmem:[%s2221_s1 + $0xa4] sm:$0xf0]  ;;  %v1173_v4 = vor.u32 %v1489_v60, %v1172_v59  ;;  %v1164_v7 = vld [vmem:[%s2221_s1 + $0x10] sm:$0xf] }
  0x1b   : > { %774 = vmatpush.bf16.msra.mxu0 %v1189_v44  ;;  %v1300_v0 = vld [vmem:[%s2221_s1 + $0x120] sm:$0xf]  ;;  %v1521_v1 = vld [vmem:[%s2221_s1 + $0x124] sm:$0xf0]  ;;  %v1237_v5 = vor.u32 %v1505_v63, %v1236_v61  ;;  %v1487_v8 = vld [vmem:[%s2221_s1 + $0x14] sm:$0xf0] }
  0x1c   : > { %788 = vmatpush.bf16.msra.mxu1 %v1253_v45  ;;  %v1364_v2 = vld [vmem:[%s2221_s1 + $0x1a0] sm:$0xf]  ;;  %v1537_v3 = vld [vmem:[%s2221_s1 + $0x1a4] sm:$0xf0]  ;;  %v1301_v6 = vor.u32 %v1521_v1, %v1300_v0  ;;  %v1228_v9 = vld [vmem:[%s2221_s1 + $0x90] sm:$0xf]  ;;  %v1165_v16 = vor.u32 %v1487_v8, %v1164_v7 }
  0x1d   : > { %802 = vmatpush.bf16.msra.mxu2 %v1317_v46  ;;  %v1365_v10 = vor.u32 %v1537_v3, %v1364_v2  ;;  %v1503_v11 = vld [vmem:[%s2221_s1 + $0x94] sm:$0xf0]  ;;  %v1292_v12 = vld [vmem:[%s2221_s1 + $0x110] sm:$0xf]  ;;  %v1156_v17 = vld [vmem:[%s2221_s1] sm:$0xf] }
  0x1e   : > { %816 = vmatpush.bf16.msra.mxu3 %v1381_v50  ;;  %v1519_v13 = vld [vmem:[%s2221_s1 + $0x114] sm:$0xf0]  ;;  %v1356_v14 = vld [vmem:[%s2221_s1 + $0x190] sm:$0xf]  ;;  %v1485_v18 = vld [vmem:[%s2221_s1 + $0x4] sm:$0xf0]  ;;  %v1229_v19 = vor.u32 %v1503_v11, %v1228_v9 }
  0x1f   : > { %775 = vmatpush.bf16.msra.mxu0 %v1181_v56  ;;  %v1535_v15 = vld [vmem:[%s2221_s1 + $0x194] sm:$0xf0]  ;;  %v1293_v20 = vor.u32 %v1519_v13, %v1292_v12  ;;  %v1220_v21 = vld [vmem:[%s2221_s1 + $0x80] sm:$0xf]  ;;  %v1501_v22 = vld [vmem:[%s2221_s1 + $0x84] sm:$0xf0]  ;;  %v1157_v31 = vor.u32 %v1485_v18, %v1156_v17 }
  0x20   : > { %789 = vmatpush.bf16.msra.mxu1 %v1245_v57  ;;  %v1284_v23 = vld [vmem:[%s2221_s1 + $0x100] sm:$0xf]  ;;  %v1357_v24 = vor.u32 %v1535_v15, %v1356_v14  ;;  %v1517_v25 = vld [vmem:[%s2221_s1 + $0x104] sm:$0xf0]  ;;  %v1468_v26 = vld [vmem:[%s2221_s1 + $0x270] sm:$0xf]  ;;  %v1221_v35 = vor.u32 %v1501_v22, %v1220_v21 }
  0x21   : > { %803 = vmatpush.bf16.msra.mxu2 %v1309_v58  ;;  %v1563_v27 = vld [vmem:[%s2221_s1 + $0x274] sm:$0xf0]  ;;  %v1498_v28 = vld [vmem:[%s2221_s1 + $0x74] sm:$0xf]  ;;  %v1214_v29 = vld [vmem:[%s2221_s1 + $0x78] sm:$0xf0]  ;;  %v1285_v36 = vor.u32 %v1517_v25, %v1284_v23 }
  0x22   : > { %817 = vmatpush.bf16.msra.mxu3 %v1373_v62  ;;  %v1514_v30 = vld [vmem:[%s2221_s1 + $0xf4] sm:$0xf]  ;;  %v1278_v32 = vld [vmem:[%s2221_s1 + $0xf8] sm:$0xf0]  ;;  %v1348_v33 = vld [vmem:[%s2221_s1 + $0x180] sm:$0xf]  ;;  %v1469_v39 = vor.u32 %v1563_v27, %v1468_v26  ;;  %v1217_v40 = vor.u32 %v1498_v28, %v1214_v29 }
  0x23   : > { %776 = vmatpush.bf16.msra.mxu0 %v1173_v4  ;;  %v1533_v34 = vld [vmem:[%s2221_s1 + $0x184] sm:$0xf0]  ;;  %v1530_v37 = vld [vmem:[%s2221_s1 + $0x174] sm:$0xf]  ;;  %v1342_v38 = vld [vmem:[%s2221_s1 + $0x178] sm:$0xf0]  ;;  %v1281_v42 = vor.u32 %v1514_v30, %v1278_v32 }
  0x24   : > { %790 = vmatpush.bf16.msra.mxu1 %v1237_v5  ;;  %v1460_v41 = vld [vmem:[%s2221_s1 + $0x260] sm:$0xf]  ;;  %v1349_v43 = vor.u32 %v1533_v34, %v1348_v33  ;;  %v1561_v44 = vld [vmem:[%s2221_s1 + $0x264] sm:$0xf0]  ;;  %v1496_v45 = vld [vmem:[%s2221_s1 + $0x64] sm:$0xf]  ;;  %v1345_v47 = vor.u32 %v1530_v37, %v1342_v38 }
  0x25   : > { %804 = vmatpush.bf16.msra.mxu2 %v1301_v6  ;;  %v1206_v46 = vld [vmem:[%s2221_s1 + $0x68] sm:$0xf0]  ;;  %v1512_v48 = vld [vmem:[%s2221_s1 + $0xe4] sm:$0xf]  ;;  %v1452_v52 = vld [vmem:[%s2221_s1 + $0x250] sm:$0xf]  ;;  %v1461_v53 = vor.u32 %v1561_v44, %v1460_v41 }
  0x26   : > { %818 = vmatpush.bf16.msra.mxu3 %v1365_v10  ;;  %v1270_v49 = vld [vmem:[%s2221_s1 + $0xe8] sm:$0xf0]  ;;  %v1528_v50 = vld [vmem:[%s2221_s1 + $0x164] sm:$0xf]  ;;  %v1209_v54 = vor.u32 %v1496_v45, %v1206_v46  ;;  %v1559_v55 = vld [vmem:[%s2221_s1 + $0x254] sm:$0xf0] }
  0x27   : > { %777 = vmatpush.bf16.msra.mxu0 %v1165_v16  ;;  %v1334_v51 = vld [vmem:[%s2221_s1 + $0x168] sm:$0xf0]  ;;  %v1494_v56 = vld [vmem:[%s2221_s1 + $0x54] sm:$0xf]  ;;  %s2230_s15 = smov (!%p232_p4, %s1622_s15), 1  ;;  %v1273_v57 = vor.u32 %v1512_v48, %v1270_v49  ;;  %v1453_v3 = vor.u32 %v1559_v55, %v1452_v52  ;;  %vm991_vm10 = vcmask 1040384  }
  0x28   : > { %791 = vmatpush.bf16.msra.mxu1 %v1229_v19  ;;  %v1198_v58 = vld [vmem:[%s2221_s1 + $0x58] sm:$0xf0]  ;;  %v1510_v59 = vld [vmem:[%s2221_s1 + $0xd4] sm:$0xf]  ;;  %v1337_v61 = vor.u32 %v1528_v50, %v1334_v51  ;;  %s1569_s19 = smul.u32 40, %s2230_s15  ;;  %s1478_s20 = sshll.u32 %s2230_s15, 3 }
  0x29   : > { %805 = vmatpush.bf16.msra.mxu2 %v1293_v20  ;;  %v1262_v60 = vld [vmem:[%s2221_s1 + $0xd8] sm:$0xf0]  ;;  %v1526_v62 = vld [vmem:[%s2221_s1 + $0x154] sm:$0xf]  ;;  %v1444_v0 = vld [vmem:[%s2221_s1 + $0x240] sm:$0xf]  ;;  %v1201_v4 = vor.u32 %v1494_v56, %v1198_v58  ;;  %s250_s23 = scalar_lea.vmem %s2223_s3, %s1478_s20 }
  0x2a   : > { %819 = vmatpush.bf16.msra.mxu3 %v1357_v24  ;;  %v1326_v63 = vld [vmem:[%s2221_s1 + $0x158] sm:$0xf0]  ;;  %v1557_v1 = vld [vmem:[%s2221_s1 + $0x244] sm:$0xf0]  ;;  %v1492_v2 = vld [vmem:[%s2221_s1 + $0x44] sm:$0xf]  ;;  %s1967_s8 = scalar_lea.vmem %s2220_s0, %s1569_s19  ;;  %v1265_v8 = vor.u32 %v1510_v59, %v1262_v60 }
  0x2b   : > { %778 = vmatpush.bf16.msra.mxu0 %v1157_v31  ;;  %v1190_v5 = vld [vmem:[%s2221_s1 + $0x48] sm:$0xf0]  ;;  %v1508_v6 = vld [vmem:[%s2221_s1 + $0xc4] sm:$0xf]  ;;  %v1136_v9 = vld [vmem:[%s1967_s8] sm:$0xf]  ;;  %v1329_v13 = vor.u32 %v1526_v62, %v1326_v63  ;;  %v1445_v23 = vor.u32 %v1557_v1, %v1444_v0 }
  0x2c   : > { %792 = vmatpush.bf16.msra.mxu1 %v1221_v35  ;;  %v1254_v7 = vld [vmem:[%s2221_s1 + $0xc8] sm:$0xf0]  ;;  %v1481_v10 = vld [vmem:[%s1967_s8 + $0x10] sm:$0xf0]  ;;  %v1524_v11 = vld [vmem:[%s2221_s1 + $0x144] sm:$0xf]  ;;  %v1193_v24 = vor.u32 %v1492_v2, %v1190_v5 }
  0x2d   : > { %806 = vmatpush.bf16.msra.mxu2 %v1285_v36  ;;  %v1144_v12 = vld [vmem:[%s1967_s8 + $0x8] sm:$0xf]  ;;  %v1975_v14 = vor.u32 %v1481_v10, %v1136_v9  ;;  %v1482_v15 = vld [vmem:[%s1967_s8 + $0x18] sm:$0xf0]  ;;  %v1480_v16 = vld [vmem:[%s1967_s8 + $0xc] sm:$0xf]  ;;  %v1257_v27 = vor.u32 %v1508_v6, %v1254_v7 }
  0x2e   : > { %820 = vmatpush.bf16.msra.mxu3 %v1349_v43  ;;  %v1146_v17 = vld [vmem:[%s1967_s8 + $0x1c] sm:$0xf0]  ;;  %v1318_v18 = vld [vmem:[%s2221_s1 + $0x148] sm:$0xf0]  ;;  %v1983_v19 = vor.u32 %v1482_v15, %v1144_v12  ;;  %v1479_v21 = vld [vmem:[%s1967_s8 + $0x4] sm:$0xf] }
  0x2f   : > { %827 = vmatpush.bf16.msrb.mxu0 %v1469_v39  ;;  %v1985_v20 = vor.u32 %v1480_v16, %v1146_v17  ;;  %v1138_v22 = vld [vmem:[%s1967_s8 + $0x14] sm:$0xf0]  ;;  %v1436_v25 = vld [vmem:[%s2221_s1 + $0x230] sm:$0xf]  ;;  %v1490_v29 = vld [vmem:[%s2221_s1 + $0x34] sm:$0xf]  ;;  %v1321_v31 = vor.u32 %v1524_v11, %v1318_v18 }
  0x30   : > { %841 = vmatpush.bf16.msrb.mxu1 %v1217_v40  ;;  %v1992_v26 = vor.u32 %v1479_v21, %v1138_v22  ;;  %779 = vmatmul.bf16.vlgmr.msra.gmra.mxu0 %v1975_v14  ;;  %v1555_v28 = vld [vmem:[%s2221_s1 + $0x234] sm:$0xf0]  ;;  %v1182_v30 = vld [vmem:[%s2221_s1 + $0x38] sm:$0xf0]  ;;  %v1506_v32 = vld [vmem:[%s2221_s1 + $0xb4] sm:$0xf] }
  0x31   : > { %855 = vmatpush.bf16.msrb.mxu2 %v1281_v42  ;;  %v1246_v33 = vld [vmem:[%s2221_s1 + $0xb8] sm:$0xf0]  ;;  %821 = vmatmul.bf16.vlgmr.msra.gmra.mxu3 %v1985_v20  ;;  %v1522_v34 = vld [vmem:[%s2221_s1 + $0x134] sm:$0xf]  ;;  %v1437_v36 = vor.u32 %v1555_v28, %v1436_v25  ;;  %v1185_v37 = vor.u32 %v1490_v29, %v1182_v30  ;;  %v1428_v38 = vld [vmem:[%s2221_s1 + $0x220] sm:$0xf] }
  0x32   : > { %869 = vmatpush.bf16.msrb.mxu3 %v1345_v47  ;;  %807 = vmatmul.bf16.vlgmr.msra.gmra.mxu2 %v1983_v19  ;;  %v1310_v35 = vld [vmem:[%s2221_s1 + $0x138] sm:$0xf0]  ;;  %v1249_v39 = vor.u32 %v1506_v32, %v1246_v33  ;;  %v1553_v40 = vld [vmem:[%s2221_s1 + $0x224] sm:$0xf0]  ;;  %v1488_v41 = vld [vmem:[%s2221_s1 + $0x24] sm:$0xf] }
  0x33   : > { %828 = vmatpush.bf16.msrb.mxu0 %v1461_v53  ;;  %793 = vmatmul.bf16.vlgmr.msra.gmra.mxu1 %v1992_v26  ;;  %v1174_v42 = vld [vmem:[%s2221_s1 + $0x28] sm:$0xf0]  ;;  %v1313_v43 = vor.u32 %v1522_v34, %v1310_v35  ;;  %v1504_v44 = vld [vmem:[%s2221_s1 + $0xa4] sm:$0xf]  ;;  %v1429_v48 = vor.u32 %v1553_v40, %v1428_v38  ;;  %v1420_v50 = vld [vmem:[%s2221_s1 + $0x210] sm:$0xf] }
  0x34   : > { %842 = vmatpush.bf16.msrb.mxu1 %v1209_v54  ;;  %v1238_v45 = vld [vmem:[%s2221_s1 + $0xa8] sm:$0xf0]  ;;  %v1520_v46 = vld [vmem:[%s2221_s1 + $0x124] sm:$0xf]  ;;  %v1177_v49 = vor.u32 %v1488_v41, %v1174_v42  ;;  %v1551_v52 = vld [vmem:[%s2221_s1 + $0x214] sm:$0xf0] }
  0x35   : > { %856 = vmatpush.bf16.msrb.mxu2 %v1273_v57  ;;  %v1302_v47 = vld [vmem:[%s2221_s1 + $0x128] sm:$0xf0]  ;;  %v1241_v51 = vor.u32 %v1504_v44, %v1238_v45  ;;  %v1486_v53 = vld [vmem:[%s2221_s1 + $0x14] sm:$0xf]  ;;  %v1166_v54 = vld [vmem:[%s2221_s1 + $0x18] sm:$0xf0]  ;;  %v1421_v60 = vor.u32 %v1551_v52, %v1420_v50 }
  0x36   : > { %870 = vmatpush.bf16.msrb.mxu3 %v1337_v61  ;;  %v1305_v55 = vor.u32 %v1520_v46, %v1302_v47  ;;  %v1502_v56 = vld [vmem:[%s2221_s1 + $0x94] sm:$0xf]  ;;  %v1230_v57 = vld [vmem:[%s2221_s1 + $0x98] sm:$0xf0]  ;;  %v1169_v61 = vor.u32 %v1486_v53, %v1166_v54  ;;  %v1412_v62 = vld [vmem:[%s2221_s1 + $0x200] sm:$0xf] }
  0x37   : > { %829 = vmatpush.bf16.msrb.mxu0 %v1453_v3  ;;  %v1518_v58 = vld [vmem:[%s2221_s1 + $0x114] sm:$0xf]  ;;  %v1294_v59 = vld [vmem:[%s2221_s1 + $0x118] sm:$0xf0]  ;;  %v1549_v63 = vld [vmem:[%s2221_s1 + $0x204] sm:$0xf0]  ;;  %v1233_v1 = vor.u32 %v1502_v56, %v1230_v57 }
  0x38   : > { %843 = vmatpush.bf16.msrb.mxu1 %v1201_v4  ;;  %v1484_v0 = vld [vmem:[%s2221_s1 + $0x4] sm:$0xf]  ;;  %v1158_v2 = vld [vmem:[%s2221_s1 + $0x8] sm:$0xf0]  ;;  %v1297_v5 = vor.u32 %v1518_v58, %v1294_v59  ;;  %v1546_v6 = vld [vmem:[%s2221_s1 + $0x1f4] sm:$0xf]  ;;  %v1413_v12 = vor.u32 %v1549_v63, %v1412_v62 }
  0x39   : > { %857 = vmatpush.bf16.msrb.mxu2 %v1265_v8  ;;  %v1500_v3 = vld [vmem:[%s2221_s1 + $0x84] sm:$0xf]  ;;  %v1222_v4 = vld [vmem:[%s2221_s1 + $0x88] sm:$0xf0]  ;;  %v1406_v7 = vld [vmem:[%s2221_s1 + $0x1f8] sm:$0xf0] }
  0x3a   : > { %871 = vmatpush.bf16.msrb.mxu3 %v1329_v13  ;;  %v1562_v8 = vld [vmem:[%s2221_s1 + $0x274] sm:$0xf]  ;;  %v1470_v9 = vld [vmem:[%s2221_s1 + $0x278] sm:$0xf0]  ;;  %v1516_v10 = vld [vmem:[%s2221_s1 + $0x104] sm:$0xf]  ;;  %v1161_v13 = vor.u32 %v1484_v0, %v1158_v2  ;;  %v1225_v17 = vor.u32 %v1500_v3, %v1222_v4  ;;  %v1409_v18 = vor.u32 %v1546_v6, %v1406_v7 }
  0x3b   : > { %830 = vmatpush.bf16.msrb.mxu0 %v1445_v23  ;;  %v1286_v11 = vld [vmem:[%s2221_s1 + $0x108] sm:$0xf0]  ;;  %v1152_v15 = vld [vmem:[%s1967_s8 + $0x10] sm:$0xf]  ;;  %v1483_v16 = vld [vmem:[%s1967_s8 + $0x20] sm:$0xf0]  ;;  %v1473_v21 = vor.u32 %v1562_v8, %v1470_v9 }
  0x3c   : > { %844 = vmatpush.bf16.msrb.mxu1 %v1193_v24  ;;  %v1289_v22 = vor.u32 %v1516_v10, %v1286_v11  ;;  %v1544_v23 = vld [vmem:[%s2221_s1 + $0x1e4] sm:$0xf]  ;;  %v1398_v24 = vld [vmem:[%s2221_s1 + $0x1e8] sm:$0xf0]  ;;  %v2111_v25 = vor.u32 %v1483_v16, %v1152_v15  ;;  %v1390_v32 = vld [vmem:[%s2221_s1 + $0x1d8] sm:$0xf0] }
  0x3d   : > { %858 = vmatpush.bf16.msrb.mxu2 %v1257_v27  ;;  %v1560_v27 = vld [vmem:[%s2221_s1 + $0x264] sm:$0xf]  ;;  %v1462_v28 = vld [vmem:[%s2221_s1 + $0x268] sm:$0xf0]  ;;  %v1401_v29 = vor.u32 %v1544_v23, %v1398_v24  ;;  %v1558_v33 = vld [vmem:[%s2221_s1 + $0x254] sm:$0xf] }
  0x3e   : > { %872 = vmatpush.bf16.msrb.mxu3 %v1321_v31  ;;  %v1465_v30 = vor.u32 %v1560_v27, %v1462_v28  ;;  %v1542_v31 = vld [vmem:[%s2221_s1 + $0x1d4] sm:$0xf]  ;;  %v1454_v34 = vld [vmem:[%s2221_s1 + $0x258] sm:$0xf0]  ;;  %v1382_v38 = vld [vmem:[%s2221_s1 + $0x1c8] sm:$0xf0] }
  0x3f   : > { %831 = vmatpush.bf16.msrb.mxu0 %v1437_v36  ;;  %v1393_v35 = vor.u32 %v1542_v31, %v1390_v32  ;;  %v1457_v36 = vor.u32 %v1558_v33, %v1454_v34  ;;  %v1538_v40 = vld [vmem:[%s2221_s1 + $0x1b4] sm:$0xf]  ;;  %v1374_v41 = vld [vmem:[%s2221_s1 + $0x1b8] sm:$0xf0]  ;;  %v1536_v46 = vld [vmem:[%s2221_s1 + $0x1a4] sm:$0xf] }
  0x40   : > { %845 = vmatpush.bf16.msrb.mxu1 %v1185_v37  ;;  %v1540_v37 = vld [vmem:[%s2221_s1 + $0x1c4] sm:$0xf]  ;;  %v1554_v42 = vld [vmem:[%s2221_s1 + $0x234] sm:$0xf]  ;;  %v1377_v44 = vor.u32 %v1538_v40, %v1374_v41  ;;  %v1366_v47 = vld [vmem:[%s2221_s1 + $0x1a8] sm:$0xf0] }
  0x41   : > { %859 = vmatpush.bf16.msrb.mxu2 %v1249_v39  ;;  %v1369_v50 = vor.u32 %v1536_v46, %v1366_v47  ;;  %v1534_v52 = vld [vmem:[%s2221_s1 + $0x194] sm:$0xf]  ;;  %v1358_v53 = vld [vmem:[%s2221_s1 + $0x198] sm:$0xf0]  ;;  %v1532_v58 = vld [vmem:[%s2221_s1 + $0x184] sm:$0xf] }
  0x42   : > { %873 = vmatpush.bf16.msrb.mxu3 %v1313_v43  ;;  %v1438_v43 = vld [vmem:[%s2221_s1 + $0x238] sm:$0xf0]  ;;  %v1550_v54 = vld [vmem:[%s2221_s1 + $0x214] sm:$0xf]  ;;  %v1361_v56 = vor.u32 %v1534_v52, %v1358_v53  ;;  %v1350_v59 = vld [vmem:[%s2221_s1 + $0x188] sm:$0xf0] }
  0x43   : > { %832 = vmatpush.bf16.msrb.mxu0 %v1429_v48  ;;  %v1441_v45 = vor.u32 %v1554_v42, %v1438_v43  ;;  %v1552_v48 = vld [vmem:[%s2221_s1 + $0x224] sm:$0xf]  ;;  %v1353_v62 = vor.u32 %v1532_v58, %v1350_v59  ;;  %v1595_v23 = vld [vmem:[%s2222_s2 + $0x1] ss:$0 sm:$0xff]  ;;  %s1133_s24 = sshll.u32 %s2230_s15, 1 }
  0x44   : > { %846 = vmatpush.bf16.msrb.mxu1 %v1177_v49  ;;  %v1430_v49 = vld [vmem:[%s2221_s1 + $0x228] sm:$0xf0]  ;;  %s258_s27 = scalar_lea.vmem %s2224_s4, %s1133_s24 }
  0x45   : > { %860 = vmatpush.bf16.msrb.mxu2 %v1241_v51  ;;  %v1433_v51 = vor.u32 %v1552_v48, %v1430_v49 }
  0x46   : > { %874 = vmatpush.bf16.msrb.mxu3 %v1305_v55  ;;  %v1422_v55 = vld [vmem:[%s2221_s1 + $0x218] sm:$0xf0] }
  0x47   : > { %833 = vmatpush.bf16.msrb.mxu0 %v1421_v60  ;;  %v1425_v57 = vor.u32 %v1550_v54, %v1422_v55  ;;  %v1548_v60 = vld [vmem:[%s2221_s1 + $0x204] sm:$0xf] }
  0x48   : > { %847 = vmatpush.bf16.msrb.mxu1 %v1169_v61  ;;  %v1414_v61 = vld [vmem:[%s2221_s1 + $0x208] sm:$0xf0] }
  0x49   : > { %861 = vmatpush.bf16.msrb.mxu2 %v1233_v1  ;;  %v1417_v63 = vor.u32 %v1548_v60, %v1414_v61 }
  0x4a   : > { %875 = vmatpush.bf16.msrb.mxu3 %v1297_v5 }
  0x4b   : > { %834 = vmatpush.bf16.msrb.mxu0 %v1413_v12 }
  0x4c   : > { %848 = vmatpush.bf16.msrb.mxu1 %v1161_v13 }
  0x4d   : > { %862 = vmatpush.bf16.msrb.mxu2 %v1225_v17 }
  0x4e   : > { %876 = vmatpush.bf16.msrb.mxu3 %v1289_v22  ;;  %835 = vmatmul.bf16.vlgmr.msrb.gmra.mxu0 %v2111_v25 }
  0x4f   : > { %883 = vmatpush.bf16.msra.mxu0 %v1409_v18  ;;  %849 = vmatmul.bf16.vlgmr.msrb.gmra.mxu1 %v1975_v14  ;;  %v1556_v14 = vld [vmem:[%s2221_s1 + $0x244] sm:$0xf] }
  0x50   : > { %897 = vmatpush.bf16.msra.mxu1 %v1473_v21  ;;  %863 = vmatmul.bf16.vlgmr.msrb.gmra.mxu2 %v1992_v26  ;;  %v1446_v26 = vld [vmem:[%s2221_s1 + $0x248] sm:$0xf0] }
  0x51   : > { %877 = vmatmul.bf16.vlgmr.msrb.gmra.mxu3 %v1983_v19  ;;  %v1385_v19 = vor.u32 %v1540_v37, %v1382_v38  ;;  %v1449_v39 = vor.u32 %v1556_v14, %v1446_v26 }
  0x53   : > { %884 = vmatpush.bf16.msra.mxu0 %v1401_v29 }
  0x54   : > { %898 = vmatpush.bf16.msra.mxu1 %v1465_v30 }
  0x57   : > { %885 = vmatpush.bf16.msra.mxu0 %v1393_v35 }
  0x58   : > { %899 = vmatpush.bf16.msra.mxu1 %v1457_v36 }
  0x5b   : > { %886 = vmatpush.bf16.msra.mxu0 %v1385_v19  ;;  %v1594_v19 = vld [vmem:[%s2222_s2] ss:$0 sm:$0xff] }
  0x5c   : > { %900 = vmatpush.bf16.msra.mxu1 %v1449_v39 }
  0x5f   : > { %887 = vmatpush.bf16.msra.mxu0 %v1377_v44 }
  0x60   : > { %901 = vmatpush.bf16.msra.mxu1 %v1441_v45 }
  0x63   : > { %888 = vmatpush.bf16.msra.mxu0 %v1369_v50 }
  0x64   : > { %902 = vmatpush.bf16.msra.mxu1 %v1433_v51 }
  0x67   : > { %889 = vmatpush.bf16.msra.mxu0 %v1361_v56 }
  0x68   : > { %903 = vmatpush.bf16.msra.mxu1 %v1425_v57 }
  0x6b   : > { %890 = vmatpush.bf16.msra.mxu0 %v1353_v62 }
  0x6c   : > { %904 = vmatpush.bf16.msra.mxu1 %v1417_v63 }
  0x6e   : > { %891 = vmatmul.bf16.vlgmr.msra.gmra.mxu0 %v1985_v20 }
  0x6f   : > { %905 = vmatmul.bf16.vlgmr.msra.gmra.mxu1 %v2111_v25 }
  0xad   : > { %v780_v0 = vpop.f32.mrf.mxu0 }
  0xb0   : > { %v794_v1 = vpop.f32.mrf.mxu1 }
  0xb1   : > { %v795_v18 = vadd.f32 %v794_v1, %v780_v0 }
  0xb4   : > { %v822_v4 = vpop.f32.mrf.mxu3 }
  0xb5   : > { %v808_v2 = vpop.f32.mrf.mxu2  ;;  %v782_v3 = vpop.f32.mrf.mxu0 }
  0xb6   : > { %v809_v28 = vadd.f32 %v808_v2, %v795_v18 }
  0xb8   : > { %v796_v5 = vpop.f32.mrf.mxu1  ;;  %v823_v34 = vadd.f32 %v822_v4, %v809_v28 }
  0xb9   : > { %v797_v29 = vadd.f32 %v796_v5, %v782_v3 }
  0xbc   : > { %v824_v9 = vpop.f32.mrf.mxu3 }
  0xbd   : > { %v810_v6 = vpop.f32.mrf.mxu2 }
  0xbe   : > { %v811_v35 = vadd.f32 %v810_v6, %v797_v29 }
  0xc0   : > { %v825_v39 = vadd.f32 %v824_v9, %v811_v35 }
  0xcb   : > { %v836_v7 = vpop.f32.mrf.mxu0 }
  0xcc   : > { %v850_v8 = vpop.f32.mrf.mxu1  ;;  %v837_v26 = vadd.f32 %v836_v7, %v823_v34 }
  0xce   : > { %v913_v44 = vadd.f32 %v1594_v19, %v837_v26 }
  0xd0   : > { %v921_v48 = vmin.f32 %v913_v44, 0.0  ;;  %vm919_vm5 = vcmp.gt.f32.partialorder %v913_v44, 0.0 }
  0xd2   : > { %v923_v51 = vmul.f32 1.442695, %v921_v48 }
  0xd3   : > { %v864_v10 = vpop.f32.mrf.mxu2  ;;  %v838_v11 = vpop.f32.mrf.mxu0 }
  0xd4   : > { %v852_v12 = vpop.f32.mrf.mxu1  ;;  %v878_v13 = vpop.f32.mrf.mxu3  ;;  %v865_v15 = vadd.f32 %v864_v10, %v850_v8  ;;  %v839_v41 = vadd.f32 %v838_v11, %v825_v39 }
  0xd6   : > { %v879_v16 = vadd.f32 %v878_v13, %v865_v15  ;;  %v914_v47 = vadd.f32 %v1594_v19, %v839_v41 }
  0xd8   : > { %v922_v49 = vmin.f32 %v914_v47, 0.0  ;;  %vm920_vm8 = vcmp.gt.f32.partialorder %v914_v47, 0.0 }
  0xda   : > { %v925_v54 = vmul.f32 1.442695, %v922_v49 }
  0xdb   : > { %v866_v17 = vpop.f32.mrf.mxu2 }
  0xdc   : > { %v867_v24 = vadd.f32 %v866_v17, %v852_v12  ;;  %v880_v27 = vpop.f32.mrf.mxu3 }
  0xde   : > { %v881_v31 = vadd.f32 %v880_v27, %v867_v24 }
  0xeb   : > { %v892_v20 = vpop.f32.mrf.mxu0 }
  0xec   : > { %v893_v21 = vadd.f32 %v892_v20, %v879_v16  ;;  %v906_v22 = vpop.f32.mrf.mxu1 }
  0xee   : > { %v907_v25 = vadd.f32 %v906_v22, %v893_v21 }
  0xf0   : > { %v917_v30 = vadd.f32 %v1595_v23, %v907_v25 }
  0xf2   : > { %v931_v32 = vsub.f32 0.0, %v917_v30 }
  0xf3   : > { %v894_v33 = vpop.f32.mrf.mxu0 }
  0xf4   : > { %v933_v36 = vmul.f32 1.442695, %v931_v32  ;;  %v895_v37 = vadd.f32 %v894_v33, %v881_v31  ;;  %v908_v38 = vpop.f32.mrf.mxu1 }
  0xf6   : > { %1596 = vpow2.f32 %v933_v36  ;;  %v909_v14 = vadd.f32 %v908_v38, %v895_v37 }
  0xf8   : > { %v918_v40 = vadd.f32 %v1595_v23, %v909_v14 }
  0xfa   : > { %v932_v42 = vsub.f32 0.0, %v918_v40 }
  0xfc   : > { %v1597_v43 = vpop.eup %1596  ;;  %v935_v45 = vmul.f32 1.442695, %v932_v42 }
  0xfd   : > { %v937_v46 = vadd.f32 1.0, %v1597_v43 }
  0xfe   : > { %1598 = vpow2.f32 %v935_v45 }
  0xff   : > { %1600 = vrcp.f32 %v937_v46  ;;  %v950_v60 = vand.u32 2147483648, %v937_v46  ;;  %vm944_vm1 = vweird.f32 %v937_v46  ;;  %v948_v62 = vand.u32 2147483647, %v937_v46 }
 0x101   : > { %v951_v4 = vor.u32 1.1754944e-38, %v950_v60  ;;  %vm949_vm3 = vcmp.eq.f32.partialorder %v948_v62, 8.507059e+37 }
 0x104   : > { %v1599_v50 = vpop.eup %1598 }
 0x105   : > { %v1601_v52 = vpop.eup %1600  ;;  %v938_v53 = vadd.f32 1.0, %v1599_v50 }
 0x106   : > { %v940_v55 = vmul.f32 %v1601_v52, %v937_v46  ;;  %vm945_vm0 = vweird.f32 %v1601_v52 }
 0x107   : > { %1602 = vrcp.f32 %v938_v53  ;;  %vm946_vm2 = vmor %vm944_vm1, %vm945_vm0  ;;  %v965_v5 = vand.u32 2147483648, %v938_v53  ;;  %v963_v7 = vand.u32 2147483647, %v938_v53  ;;  %vm959_vm6 = vweird.f32 %v938_v53 }
 0x108   : > { %1604 = vpow2.f32 %v923_v51  ;;  %v941_v56 = vsub.f32 1.0, %v940_v55 }
 0x109   : > { %1606 = vpow2.f32 %v925_v54  ;;  %v966_v12 = vor.u32 1.1754944e-38, %v965_v5  ;;  %vm964_vm9 = vcmp.eq.f32.partialorder %v963_v7, 8.507059e+37 }
 0x10a   : > { %v942_v57 = vmul.f32 %v1601_v52, %v941_v56 }
 0x10c   : > { %v943_v58 = vadd.f32 %v1601_v52, %v942_v57 }
 0x10d   : > { %v1603_v59 = vpop.eup %1602 }
 0x10e   : > { %v1605_v61 = vpop.eup %1604  ;;  %v955_v63 = vmul.f32 %v1603_v59, %v938_v53  ;;  %v947_v1 = vsel %vm946_vm2, %v1601_v52, %v943_v58  ;;  %vm960_vm4 = vweird.f32 %v1603_v59 }
 0x10f   : > { %v1607_v0 = vpop.eup %1606  ;;  %v1474_v3 = vadd.f32 -1.0, %v1605_v61  ;;  %v952_v9 = vsel %vm949_vm3, %v951_v4, %v947_v1  ;;  %vm961_vm7 = vmor %vm959_vm6, %vm960_vm4 }
 0x110   : > { %v956_v2 = vsub.f32 1.0, %v955_v63  ;;  %v1475_v8 = vadd.f32 -1.0, %v1607_v0 }
 0x111   : > { %v929_v11 = vsel %vm919_vm5, %v913_v44, %v1474_v3 }
 0x112   : > { %v957_v6 = vmul.f32 %v1603_v59, %v956_v2  ;;  %v969_v13 = vmul.f32 %v952_v9, %v929_v11  ;;  %v930_v16 = vsel %vm920_vm8, %v914_v47, %v1475_v8 }
 0x114   : > { %v958_v10 = vadd.f32 %v1603_v59, %v957_v6  ;;  %v982_v18 = vmul.f32 %v969_v13, %v969_v13 }
 0x116   : > { %v962_v15 = vsel %vm961_vm7, %v1603_v59, %v958_v10 }
 0x117   : > { %v967_v17 = vsel %vm964_vm9, %v966_v12, %v962_v15 }
 0x118   : > { %v970_v20 = vmul.f32 %v967_v17, %v930_v16 }
 0x11a   : > { %v1567_v21 = vpack.c.bf16 %v970_v20, %v969_v13  ;;  %v975_v22 = vadd.f32 %v970_v20, %v969_v13  ;;  %v983_v23 = vmul.f32 %v970_v20, %v970_v20 }
 0x11c   : > { %1568 = vst [vmem:[%s250_s23] sm:$0xff] %v1567_v21   ;;  %v976_v24 = vrot.slane %v975_v22, 4  ;;  %v984_v25 = vadd.f32 %v983_v23, %v982_v18 }
 0x11e   : > { %v977_v27 = vadd.f32 %v976_v24, %v975_v22  ;;  %v985_v28 = vrot.slane %v984_v25, 4 }
 0x120   : > { %v978_v29 = vrot.slane %v977_v27, 2  ;;  %v986_v30 = vadd.f32 %v985_v28, %v984_v25 }
 0x122   : > { %v979_v31 = vadd.f32 %v978_v29, %v977_v27  ;;  %v987_v32 = vrot.slane %v986_v30, 2 }
 0x124   : > { %v980_v33 = vrot.slane %v979_v31, 1  ;;  %v988_v34 = vadd.f32 %v987_v32, %v986_v30 }
 0x126   : > { %v989_v35 = vrot.slane %v988_v34, 1  ;;  %v981_v36 = vadd.f32 %v980_v33, %v979_v31 }
 0x128   : > { %v990_v37 = vadd.f32 %v989_v35, %v988_v34 }
 0x12a   : > { %v992_v38 = vsel %vm991_vm10, %v981_v36, %v990_v37 }
 0x12b   : > { %993 = vst [vmem:[%s258_s27] sm:$0x3] %v992_v38 }
 0x12c PF: > { %s15_s17 = sadd.s32 1, %s1630_s17   ;;  %s2225_s15 = smov %s1626_s16 }
 0x12d   : > { %p12_p5 = scmp.ge.s32.totalorder %s15_s17, 4   ;;  %s2226_s16 = smov %s2228_s18 }
 0x12f   :  { %14 = sbr.rel (!%p12_p5) target bundleno = 2 (0x2), region = 74 }

// kernel: gated_coarse2fine_forward.42
= control target key start
LH: loop header
LB: loop body
LE: loop exit
PB: predicated region body
PF: predicated region fallthrough
CT: control target
= control target key end

     0   :  { %s1696_s15 = smov 0   ;;  %s1698_s16 = smov 0   ;;  %s2294_s0 = inlined_call_operand.vmem [shape: bf16[2,64,384], index: 0, kind: input, shape index: {}]   ;;  %s2295_s1 = inlined_call_operand.vmem [shape: bf16[384,256], index: 1, kind: input, shape index: {}]   ;;  %s2296_s2 = inlined_call_operand.vmem [shape: f32[2,128], index: 2, kind: input, shape index: {}]   ;;  %s2297_s3 = inlined_call_operand.vmem [shape: bf16[2,64,128], index: 3, kind: output, shape index: {0}]   ;;  %s2298_s4 = inlined_call_operand.vmem [shape: f32[2,1,2,128], index: 4, kind: output, shape index: {1}]  }
   0x1   :  { %s1700_s17 = smov 0  }
   0x2 LB: > { %s27_s18 = sadd.s32 1, %s1665_s16  ;;  %p1217_p0 = scmp.ge.s32.totalorder %s1669_s17, 1  ;;  %s1669_s17 = sphi %s1700_s17, %s15_s17   ;;  %s1665_s16 = sphi %s1698_s16, %s2308_s16   ;;  %s1661_s15 = sphi %s1696_s15, %s2307_s15  }
   0x3   : > { %p29_p1 = scmp.ge.s32.totalorder %s27_s18, 2  ;;  %p189_p2 = scmp.lt.s32.totalorder %s1669_s17, 3 }
   0x5   : > { %s2310_s18 = smov (%p29_p1, %s27_s18), 0  ;;  %p190_p3 = pnand %p1217_p0, %p189_p2 }
   0x6   : > { %p232_p4 = scmp.lt.s32.totalorder (!%p190_p3), %s1661_s15, 1 }
   0x7   : > { %193 = sbr.rel (%p190_p3) target bundleno = 327 (0x147), region = 32 }
   0xc   : > { %v1328_v0 = vld [vmem:[%s2295_s1 + $0x70] sm:$0xf]  ;;  %v1500_v1 = vld [vmem:[%s2295_s1 + $0x74] sm:$0xf0]  ;;  %v1320_v5 = vld [vmem:[%s2295_s1 + $0x60] sm:$0xf] }
   0xd   : > { %v1392_v2 = vld [vmem:[%s2295_s1 + $0xf0] sm:$0xf]  ;;  %v1329_v3 = vor.u32 %v1500_v1, %v1328_v0  ;;  %v1516_v4 = vld [vmem:[%s2295_s1 + $0xf4] sm:$0xf0]  ;;  %v1498_v6 = vld [vmem:[%s2295_s1 + $0x64] sm:$0xf0] }
   0xe   : > { %v1393_v7 = vor.u32 %v1516_v4, %v1392_v2  ;;  %v1384_v8 = vld [vmem:[%s2295_s1 + $0xe0] sm:$0xf]  ;;  %v1514_v9 = vld [vmem:[%s2295_s1 + $0xe4] sm:$0xf0]  ;;  %v1321_v10 = vor.u32 %v1498_v6, %v1320_v5  ;;  %v1312_v12 = vld [vmem:[%s2295_s1 + $0x50] sm:$0xf] }
   0xf   : > { %627 = vmatpush.bf16.msra.mxu0 %v1329_v3  ;;  %1556 = vmatpush.bf16.msra.mxu2 %v1329_v3  ;;  %v1385_v11 = vor.u32 %v1514_v9, %v1384_v8  ;;  %v1496_v13 = vld [vmem:[%s2295_s1 + $0x54] sm:$0xf0]  ;;  %v1376_v14 = vld [vmem:[%s2295_s1 + $0xd0] sm:$0xf]  ;;  %v1304_v18 = vld [vmem:[%s2295_s1 + $0x40] sm:$0xf] }
  0x10   : > { %656 = vmatpush.bf16.msra.mxu1 %v1393_v7  ;;  %1564 = vmatpush.bf16.msra.mxu3 %v1393_v7  ;;  %v1512_v15 = vld [vmem:[%s2295_s1 + $0xd4] sm:$0xf0]  ;;  %v1313_v16 = vor.u32 %v1496_v13, %v1312_v12  ;;  %v1494_v19 = vld [vmem:[%s2295_s1 + $0x44] sm:$0xf0]  ;;  %v1368_v20 = vld [vmem:[%s2295_s1 + $0xc0] sm:$0xf] }
  0x11   : > { %v1377_v17 = vor.u32 %v1512_v15, %v1376_v14  ;;  %v1510_v21 = vld [vmem:[%s2295_s1 + $0xc4] sm:$0xf0]  ;;  %v1305_v22 = vor.u32 %v1494_v19, %v1304_v18  ;;  %v1296_v24 = vld [vmem:[%s2295_s1 + $0x30] sm:$0xf]  ;;  %v1492_v25 = vld [vmem:[%s2295_s1 + $0x34] sm:$0xf0] }
  0x12   : > { %v1369_v23 = vor.u32 %v1510_v21, %v1368_v20  ;;  %v1360_v26 = vld [vmem:[%s2295_s1 + $0xb0] sm:$0xf]  ;;  %v1508_v27 = vld [vmem:[%s2295_s1 + $0xb4] sm:$0xf0]  ;;  %v1297_v28 = vor.u32 %v1492_v25, %v1296_v24  ;;  %s2312_s15 = smov (!%p232_p4, %s1661_s15), 1 }
  0x13   : > { %628 = vmatpush.bf16.msra.mxu0 %v1321_v10  ;;  %1557 = vmatpush.bf16.msra.mxu2 %v1321_v10  ;;  %v1361_v29 = vor.u32 %v1508_v27, %v1360_v26  ;;  %v1288_v30 = vld [vmem:[%s2295_s1 + $0x20] sm:$0xf]  ;;  %v1490_v31 = vld [vmem:[%s2295_s1 + $0x24] sm:$0xf0]  ;;  %s1572_s23 = smul.u32 96, %s2312_s15  ;;  %s1472_s26 = sshll.u32 %s2312_s15, 5 }
  0x14   : > { %657 = vmatpush.bf16.msra.mxu1 %v1385_v11  ;;  %1565 = vmatpush.bf16.msra.mxu3 %v1385_v11  ;;  %v1352_v32 = vld [vmem:[%s2295_s1 + $0xa0] sm:$0xf]  ;;  %v1506_v33 = vld [vmem:[%s2295_s1 + $0xa4] sm:$0xf0]  ;;  %v1289_v34 = vor.u32 %v1490_v31, %v1288_v30  ;;  %v1280_v36 = vld [vmem:[%s2295_s1 + $0x10] sm:$0xf]  ;;  %s2174_s29 = scalar_lea.vmem %s2297_s3, %s1472_s26 }
  0x15   : > { %v1353_v35 = vor.u32 %v1506_v33, %v1352_v32  ;;  %v1488_v37 = vld [vmem:[%s2295_s1 + $0x14] sm:$0xf0]  ;;  %v1344_v38 = vld [vmem:[%s2295_s1 + $0x90] sm:$0xf]  ;;  %v1272_v41 = vld [vmem:[%s2295_s1] sm:$0xf]  ;;  %s1811_s10 = scalar_lea.vmem %s2294_s0, %s1572_s23 }
  0x16   : > { %v1504_v39 = vld [vmem:[%s2295_s1 + $0x94] sm:$0xf0]  ;;  %v1281_v40 = vor.u32 %v1488_v37, %v1280_v36  ;;  %v1486_v43 = vld [vmem:[%s2295_s1 + $0x4] sm:$0xf0]  ;;  %v1336_v44 = vld [vmem:[%s2295_s1 + $0x80] sm:$0xf] }
  0x17   : > { %629 = vmatpush.bf16.msra.mxu0 %v1313_v16  ;;  %1558 = vmatpush.bf16.msra.mxu2 %v1313_v16  ;;  %v1345_v42 = vor.u32 %v1504_v39, %v1344_v38  ;;  %v1502_v45 = vld [vmem:[%s2295_s1 + $0x84] sm:$0xf0]  ;;  %v1499_v46 = vld [vmem:[%s2295_s1 + $0x74] sm:$0xf]  ;;  %v1330_v47 = vld [vmem:[%s2295_s1 + $0x78] sm:$0xf0]  ;;  %v1273_v52 = vor.u32 %v1486_v43, %v1272_v41 }
  0x18   : > { %658 = vmatpush.bf16.msra.mxu1 %v1377_v17  ;;  %1566 = vmatpush.bf16.msra.mxu3 %v1377_v17  ;;  %v1456_v48 = vld [vmem:[%s2295_s1 + $0x170] sm:$0xf]  ;;  %v1224_v49 = vld [vmem:[%s1811_s10] sm:$0xf]  ;;  %v1474_v50 = vld [vmem:[%s1811_s10 + $0x8] sm:$0xf0]  ;;  %v1337_v58 = vor.u32 %v1502_v45, %v1336_v44  ;;  %v1333_v62 = vor.u32 %v1499_v46, %v1330_v47 }
  0x19   : > { %v1532_v51 = vld [vmem:[%s2295_s1 + $0x174] sm:$0xf0]  ;;  %v1248_v53 = vld [vmem:[%s1811_s10 + $0x30] sm:$0xf]  ;;  %v1480_v54 = vld [vmem:[%s1811_s10 + $0x38] sm:$0xf0]  ;;  %v1857_v3 = vor.u32 %v1474_v50, %v1224_v49 }
  0x1a   : > { %v1473_v55 = vld [vmem:[%s1811_s10 + $0x4] sm:$0xf]  ;;  %v1515_v56 = vld [vmem:[%s2295_s1 + $0xf4] sm:$0xf]  ;;  %v1394_v57 = vld [vmem:[%s2295_s1 + $0xf8] sm:$0xf0]  ;;  %v1457_v63 = vor.u32 %v1532_v51, %v1456_v48  ;;  %v1859_v4 = vor.u32 %v1480_v54, %v1248_v53 }
  0x1b   : > { %630 = vmatpush.bf16.msra.mxu0 %v1305_v22  ;;  %1559 = vmatpush.bf16.msra.mxu2 %v1305_v22  ;;  %v1226_v59 = vld [vmem:[%s1811_s10 + $0xc] sm:$0xf0]  ;;  %v1479_v60 = vld [vmem:[%s1811_s10 + $0x34] sm:$0xf]  ;;  %v1250_v61 = vld [vmem:[%s1811_s10 + $0x3c] sm:$0xf0]  ;;  %v1397_v10 = vor.u32 %v1515_v56, %v1394_v57 }
  0x1c   : > { %659 = vmatpush.bf16.msra.mxu1 %v1369_v23  ;;  %1567 = vmatpush.bf16.msra.mxu3 %v1369_v23  ;;  %v1531_v0 = vld [vmem:[%s2295_s1 + $0x174] sm:$0xf]  ;;  %v1458_v1 = vld [vmem:[%s2295_s1 + $0x178] sm:$0xf0]  ;;  %v1497_v2 = vld [vmem:[%s2295_s1 + $0x64] sm:$0xf]  ;;  %v1870_v8 = vor.u32 %v1473_v55, %v1226_v59  ;;  %v1872_v9 = vor.u32 %v1479_v60, %v1250_v61 }
  0x1d   : > { %v1322_v5 = vld [vmem:[%s2295_s1 + $0x68] sm:$0xf0]  ;;  %v1448_v6 = vld [vmem:[%s2295_s1 + $0x160] sm:$0xf]  ;;  %v1530_v7 = vld [vmem:[%s2295_s1 + $0x164] sm:$0xf0]  ;;  %v1461_v11 = vor.u32 %v1531_v0, %v1458_v1 }
  0x1e   : > { %v1513_v12 = vld [vmem:[%s2295_s1 + $0xe4] sm:$0xf]  ;;  %v1386_v13 = vld [vmem:[%s2295_s1 + $0xe8] sm:$0xf0]  ;;  %v1325_v14 = vor.u32 %v1497_v2, %v1322_v5  ;;  %v1449_v15 = vor.u32 %v1530_v7, %v1448_v6  ;;  %v1495_v18 = vld [vmem:[%s2295_s1 + $0x54] sm:$0xf] }
  0x1f   : > { %631 = vmatpush.bf16.msra.mxu0 %v1297_v28  ;;  %1560 = vmatpush.bf16.msra.mxu2 %v1297_v28  ;;  %v1529_v16 = vld [vmem:[%s2295_s1 + $0x164] sm:$0xf]  ;;  %v1450_v17 = vld [vmem:[%s2295_s1 + $0x168] sm:$0xf0]  ;;  %v1314_v19 = vld [vmem:[%s2295_s1 + $0x58] sm:$0xf0]  ;;  %v1389_v22 = vor.u32 %v1513_v12, %v1386_v13 }
  0x20   : > { %660 = vmatpush.bf16.msra.mxu1 %v1361_v29  ;;  %1568 = vmatpush.bf16.msra.mxu3 %v1361_v29  ;;  %v1440_v20 = vld [vmem:[%s2295_s1 + $0x150] sm:$0xf]  ;;  %v1528_v21 = vld [vmem:[%s2295_s1 + $0x154] sm:$0xf0]  ;;  %v1453_v23 = vor.u32 %v1529_v16, %v1450_v17  ;;  %v1511_v24 = vld [vmem:[%s2295_s1 + $0xd4] sm:$0xf]  ;;  %v1317_v26 = vor.u32 %v1495_v18, %v1314_v19 }
  0x21   : > { %v1378_v25 = vld [vmem:[%s2295_s1 + $0xd8] sm:$0xf0]  ;;  %v1441_v27 = vor.u32 %v1528_v21, %v1440_v20  ;;  %v1527_v28 = vld [vmem:[%s2295_s1 + $0x154] sm:$0xf]  ;;  %v1493_v30 = vld [vmem:[%s2295_s1 + $0x44] sm:$0xf] }
  0x22   : > { %v1442_v29 = vld [vmem:[%s2295_s1 + $0x158] sm:$0xf0]  ;;  %v1306_v31 = vld [vmem:[%s2295_s1 + $0x48] sm:$0xf0]  ;;  %v1432_v32 = vld [vmem:[%s2295_s1 + $0x140] sm:$0xf]  ;;  %v1381_v36 = vor.u32 %v1511_v24, %v1378_v25 }
  0x23   : > { %632 = vmatpush.bf16.msra.mxu0 %v1289_v34  ;;  %1561 = vmatpush.bf16.msra.mxu2 %v1289_v34  ;;  %v1526_v33 = vld [vmem:[%s2295_s1 + $0x144] sm:$0xf0]  ;;  %v1509_v34 = vld [vmem:[%s2295_s1 + $0xc4] sm:$0xf]  ;;  %v1445_v37 = vor.u32 %v1527_v28, %v1442_v29  ;;  %v1434_v39 = vld [vmem:[%s2295_s1 + $0x148] sm:$0xf0] }
  0x24   : > { %661 = vmatpush.bf16.msra.mxu1 %v1353_v35  ;;  %1569 = vmatpush.bf16.msra.mxu3 %v1353_v35  ;;  %v1370_v35 = vld [vmem:[%s2295_s1 + $0xc8] sm:$0xf0]  ;;  %v1525_v38 = vld [vmem:[%s2295_s1 + $0x144] sm:$0xf]  ;;  %v1433_v41 = vor.u32 %v1526_v33, %v1432_v32  ;;  %v1260_v44 = vld [vmem:[%s1811_s10 + $0x48] sm:$0xf] }
  0x25   : > { %v1477_v43 = vld [vmem:[%s1811_s10 + $0x20] sm:$0xf0]  ;;  %v1483_v45 = vld [vmem:[%s1811_s10 + $0x50] sm:$0xf0]  ;;  %v1298_v47 = vld [vmem:[%s2295_s1 + $0x38] sm:$0xf0]  ;;  %v1373_v53 = vor.u32 %v1509_v34, %v1370_v35  ;;  %v1437_v54 = vor.u32 %v1525_v38, %v1434_v39 }
  0x26   : > { %v1491_v46 = vld [vmem:[%s2295_s1 + $0x34] sm:$0xf]  ;;  %v1424_v48 = vld [vmem:[%s2295_s1 + $0x130] sm:$0xf]  ;;  %v1524_v49 = vld [vmem:[%s2295_s1 + $0x134] sm:$0xf0]  ;;  %v1975_v0 = vor.u32 %v1483_v45, %v1260_v44 }
  0x27   : > { %633 = vmatpush.bf16.msra.mxu0 %v1281_v40  ;;  %1562 = vmatpush.bf16.msra.mxu2 %v1281_v40  ;;  %v1309_v40 = vor.u32 %v1493_v30, %v1306_v31  ;;  %v1476_v50 = vld [vmem:[%s1811_s10 + $0x1c] sm:$0xf]  ;;  %v1238_v51 = vld [vmem:[%s1811_s10 + $0x24] sm:$0xf0]  ;;  %v1262_v55 = vld [vmem:[%s1811_s10 + $0x54] sm:$0xf0]  ;;  %v1425_v59 = vor.u32 %v1524_v49, %v1424_v48 }
  0x28   : > { %662 = vmatpush.bf16.msra.mxu1 %v1345_v42  ;;  %1570 = vmatpush.bf16.msra.mxu3 %v1345_v42  ;;  %v1236_v42 = vld [vmem:[%s1811_s10 + $0x18] sm:$0xf]  ;;  %v1507_v56 = vld [vmem:[%s2295_s1 + $0xb4] sm:$0xf]  ;;  %v1362_v57 = vld [vmem:[%s2295_s1 + $0xb8] sm:$0xf0]  ;;  %v1986_v6 = vor.u32 %v1476_v50, %v1238_v51 }
  0x29   : > { %v1523_v60 = vld [vmem:[%s2295_s1 + $0x134] sm:$0xf]  ;;  %v1426_v61 = vld [vmem:[%s2295_s1 + $0x138] sm:$0xf0]  ;;  %v1290_v1 = vld [vmem:[%s2295_s1 + $0x28] sm:$0xf0] }
  0x2a   : > { %v1416_v2 = vld [vmem:[%s2295_s1 + $0x120] sm:$0xf]  ;;  %v1522_v5 = vld [vmem:[%s2295_s1 + $0x124] sm:$0xf0]  ;;  %v1505_v12 = vld [vmem:[%s2295_s1 + $0xa4] sm:$0xf] }
  0x2b   : > { %634 = vmatpush.bf16.msra.mxu0 %v1273_v52  ;;  %1563 = vmatpush.bf16.msra.mxu2 %v1273_v52  ;;  %v1482_v52 = vld [vmem:[%s1811_s10 + $0x4c] sm:$0xf]  ;;  %v1521_v16 = vld [vmem:[%s2295_s1 + $0x124] sm:$0xf]  ;;  %v1487_v18 = vld [vmem:[%s2295_s1 + $0x14] sm:$0xf] }
  0x2c   : > { %663 = vmatpush.bf16.msra.mxu1 %v1337_v58  ;;  %1571 = vmatpush.bf16.msra.mxu3 %v1337_v58  ;;  %v1301_v58 = vor.u32 %v1491_v46, %v1298_v47  ;;  %v1988_v7 = vor.u32 %v1482_v52, %v1262_v55  ;;  %v1354_v13 = vld [vmem:[%s2295_s1 + $0xa8] sm:$0xf0]  ;;  %v1282_v19 = vld [vmem:[%s2295_s1 + $0x18] sm:$0xf0]  ;;  %v1408_v20 = vld [vmem:[%s2295_s1 + $0x110] sm:$0xf] }
  0x2d   : > { %v1418_v17 = vld [vmem:[%s2295_s1 + $0x128] sm:$0xf0]  ;;  %v1520_v21 = vld [vmem:[%s2295_s1 + $0x114] sm:$0xf0]  ;;  %v1503_v24 = vld [vmem:[%s2295_s1 + $0x94] sm:$0xf] }
  0x2e   : > { %635 = vmatmul.bf16.vlgmr.msra.gmra.mxu0 %v1857_v3  ;;  %645 = vmatmul.bf16.vlgmr.msra.gmra.mxu2 %v1859_v4  ;;  %v1346_v25 = vld [vmem:[%s2295_s1 + $0x98] sm:$0xf0]  ;;  %v1519_v28 = vld [vmem:[%s2295_s1 + $0x114] sm:$0xf]  ;;  %v1485_v30 = vld [vmem:[%s2295_s1 + $0x4] sm:$0xf] }
  0x2f   : > { %685 = vmatpush.bf16.msrb.mxu2 %v1457_v63  ;;  %664 = vmatmul.bf16.vlgmr.msra.gmra.mxu1 %v1870_v8  ;;  %v1973_v63 = vor.u32 %v1477_v43, %v1236_v42  ;;  %v1410_v29 = vld [vmem:[%s2295_s1 + $0x118] sm:$0xf0]  ;;  %v1274_v31 = vld [vmem:[%s2295_s1 + $0x8] sm:$0xf0]  ;;  %v1400_v32 = vld [vmem:[%s2295_s1 + $0x100] sm:$0xf]  ;;  %v1349_v34 = vor.u32 %v1503_v24, %v1346_v25 }
  0x30   : > { %714 = vmatpush.bf16.msrb.mxu3 %v1333_v62  ;;  %743 = vmatpush.bf16.msrb.mxu0 %v1397_v10  ;;  %v1489_v62 = vld [vmem:[%s2295_s1 + $0x24] sm:$0xf]  ;;  %v1365_v10 = vor.u32 %v1507_v56, %v1362_v57  ;;  %v1518_v33 = vld [vmem:[%s2295_s1 + $0x104] sm:$0xf0]  ;;  %v1413_v35 = vor.u32 %v1519_v28, %v1410_v29  ;;  %v1338_v39 = vld [vmem:[%s2295_s1 + $0x88] sm:$0xf0] }
  0x31   : > { %674 = vmatmul.bf16.vlgmr.msra.gmra.mxu3 %v1872_v9  ;;  %772 = vmatpush.bf16.msrb.mxu1 %v1461_v11  ;;  %v1429_v11 = vor.u32 %v1523_v60, %v1426_v61  ;;  %v1401_v38 = vor.u32 %v1518_v33, %v1400_v32  ;;  %v1232_v42 = vld [vmem:[%s1811_s10 + $0x8] sm:$0xf]  ;;  %v1475_v43 = vld [vmem:[%s1811_s10 + $0x10] sm:$0xf0]  ;;  %v1244_v47 = vld [vmem:[%s1811_s10 + $0x20] sm:$0xf] }
  0x32   : > { %v1233_v46 = vor.u32 %v1475_v43, %v1232_v42  ;;  %v1478_v48 = vld [vmem:[%s1811_s10 + $0x28] sm:$0xf0]  ;;  %v1256_v50 = vld [vmem:[%s1811_s10 + $0x38] sm:$0xf]  ;;  %v1481_v51 = vld [vmem:[%s1811_s10 + $0x40] sm:$0xf0] }
  0x33   : > { %686 = vmatpush.bf16.msrb.mxu2 %v1449_v15  ;;  %v1417_v15 = vor.u32 %v1522_v5, %v1416_v2  ;;  %v1245_v49 = vor.u32 %v1478_v48, %v1244_v47  ;;  %v1257_v52 = vor.u32 %v1481_v51, %v1256_v50  ;;  %s1221_s30 = sshll.u32 %s2312_s15, 1 }
  0x34   : > { %715 = vmatpush.bf16.msrb.mxu3 %v1325_v14  ;;  %744 = vmatpush.bf16.msrb.mxu0 %v1389_v22  ;;  %v1293_v14 = vor.u32 %v1489_v62, %v1290_v1  ;;  %v1357_v22 = vor.u32 %v1505_v12, %v1354_v13  ;;  %s258_s7 = scalar_lea.vmem %s2298_s4, %s1221_s30 }
  0x35   : > { %773 = vmatpush.bf16.msrb.mxu1 %v1453_v23  ;;  %v1421_v23 = vor.u32 %v1521_v16, %v1418_v17  ;;  %v2083_v17 = vld [vmem:[%s2296_s2 + $0x1] ss:$0 sm:$0xff] }
  0x37   : > { %687 = vmatpush.bf16.msrb.mxu2 %v1441_v27  ;;  %v1409_v27 = vor.u32 %v1520_v21, %v1408_v20 }
  0x38   : > { %716 = vmatpush.bf16.msrb.mxu3 %v1317_v26  ;;  %745 = vmatpush.bf16.msrb.mxu0 %v1381_v36  ;;  %v1285_v26 = vor.u32 %v1487_v18, %v1282_v19  ;;  %v1501_v36 = vld [vmem:[%s2295_s1 + $0x84] sm:$0xf] }
  0x39   : > { %774 = vmatpush.bf16.msrb.mxu1 %v1445_v37  ;;  %v1277_v37 = vor.u32 %v1485_v30, %v1274_v31  ;;  %v1341_v44 = vor.u32 %v1501_v36, %v1338_v39 }
  0x3b   : > { %688 = vmatpush.bf16.msrb.mxu2 %v1433_v41  ;;  %v1402_v41 = vld [vmem:[%s2295_s1 + $0x108] sm:$0xf0] }
  0x3c   : > { %717 = vmatpush.bf16.msrb.mxu3 %v1309_v40  ;;  %746 = vmatpush.bf16.msrb.mxu0 %v1373_v53  ;;  %v1517_v40 = vld [vmem:[%s2295_s1 + $0x104] sm:$0xf] }
  0x3d   : > { %775 = vmatpush.bf16.msrb.mxu1 %v1437_v54  ;;  %v1405_v45 = vor.u32 %v1517_v40, %v1402_v41 }
  0x3e   : > { %640 = vmatmul.bf16.gmra.mxu0 %v1973_v63  ;;  %650 = vmatmul.bf16.gmra.mxu2 %v1975_v0 }
  0x3f   : > { %689 = vmatpush.bf16.msrb.mxu2 %v1425_v59  ;;  %669 = vmatmul.bf16.gmra.mxu1 %v1986_v6 }
  0x40   : > { %718 = vmatpush.bf16.msrb.mxu3 %v1301_v58  ;;  %747 = vmatpush.bf16.msrb.mxu0 %v1365_v10 }
  0x41   : > { %679 = vmatmul.bf16.gmra.mxu3 %v1988_v7  ;;  %776 = vmatpush.bf16.msrb.mxu1 %v1429_v11 }
  0x43   : > { %690 = vmatpush.bf16.msrb.mxu2 %v1417_v15 }
  0x44   : > { %719 = vmatpush.bf16.msrb.mxu3 %v1293_v14  ;;  %748 = vmatpush.bf16.msrb.mxu0 %v1357_v22 }
  0x45   : > { %777 = vmatpush.bf16.msrb.mxu1 %v1421_v23 }
  0x47   : > { %691 = vmatpush.bf16.msrb.mxu2 %v1409_v27 }
  0x48   : > { %720 = vmatpush.bf16.msrb.mxu3 %v1285_v26  ;;  %749 = vmatpush.bf16.msrb.mxu0 %v1349_v34  ;;  %v2089_v26 = vld [vmem:[%s2296_s2] ss:$0 sm:$0xff] }
  0x49   : > { %778 = vmatpush.bf16.msrb.mxu1 %v1413_v35 }
  0x4b   : > { %692 = vmatpush.bf16.msrb.mxu2 %v1401_v38 }
  0x4c   : > { %721 = vmatpush.bf16.msrb.mxu3 %v1277_v37  ;;  %750 = vmatpush.bf16.msrb.mxu0 %v1341_v44 }
  0x4d   : > { %779 = vmatpush.bf16.msrb.mxu1 %v1405_v45 }
  0x4e   : > { %693 = vmatmul.bf16.vlgmr.msrb.gmra.mxu2 %v1233_v46 }
  0x4f   : > { %751 = vmatmul.bf16.vlgmr.msrb.gmra.mxu0 %v1870_v8  ;;  %v1484_v8 = vld [vmem:[%s1811_s10 + $0x58] sm:$0xf0] }
  0x50   : > { %780 = vmatmul.bf16.vlgmr.msrb.gmra.mxu1 %v1233_v46 }
  0x51   : > { %722 = vmatmul.bf16.vlgmr.msrb.gmra.mxu3 %v1857_v3  ;;  %v1268_v3 = vld [vmem:[%s1811_s10 + $0x50] sm:$0xf] }
  0x52   : > { %v1269_v53 = vor.u32 %v1484_v8, %v1268_v3 }
  0x5e   : > { %698 = vmatmul.bf16.gmra.mxu2 %v1245_v49 }
  0x5f   : > { %756 = vmatmul.bf16.gmra.mxu0 %v1986_v6 }
  0x60   : > { %785 = vmatmul.bf16.gmra.mxu1 %v1245_v49 }
  0x61   : > { %727 = vmatmul.bf16.gmra.mxu3 %v1973_v63 }
  0x6e   : > { %703 = vmatmul.bf16.gmra.mxu2 %v1257_v52 }
  0x6f   : > { %761 = vmatmul.bf16.gmra.mxu0 %v1872_v9 }
  0x70   : > { %790 = vmatmul.bf16.gmra.mxu1 %v1257_v52 }
  0x71   : > { %732 = vmatmul.bf16.gmra.mxu3 %v1859_v4 }
  0x7e   : > { %708 = vmatmul.bf16.gmra.mxu2 %v1269_v53 }
  0x7f   : > { %766 = vmatmul.bf16.gmra.mxu0 %v1988_v7 }
  0x80   : > { %795 = vmatmul.bf16.gmra.mxu1 %v1269_v53 }
  0x81   : > { %737 = vmatmul.bf16.gmra.mxu3 %v1975_v0 }
  0xab   : > { %v636_v54 = vpop.f32.mrf.mxu0 }
  0xac   : > { %v665_v55 = vpop.f32.mrf.mxu1 }
  0xad   : > { %v666_v22 = vadd.f32 %v665_v55, %v636_v54 }
  0xb1   : > { %v646_v56 = vpop.f32.mrf.mxu2 }
  0xb3   : > { %v638_v59 = vpop.f32.mrf.mxu0 }
  0xb4   : > { %v675_v57 = vpop.f32.mrf.mxu3  ;;  %v667_v4 = vpop.f32.mrf.mxu1 }
  0xb5   : > { %v2070_v58 = vadd.f32 %v675_v57, %v646_v56  ;;  %v668_v34 = vadd.f32 %v667_v4, %v638_v59 }
  0xb9   : > { %v648_v60 = vpop.f32.mrf.mxu2 }
  0xbb   : > { %v641_v62 = vpop.f32.mrf.mxu0 }
  0xbc   : > { %v677_v9 = vpop.f32.mrf.mxu3  ;;  %v670_v63 = vpop.f32.mrf.mxu1 }
  0xbd   : > { %v2072_v61 = vadd.f32 %v677_v9, %v648_v60  ;;  %v671_v51 = vadd.f32 %v670_v63, %v641_v62 }
  0xc1   : > { %v651_v1 = vpop.f32.mrf.mxu2 }
  0xc3   : > { %v2076_v5 = vpop.f32.mrf.mxu0 }
  0xc4   : > { %v680_v2 = vpop.f32.mrf.mxu3  ;;  %v672_v6 = vpop.f32.mrf.mxu1 }
  0xc5   : > { %v2074_v0 = vadd.f32 %v680_v2, %v651_v1  ;;  %v673_v63 = vadd.f32 %v672_v6, %v2076_v5 }
  0xc9   : > { %v653_v7 = vpop.f32.mrf.mxu2 }
  0xcc   : > { %v682_v10 = vpop.f32.mrf.mxu3  ;;  %v752_v12 = vpop.f32.mrf.mxu0 }
  0xcd   : > { %v2078_v11 = vadd.f32 %v682_v10, %v653_v7  ;;  %v781_v13 = vpop.f32.mrf.mxu1 }
  0xd1   : > { %v694_v14 = vpop.f32.mrf.mxu2 }
  0xd2   : > { %v695_v25 = vadd.f32 %v694_v14, %v666_v22 }
  0xd4   : > { %v723_v15 = vpop.f32.mrf.mxu3  ;;  %v754_v18 = vpop.f32.mrf.mxu0  ;;  %v2092_v33 = vadd.f32 %v2089_v26, %v695_v25 }
  0xd5   : > { %v753_v16 = vadd.f32 %v752_v12, %v723_v15  ;;  %v783_v20 = vpop.f32.mrf.mxu1 }
  0xd6   : > { %v829_v39 = vmin.f32 %v2092_v33, 0.0  ;;  %vm821_vm1 = vcmp.gt.f32.partialorder %v2092_v33, 0.0 }
  0xd7   : > { %v782_v19 = vadd.f32 %v781_v13, %v753_v16 }
  0xd8   : > { %v837_v48 = vmul.f32 1.442695, %v829_v39 }
  0xd9   : > { %v813_v21 = vadd.f32 %v2083_v17, %v782_v19  ;;  %v696_v24 = vpop.f32.mrf.mxu2 }
  0xda   : > { %v697_v36 = vadd.f32 %v696_v24, %v668_v34 }
  0xdb   : > { %v869_v23 = vsub.f32 0.0, %v813_v21 }
  0xdc   : > { %v725_v27 = vpop.f32.mrf.mxu3  ;;  %v757_v30 = vpop.f32.mrf.mxu0  ;;  %v2099_v46 = vadd.f32 %v2089_v26, %v697_v36 }
  0xdd   : > { %v877_v28 = vmul.f32 1.442695, %v869_v23  ;;  %v755_v29 = vadd.f32 %v754_v18, %v725_v27  ;;  %v786_v32 = vpop.f32.mrf.mxu1 }
  0xde   : > { %v830_v52 = vmin.f32 %v2099_v46, 0.0  ;;  %vm822_vm2 = vcmp.gt.f32.partialorder %v2099_v46, 0.0 }
  0xdf   : > { %1599 = vpow2.f32 %v877_v28  ;;  %v784_v31 = vadd.f32 %v783_v20, %v755_v29 }
  0xe0   : > { %v839_v9 = vmul.f32 1.442695, %v830_v52 }
  0xe1   : > { %v814_v35 = vadd.f32 %v2083_v17, %v784_v31  ;;  %v699_v38 = vpop.f32.mrf.mxu2 }
  0xe2   : > { %v700_v55 = vadd.f32 %v699_v38, %v671_v51 }
  0xe3   : > { %v870_v37 = vsub.f32 0.0, %v814_v35 }
  0xe4   : > { %v728_v40 = vpop.f32.mrf.mxu3  ;;  %v759_v45 = vpop.f32.mrf.mxu0  ;;  %v2113_v7 = vadd.f32 %v2089_v26, %v700_v55 }
  0xe5   : > { %v1600_v41 = vpop.eup %1599  ;;  %v879_v42 = vmul.f32 1.442695, %v870_v37  ;;  %v758_v43 = vadd.f32 %v757_v30, %v728_v40  ;;  %v788_v50 = vpop.f32.mrf.mxu1 }
  0xe6   : > { %v2096_v44 = vadd.f32 1.0, %v1600_v41  ;;  %v831_v6 = vmin.f32 %v2113_v7, 0.0  ;;  %vm823_vm11 = vcmp.gt.f32.partialorder %v2113_v7, 0.0 }
  0xe7   : > { %1601 = vpow2.f32 %v879_v42  ;;  %v787_v47 = vadd.f32 %v786_v32, %v758_v43 }
  0xe8   : > { %1603 = vrcp.f32 %v2096_v44  ;;  %v910_v23 = vand.u32 2147483647, %v2096_v44  ;;  %v912_v30 = vand.u32 2147483648, %v2096_v44  ;;  %vm906_vm3 = vweird.f32 %v2096_v44 }
  0xe9   : > { %v815_v49 = vadd.f32 %v2083_v17, %v787_v47  ;;  %v701_v8 = vpop.f32.mrf.mxu2  ;;  %1605 = vpow2.f32 %v837_v48  ;;  %v841_v35 = vmul.f32 1.442695, %v831_v6 }
  0xea   : > { %v702_v13 = vadd.f32 %v701_v8, %v673_v63  ;;  %vm2138_vm5 = vcmp.eq.f32.partialorder %v910_v23, 8.507059e+37 }
  0xeb   : > { %v871_v3 = vsub.f32 0.0, %v815_v49 }
  0xec   : > { %v730_v53 = vpop.f32.mrf.mxu3  ;;  %v762_v1 = vpop.f32.mrf.mxu0  ;;  %v2122_v25 = vadd.f32 %v2089_v26, %v702_v13 }
  0xed   : > { %v1602_v54 = vpop.eup %1601  ;;  %v881_v56 = vmul.f32 1.442695, %v871_v3  ;;  %v760_v57 = vadd.f32 %v759_v45, %v730_v53  ;;  %v791_v16 = vpop.f32.mrf.mxu1 }
  0xee   : > { %v2104_v59 = vpop.eup %1603  ;;  %v2106_v4 = vadd.f32 1.0, %v1602_v54 }
  0xef   : > { %v902_v60 = vmul.f32 %v2104_v59, %v2096_v44  ;;  %1607 = vpow2.f32 %v881_v56  ;;  %v789_v62 = vadd.f32 %v788_v50, %v760_v57  ;;  %v1606_v12 = vpop.eup %1605  ;;  %vm907_vm0 = vweird.f32 %v2104_v59 }
  0xf0   : > { %1609 = vrcp.f32 %v2106_v4  ;;  %v1462_v5 = vadd.f32 -1.0, %v1606_v12  ;;  %v927_v34 = vand.u32 2147483648, %v2106_v4  ;;  %vm2134_vm4 = vmor %vm906_vm3, %vm907_vm0  ;;  %v925_v39 = vand.u32 2147483647, %v2106_v4 }
  0xf1   : > { %v903_v2 = vsub.f32 1.0, %v902_v60  ;;  %v816_v10 = vadd.f32 %v2083_v17, %v789_v62  ;;  %1611 = vpow2.f32 %v839_v9  ;;  %v704_v18 = vpop.f32.mrf.mxu2  ;;  %v913_v44 = vor.u32 1.1754944e-38, %v912_v30 }
  0xf2   : > { %v861_v36 = vsel %vm821_vm1, %v2092_v33, %v1462_v5  ;;  %v832_v33 = vmin.f32 %v2122_v25, 0.0  ;;  %v705_v47 = vadd.f32 %v704_v18, %v2070_v58  ;;  %vm921_vm7 = vweird.f32 %v2106_v4 }
  0xf3   : > { %v904_v14 = vmul.f32 %v2104_v59, %v903_v2  ;;  %v872_v15 = vsub.f32 0.0, %v816_v10  ;;  %v928_v3 = vor.u32 1.1754944e-38, %v927_v34  ;;  %vm926_vm9 = vcmp.eq.f32.partialorder %v925_v39, 8.507059e+37 }
  0xf4   : > { %v733_v19 = vpop.f32.mrf.mxu3  ;;  %v764_v41 = vpop.f32.mrf.mxu0  ;;  %v2165_v62 = vadd.f32 %v2089_v26, %v705_v47  ;;  %vm824_vm1 = vcmp.gt.f32.partialorder %v2122_v25, 0.0 }
  0xf5   : > { %v1608_v20 = vpop.eup %1607  ;;  %v883_v21 = vmul.f32 1.442695, %v872_v15  ;;  %v763_v27 = vadd.f32 %v762_v1, %v733_v19  ;;  %v905_v28 = vadd.f32 %v2104_v59, %v904_v14  ;;  %v793_v8 = vpop.f32.mrf.mxu1 }
  0xf6   : > { %v1610_v22 = vpop.eup %1609  ;;  %v2119_v24 = vadd.f32 1.0, %v1608_v20  ;;  %v833_v18 = vmin.f32 %v2165_v62, 0.0 }
  0xf7   : > { %v917_v29 = vmul.f32 %v1610_v22, %v2106_v4  ;;  %1613 = vpow2.f32 %v883_v21  ;;  %v1612_v31 = vpop.eup %1611  ;;  %v792_v40 = vadd.f32 %v791_v16, %v763_v27  ;;  %v909_v42 = vsel %vm2134_vm4, %v2104_v59, %v905_v28 }
  0xf8   : > { %1615 = vrcp.f32 %v2119_v24  ;;  %vm922_vm6 = vweird.f32 %v1610_v22  ;;  %v1463_v45 = vadd.f32 -1.0, %v1612_v31  ;;  %v914_v54 = vsel %vm2138_vm5, %v913_v44, %v909_v42 }
  0xf9   : > { %v918_v32 = vsub.f32 1.0, %v917_v29  ;;  %v817_v48 = vadd.f32 %v2083_v17, %v792_v40  ;;  %v706_v49 = vpop.f32.mrf.mxu2  ;;  %1617 = vpow2.f32 %v841_v35  ;;  %vm923_vm8 = vmor %vm921_vm7, %vm922_vm6  ;;  %v843_v4 = vmul.f32 1.442695, %v832_v33 }
  0xfa   : > { %v862_v60 = vsel %vm822_vm2, %v2099_v46, %v1463_v45  ;;  %v2167_v63 = vmul.f32 %v914_v54, %v861_v36  ;;  %v707_v46 = vadd.f32 %v706_v49, %v2072_v61  ;;  %v940_v16 = vand.u32 2147483647, %v2119_v24 }
  0xfb   : > { %v919_v43 = vmul.f32 %v1610_v22, %v918_v32  ;;  %v873_v55 = vsub.f32 0.0, %v817_v48  ;;  %v942_v61 = vand.u32 2147483648, %v2119_v24  ;;  %vm936_vm12 = vweird.f32 %v2119_v24 }
  0xfc   : > { %v735_v50 = vpop.f32.mrf.mxu3  ;;  %v767_v20 = vpop.f32.mrf.mxu0  ;;  %vm2193_vm13 = vcmp.eq.f32.partialorder %v940_v16, 8.507059e+37  ;;  %v845_v34 = vmul.f32 1.442695, %v833_v18  ;;  %vm825_vm4 = vcmp.gt.f32.partialorder %v2165_v62, 0.0 }
  0xfd   : > { %v1614_v51 = vpop.eup %1613  ;;  %v920_v52 = vadd.f32 %v1610_v22, %v919_v43  ;;  %v765_v56 = vadd.f32 %v764_v41, %v735_v50  ;;  %v885_v10 = vmul.f32 1.442695, %v873_v55  ;;  %v796_v31 = vpop.f32.mrf.mxu1  ;;  %v943_v39 = vor.u32 1.1754944e-38, %v942_v61 }
  0xfe   : > { %v2150_v53 = vpop.eup %1615  ;;  %v2155_v58 = vadd.f32 1.0, %v1614_v51 }
  0xff   : > { %v924_v57 = vsel %vm923_vm8, %v1610_v22, %v920_v52  ;;  %v932_v59 = vmul.f32 %v2150_v53, %v2119_v24  ;;  %v794_v12 = vadd.f32 %v793_v8, %v765_v56  ;;  %v1618_v13 = vpop.eup %1617  ;;  %vm937_vm10 = vweird.f32 %v2150_v53 }
 0x100   : > { %v929_v9 = vsel %vm926_vm9, %v928_v3, %v924_v57  ;;  %1619 = vrcp.f32 %v2155_v58  ;;  %v2188_v22 = vadd.f32 %v2089_v26, %v707_v46  ;;  %v1464_v29 = vadd.f32 -1.0, %v1618_v13  ;;  %vm2199_vm14 = vmor %vm936_vm12, %vm937_vm10 }
 0x101   : > { %v2169_v1 = vmul.f32 %v929_v9, %v862_v60  ;;  %v933_v2 = vsub.f32 1.0, %v932_v59  ;;  %1621 = vpow2.f32 %v843_v4  ;;  %v818_v19 = vadd.f32 %v2083_v17, %v794_v12  ;;  %v709_v27 = vpop.f32.mrf.mxu2 }
 0x102   : > { %1623 = vpow2.f32 %v885_v10  ;;  %v957_v24 = vand.u32 2147483648, %v2155_v58  ;;  %v710_v41 = vadd.f32 %v709_v27, %v2074_v0  ;;  %v834_v33 = vmin.f32 %v2188_v22, 0.0 }
 0x103   : > { %v1536_v14 = vpack.c.bf16 %v2169_v1, %v2167_v63  ;;  %v934_v15 = vmul.f32 %v2150_v53, %v933_v2  ;;  %v874_v23 = vsub.f32 0.0, %v818_v19  ;;  %v955_v47 = vand.u32 2147483647, %v2155_v58 }
 0x104   : > { %v738_v5 = vpop.f32.mrf.mxu3  ;;  %vm951_vm0 = vweird.f32 %v2155_v58  ;;  %v2218_v3 = vadd.f32 %v2089_v26, %v710_v41  ;;  %v863_v8 = vsel %vm823_vm11, %v2113_v7, %v1464_v29  ;;  %v847_v54 = vmul.f32 1.442695, %v834_v33 }
 0x105   : > { %1537 = vst [vmem:[%s2174_s29] sm:$0xff] %v1536_v14   ;;  %v935_v21 = vadd.f32 %v2150_v53, %v934_v15  ;;  %v768_v28 = vadd.f32 %v767_v20, %v738_v5  ;;  %v887_v35 = vmul.f32 1.442695, %v874_v23  ;;  %vm956_vm3 = vcmp.eq.f32.partialorder %v955_v47, 8.507059e+37  ;;  %v798_v46 = vpop.f32.mrf.mxu1 }
 0x106   : > { %v1620_v6 = vpop.eup %1619  ;;  %v835_v10 = vmin.f32 %v2218_v3, 0.0  ;;  %v1059_v18 = vmul.f32 %v2169_v1, %v2169_v1  ;;  %vm826_vm10 = vcmp.gt.f32.partialorder %v2188_v22, 0.0 }
 0x107   : > { %v947_v30 = vmul.f32 %v1620_v6, %v2155_v58  ;;  %v797_v36 = vadd.f32 %v796_v31, %v768_v28  ;;  %v1622_v37 = vpop.eup %1621  ;;  %v939_v43 = vsel %vm2199_vm14, %v2150_v53, %v935_v21  ;;  %1625 = vpow2.f32 %v887_v35  ;;  %v769_v58 = vpop.f32.mrf.mxu0 }
 0x108   : > { %v1624_v42 = vpop.eup %1623  ;;  %vm952_vm15 = vweird.f32 %v1620_v6  ;;  %v1465_v49 = vadd.f32 -1.0, %v1622_v37  ;;  %1627 = vpow2.f32 %v845_v34  ;;  %v944_v51 = vsel %vm2193_vm13, %v943_v39, %v939_v43 }
 0x109   : > { %v948_v40 = vsub.f32 1.0, %v947_v30  ;;  %v819_v44 = vadd.f32 %v2083_v17, %v797_v36  ;;  %v2211_v48 = vadd.f32 1.0, %v1624_v42  ;;  %vm953_vm2 = vmor %vm951_vm0, %vm952_vm15  ;;  %v958_v53 = vor.u32 1.1754944e-38, %v957_v24  ;;  %v711_v16 = vpop.f32.mrf.mxu2 }
 0x10a   : > { %v2224_v4 = vmul.f32 %v944_v51, %v863_v8  ;;  %v864_v60 = vsel %vm824_vm1, %v2122_v25, %v1465_v49  ;;  %v849_v20 = vmul.f32 1.442695, %v835_v10  ;;  %v1058_v21 = vmul.f32 %v2167_v63, %v2167_v63 }
 0x10b   : > { %v949_v45 = vmul.f32 %v1620_v6, %v948_v40  ;;  %v875_v0 = vsub.f32 0.0, %v819_v44  ;;  %1629 = vrcp.f32 %v2211_v48  ;;  %v970_v23 = vand.u32 2147483647, %v2211_v48 }
 0x10c   : > { %v740_v50 = vpop.f32.mrf.mxu3  ;;  %v972_v27 = vand.u32 2147483648, %v2211_v48  ;;  %v712_v28 = vadd.f32 %v711_v16, %v2078_v11  ;;  %v1066_v35 = vadd.f32 %v1059_v18, %v1058_v21  ;;  %vm966_vm6 = vweird.f32 %v2211_v48 }
 0x10d   : > { %v950_v52 = vadd.f32 %v1620_v6, %v949_v45  ;;  %v889_v56 = vmul.f32 1.442695, %v875_v0  ;;  %v770_v57 = vadd.f32 %v769_v58, %v740_v50  ;;  %v1626_v59 = vpop.eup %1625  ;;  %v1060_v38 = vmul.f32 %v2224_v4, %v2224_v4 }
 0x10e   : > { %v2229_v7 = vadd.f32 1.0, %v1626_v59  ;;  %v1628_v12 = vpop.eup %1627  ;;  %v973_v39 = vor.u32 1.1754944e-38, %v972_v27  ;;  %vm971_vm8 = vcmp.eq.f32.partialorder %v970_v23, 8.507059e+37  ;;  %vm827_vm1 = vcmp.gt.f32.partialorder %v2218_v3, 0.0 }
 0x10f   : > { %v954_v55 = vsel %vm953_vm2, %v1620_v6, %v950_v52  ;;  %1631 = vpow2.f32 %v889_v56  ;;  %v799_v13 = vadd.f32 %v798_v46, %v770_v57  ;;  %v1466_v19 = vadd.f32 -1.0, %v1628_v12 }
 0x110   : > { %v959_v9 = vsel %vm956_vm3, %v958_v53, %v954_v55  ;;  %1633 = vpow2.f32 %v847_v54  ;;  %v987_v43 = vand.u32 2147483648, %v2229_v7  ;;  %v985_v45 = vand.u32 2147483647, %v2229_v7 }
 0x111   : > { %v2227_v2 = vmul.f32 %v959_v9, %v864_v60  ;;  %v1630_v14 = vpop.eup %1629  ;;  %1635 = vrcp.f32 %v2229_v7  ;;  %v820_v61 = vadd.f32 %v2083_v17, %v799_v13  ;;  %v1045_v17 = vadd.f32 %v2169_v1, %v2167_v63 }
 0x112   : > { %v962_v25 = vmul.f32 %v1630_v14, %v2211_v48  ;;  %vm967_vm5 = vweird.f32 %v1630_v14  ;;  %v865_v36 = vsel %vm825_vm4, %v2165_v62, %v1466_v19  ;;  %1637 = vpow2.f32 %v849_v20 }
 0x113   : > { %v1541_v15 = vpack.c.bf16 %v2227_v2, %v2224_v4  ;;  %v876_v32 = vsub.f32 0.0, %v820_v61  ;;  %vm968_vm7 = vmor %vm966_vm6, %vm967_vm5  ;;  %v2259_v63 = vadd.f32 %v2089_v26, %v712_v28  ;;  %v1061_v41 = vmul.f32 %v2227_v2, %v2227_v2 }
 0x114   : > { %v963_v5 = vsub.f32 1.0, %v962_v25  ;;  %v1046_v49 = vadd.f32 %v1045_v17, %v2224_v4  ;;  %v1067_v0 = vadd.f32 %v1066_v35, %v1060_v38  ;;  %vm981_vm11 = vweird.f32 %v2229_v7 }
 0x115   : > { %1553 = vst [vmem:[%s2174_s29 + $0x8] sm:$0xff] %v1541_v15   ;;  %v1632_v6 = vpop.eup %1631  ;;  %v891_v1 = vmul.f32 1.442695, %v876_v32  ;;  %v836_v26 = vmin.f32 %v2259_v63, 0.0  ;;  %v988_v8 = vor.u32 1.1754944e-38, %v987_v43  ;;  %vm986_vm13 = vcmp.eq.f32.partialorder %v985_v45, 8.507059e+37 }
 0x116   : > { %v1634_v29 = vpop.eup %1633  ;;  %v964_v30 = vmul.f32 %v1630_v14, %v963_v5  ;;  %v2246_v31 = vadd.f32 1.0, %v1632_v6  ;;  %v1047_v54 = vadd.f32 %v1046_v49, %v2227_v2  ;;  %v1068_v58 = vadd.f32 %v1067_v0, %v1061_v41 }
 0x117   : > { %v1636_v34 = vpop.eup %1635  ;;  %v1467_v62 = vadd.f32 -1.0, %v1634_v29  ;;  %v851_v60 = vmul.f32 1.442695, %v836_v26  ;;  %vm828_vm6 = vcmp.gt.f32.partialorder %v2259_v63, 0.0 }
 0x118   : > { %v965_v37 = vadd.f32 %v1630_v14, %v964_v30  ;;  %v977_v11 = vmul.f32 %v1636_v34, %v2229_v7  ;;  %1639 = vrcp.f32 %v2246_v31  ;;  %vm982_vm9 = vweird.f32 %v1636_v34  ;;  %v1638_v47 = vpop.eup %1637 }
 0x119   : > { %1641 = vpow2.f32 %v891_v1  ;;  %v866_v52 = vsel %vm826_vm10, %v2188_v22, %v1467_v62  ;;  %vm983_vm12 = vmor %vm981_vm11, %vm982_vm9  ;;  %v1468_v59 = vadd.f32 -1.0, %v1638_v47  ;;  %v1002_v10 = vand.u32 2147483648, %v2246_v31 }
 0x11a   : > { %v969_v40 = vsel %vm968_vm7, %v1630_v14, %v965_v37  ;;  %v978_v24 = vsub.f32 1.0, %v977_v11  ;;  %v1000_v13 = vand.u32 2147483647, %v2246_v31  ;;  %vm996_vm15 = vweird.f32 %v2246_v31 }
 0x11b   : > { %v974_v42 = vsel %vm971_vm8, %v973_v39, %v969_v40  ;;  %v1003_v18 = vor.u32 1.1754944e-38, %v1002_v10  ;;  %v867_v20 = vsel %vm827_vm1, %v2218_v3, %v1468_v59  ;;  %vm1079_vm8 = vcmask 1040384  }
 0x11c   : > { %v1025_v33 = vmul.f32 %v974_v42, %v865_v36  ;;  %v979_v44 = vmul.f32 %v1636_v34, %v978_v24  ;;  %vm1001_vm2 = vcmp.eq.f32.partialorder %v1000_v13, 8.507059e+37 }
 0x11e   : > { %v1640_v48 = vpop.eup %1639  ;;  %v980_v50 = vadd.f32 %v1636_v34, %v979_v44  ;;  %v1062_v51 = vmul.f32 %v1025_v33, %v1025_v33  ;;  %v1048_v9 = vadd.f32 %v1047_v54, %v1025_v33 }
 0x11f   : > { %v992_v53 = vmul.f32 %v1640_v48, %v2246_v31  ;;  %v1642_v56 = vpop.eup %1641  ;;  %vm997_vm14 = vweird.f32 %v1640_v48 }
 0x120   : > { %v984_v55 = vsel %vm983_vm12, %v1636_v34, %v980_v50  ;;  %v900_v22 = vadd.f32 1.0, %v1642_v56  ;;  %v1069_v46 = vadd.f32 %v1068_v58, %v1062_v51  ;;  %vm998_vm0 = vmor %vm996_vm15, %vm997_vm14 }
 0x121   : > { %v989_v57 = vsel %vm986_vm13, %v988_v8, %v984_v55  ;;  %v993_v4 = vsub.f32 1.0, %v992_v53 }
 0x122   : > { %v1026_v7 = vmul.f32 %v989_v57, %v866_v52  ;;  %1643 = vrcp.f32 %v900_v22  ;;  %v1017_v31 = vand.u32 2147483648, %v900_v22  ;;  %v1015_v34 = vand.u32 2147483647, %v900_v22 }
 0x123   : > { %v994_v12 = vmul.f32 %v1640_v48, %v993_v4  ;;  %1645 = vpow2.f32 %v851_v60  ;;  %vm1011_vm4 = vweird.f32 %v900_v22 }
 0x124   : > { %v1546_v2 = vpack.c.bf16 %v1026_v7, %v1025_v33  ;;  %v1049_v14 = vadd.f32 %v1048_v9, %v1026_v7  ;;  %v1063_v15 = vmul.f32 %v1026_v7, %v1026_v7  ;;  %v1018_v36 = vor.u32 1.1754944e-38, %v1017_v31 }
 0x125   : > { %v995_v25 = vadd.f32 %v1640_v48, %v994_v12  ;;  %vm1016_vm7 = vcmp.eq.f32.partialorder %v1015_v34, 8.507059e+37 }
 0x126   : > { %1554 = vst [vmem:[%s2174_s29 + $0x10] sm:$0xff] %v1546_v2   ;;  %v1070_v16 = vadd.f32 %v1069_v46, %v1063_v15 }
 0x127   : > { %v999_v19 = vsel %vm998_vm0, %v1640_v48, %v995_v25 }
 0x128   : > { %v1004_v5 = vsel %vm1001_vm2, %v1003_v18, %v999_v19  ;;  %v1644_v6 = vpop.eup %1643 }
 0x129   : > { %v1027_v61 = vmul.f32 %v1004_v5, %v867_v20  ;;  %v1007_v27 = vmul.f32 %v1644_v6, %v900_v22  ;;  %v1646_v28 = vpop.eup %1645  ;;  %vm1012_vm3 = vweird.f32 %v1644_v6 }
 0x12a   : > { %v1469_v17 = vadd.f32 -1.0, %v1646_v28  ;;  %vm1013_vm5 = vmor %vm1011_vm4, %vm1012_vm3 }
 0x12b   : > { %v1050_v21 = vadd.f32 %v1049_v14, %v1027_v61  ;;  %v1064_v23 = vmul.f32 %v1027_v61, %v1027_v61  ;;  %v1008_v30 = vsub.f32 1.0, %v1007_v27 }
 0x12c   : > { %v868_v37 = vsel %vm828_vm6, %v2259_v63, %v1469_v17 }
 0x12d   : > { %v1071_v29 = vadd.f32 %v1070_v16, %v1064_v23  ;;  %v1009_v32 = vmul.f32 %v1644_v6, %v1008_v30 }
 0x12f   : > { %v1010_v35 = vadd.f32 %v1644_v6, %v1009_v32 }
 0x131   : > { %v1014_v3 = vsel %vm1013_vm5, %v1644_v6, %v1010_v35 }
 0x132   : > { %v1019_v11 = vsel %vm1016_vm7, %v1018_v36, %v1014_v3 }
 0x133   : > { %v1028_v38 = vmul.f32 %v1019_v11, %v868_v37 }
 0x135   : > { %v1551_v39 = vpack.c.bf16 %v1028_v38, %v1027_v61  ;;  %v1051_v1 = vadd.f32 %v1050_v21, %v1028_v38  ;;  %v1065_v40 = vmul.f32 %v1028_v38, %v1028_v38 }
 0x137   : > { %1555 = vst [vmem:[%s2174_s29 + $0x18] sm:$0xff] %v1551_v39   ;;  %v1052_v62 = vrot.slane %v1051_v1, 4  ;;  %v1072_v24 = vadd.f32 %v1071_v29, %v1065_v40 }
 0x139   : > { %v1053_v41 = vadd.f32 %v1052_v62, %v1051_v1  ;;  %v1073_v42 = vrot.slane %v1072_v24, 4 }
 0x13b   : > { %v1054_v43 = vrot.slane %v1053_v41, 2  ;;  %v1074_v33 = vadd.f32 %v1073_v42, %v1072_v24 }
 0x13d   : > { %v1055_v44 = vadd.f32 %v1054_v43, %v1053_v41  ;;  %v1075_v45 = vrot.slane %v1074_v33, 2 }
 0x13f   : > { %v1056_v47 = vrot.slane %v1055_v44, 1  ;;  %v1076_v26 = vadd.f32 %v1075_v45, %v1074_v33 }
 0x141   : > { %v1077_v48 = vrot.slane %v1076_v26, 1  ;;  %v1057_v63 = vadd.f32 %v1056_v47, %v1055_v44 }
 0x143   : > { %v1078_v49 = vadd.f32 %v1077_v48, %v1076_v26 }
 0x145   : > { %v1080_v0 = vsel %vm1079_vm8, %v1057_v63, %v1078_v49 }
 0x146   : > { %1081 = vst [vmem:[%s258_s7] sm:$0x3] %v1080_v0 }
 0x147 PF: > { %s15_s17 = sadd.s32 1, %s1669_s17   ;;  %s2307_s15 = smov %s1665_s16 }
 0x148   : > { %p12_p5 = scmp.ge.s32.totalorder %s15_s17, 4   ;;  %s2308_s16 = smov %s2310_s18 }
 0x14a   :  { %14 = sbr.rel (!%p12_p5) target bundleno = 2 (0x2), region = 74 }

// kernel: gated_coarse2fine_forward.43
= control target key start
LH: loop header
LB: loop body
LE: loop exit
PB: predicated region body
PF: predicated region fallthrough
CT: control target
= control target key end

     0   :  { %s1395_s15 = smov 0   ;;  %s1397_s16 = smov 0   ;;  %s1830_s0 = inlined_call_operand.vmem [shape: bf16[2,64,256], index: 0, kind: input, shape index: {}]   ;;  %s1831_s1 = inlined_call_operand.vmem [shape: bf16[256,256], index: 1, kind: input, shape index: {}]   ;;  %s1832_s2 = inlined_call_operand.vmem [shape: f32[2,128], index: 2, kind: input, shape index: {}]   ;;  %s1833_s3 = inlined_call_operand.vmem [shape: bf16[2,64,128], index: 3, kind: output, shape index: {0}]   ;;  %s1834_s4 = inlined_call_operand.vmem [shape: f32[2,1,2,128], index: 4, kind: output, shape index: {1}]  }
   0x1   :  { %s1399_s17 = smov 0  }
   0x2 LB: > { %s27_s18 = sadd.s32 1, %s1364_s16  ;;  %p1031_p0 = scmp.ge.s32.totalorder %s1368_s17, 1  ;;  %s1368_s17 = sphi %s1399_s17, %s15_s17   ;;  %s1364_s16 = sphi %s1397_s16, %s1842_s16   ;;  %s1360_s15 = sphi %s1395_s15, %s1841_s15  }
   0x3   : > { %p29_p1 = scmp.ge.s32.totalorder %s27_s18, 2  ;;  %p189_p2 = scmp.lt.s32.totalorder %s1368_s17, 3 }
   0x5   : > { %s1844_s18 = smov (%p29_p1, %s27_s18), 0  ;;  %p190_p3 = pnand %p1031_p0, %p189_p2 }
   0x6   : > { %p232_p4 = scmp.lt.s32.totalorder (!%p190_p3), %s1360_s15, 1 }
   0x7   : > { %193 = sbr.rel (%p190_p3) target bundleno = 293 (0x125), region = 32 }
   0xc   : > { %v1231_v0 = vld [vmem:[%s1831_s1 + $0x74] sm:$0xf]  ;;  %v1129_v1 = vld [vmem:[%s1831_s1 + $0x78] sm:$0xf0]  ;;  %v1127_v5 = vld [vmem:[%s1831_s1 + $0x70] sm:$0xf] }
   0xd   : > { %v1247_v2 = vld [vmem:[%s1831_s1 + $0xf4] sm:$0xf]  ;;  %v1132_v3 = vor.u32 %v1231_v0, %v1129_v1  ;;  %v1193_v4 = vld [vmem:[%s1831_s1 + $0xf8] sm:$0xf0]  ;;  %v1232_v6 = vld [vmem:[%s1831_s1 + $0x74] sm:$0xf0] }
   0xe   : > { %v1196_v7 = vor.u32 %v1247_v2, %v1193_v4  ;;  %v1128_v8 = vor.u32 %v1232_v6, %v1127_v5  ;;  %v1191_v9 = vld [vmem:[%s1831_s1 + $0xf0] sm:$0xf]  ;;  %v1248_v10 = vld [vmem:[%s1831_s1 + $0xf4] sm:$0xf0]  ;;  %v1229_v11 = vld [vmem:[%s1831_s1 + $0x64] sm:$0xf] }
   0xf   : > { %557 = vmatpush.bf16.msra.mxu2 %v1132_v3  ;;  %v1192_v12 = vor.u32 %v1248_v10, %v1191_v9  ;;  %v1121_v13 = vld [vmem:[%s1831_s1 + $0x68] sm:$0xf0]  ;;  %v1245_v14 = vld [vmem:[%s1831_s1 + $0xe4] sm:$0xf]  ;;  %v1119_v18 = vld [vmem:[%s1831_s1 + $0x60] sm:$0xf] }
  0x10   : > { %v1185_v15 = vld [vmem:[%s1831_s1 + $0xe8] sm:$0xf0]  ;;  %586 = vmatpush.bf16.msra.mxu3 %v1196_v7  ;;  %499 = vmatpush.bf16.msra.mxu0 %v1128_v8  ;;  %v1124_v16 = vor.u32 %v1229_v11, %v1121_v13  ;;  %v1230_v19 = vld [vmem:[%s1831_s1 + $0x64] sm:$0xf0]  ;;  %v1183_v20 = vld [vmem:[%s1831_s1 + $0xe0] sm:$0xf] }
  0x11   : > { %v1188_v17 = vor.u32 %v1245_v14, %v1185_v15  ;;  %528 = vmatpush.bf16.msra.mxu1 %v1192_v12  ;;  %v1120_v21 = vor.u32 %v1230_v19, %v1119_v18  ;;  %v1246_v22 = vld [vmem:[%s1831_s1 + $0xe4] sm:$0xf0]  ;;  %v1227_v23 = vld [vmem:[%s1831_s1 + $0x54] sm:$0xf]  ;;  %v1113_v24 = vld [vmem:[%s1831_s1 + $0x58] sm:$0xf0] }
  0x12   : > { %v1184_v25 = vor.u32 %v1246_v22, %v1183_v20  ;;  %v1243_v26 = vld [vmem:[%s1831_s1 + $0xd4] sm:$0xf]  ;;  %v1177_v27 = vld [vmem:[%s1831_s1 + $0xd8] sm:$0xf0]  ;;  %v1111_v28 = vld [vmem:[%s1831_s1 + $0x50] sm:$0xf]  ;;  %v1116_v29 = vor.u32 %v1227_v23, %v1113_v24 }
  0x13   : > { %558 = vmatpush.bf16.msra.mxu2 %v1124_v16  ;;  %v1228_v30 = vld [vmem:[%s1831_s1 + $0x54] sm:$0xf0]  ;;  %v1175_v31 = vld [vmem:[%s1831_s1 + $0xd0] sm:$0xf]  ;;  %v1180_v33 = vor.u32 %v1243_v26, %v1177_v27  ;;  %v1225_v35 = vld [vmem:[%s1831_s1 + $0x44] sm:$0xf] }
  0x14   : > { %v1244_v32 = vld [vmem:[%s1831_s1 + $0xd4] sm:$0xf0]  ;;  %587 = vmatpush.bf16.msra.mxu3 %v1188_v17  ;;  %500 = vmatpush.bf16.msra.mxu0 %v1120_v21  ;;  %v1112_v34 = vor.u32 %v1228_v30, %v1111_v28  ;;  %v1105_v36 = vld [vmem:[%s1831_s1 + $0x48] sm:$0xf0]  ;;  %v1241_v37 = vld [vmem:[%s1831_s1 + $0xc4] sm:$0xf] }
  0x15   : > { %529 = vmatpush.bf16.msra.mxu1 %v1184_v25  ;;  %v1176_v38 = vor.u32 %v1244_v32, %v1175_v31  ;;  %v1169_v39 = vld [vmem:[%s1831_s1 + $0xc8] sm:$0xf0]  ;;  %v1103_v40 = vld [vmem:[%s1831_s1 + $0x40] sm:$0xf]  ;;  %v1226_v41 = vld [vmem:[%s1831_s1 + $0x44] sm:$0xf0]  ;;  %v1108_v44 = vor.u32 %v1225_v35, %v1105_v36 }
  0x16   : > { %v1167_v42 = vld [vmem:[%s1831_s1 + $0xc0] sm:$0xf]  ;;  %v1242_v43 = vld [vmem:[%s1831_s1 + $0xc4] sm:$0xf0]  ;;  %v1172_v45 = vor.u32 %v1241_v37, %v1169_v39  ;;  %v1104_v46 = vor.u32 %v1226_v41, %v1103_v40  ;;  %v1223_v47 = vld [vmem:[%s1831_s1 + $0x34] sm:$0xf] }
  0x17   : > { %559 = vmatpush.bf16.msra.mxu2 %v1116_v29  ;;  %v1097_v48 = vld [vmem:[%s1831_s1 + $0x38] sm:$0xf0]  ;;  %v1239_v49 = vld [vmem:[%s1831_s1 + $0xb4] sm:$0xf]  ;;  %v1168_v50 = vor.u32 %v1242_v43, %v1167_v42  ;;  %v1095_v52 = vld [vmem:[%s1831_s1 + $0x30] sm:$0xf] }
  0x18   : > { %588 = vmatpush.bf16.msra.mxu3 %v1180_v33  ;;  %501 = vmatpush.bf16.msra.mxu0 %v1112_v34  ;;  %v1161_v51 = vld [vmem:[%s1831_s1 + $0xb8] sm:$0xf0]  ;;  %v1224_v53 = vld [vmem:[%s1831_s1 + $0x34] sm:$0xf0]  ;;  %v1159_v54 = vld [vmem:[%s1831_s1 + $0xb0] sm:$0xf]  ;;  %v1100_v56 = vor.u32 %v1223_v47, %v1097_v48 }
  0x19   : > { %530 = vmatpush.bf16.msra.mxu1 %v1176_v38  ;;  %v1240_v55 = vld [vmem:[%s1831_s1 + $0xb4] sm:$0xf0]  ;;  %v1164_v57 = vor.u32 %v1239_v49, %v1161_v51  ;;  %v1096_v58 = vor.u32 %v1224_v53, %v1095_v52  ;;  %v1221_v59 = vld [vmem:[%s1831_s1 + $0x24] sm:$0xf]  ;;  %v1089_v60 = vld [vmem:[%s1831_s1 + $0x28] sm:$0xf0] }
  0x1a   : > { %v1237_v61 = vld [vmem:[%s1831_s1 + $0xa4] sm:$0xf]  ;;  %v1160_v62 = vor.u32 %v1240_v55, %v1159_v54  ;;  %v1153_v63 = vld [vmem:[%s1831_s1 + $0xa8] sm:$0xf0]  ;;  %v1087_v0 = vld [vmem:[%s1831_s1 + $0x20] sm:$0xf]  ;;  %v1092_v4 = vor.u32 %v1221_v59, %v1089_v60 }
  0x1b   : > { %560 = vmatpush.bf16.msra.mxu2 %v1108_v44  ;;  %v1222_v1 = vld [vmem:[%s1831_s1 + $0x24] sm:$0xf0]  ;;  %v1151_v2 = vld [vmem:[%s1831_s1 + $0xa0] sm:$0xf]  ;;  %v1219_v5 = vld [vmem:[%s1831_s1 + $0x14] sm:$0xf]  ;;  %v1156_v7 = vor.u32 %v1237_v61, %v1153_v63 }
  0x1c   : > { %589 = vmatpush.bf16.msra.mxu3 %v1172_v45  ;;  %502 = vmatpush.bf16.msra.mxu0 %v1104_v46  ;;  %v1238_v3 = vld [vmem:[%s1831_s1 + $0xa4] sm:$0xf0]  ;;  %v1081_v6 = vld [vmem:[%s1831_s1 + $0x18] sm:$0xf0]  ;;  %v1088_v8 = vor.u32 %v1222_v1, %v1087_v0  ;;  %v1235_v9 = vld [vmem:[%s1831_s1 + $0x94] sm:$0xf] }
  0x1d   : > { %531 = vmatpush.bf16.msra.mxu1 %v1168_v50  ;;  %v1145_v10 = vld [vmem:[%s1831_s1 + $0x98] sm:$0xf0]  ;;  %v1079_v11 = vld [vmem:[%s1831_s1 + $0x10] sm:$0xf]  ;;  %v1152_v12 = vor.u32 %v1238_v3, %v1151_v2  ;;  %v1220_v13 = vld [vmem:[%s1831_s1 + $0x14] sm:$0xf0]  ;;  %v1084_v16 = vor.u32 %v1219_v5, %v1081_v6 }
  0x1e   : > { %v1143_v14 = vld [vmem:[%s1831_s1 + $0x90] sm:$0xf]  ;;  %v1236_v15 = vld [vmem:[%s1831_s1 + $0x94] sm:$0xf0]  ;;  %v1217_v17 = vld [vmem:[%s1831_s1 + $0x4] sm:$0xf]  ;;  %v1148_v18 = vor.u32 %v1235_v9, %v1145_v10  ;;  %v1080_v19 = vor.u32 %v1220_v13, %v1079_v11 }
  0x1f   : > { %561 = vmatpush.bf16.msra.mxu2 %v1100_v56  ;;  %s1846_s15 = smov (!%p232_p4, %s1360_s15), 1  ;;  %v1073_v20 = vld [vmem:[%s1831_s1 + $0x8] sm:$0xf0]  ;;  %v1233_v21 = vld [vmem:[%s1831_s1 + $0x84] sm:$0xf]  ;;  %v1144_v23 = vor.u32 %v1236_v15, %v1143_v14 }
  0x20   : > { %590 = vmatpush.bf16.msra.mxu3 %v1164_v57  ;;  %503 = vmatpush.bf16.msra.mxu0 %v1096_v58  ;;  %v1137_v22 = vld [vmem:[%s1831_s1 + $0x88] sm:$0xf0]  ;;  %v1071_v24 = vld [vmem:[%s1831_s1] sm:$0xf]  ;;  %v1218_v25 = vld [vmem:[%s1831_s1 + $0x4] sm:$0xf0]  ;;  %v1076_v28 = vor.u32 %v1217_v17, %v1073_v20 }
  0x21   : > { %532 = vmatpush.bf16.msra.mxu1 %v1160_v62  ;;  %s1207_s7 = sshll.u32 %s1846_s15, 6  ;;  %v1135_v26 = vld [vmem:[%s1831_s1 + $0x80] sm:$0xf]  ;;  %v1234_v27 = vld [vmem:[%s1831_s1 + $0x84] sm:$0xf0]  ;;  %v1140_v31 = vor.u32 %v1233_v21, %v1137_v22  ;;  %v1072_v32 = vor.u32 %v1218_v25, %v1071_v24  ;;  %s1208_s23 = sshll.u32 %s1846_s15, 5 }
  0x22   : > { %s1615_s14 = scalar_lea.vmem %s1830_s0, %s1207_s7  ;;  %v1136_v35 = vor.u32 %v1234_v27, %v1135_v26  ;;  %v1636_v59 = vld [vmem:[%s1832_s2 + $0x1] ss:$0 sm:$0xff]  ;;  %v1642_v5 = vld [vmem:[%s1832_s2] ss:$0 sm:$0xff]  ;;  %s1710_s26 = scalar_lea.vmem %s1833_s3, %s1208_s23 }
  0x23   : > { %562 = vmatpush.bf16.msra.mxu2 %v1092_v4  ;;  %v1039_v29 = vld [vmem:[%s1615_s14] sm:$0xf]  ;;  %v1210_v30 = vld [vmem:[%s1615_s14 + $0x4] sm:$0xf0]  ;;  %v1209_v33 = vld [vmem:[%s1615_s14 + $0x4] sm:$0xf] }
  0x24   : > { %591 = vmatpush.bf16.msra.mxu3 %v1156_v7  ;;  %504 = vmatpush.bf16.msra.mxu0 %v1088_v8  ;;  %v1041_v34 = vld [vmem:[%s1615_s14 + $0x8] sm:$0xf0]  ;;  %v1040_v36 = vor.u32 %v1210_v30, %v1039_v29  ;;  %v1047_v38 = vld [vmem:[%s1615_s14 + $0x10] sm:$0xf]  ;;  %v1212_v39 = vld [vmem:[%s1615_s14 + $0x14] sm:$0xf0] }
  0x25   : > { %533 = vmatpush.bf16.msra.mxu1 %v1152_v12  ;;  %v1044_v37 = vor.u32 %v1209_v33, %v1041_v34  ;;  %v1211_v40 = vld [vmem:[%s1615_s14 + $0x14] sm:$0xf]  ;;  %v1049_v41 = vld [vmem:[%s1615_s14 + $0x18] sm:$0xf0]  ;;  %v1048_v42 = vor.u32 %v1212_v39, %v1047_v38  ;;  %v1055_v44 = vld [vmem:[%s1615_s14 + $0x20] sm:$0xf] }
  0x26   : > { %v1052_v43 = vor.u32 %v1211_v40, %v1049_v41  ;;  %v1214_v45 = vld [vmem:[%s1615_s14 + $0x24] sm:$0xf0]  ;;  %v1213_v46 = vld [vmem:[%s1615_s14 + $0x24] sm:$0xf]  ;;  %v1057_v47 = vld [vmem:[%s1615_s14 + $0x28] sm:$0xf0] }
  0x27   : > { %563 = vmatpush.bf16.msra.mxu2 %v1084_v16  ;;  %v1056_v48 = vor.u32 %v1214_v45, %v1055_v44  ;;  %v1060_v49 = vor.u32 %v1213_v46, %v1057_v47  ;;  %v1063_v50 = vld [vmem:[%s1615_s14 + $0x30] sm:$0xf]  ;;  %v1216_v51 = vld [vmem:[%s1615_s14 + $0x34] sm:$0xf0]  ;;  %v1215_v52 = vld [vmem:[%s1615_s14 + $0x34] sm:$0xf] }
  0x28   : > { %592 = vmatpush.bf16.msra.mxu3 %v1148_v18  ;;  %505 = vmatpush.bf16.msra.mxu0 %v1080_v19  ;;  %v1065_v53 = vld [vmem:[%s1615_s14 + $0x38] sm:$0xf0]  ;;  %v1064_v54 = vor.u32 %v1216_v51, %v1063_v50  ;;  %s1036_s27 = sshll.u32 %s1846_s15, 1 }
  0x29   : > { %534 = vmatpush.bf16.msra.mxu1 %v1144_v23  ;;  %v1068_v55 = vor.u32 %v1215_v52, %v1065_v53  ;;  %s258_s30 = scalar_lea.vmem %s1834_s4, %s1036_s27 }
  0x2b   : > { %564 = vmatpush.bf16.msra.mxu2 %v1076_v28 }
  0x2c   : > { %593 = vmatpush.bf16.msra.mxu3 %v1140_v31  ;;  %506 = vmatpush.bf16.msra.mxu0 %v1072_v32 }
  0x2d   : > { %535 = vmatpush.bf16.msra.mxu1 %v1136_v35 }
  0x2e   : > { %565 = vmatmul.bf16.vlgmr.msra.gmra.mxu2 %v1040_v36 }
  0x2f   : > { %594 = vmatmul.bf16.vlgmr.msra.gmra.mxu3 %v1044_v37  ;;  %507 = vmatmul.bf16.vlgmr.msra.gmra.mxu0 %v1040_v36 }
  0x30   : > { %536 = vmatmul.bf16.vlgmr.msra.gmra.mxu1 %v1044_v37 }
  0x3e   : > { %570 = vmatmul.bf16.gmra.mxu2 %v1048_v42 }
  0x3f   : > { %599 = vmatmul.bf16.gmra.mxu3 %v1052_v43  ;;  %512 = vmatmul.bf16.gmra.mxu0 %v1048_v42 }
  0x40   : > { %541 = vmatmul.bf16.gmra.mxu1 %v1052_v43 }
  0x4e   : > { %575 = vmatmul.bf16.gmra.mxu2 %v1056_v48 }
  0x4f   : > { %604 = vmatmul.bf16.gmra.mxu3 %v1060_v49  ;;  %517 = vmatmul.bf16.gmra.mxu0 %v1056_v48 }
  0x50   : > { %546 = vmatmul.bf16.gmra.mxu1 %v1060_v49 }
  0x5e   : > { %580 = vmatmul.bf16.gmra.mxu2 %v1064_v54 }
  0x5f   : > { %609 = vmatmul.bf16.gmra.mxu3 %v1068_v55  ;;  %522 = vmatmul.bf16.gmra.mxu0 %v1064_v54 }
  0x60   : > { %551 = vmatmul.bf16.gmra.mxu1 %v1068_v55 }
  0xac   : > { %v508_v56 = vpop.f32.mrf.mxu0 }
  0xad   : > { %v537_v57 = vpop.f32.mrf.mxu1 }
  0xae   : > { %v538_v4 = vadd.f32 %v537_v57, %v508_v56 }
  0xb0   : > { %v1646_v10 = vadd.f32 %v1642_v5, %v538_v4 }
  0xb1   : > { %v566_v58 = vpop.f32.mrf.mxu2 }
  0xb2   : > { %v595_v60 = vpop.f32.mrf.mxu3  ;;  %v643_v17 = vmin.f32 %v1646_v10, 0.0  ;;  %vm635_vm1 = vcmp.gt.f32.partialorder %v1646_v10, 0.0 }
  0xb3   : > { %v596_v61 = vadd.f32 %v595_v60, %v566_v58 }
  0xb4   : > { %v510_v62 = vpop.f32.mrf.mxu0  ;;  %v651_v23 = vmul.f32 1.442695, %v643_v17 }
  0xb5   : > { %v627_v63 = vadd.f32 %v1636_v59, %v596_v61  ;;  %v539_v0 = vpop.f32.mrf.mxu1 }
  0xb6   : > { %v540_v12 = vadd.f32 %v539_v0, %v510_v62 }
  0xb7   : > { %v683_v1 = vsub.f32 0.0, %v627_v63 }
  0xb8   : > { %v1652_v20 = vadd.f32 %v1642_v5, %v540_v12 }
  0xb9   : > { %v691_v2 = vmul.f32 1.442695, %v683_v1  ;;  %v568_v3 = vpop.f32.mrf.mxu2 }
  0xba   : > { %v597_v6 = vpop.f32.mrf.mxu3  ;;  %v644_v24 = vmin.f32 %v1652_v20, 0.0  ;;  %vm636_vm4 = vcmp.gt.f32.partialorder %v1652_v20, 0.0 }
  0xbb   : > { %1298 = vpow2.f32 %v691_v2  ;;  %v598_v7 = vadd.f32 %v597_v6, %v568_v3 }
  0xbc   : > { %v513_v9 = vpop.f32.mrf.mxu0  ;;  %v653_v36 = vmul.f32 1.442695, %v644_v24 }
  0xbd   : > { %v628_v8 = vadd.f32 %v1636_v59, %v598_v7  ;;  %v542_v11 = vpop.f32.mrf.mxu1 }
  0xbe   : > { %v543_v29 = vadd.f32 %v542_v11, %v513_v9 }
  0xbf   : > { %v684_v13 = vsub.f32 0.0, %v628_v8 }
  0xc0   : > { %v1662_v39 = vadd.f32 %v1642_v5, %v543_v29 }
  0xc1   : > { %v1299_v14 = vpop.eup %1298  ;;  %v693_v15 = vmul.f32 1.442695, %v684_v13  ;;  %v571_v16 = vpop.f32.mrf.mxu2 }
  0xc2   : > { %v1649_v18 = vadd.f32 1.0, %v1299_v14  ;;  %v600_v19 = vpop.f32.mrf.mxu3  ;;  %v645_v46 = vmin.f32 %v1662_v39, 0.0  ;;  %vm637_vm10 = vcmp.gt.f32.partialorder %v1662_v39, 0.0 }
  0xc3   : > { %1300 = vpow2.f32 %v693_v15  ;;  %v601_v21 = vadd.f32 %v600_v19, %v571_v16 }
  0xc4   : > { %1302 = vrcp.f32 %v1649_v18  ;;  %v515_v26 = vpop.f32.mrf.mxu0  ;;  %v724_v57 = vand.u32 2147483647, %v1649_v18  ;;  %v726_v58 = vand.u32 2147483648, %v1649_v18  ;;  %vm720_vm2 = vweird.f32 %v1649_v18 }
  0xc5   : > { %v629_v22 = vadd.f32 %v1636_v59, %v601_v21  ;;  %v544_v27 = vpop.f32.mrf.mxu1  ;;  %1304 = vpow2.f32 %v651_v23  ;;  %v655_v62 = vmul.f32 1.442695, %v645_v46 }
  0xc6   : > { %v545_v40 = vadd.f32 %v544_v27, %v515_v26  ;;  %vm725_vm6 = vcmp.eq.f32.partialorder %v724_v57, 8.507059e+37  ;;  %v727_v8 = vor.u32 1.1754944e-38, %v726_v58 }
  0xc7   : > { %v685_v25 = vsub.f32 0.0, %v629_v22 }
  0xc8   : > { %v1667_v47 = vadd.f32 %v1642_v5, %v545_v40 }
  0xc9   : > { %v1301_v28 = vpop.eup %1300  ;;  %v695_v30 = vmul.f32 1.442695, %v685_v25  ;;  %v573_v31 = vpop.f32.mrf.mxu2 }
  0xca   : > { %v1303_v32 = vpop.eup %1302  ;;  %v1657_v33 = vadd.f32 1.0, %v1301_v28  ;;  %v602_v34 = vpop.f32.mrf.mxu3  ;;  %v646_v63 = vmin.f32 %v1667_v47, 0.0  ;;  %vm638_vm12 = vcmp.gt.f32.partialorder %v1667_v47, 0.0 }
  0xcb   : > { %v716_v35 = vmul.f32 %v1303_v32, %v1649_v18  ;;  %1306 = vpow2.f32 %v695_v30  ;;  %v603_v37 = vadd.f32 %v602_v34, %v573_v31  ;;  %v1305_v44 = vpop.eup %1304  ;;  %vm721_vm0 = vweird.f32 %v1303_v32 }
  0xcc   : > { %1308 = vrcp.f32 %v1657_v33  ;;  %v518_v49 = vpop.f32.mrf.mxu0  ;;  %v1197_v0 = vadd.f32 -1.0, %v1305_v44  ;;  %vm1678_vm3 = vmor %vm720_vm2, %vm721_vm0  ;;  %v741_v2 = vand.u32 2147483648, %v1657_v33  ;;  %v739_v7 = vand.u32 2147483647, %v1657_v33 }
  0xcd   : > { %v717_v38 = vsub.f32 1.0, %v716_v35  ;;  %v630_v41 = vadd.f32 %v1636_v59, %v603_v37  ;;  %1310 = vpow2.f32 %v653_v36  ;;  %v547_v53 = vpop.f32.mrf.mxu1  ;;  %vm735_vm7 = vweird.f32 %v1657_v33 }
  0xce   : > { %v657_v14 = vmul.f32 1.442695, %v646_v63  ;;  %v742_v18 = vor.u32 1.1754944e-38, %v741_v2  ;;  %vm740_vm9 = vcmp.eq.f32.partialorder %v739_v7, 8.507059e+37  ;;  %v675_v26 = vsel %vm635_vm1, %v1646_v10, %v1197_v0 }
  0xcf   : > { %v718_v42 = vmul.f32 %v1303_v32, %v717_v38  ;;  %v686_v43 = vsub.f32 0.0, %v630_v41  ;;  %v548_v10 = vadd.f32 %v547_v53, %v518_v49 }
  0xd1   : > { %v1307_v45 = vpop.eup %1306  ;;  %v697_v48 = vmul.f32 1.442695, %v686_v43  ;;  %v576_v50 = vpop.f32.mrf.mxu2  ;;  %v719_v55 = vadd.f32 %v1303_v32, %v718_v42  ;;  %v1719_v43 = vadd.f32 %v1642_v5, %v548_v10 }
  0xd2   : > { %v1309_v51 = vpop.eup %1308  ;;  %v1669_v52 = vadd.f32 1.0, %v1307_v45  ;;  %v605_v54 = vpop.f32.mrf.mxu3 }
  0xd3   : > { %v731_v56 = vmul.f32 %v1309_v51, %v1657_v33  ;;  %1312 = vpow2.f32 %v697_v48  ;;  %v1311_v60 = vpop.eup %1310  ;;  %v606_v3 = vadd.f32 %v605_v54, %v576_v50  ;;  %v723_v4 = vsel %vm1678_vm3, %v1303_v32, %v719_v55 }
  0xd4   : > { %1314 = vrcp.f32 %v1669_v52  ;;  %vm736_vm5 = vweird.f32 %v1309_v51  ;;  %v1198_v9 = vadd.f32 -1.0, %v1311_v60  ;;  %v728_v17 = vsel %vm725_vm6, %v727_v8, %v723_v4  ;;  %v520_v29 = vpop.f32.mrf.mxu0 }
  0xd5   : > { %v732_v61 = vsub.f32 1.0, %v731_v56  ;;  %v631_v11 = vadd.f32 %v1636_v59, %v606_v3  ;;  %1316 = vpow2.f32 %v655_v62  ;;  %vm737_vm8 = vmor %vm735_vm7, %vm736_vm5  ;;  %v549_v30 = vpop.f32.mrf.mxu1  ;;  %v1703_v31 = vmul.f32 %v728_v17, %v675_v26 }
  0xd6   : > { %v676_v27 = vsel %vm636_vm4, %v1652_v20, %v1198_v9  ;;  %v550_v38 = vadd.f32 %v549_v30, %v520_v29  ;;  %v756_v49 = vand.u32 2147483648, %v1669_v52  ;;  %vm750_vm13 = vweird.f32 %v1669_v52 }
  0xd7   : > { %v733_v6 = vmul.f32 %v1309_v51, %v732_v61  ;;  %v687_v21 = vsub.f32 0.0, %v631_v11  ;;  %v754_v55 = vand.u32 2147483647, %v1669_v52  ;;  %v647_v62 = vmin.f32 %v1719_v43, 0.0 }
  0xd8   : > { %v1727_v50 = vadd.f32 %v1642_v5, %v550_v38  ;;  %v757_v4 = vor.u32 1.1754944e-38, %v756_v49  ;;  %vm639_vm4 = vcmp.gt.f32.partialorder %v1719_v43, 0.0 }
  0xd9   : > { %v1313_v12 = vpop.eup %1312  ;;  %v734_v13 = vadd.f32 %v1309_v51, %v733_v6  ;;  %v578_v15 = vpop.f32.mrf.mxu2  ;;  %v699_v34 = vmul.f32 1.442695, %v687_v21  ;;  %vm755_vm0 = vcmp.eq.f32.partialorder %v754_v55, 8.507059e+37 }
  0xda   : > { %v1689_v16 = vpop.eup %1314  ;;  %v1691_v19 = vadd.f32 1.0, %v1313_v12  ;;  %v607_v22 = vpop.f32.mrf.mxu3  ;;  %v648_v7 = vmin.f32 %v1727_v50, 0.0 }
  0xdb   : > { %v738_v23 = vsel %vm737_vm8, %v1309_v51, %v734_v13  ;;  %v746_v24 = vmul.f32 %v1689_v16, %v1669_v52  ;;  %v608_v25 = vadd.f32 %v607_v22, %v578_v15  ;;  %v1317_v35 = vpop.eup %1316  ;;  %vm751_vm11 = vweird.f32 %v1689_v16 }
  0xdc   : > { %v743_v28 = vsel %vm740_vm9, %v742_v18, %v738_v23  ;;  %1318 = vrcp.f32 %v1691_v19  ;;  %v1199_v54 = vadd.f32 -1.0, %v1317_v35  ;;  %vm1731_vm14 = vmor %vm750_vm13, %vm751_vm11  ;;  %v769_v60 = vand.u32 2147483647, %v1691_v19  ;;  %v523_v63 = vpop.f32.mrf.mxu0 }
  0xdd   : > { %v1705_v32 = vmul.f32 %v743_v28, %v676_v27  ;;  %v747_v33 = vsub.f32 1.0, %v746_v24  ;;  %v632_v20 = vadd.f32 %v1636_v59, %v608_v25  ;;  %1320 = vpow2.f32 %v657_v14  ;;  %v552_v0 = vpop.f32.mrf.mxu1 }
  0xde   : > { %1322 = vpow2.f32 %v699_v34  ;;  %v771_v61 = vand.u32 2147483648, %v1691_v19  ;;  %vm765_vm1 = vweird.f32 %v1691_v19  ;;  %v659_v14 = vmul.f32 1.442695, %v647_v62 }
  0xdf   : > { %v1252_v36 = vpack.c.bf16 %v1705_v32, %v1703_v31  ;;  %v748_v37 = vmul.f32 %v1689_v16, %v747_v33  ;;  %v688_v40 = vsub.f32 0.0, %v632_v20  ;;  %vm770_vm3 = vcmp.eq.f32.partialorder %v769_v60, 8.507059e+37 }
  0xe0   : > { %v772_v13 = vor.u32 1.1754944e-38, %v771_v61  ;;  %v677_v22 = vsel %vm637_vm10, %v1662_v39, %v1199_v54  ;;  %v661_v24 = vmul.f32 1.442695, %v648_v7  ;;  %v553_v27 = vadd.f32 %v552_v0, %v523_v63 }
  0xe1   : > { %1253 = vst [vmem:[%s1710_s26] sm:$0xff] %v1252_v36   ;;  %v581_v41 = vpop.f32.mrf.mxu2  ;;  %v701_v44 = vmul.f32 1.442695, %v688_v40  ;;  %v749_v46 = vadd.f32 %v1689_v16, %v748_v37  ;;  %vm640_vm9 = vcmp.gt.f32.partialorder %v1727_v50, 0.0 }
  0xe2   : > { %v1319_v42 = vpop.eup %1318  ;;  %v610_v45 = vpop.f32.mrf.mxu3  ;;  %v1765_v34 = vadd.f32 %v1642_v5, %v553_v27 }
  0xe3   : > { %v761_v48 = vmul.f32 %v1319_v42, %v1691_v19  ;;  %1324 = vpow2.f32 %v701_v44  ;;  %v611_v51 = vadd.f32 %v610_v45, %v581_v41  ;;  %v1321_v53 = vpop.eup %1320  ;;  %v753_v52 = vsel %vm1731_vm14, %v1689_v16, %v749_v46 }
  0xe4   : > { %v1323_v57 = vpop.eup %1322  ;;  %vm766_vm15 = vweird.f32 %v1319_v42  ;;  %v1200_v6 = vadd.f32 -1.0, %v1321_v53  ;;  %v758_v12 = vsel %vm755_vm0, %v757_v4, %v753_v52  ;;  %v649_v45 = vmin.f32 %v1765_v34, 0.0 }
  0xe5   : > { %v762_v56 = vsub.f32 1.0, %v761_v48  ;;  %v633_v1 = vadd.f32 %v1636_v59, %v611_v51  ;;  %v1742_v3 = vadd.f32 1.0, %v1323_v57  ;;  %vm767_vm2 = vmor %vm765_vm1, %vm766_vm15  ;;  %v1755_v25 = vmul.f32 %v758_v12, %v677_v22  ;;  %v554_v33 = vpop.f32.mrf.mxu1 }
  0xe6   : > { %v678_v19 = vsel %vm638_vm12, %v1667_v47, %v1200_v6  ;;  %v525_v47 = vpop.f32.mrf.mxu0  ;;  %vm641_vm1 = vcmp.gt.f32.partialorder %v1765_v34, 0.0 }
  0xe7   : > { %v763_v2 = vmul.f32 %v1319_v42, %v762_v56  ;;  %v689_v8 = vsub.f32 0.0, %v633_v1  ;;  %1326 = vrcp.f32 %v1742_v3  ;;  %v555_v36 = vadd.f32 %v554_v33, %v525_v47 }
  0xe8   : > { %v786_v44 = vand.u32 2147483648, %v1742_v3  ;;  %vm780_vm6 = vweird.f32 %v1742_v3  ;;  %v784_v51 = vand.u32 2147483647, %v1742_v3  ;;  %v663_v1 = vmul.f32 1.442695, %v649_v45 }
  0xe9   : > { %v764_v9 = vadd.f32 %v1319_v42, %v763_v2  ;;  %v1325_v11 = vpop.eup %1324  ;;  %v703_v17 = vmul.f32 1.442695, %v689_v8  ;;  %v583_v18 = vpop.f32.mrf.mxu2  ;;  %v1784_v57 = vadd.f32 %v1642_v5, %v555_v36 }
  0xea   : > { %v1747_v16 = vadd.f32 1.0, %v1325_v11  ;;  %v612_v21 = vpop.f32.mrf.mxu3  ;;  %v787_v62 = vor.u32 1.1754944e-38, %v786_v44  ;;  %vm785_vm10 = vcmp.eq.f32.partialorder %v784_v51, 8.507059e+37 }
  0xeb   : > { %v768_v15 = vsel %vm767_vm2, %v1319_v42, %v764_v9  ;;  %v613_v28 = vadd.f32 %v612_v21, %v583_v18 }
  0xec   : > { %v773_v23 = vsel %vm770_vm3, %v772_v13, %v768_v15  ;;  %1328 = vrcp.f32 %v1747_v16  ;;  %v799_v55 = vand.u32 2147483647, %v1747_v16  ;;  %v801_v56 = vand.u32 2147483648, %v1747_v16 }
  0xed   : > { %v1757_v26 = vmul.f32 %v773_v23, %v678_v19  ;;  %1330 = vpow2.f32 %v703_v17  ;;  %v1327_v29 = vpop.eup %1326  ;;  %v634_v10 = vadd.f32 %v1636_v59, %v613_v28  ;;  %vm795_vm11 = vweird.f32 %v1747_v16 }
  0xee   : > { %1332 = vpow2.f32 %v659_v14  ;;  %v776_v30 = vmul.f32 %v1327_v29, %v1742_v3  ;;  %vm781_vm5 = vweird.f32 %v1327_v29  ;;  %v802_v5 = vor.u32 1.1754944e-38, %v801_v56 }
  0xef   : > { %v1257_v39 = vpack.c.bf16 %v1757_v26, %v1755_v25  ;;  %1334 = vpow2.f32 %v661_v24  ;;  %v690_v37 = vsub.f32 0.0, %v634_v10  ;;  %vm1776_vm7 = vmor %vm780_vm6, %vm781_vm5  ;;  %vm800_vm13 = vcmp.eq.f32.partialorder %v799_v55, 8.507059e+37 }
  0xf0   : > { %v777_v20 = vsub.f32 1.0, %v776_v30  ;;  %v650_v3 = vmin.f32 %v1784_v57, 0.0  ;;  %v872_v23 = vmul.f32 %v1703_v31, %v1703_v31  ;;  %v874_v24 = vmul.f32 %v1755_v25, %v1755_v25 }
  0xf1   : > { %1269 = vst [vmem:[%s1710_s26 + $0x8] sm:$0xff] %v1257_v39   ;;  %v705_v48 = vmul.f32 1.442695, %v690_v37 }
  0xf2   : > { %v1329_v35 = vpop.eup %1328  ;;  %v778_v40 = vmul.f32 %v1327_v29, %v777_v20  ;;  %v665_v17 = vmul.f32 1.442695, %v650_v3  ;;  %v875_v20 = vmul.f32 %v1757_v26, %v1757_v26 }
  0xf3   : > { %v1331_v38 = vpop.eup %1330  ;;  %v791_v41 = vmul.f32 %v1329_v35, %v1747_v16  ;;  %vm796_vm8 = vweird.f32 %v1329_v35 }
  0xf4   : > { %v1333_v42 = vpop.eup %1332  ;;  %v1772_v46 = vadd.f32 1.0, %v1331_v38  ;;  %v779_v49 = vadd.f32 %v1327_v29, %v778_v40  ;;  %vm797_vm12 = vmor %vm795_vm11, %vm796_vm8  ;;  %vm893_vm8 = vcmask 1040384  }
  0xf5   : > { %v1335_v59 = vpop.eup %1334  ;;  %v792_v53 = vsub.f32 1.0, %v791_v41  ;;  %v1201_v61 = vadd.f32 -1.0, %v1333_v42 }
  0xf6   : > { %1336 = vrcp.f32 %v1772_v46  ;;  %v783_v58 = vsel %vm1776_vm7, %v1327_v29, %v779_v49  ;;  %v1202_v63 = vadd.f32 -1.0, %v1335_v59  ;;  %vm810_vm15 = vweird.f32 %v1772_v46 }
  0xf7   : > { %v793_v60 = vmul.f32 %v1329_v35, %v792_v53  ;;  %1338 = vpow2.f32 %v705_v48  ;;  %v788_v52 = vsel %vm785_vm10, %v787_v62, %v783_v58  ;;  %v679_v6 = vsel %vm639_vm4, %v1719_v43, %v1201_v61 }
  0xf8   : > { %v680_v7 = vsel %vm640_vm9, %v1727_v50, %v1202_v63  ;;  %v839_v11 = vmul.f32 %v788_v52, %v679_v6  ;;  %1340 = vpow2.f32 %v663_v1  ;;  %v873_v43 = vmul.f32 %v1705_v32, %v1705_v32 }
  0xf9   : > { %v794_v0 = vadd.f32 %v1329_v35, %v793_v60  ;;  %v816_v50 = vand.u32 2147483648, %v1772_v46  ;;  %v814_v19 = vand.u32 2147483647, %v1772_v46  ;;  %v859_v29 = vadd.f32 %v1705_v32, %v1703_v31 }
  0xfa   : > { %v880_v47 = vadd.f32 %v873_v43, %v872_v23  ;;  %v876_v41 = vmul.f32 %v839_v11, %v839_v11  ;;  %vm642_vm4 = vcmp.gt.f32.partialorder %v1784_v57, 0.0 }
  0xfb   : > { %v798_v2 = vsel %vm797_vm12, %v1329_v35, %v794_v0  ;;  %v817_v30 = vor.u32 1.1754944e-38, %v816_v50  ;;  %vm815_vm2 = vcmp.eq.f32.partialorder %v814_v19, 8.507059e+37  ;;  %v860_v10 = vadd.f32 %v859_v29, %v1755_v25 }
  0xfc   : > { %v1337_v4 = vpop.eup %1336  ;;  %v803_v8 = vsel %vm800_vm13, %v802_v5, %v798_v2  ;;  %v881_v37 = vadd.f32 %v880_v47, %v874_v24 }
  0xfd   : > { %v1339_v9 = vpop.eup %1338  ;;  %v840_v12 = vmul.f32 %v803_v8, %v680_v7  ;;  %v806_v13 = vmul.f32 %v1337_v4, %v1772_v46  ;;  %vm811_vm14 = vweird.f32 %v1337_v4  ;;  %v861_v40 = vadd.f32 %v860_v10, %v1757_v26 }
  0xfe   : > { %v714_v14 = vadd.f32 1.0, %v1339_v9  ;;  %v1341_v21 = vpop.eup %1340  ;;  %vm812_vm0 = vmor %vm810_vm15, %vm811_vm14  ;;  %v882_v46 = vadd.f32 %v881_v37, %v875_v20 }
  0xff   : > { %v1262_v15 = vpack.c.bf16 %v840_v12, %v839_v11  ;;  %v807_v16 = vsub.f32 1.0, %v806_v13  ;;  %v1203_v39 = vadd.f32 -1.0, %v1341_v21  ;;  %v862_v48 = vadd.f32 %v861_v40, %v839_v11 }
 0x100   : > { %1342 = vrcp.f32 %v714_v14  ;;  %v831_v32 = vand.u32 2147483648, %v714_v14  ;;  %v829_v45 = vand.u32 2147483647, %v714_v14  ;;  %v877_v59 = vmul.f32 %v840_v12, %v840_v12 }
 0x101   : > { %1270 = vst [vmem:[%s1710_s26 + $0x10] sm:$0xff] %v1262_v15   ;;  %v808_v18 = vmul.f32 %v1337_v4, %v807_v16  ;;  %1344 = vpow2.f32 %v665_v17  ;;  %v681_v31 = vsel %vm641_vm1, %v1765_v34, %v1203_v39  ;;  %vm825_vm5 = vweird.f32 %v714_v14 }
 0x102   : > { %v883_v51 = vadd.f32 %v882_v46, %v876_v41  ;;  %v832_v26 = vor.u32 1.1754944e-38, %v831_v32  ;;  %v863_v53 = vadd.f32 %v862_v48, %v840_v12  ;;  %vm830_vm7 = vcmp.eq.f32.partialorder %v829_v45, 8.507059e+37 }
 0x103   : > { %v809_v22 = vadd.f32 %v1337_v4, %v808_v18 }
 0x104   : > { %v884_v58 = vadd.f32 %v883_v51, %v877_v59 }
 0x105   : > { %v813_v27 = vsel %vm812_vm0, %v1337_v4, %v809_v22 }
 0x106   : > { %v1343_v28 = vpop.eup %1342  ;;  %v818_v35 = vsel %vm815_vm2, %v817_v30, %v813_v27 }
 0x107   : > { %v821_v33 = vmul.f32 %v1343_v28, %v714_v14  ;;  %v1345_v36 = vpop.eup %1344  ;;  %v841_v42 = vmul.f32 %v818_v35, %v681_v31  ;;  %vm826_vm3 = vweird.f32 %v1343_v28 }
 0x108   : > { %v1204_v25 = vadd.f32 -1.0, %v1345_v36  ;;  %vm827_vm6 = vmor %vm825_vm5, %vm826_vm3 }
 0x109   : > { %v822_v38 = vsub.f32 1.0, %v821_v33  ;;  %v878_v54 = vmul.f32 %v841_v42, %v841_v42  ;;  %v864_v60 = vadd.f32 %v863_v53, %v841_v42 }
 0x10a   : > { %v682_v55 = vsel %vm642_vm4, %v1784_v57, %v1204_v25 }
 0x10b   : > { %v823_v44 = vmul.f32 %v1343_v28, %v822_v38  ;;  %v885_v62 = vadd.f32 %v884_v58, %v878_v54 }
 0x10d   : > { %v824_v49 = vadd.f32 %v1343_v28, %v823_v44 }
 0x10f   : > { %v828_v34 = vsel %vm827_vm6, %v1343_v28, %v824_v49 }
 0x110   : > { %v833_v56 = vsel %vm830_vm7, %v832_v26, %v828_v34 }
 0x111   : > { %v842_v61 = vmul.f32 %v833_v56, %v682_v55 }
 0x113   : > { %v1267_v63 = vpack.c.bf16 %v842_v61, %v841_v42  ;;  %v865_v0 = vadd.f32 %v864_v60, %v842_v61  ;;  %v879_v1 = vmul.f32 %v842_v61, %v842_v61 }
 0x115   : > { %1271 = vst [vmem:[%s1710_s26 + $0x18] sm:$0xff] %v1267_v63   ;;  %v866_v52 = vrot.slane %v865_v0, 4  ;;  %v886_v5 = vadd.f32 %v885_v62, %v879_v1 }
 0x117   : > { %v867_v2 = vadd.f32 %v866_v52, %v865_v0  ;;  %v887_v3 = vrot.slane %v886_v5, 4 }
 0x119   : > { %v868_v4 = vrot.slane %v867_v2, 2  ;;  %v888_v6 = vadd.f32 %v887_v3, %v886_v5 }
 0x11b   : > { %v869_v7 = vadd.f32 %v868_v4, %v867_v2  ;;  %v889_v8 = vrot.slane %v888_v6, 2 }
 0x11d   : > { %v870_v9 = vrot.slane %v869_v7, 1  ;;  %v890_v57 = vadd.f32 %v889_v8, %v888_v6 }
 0x11f   : > { %v891_v11 = vrot.slane %v890_v57, 1  ;;  %v871_v12 = vadd.f32 %v870_v9, %v869_v7 }
 0x121   : > { %v892_v13 = vadd.f32 %v891_v11, %v890_v57 }
 0x123   : > { %v894_v14 = vsel %vm893_vm8, %v871_v12, %v892_v13 }
 0x124   : > { %895 = vst [vmem:[%s258_s30] sm:$0x3] %v894_v14 }
 0x125 PF: > { %s15_s17 = sadd.s32 1, %s1368_s17   ;;  %s1841_s15 = smov %s1364_s16 }
 0x126   : > { %p12_p5 = scmp.ge.s32.totalorder %s15_s17, 4   ;;  %s1842_s16 = smov %s1844_s18 }
 0x128   :  { %14 = sbr.rel (!%p12_p5) target bundleno = 2 (0x2), region = 74 }

// kernel: gated_coarse2fine_forward.44
= control target key start
LH: loop header
LB: loop body
LE: loop exit
PB: predicated region body
PF: predicated region fallthrough
CT: control target
= control target key end

     0   :  { %s2291_s15 = smov 0   ;;  %s2293_s16 = smov 0   ;;  %s3133_s0 = inlined_call_operand.vmem [shape: bf16[2,176,256], index: 0, kind: input, shape index: {}]   ;;  %s3134_s1 = inlined_call_operand.vmem [shape: bf16[256,256], index: 1, kind: input, shape index: {}]   ;;  %s3135_s2 = inlined_call_operand.vmem [shape: f32[2,128], index: 2, kind: input, shape index: {}]   ;;  %s3136_s3 = inlined_call_operand.vmem [shape: bf16[2,176,128], index: 3, kind: output, shape index: {0}]   ;;  %s3137_s4 = inlined_call_operand.vmem [shape: f32[2,1,2,128], index: 4, kind: output, shape index: {1}]  }
   0x1   :  { %s2295_s17 = smov 0  }
   0x2 LB: > { %s27_s18 = sadd.s32 1, %s2260_s16  ;;  %p1717_p0 = scmp.ge.s32.totalorder %s2264_s17, 1  ;;  %s2264_s17 = sphi %s2295_s17, %s15_s17   ;;  %s2260_s16 = sphi %s2293_s16, %s3157_s16   ;;  %s2256_s15 = sphi %s2291_s15, %s3156_s15  }
   0x3   : > { %p29_p1 = scmp.ge.s32.totalorder %s27_s18, 2  ;;  %p189_p2 = scmp.lt.s32.totalorder %s2264_s17, 3 }
   0x5   : > { %s3159_s18 = smov (%p29_p1, %s27_s18), 0  ;;  %p190_p3 = pnand %p1717_p0, %p189_p2 }
   0x6   : > { %p232_p4 = scmp.lt.s32.totalorder (!%p190_p3), %s2256_s15, 1 }
   0x7   : > { %193 = sbr.rel (%p190_p3) target bundleno = 403 (0x193), region = 32 }
   0xc   : > { %v1997_v0 = vld [vmem:[%s3134_s1 + $0x74] sm:$0xf]  ;;  %v1869_v1 = vld [vmem:[%s3134_s1 + $0x78] sm:$0xf0]  ;;  %v1867_v5 = vld [vmem:[%s3134_s1 + $0x70] sm:$0xf] }
   0xd   : > { %v2013_v2 = vld [vmem:[%s3134_s1 + $0xf4] sm:$0xf]  ;;  %v1872_v3 = vor.u32 %v1997_v0, %v1869_v1  ;;  %v1933_v4 = vld [vmem:[%s3134_s1 + $0xf8] sm:$0xf0]  ;;  %v1998_v6 = vld [vmem:[%s3134_s1 + $0x74] sm:$0xf0] }
   0xe   : > { %v1936_v7 = vor.u32 %v2013_v2, %v1933_v4  ;;  %v1868_v8 = vor.u32 %v1998_v6, %v1867_v5  ;;  %v1931_v9 = vld [vmem:[%s3134_s1 + $0xf0] sm:$0xf]  ;;  %v2014_v10 = vld [vmem:[%s3134_s1 + $0xf4] sm:$0xf0]  ;;  %v1995_v11 = vld [vmem:[%s3134_s1 + $0x64] sm:$0xf] }
   0xf   : > { %711 = vmatpush.bf16.msra.mxu2 %v1872_v3  ;;  %v1932_v12 = vor.u32 %v2014_v10, %v1931_v9  ;;  %v1861_v13 = vld [vmem:[%s3134_s1 + $0x68] sm:$0xf0]  ;;  %v2011_v14 = vld [vmem:[%s3134_s1 + $0xe4] sm:$0xf]  ;;  %v1859_v18 = vld [vmem:[%s3134_s1 + $0x60] sm:$0xf] }
  0x10   : > { %v1925_v15 = vld [vmem:[%s3134_s1 + $0xe8] sm:$0xf0]  ;;  %775 = vmatpush.bf16.msra.mxu3 %v1936_v7  ;;  %583 = vmatpush.bf16.msra.mxu0 %v1868_v8  ;;  %v1864_v16 = vor.u32 %v1995_v11, %v1861_v13  ;;  %v1996_v19 = vld [vmem:[%s3134_s1 + $0x64] sm:$0xf0]  ;;  %v1923_v20 = vld [vmem:[%s3134_s1 + $0xe0] sm:$0xf] }
  0x11   : > { %v1928_v17 = vor.u32 %v2011_v14, %v1925_v15  ;;  %647 = vmatpush.bf16.msra.mxu1 %v1932_v12  ;;  %v1860_v21 = vor.u32 %v1996_v19, %v1859_v18  ;;  %v2012_v22 = vld [vmem:[%s3134_s1 + $0xe4] sm:$0xf0]  ;;  %v1993_v23 = vld [vmem:[%s3134_s1 + $0x54] sm:$0xf]  ;;  %v1853_v24 = vld [vmem:[%s3134_s1 + $0x58] sm:$0xf0] }
  0x12   : > { %v1924_v25 = vor.u32 %v2012_v22, %v1923_v20  ;;  %v2009_v26 = vld [vmem:[%s3134_s1 + $0xd4] sm:$0xf]  ;;  %v1917_v27 = vld [vmem:[%s3134_s1 + $0xd8] sm:$0xf0]  ;;  %v1851_v28 = vld [vmem:[%s3134_s1 + $0x50] sm:$0xf]  ;;  %v1856_v29 = vor.u32 %v1993_v23, %v1853_v24 }
  0x13   : > { %712 = vmatpush.bf16.msra.mxu2 %v1864_v16  ;;  %v1994_v30 = vld [vmem:[%s3134_s1 + $0x54] sm:$0xf0]  ;;  %v1915_v31 = vld [vmem:[%s3134_s1 + $0xd0] sm:$0xf]  ;;  %v1920_v33 = vor.u32 %v2009_v26, %v1917_v27  ;;  %v1991_v35 = vld [vmem:[%s3134_s1 + $0x44] sm:$0xf] }
  0x14   : > { %v2010_v32 = vld [vmem:[%s3134_s1 + $0xd4] sm:$0xf0]  ;;  %776 = vmatpush.bf16.msra.mxu3 %v1928_v17  ;;  %584 = vmatpush.bf16.msra.mxu0 %v1860_v21  ;;  %v1852_v34 = vor.u32 %v1994_v30, %v1851_v28  ;;  %v1845_v36 = vld [vmem:[%s3134_s1 + $0x48] sm:$0xf0]  ;;  %v2007_v37 = vld [vmem:[%s3134_s1 + $0xc4] sm:$0xf] }
  0x15   : > { %648 = vmatpush.bf16.msra.mxu1 %v1924_v25  ;;  %v1916_v38 = vor.u32 %v2010_v32, %v1915_v31  ;;  %v1909_v39 = vld [vmem:[%s3134_s1 + $0xc8] sm:$0xf0]  ;;  %v1843_v40 = vld [vmem:[%s3134_s1 + $0x40] sm:$0xf]  ;;  %v1992_v41 = vld [vmem:[%s3134_s1 + $0x44] sm:$0xf0]  ;;  %v1848_v44 = vor.u32 %v1991_v35, %v1845_v36 }
  0x16   : > { %v1907_v42 = vld [vmem:[%s3134_s1 + $0xc0] sm:$0xf]  ;;  %v2008_v43 = vld [vmem:[%s3134_s1 + $0xc4] sm:$0xf0]  ;;  %v1912_v45 = vor.u32 %v2007_v37, %v1909_v39  ;;  %v1844_v46 = vor.u32 %v1992_v41, %v1843_v40  ;;  %v1989_v47 = vld [vmem:[%s3134_s1 + $0x34] sm:$0xf] }
  0x17   : > { %713 = vmatpush.bf16.msra.mxu2 %v1856_v29  ;;  %v1837_v48 = vld [vmem:[%s3134_s1 + $0x38] sm:$0xf0]  ;;  %v2005_v49 = vld [vmem:[%s3134_s1 + $0xb4] sm:$0xf]  ;;  %v1908_v50 = vor.u32 %v2008_v43, %v1907_v42  ;;  %v1835_v52 = vld [vmem:[%s3134_s1 + $0x30] sm:$0xf] }
  0x18   : > { %777 = vmatpush.bf16.msra.mxu3 %v1920_v33  ;;  %585 = vmatpush.bf16.msra.mxu0 %v1852_v34  ;;  %v1901_v51 = vld [vmem:[%s3134_s1 + $0xb8] sm:$0xf0]  ;;  %v1990_v53 = vld [vmem:[%s3134_s1 + $0x34] sm:$0xf0]  ;;  %v1899_v54 = vld [vmem:[%s3134_s1 + $0xb0] sm:$0xf]  ;;  %v1840_v56 = vor.u32 %v1989_v47, %v1837_v48 }
  0x19   : > { %649 = vmatpush.bf16.msra.mxu1 %v1916_v38  ;;  %v2006_v55 = vld [vmem:[%s3134_s1 + $0xb4] sm:$0xf0]  ;;  %v1904_v57 = vor.u32 %v2005_v49, %v1901_v51  ;;  %v1836_v58 = vor.u32 %v1990_v53, %v1835_v52  ;;  %v1987_v59 = vld [vmem:[%s3134_s1 + $0x24] sm:$0xf]  ;;  %v1829_v60 = vld [vmem:[%s3134_s1 + $0x28] sm:$0xf0] }
  0x1a   : > { %v2003_v61 = vld [vmem:[%s3134_s1 + $0xa4] sm:$0xf]  ;;  %v1900_v62 = vor.u32 %v2006_v55, %v1899_v54  ;;  %v1893_v63 = vld [vmem:[%s3134_s1 + $0xa8] sm:$0xf0]  ;;  %v1827_v0 = vld [vmem:[%s3134_s1 + $0x20] sm:$0xf]  ;;  %v1832_v4 = vor.u32 %v1987_v59, %v1829_v60 }
  0x1b   : > { %714 = vmatpush.bf16.msra.mxu2 %v1848_v44  ;;  %v1988_v1 = vld [vmem:[%s3134_s1 + $0x24] sm:$0xf0]  ;;  %v1891_v2 = vld [vmem:[%s3134_s1 + $0xa0] sm:$0xf]  ;;  %v1985_v5 = vld [vmem:[%s3134_s1 + $0x14] sm:$0xf]  ;;  %v1896_v7 = vor.u32 %v2003_v61, %v1893_v63 }
  0x1c   : > { %778 = vmatpush.bf16.msra.mxu3 %v1912_v45  ;;  %586 = vmatpush.bf16.msra.mxu0 %v1844_v46  ;;  %v2004_v3 = vld [vmem:[%s3134_s1 + $0xa4] sm:$0xf0]  ;;  %v1821_v6 = vld [vmem:[%s3134_s1 + $0x18] sm:$0xf0]  ;;  %v1828_v8 = vor.u32 %v1988_v1, %v1827_v0  ;;  %v2001_v9 = vld [vmem:[%s3134_s1 + $0x94] sm:$0xf] }
  0x1d   : > { %650 = vmatpush.bf16.msra.mxu1 %v1908_v50  ;;  %v1885_v10 = vld [vmem:[%s3134_s1 + $0x98] sm:$0xf0]  ;;  %v1819_v11 = vld [vmem:[%s3134_s1 + $0x10] sm:$0xf]  ;;  %v1892_v12 = vor.u32 %v2004_v3, %v1891_v2  ;;  %v1986_v13 = vld [vmem:[%s3134_s1 + $0x14] sm:$0xf0]  ;;  %v1824_v16 = vor.u32 %v1985_v5, %v1821_v6 }
  0x1e   : > { %v1883_v14 = vld [vmem:[%s3134_s1 + $0x90] sm:$0xf]  ;;  %v2002_v15 = vld [vmem:[%s3134_s1 + $0x94] sm:$0xf0]  ;;  %v1983_v17 = vld [vmem:[%s3134_s1 + $0x4] sm:$0xf]  ;;  %v1888_v18 = vor.u32 %v2001_v9, %v1885_v10  ;;  %v1820_v19 = vor.u32 %v1986_v13, %v1819_v11 }
  0x1f   : > { %715 = vmatpush.bf16.msra.mxu2 %v1840_v56  ;;  %s3161_s15 = smov (!%p232_p4, %s2256_s15), 1  ;;  %v1813_v20 = vld [vmem:[%s3134_s1 + $0x8] sm:$0xf0]  ;;  %v1999_v21 = vld [vmem:[%s3134_s1 + $0x84] sm:$0xf]  ;;  %v1884_v23 = vor.u32 %v2002_v15, %v1883_v14 }
  0x20   : > { %779 = vmatpush.bf16.msra.mxu3 %v1904_v57  ;;  %587 = vmatpush.bf16.msra.mxu0 %v1836_v58  ;;  %v1877_v22 = vld [vmem:[%s3134_s1 + $0x88] sm:$0xf0]  ;;  %v1811_v24 = vld [vmem:[%s3134_s1] sm:$0xf]  ;;  %v1984_v25 = vld [vmem:[%s3134_s1 + $0x4] sm:$0xf0]  ;;  %v1816_v28 = vor.u32 %v1983_v17, %v1813_v20 }
  0x21   : > { %651 = vmatpush.bf16.msra.mxu1 %v1900_v62  ;;  %s2080_s7 = smul.u32 176, %s3161_s15  ;;  %v1875_v26 = vld [vmem:[%s3134_s1 + $0x80] sm:$0xf]  ;;  %v2000_v27 = vld [vmem:[%s3134_s1 + $0x84] sm:$0xf0]  ;;  %v1880_v29 = vor.u32 %v1999_v21, %v1877_v22  ;;  %v1812_v30 = vor.u32 %v1984_v25, %v1811_v24  ;;  %s1720_s5 = sshll.u32 %s3161_s15, 1 }
  0x22   : > { %v1876_v34 = vor.u32 %v2000_v27, %v1875_v26  ;;  %v2552_v25 = vld [vmem:[%s3135_s2 + $0x1] ss:$0 sm:$0xff]  ;;  %s2081_s23 = smul.u32 88, %s3161_s15  ;;  %s258_s8 = scalar_lea.vmem %s3137_s4, %s1720_s5 }
  0x23   : > { %716 = vmatpush.bf16.msra.mxu2 %v1832_v4  ;;  %s2511_s14 = scalar_lea.vmem %s3133_s0, %s2080_s7 }
  0x24   : > { %780 = vmatpush.bf16.msra.mxu3 %v1896_v7  ;;  %588 = vmatpush.bf16.msra.mxu0 %v1828_v8  ;;  %v1723_v31 = vld [vmem:[%s2511_s14] sm:$0xf]  ;;  %v1962_v32 = vld [vmem:[%s2511_s14 + $0x4] sm:$0xf0]  ;;  %v1961_v33 = vld [vmem:[%s2511_s14 + $0x4] sm:$0xf]  ;;  %s2631_s26 = scalar_lea.vmem %s3136_s3, %s2081_s23 }
  0x25   : > { %652 = vmatpush.bf16.msra.mxu1 %v1892_v12  ;;  %v1725_v35 = vld [vmem:[%s2511_s14 + $0x8] sm:$0xf0]  ;;  %v1724_v36 = vor.u32 %v1962_v32, %v1723_v31  ;;  %v1731_v38 = vld [vmem:[%s2511_s14 + $0x10] sm:$0xf]  ;;  %v1964_v39 = vld [vmem:[%s2511_s14 + $0x14] sm:$0xf0] }
  0x26   : > { %v1728_v37 = vor.u32 %v1961_v33, %v1725_v35  ;;  %v1963_v40 = vld [vmem:[%s2511_s14 + $0x14] sm:$0xf]  ;;  %v1733_v41 = vld [vmem:[%s2511_s14 + $0x18] sm:$0xf0]  ;;  %v1732_v42 = vor.u32 %v1964_v39, %v1731_v38  ;;  %v1739_v44 = vld [vmem:[%s2511_s14 + $0x20] sm:$0xf] }
  0x27   : > { %717 = vmatpush.bf16.msra.mxu2 %v1824_v16  ;;  %v1736_v43 = vor.u32 %v1963_v40, %v1733_v41  ;;  %v1966_v45 = vld [vmem:[%s2511_s14 + $0x24] sm:$0xf0]  ;;  %v1965_v46 = vld [vmem:[%s2511_s14 + $0x24] sm:$0xf]  ;;  %v1741_v47 = vld [vmem:[%s2511_s14 + $0x28] sm:$0xf0] }
  0x28   : > { %781 = vmatpush.bf16.msra.mxu3 %v1888_v18  ;;  %589 = vmatpush.bf16.msra.mxu0 %v1820_v19  ;;  %v1740_v48 = vor.u32 %v1966_v45, %v1739_v44  ;;  %v1744_v49 = vor.u32 %v1965_v46, %v1741_v47  ;;  %v1747_v50 = vld [vmem:[%s2511_s14 + $0x30] sm:$0xf]  ;;  %v1968_v51 = vld [vmem:[%s2511_s14 + $0x34] sm:$0xf0]  ;;  %v1967_v52 = vld [vmem:[%s2511_s14 + $0x34] sm:$0xf] }
  0x29   : > { %653 = vmatpush.bf16.msra.mxu1 %v1884_v23  ;;  %v1749_v53 = vld [vmem:[%s2511_s14 + $0x38] sm:$0xf0]  ;;  %v1748_v54 = vor.u32 %v1968_v51, %v1747_v50  ;;  %v1755_v56 = vld [vmem:[%s2511_s14 + $0x40] sm:$0xf]  ;;  %v1970_v57 = vld [vmem:[%s2511_s14 + $0x44] sm:$0xf0] }
  0x2a   : > { %v1752_v55 = vor.u32 %v1967_v52, %v1749_v53  ;;  %v1969_v58 = vld [vmem:[%s2511_s14 + $0x44] sm:$0xf]  ;;  %v1757_v59 = vld [vmem:[%s2511_s14 + $0x48] sm:$0xf0]  ;;  %v1756_v60 = vor.u32 %v1970_v57, %v1755_v56  ;;  %v1763_v62 = vld [vmem:[%s2511_s14 + $0x50] sm:$0xf] }
  0x2b   : > { %718 = vmatpush.bf16.msra.mxu2 %v1816_v28  ;;  %v1760_v61 = vor.u32 %v1969_v58, %v1757_v59  ;;  %v1972_v63 = vld [vmem:[%s2511_s14 + $0x54] sm:$0xf0]  ;;  %v1971_v0 = vld [vmem:[%s2511_s14 + $0x54] sm:$0xf]  ;;  %v1765_v1 = vld [vmem:[%s2511_s14 + $0x58] sm:$0xf0] }
  0x2c   : > { %782 = vmatpush.bf16.msra.mxu3 %v1880_v29  ;;  %590 = vmatpush.bf16.msra.mxu0 %v1812_v30  ;;  %v1764_v2 = vor.u32 %v1972_v63, %v1763_v62  ;;  %v1768_v3 = vor.u32 %v1971_v0, %v1765_v1  ;;  %v1771_v4 = vld [vmem:[%s2511_s14 + $0x60] sm:$0xf]  ;;  %v1974_v5 = vld [vmem:[%s2511_s14 + $0x64] sm:$0xf0]  ;;  %v1973_v6 = vld [vmem:[%s2511_s14 + $0x64] sm:$0xf] }
  0x2d   : > { %654 = vmatpush.bf16.msra.mxu1 %v1876_v34  ;;  %v1773_v7 = vld [vmem:[%s2511_s14 + $0x68] sm:$0xf0]  ;;  %v1772_v8 = vor.u32 %v1974_v5, %v1771_v4  ;;  %v1779_v10 = vld [vmem:[%s2511_s14 + $0x70] sm:$0xf]  ;;  %v1976_v11 = vld [vmem:[%s2511_s14 + $0x74] sm:$0xf0] }
  0x2e   : > { %719 = vmatmul.bf16.vlgmr.msra.gmra.mxu2 %v1724_v36  ;;  %v1776_v9 = vor.u32 %v1973_v6, %v1773_v7  ;;  %v1975_v12 = vld [vmem:[%s2511_s14 + $0x74] sm:$0xf]  ;;  %v1781_v13 = vld [vmem:[%s2511_s14 + $0x78] sm:$0xf0]  ;;  %v1780_v14 = vor.u32 %v1976_v11, %v1779_v10  ;;  %v1787_v16 = vld [vmem:[%s2511_s14 + $0x80] sm:$0xf] }
  0x2f   : > { %783 = vmatmul.bf16.vlgmr.msra.gmra.mxu3 %v1728_v37  ;;  %591 = vmatmul.bf16.vlgmr.msra.gmra.mxu0 %v1724_v36  ;;  %v1784_v15 = vor.u32 %v1975_v12, %v1781_v13  ;;  %v1978_v17 = vld [vmem:[%s2511_s14 + $0x84] sm:$0xf0]  ;;  %v1977_v18 = vld [vmem:[%s2511_s14 + $0x84] sm:$0xf]  ;;  %v1789_v19 = vld [vmem:[%s2511_s14 + $0x88] sm:$0xf0] }
  0x30   : > { %655 = vmatmul.bf16.vlgmr.msra.gmra.mxu1 %v1728_v37  ;;  %v1788_v20 = vor.u32 %v1978_v17, %v1787_v16  ;;  %v1792_v21 = vor.u32 %v1977_v18, %v1789_v19  ;;  %v1795_v32 = vld [vmem:[%s2511_s14 + $0x90] sm:$0xf]  ;;  %v1980_v33 = vld [vmem:[%s2511_s14 + $0x94] sm:$0xf0]  ;;  %v1979_v34 = vld [vmem:[%s2511_s14 + $0x94] sm:$0xf] }
  0x31   : > { %v1797_v35 = vld [vmem:[%s2511_s14 + $0x98] sm:$0xf0]  ;;  %v2562_v37 = vld [vmem:[%s3135_s2] ss:$0 sm:$0xff]  ;;  %v1981_v5 = vld [vmem:[%s2511_s14 + $0xa4] sm:$0xf] }
  0x32   : > { %v1800_v44 = vor.u32 %v1979_v34, %v1797_v35  ;;  %v1805_v6 = vld [vmem:[%s2511_s14 + $0xa8] sm:$0xf0] }
  0x3e   : > { %724 = vmatmul.bf16.gmra.mxu2 %v1732_v42 }
  0x3f   : > { %788 = vmatmul.bf16.gmra.mxu3 %v1736_v43  ;;  %596 = vmatmul.bf16.gmra.mxu0 %v1732_v42  ;;  %v1796_v42 = vor.u32 %v1980_v33, %v1795_v32 }
  0x40   : > { %660 = vmatmul.bf16.gmra.mxu1 %v1736_v43 }
  0x4e   : > { %729 = vmatmul.bf16.gmra.mxu2 %v1740_v48 }
  0x4f   : > { %793 = vmatmul.bf16.gmra.mxu3 %v1744_v49  ;;  %601 = vmatmul.bf16.gmra.mxu0 %v1740_v48 }
  0x50   : > { %665 = vmatmul.bf16.gmra.mxu1 %v1744_v49 }
  0x5e   : > { %734 = vmatmul.bf16.gmra.mxu2 %v1748_v54 }
  0x5f   : > { %798 = vmatmul.bf16.gmra.mxu3 %v1752_v55  ;;  %606 = vmatmul.bf16.gmra.mxu0 %v1748_v54 }
  0x60   : > { %670 = vmatmul.bf16.gmra.mxu1 %v1752_v55 }
  0x6e   : > { %739 = vmatmul.bf16.gmra.mxu2 %v1756_v60 }
  0x6f   : > { %803 = vmatmul.bf16.gmra.mxu3 %v1760_v61  ;;  %611 = vmatmul.bf16.gmra.mxu0 %v1756_v60 }
  0x70   : > { %675 = vmatmul.bf16.gmra.mxu1 %v1760_v61 }
  0x7e   : > { %744 = vmatmul.bf16.gmra.mxu2 %v1764_v2 }
  0x7f   : > { %808 = vmatmul.bf16.gmra.mxu3 %v1768_v3  ;;  %616 = vmatmul.bf16.gmra.mxu0 %v1764_v2  ;;  %v1803_v2 = vld [vmem:[%s2511_s14 + $0xa0] sm:$0xf] }
  0x80   : > { %680 = vmatmul.bf16.gmra.mxu1 %v1768_v3  ;;  %v1982_v3 = vld [vmem:[%s2511_s14 + $0xa4] sm:$0xf0] }
  0x81   : > { %v1804_v10 = vor.u32 %v1982_v3, %v1803_v2 }
  0x8e   : > { %749 = vmatmul.bf16.gmra.mxu2 %v1772_v8 }
  0x8f   : > { %813 = vmatmul.bf16.gmra.mxu3 %v1776_v9  ;;  %621 = vmatmul.bf16.gmra.mxu0 %v1772_v8 }
  0x90   : > { %685 = vmatmul.bf16.gmra.mxu1 %v1776_v9 }
  0x9e   : > { %754 = vmatmul.bf16.gmra.mxu2 %v1780_v14 }
  0x9f   : > { %818 = vmatmul.bf16.gmra.mxu3 %v1784_v15  ;;  %626 = vmatmul.bf16.gmra.mxu0 %v1780_v14 }
  0xa0   : > { %690 = vmatmul.bf16.gmra.mxu1 %v1784_v15  ;;  %v1808_v15 = vor.u32 %v1981_v5, %v1805_v6 }
  0xac   : > { %v592_v22 = vpop.f32.mrf.mxu0 }
  0xad   : > { %v656_v23 = vpop.f32.mrf.mxu1 }
  0xae   : > { %759 = vmatmul.bf16.gmra.mxu2 %v1788_v20  ;;  %v657_v36 = vadd.f32 %v656_v23, %v592_v22 }
  0xaf   : > { %823 = vmatmul.bf16.gmra.mxu3 %v1792_v21  ;;  %631 = vmatmul.bf16.gmra.mxu0 %v1788_v20 }
  0xb0   : > { %695 = vmatmul.bf16.gmra.mxu1 %v1792_v21  ;;  %v2565_v46 = vadd.f32 %v2562_v37, %v657_v36 }
  0xb1   : > { %v720_v24 = vpop.f32.mrf.mxu2 }
  0xb2   : > { %v784_v26 = vpop.f32.mrf.mxu3  ;;  %v909_v52 = vmin.f32 %v2565_v46, 0.0  ;;  %vm887_vm2 = vcmp.gt.f32.partialorder %v2565_v46, 0.0 }
  0xb3   : > { %v785_v27 = vadd.f32 %v784_v26, %v720_v24 }
  0xb4   : > { %v594_v28 = vpop.f32.mrf.mxu0  ;;  %v931_v61 = vmul.f32 1.442695, %v909_v52 }
  0xb5   : > { %v865_v29 = vadd.f32 %v2552_v25, %v785_v27  ;;  %v658_v30 = vpop.f32.mrf.mxu1 }
  0xb6   : > { %v659_v40 = vadd.f32 %v658_v30, %v594_v28 }
  0xb7   : > { %v1019_v31 = vsub.f32 0.0, %v865_v29 }
  0xb8   : > { %v2569_v49 = vadd.f32 %v2562_v37, %v659_v40 }
  0xb9   : > { %v1041_v38 = vmul.f32 1.442695, %v1019_v31  ;;  %v722_v39 = vpop.f32.mrf.mxu2 }
  0xba   : > { %v786_v41 = vpop.f32.mrf.mxu3  ;;  %v910_v56 = vmin.f32 %v2569_v49, 0.0  ;;  %vm888_vm5 = vcmp.gt.f32.partialorder %v2569_v49, 0.0 }
  0xbb   : > { %2108 = vpow2.f32 %v1041_v38  ;;  %v787_v43 = vadd.f32 %v786_v41, %v722_v39 }
  0xbc   : > { %v597_v45 = vpop.f32.mrf.mxu0  ;;  %v933_v0 = vmul.f32 1.442695, %v910_v56 }
  0xbd   : > { %v866_v47 = vadd.f32 %v2552_v25, %v787_v43  ;;  %v661_v48 = vpop.f32.mrf.mxu1 }
  0xbe   : > { %764 = vmatmul.bf16.gmra.mxu2 %v1796_v42  ;;  %v662_v57 = vadd.f32 %v661_v48, %v597_v45 }
  0xbf   : > { %v1020_v50 = vsub.f32 0.0, %v866_v47  ;;  %828 = vmatmul.bf16.gmra.mxu3 %v1800_v44  ;;  %636 = vmatmul.bf16.gmra.mxu0 %v1796_v42 }
  0xc0   : > { %700 = vmatmul.bf16.gmra.mxu1 %v1800_v44  ;;  %v2578_v1 = vadd.f32 %v2562_v37, %v662_v57 }
  0xc1   : > { %v2109_v51 = vpop.eup %2108  ;;  %v1043_v53 = vmul.f32 1.442695, %v1020_v50  ;;  %v725_v54 = vpop.f32.mrf.mxu2 }
  0xc2   : > { %v2572_v55 = vadd.f32 1.0, %v2109_v51  ;;  %v789_v58 = vpop.f32.mrf.mxu3  ;;  %v911_v13 = vmin.f32 %v2578_v1, 0.0  ;;  %vm889_vm11 = vcmp.gt.f32.partialorder %v2578_v1, 0.0 }
  0xc3   : > { %2110 = vpow2.f32 %v1043_v53  ;;  %v790_v59 = vadd.f32 %v789_v58, %v725_v54 }
  0xc4   : > { %2112 = vrcp.f32 %v2572_v55  ;;  %v599_v60 = vpop.f32.mrf.mxu0  ;;  %v935_v23 = vmul.f32 1.442695, %v911_v13  ;;  %v1118_v32 = vand.u32 2147483648, %v2572_v55  ;;  %vm1112_vm1 = vweird.f32 %v2572_v55 }
  0xc5   : > { %v867_v62 = vadd.f32 %v2552_v25, %v790_v59  ;;  %v663_v63 = vpop.f32.mrf.mxu1  ;;  %2114 = vpow2.f32 %v931_v61  ;;  %v1116_v36 = vand.u32 2147483647, %v2572_v55 }
  0xc6   : > { %2116 = vpow2.f32 %v933_v0  ;;  %v664_v17 = vadd.f32 %v663_v63, %v599_v60  ;;  %v1119_v48 = vor.u32 1.1754944e-38, %v1118_v32 }
  0xc7   : > { %v1021_v4 = vsub.f32 0.0, %v867_v62  ;;  %vm1117_vm4 = vcmp.eq.f32.partialorder %v1116_v36, 8.507059e+37 }
  0xc8   : > { %v2591_v27 = vadd.f32 %v2562_v37, %v664_v17 }
  0xc9   : > { %v2111_v7 = vpop.eup %2110  ;;  %v1045_v8 = vmul.f32 1.442695, %v1021_v4  ;;  %v727_v9 = vpop.f32.mrf.mxu2 }
  0xca   : > { %v2113_v11 = vpop.eup %2112  ;;  %v2584_v12 = vadd.f32 1.0, %v2111_v7  ;;  %v791_v14 = vpop.f32.mrf.mxu3  ;;  %v912_v42 = vmin.f32 %v2591_v27, 0.0 }
  0xcb   : > { %v1108_v16 = vmul.f32 %v2113_v11, %v2572_v55  ;;  %2118 = vpow2.f32 %v1045_v8  ;;  %v792_v18 = vadd.f32 %v791_v14, %v727_v9  ;;  %v2115_v24 = vpop.eup %2114  ;;  %vm1113_vm0 = vweird.f32 %v2113_v11 }
  0xcc   : > { %2120 = vrcp.f32 %v2584_v12  ;;  %v602_v19 = vpop.f32.mrf.mxu0  ;;  %v2117_v29 = vpop.eup %2116  ;;  %vm2599_vm3 = vmor %vm1112_vm1, %vm1113_vm0  ;;  %v1937_v43 = vadd.f32 -1.0, %v2115_v24  ;;  %v1131_v52 = vand.u32 2147483647, %v2584_v12  ;;  %v1133_v54 = vand.u32 2147483648, %v2584_v12 }
  0xcd   : > { %v1109_v20 = vsub.f32 1.0, %v1108_v16  ;;  %v868_v21 = vadd.f32 %v2552_v25, %v792_v18  ;;  %v666_v22 = vpop.f32.mrf.mxu1  ;;  %2122 = vpow2.f32 %v935_v23  ;;  %v1938_v50 = vadd.f32 -1.0, %v2117_v29 }
  0xce   : > { %769 = vmatmul.bf16.gmra.mxu2 %v1804_v10  ;;  %v667_v45 = vadd.f32 %v666_v22, %v602_v19  ;;  %v937_v58 = vmul.f32 1.442695, %v912_v42  ;;  %v997_v60 = vsel %vm887_vm2, %v2565_v46, %v1937_v43  ;;  %vm1127_vm7 = vweird.f32 %v2584_v12 }
  0xcf   : > { %v1110_v26 = vmul.f32 %v2113_v11, %v1109_v20  ;;  %v1022_v28 = vsub.f32 0.0, %v868_v21  ;;  %833 = vmatmul.bf16.gmra.mxu3 %v1808_v15  ;;  %641 = vmatmul.bf16.gmra.mxu0 %v1804_v10  ;;  %v998_v0 = vsel %vm888_vm5, %v2569_v49, %v1938_v50  ;;  %vm1132_vm8 = vcmp.eq.f32.partialorder %v1131_v52, 8.507059e+37 }
  0xd0   : > { %705 = vmatmul.bf16.gmra.mxu1 %v1808_v15  ;;  %v2615_v61 = vadd.f32 %v2562_v37, %v667_v45  ;;  %v1134_v6 = vor.u32 1.1754944e-38, %v1133_v54  ;;  %vm890_vm0 = vcmp.gt.f32.partialorder %v2591_v27, 0.0 }
  0xd1   : > { %v2119_v30 = vpop.eup %2118  ;;  %v1111_v31 = vadd.f32 %v2113_v11, %v1110_v26  ;;  %v1047_v33 = vmul.f32 1.442695, %v1022_v28  ;;  %v730_v34 = vpop.f32.mrf.mxu2 }
  0xd2   : > { %v2121_v35 = vpop.eup %2120  ;;  %v2596_v38 = vadd.f32 1.0, %v2119_v30  ;;  %v794_v39 = vpop.f32.mrf.mxu3 }
  0xd3   : > { %v1123_v41 = vmul.f32 %v2121_v35, %v2584_v12  ;;  %2124 = vpow2.f32 %v1047_v33  ;;  %v1115_v44 = vsel %vm2599_vm3, %v2113_v11, %v1111_v31  ;;  %v795_v55 = vadd.f32 %v794_v39, %v730_v34  ;;  %v2123_v59 = vpop.eup %2122 }
  0xd4   : > { %2126 = vrcp.f32 %v2596_v38  ;;  %v604_v47 = vpop.f32.mrf.mxu0  ;;  %v1120_v56 = vsel %vm1117_vm4, %v1119_v48, %v1115_v44  ;;  %vm1128_vm6 = vweird.f32 %v2121_v35  ;;  %v1939_v13 = vadd.f32 -1.0, %v2123_v59 }
  0xd5   : > { %v1124_v51 = vsub.f32 1.0, %v1123_v41  ;;  %v668_v53 = vpop.f32.mrf.mxu1  ;;  %v869_v62 = vadd.f32 %v2552_v25, %v795_v55  ;;  %v1437_v5 = vmul.f32 %v1120_v56, %v997_v60  ;;  %vm1129_vm9 = vmor %vm1127_vm7, %vm1128_vm6  ;;  %2128 = vpow2.f32 %v937_v58 }
  0xd6   : > { %v913_v12 = vmin.f32 %v2615_v61, 0.0  ;;  %v1146_v17 = vand.u32 2147483647, %v2596_v38  ;;  %v1148_v21 = vand.u32 2147483648, %v2596_v38  ;;  %v669_v29 = vadd.f32 %v668_v53, %v604_v47 }
  0xd7   : > { %v1125_v57 = vmul.f32 %v2121_v35, %v1124_v51  ;;  %v1023_v7 = vsub.f32 0.0, %v869_v62  ;;  %v1530_v20 = vmul.f32 %v1437_v5, %v1437_v5  ;;  %vm1142_vm12 = vweird.f32 %v2596_v38 }
  0xd8   : > { %v939_v34 = vmul.f32 1.442695, %v913_v12  ;;  %v1149_v39 = vor.u32 1.1754944e-38, %v1148_v21  ;;  %v999_v42 = vsel %vm889_vm11, %v2578_v1, %v1939_v13  ;;  %vm1147_vm14 = vcmp.eq.f32.partialorder %v1146_v17, 8.507059e+37 }
  0xd9   : > { %v2125_v63 = vpop.eup %2124  ;;  %v1126_v2 = vadd.f32 %v2121_v35, %v1125_v57  ;;  %v732_v3 = vpop.f32.mrf.mxu2  ;;  %v1049_v18 = vmul.f32 1.442695, %v1023_v7  ;;  %v2644_v47 = vadd.f32 %v2562_v37, %v669_v29  ;;  %vm891_vm4 = vcmp.gt.f32.partialorder %v2615_v61, 0.0 }
  0xda   : > { %v2127_v4 = vpop.eup %2126  ;;  %v2622_v46 = vadd.f32 1.0, %v2125_v63  ;;  %v796_v8 = vpop.f32.mrf.mxu3 }
  0xdb   : > { %v1130_v9 = vsel %vm1129_vm9, %v2121_v35, %v1126_v2  ;;  %v1138_v10 = vmul.f32 %v2127_v4, %v2596_v38  ;;  %v797_v49 = vadd.f32 %v796_v8, %v732_v3  ;;  %vm1143_vm10 = vweird.f32 %v2127_v4  ;;  %v2129_v31 = vpop.eup %2128 }
  0xdc   : > { %v1135_v11 = vsel %vm1132_vm8, %v1134_v6, %v1130_v9  ;;  %2130 = vrcp.f32 %v2622_v46  ;;  %v607_v14 = vpop.f32.mrf.mxu0  ;;  %vm1144_vm13 = vmor %vm1142_vm12, %vm1143_vm10  ;;  %v1161_v52 = vand.u32 2147483647, %v2622_v46  ;;  %v1163_v1 = vand.u32 2147483648, %v2622_v46 }
  0xdd   : > { %v1438_v15 = vmul.f32 %v1135_v11, %v998_v0  ;;  %v1139_v16 = vsub.f32 1.0, %v1138_v10  ;;  %v671_v19 = vpop.f32.mrf.mxu1  ;;  %v870_v22 = vadd.f32 %v2552_v25, %v797_v49  ;;  %2132 = vpow2.f32 %v1049_v18 }
  0xde   : > { %v672_v55 = vadd.f32 %v671_v19, %v607_v14  ;;  %v1940_v62 = vadd.f32 -1.0, %v2129_v31  ;;  %v914_v63 = vmin.f32 %v2644_v47, 0.0  ;;  %vm1157_vm1 = vweird.f32 %v2622_v46 }
  0xdf   : > { %v2018_v23 = vpack.c.bf16 %v1438_v15, %v1437_v5  ;;  %v1503_v24 = vadd.f32 %v1438_v15, %v1437_v5  ;;  %v1531_v26 = vmul.f32 %v1438_v15, %v1438_v15  ;;  %v1140_v28 = vmul.f32 %v2127_v4, %v1139_v16 }
  0xe0   : > { %v1024_v30 = vsub.f32 0.0, %v870_v22  ;;  %vm1162_vm3 = vcmp.eq.f32.partialorder %v1161_v52, 8.507059e+37  ;;  %v1164_v6 = vor.u32 1.1754944e-38, %v1163_v1  ;;  %v2659_v49 = vadd.f32 %v2562_v37, %v672_v55 }
  0xe1   : > { %2019 = vst [vmem:[%s2631_s26] sm:$0xff] %v2018_v23   ;;  %v1552_v32 = vadd.f32 %v1531_v26, %v1530_v20  ;;  %v1141_v33 = vadd.f32 %v2127_v4, %v1140_v28  ;;  %v735_v35 = vpop.f32.mrf.mxu2  ;;  %v941_v12 = vmul.f32 1.442695, %v914_v63  ;;  %vm892_vm5 = vcmp.gt.f32.partialorder %v2644_v47, 0.0 }
  0xe2   : > { %v2131_v36 = vpop.eup %2130  ;;  %v1051_v40 = vmul.f32 1.442695, %v1024_v30  ;;  %v799_v41 = vpop.f32.mrf.mxu3 }
  0xe3   : > { %v1145_v43 = vsel %vm1144_vm13, %v2127_v4, %v1141_v33  ;;  %v1153_v44 = vmul.f32 %v2131_v36, %v2622_v46  ;;  %v800_v38 = vadd.f32 %v799_v41, %v735_v35  ;;  %v2133_v54 = vpop.eup %2132  ;;  %vm1158_vm15 = vweird.f32 %v2131_v36 }
  0xe4   : > { %v1150_v45 = vsel %vm1147_vm14, %v1149_v39, %v1145_v43  ;;  %2134 = vpow2.f32 %v1051_v40  ;;  %v609_v48 = vpop.f32.mrf.mxu0  ;;  %v2649_v60 = vadd.f32 1.0, %v2133_v54  ;;  %vm1159_vm2 = vmor %vm1157_vm1, %vm1158_vm15  ;;  %v1000_v46 = vsel %vm890_vm0, %v2591_v27, %v1940_v62 }
  0xe5   : > { %v1439_v50 = vmul.f32 %v1150_v45, %v999_v42  ;;  %v1154_v51 = vsub.f32 1.0, %v1153_v44  ;;  %2136 = vpow2.f32 %v939_v34  ;;  %v673_v53 = vpop.f32.mrf.mxu1  ;;  %v871_v56 = vadd.f32 %v2552_v25, %v800_v38 }
  0xe6   : > { %2138 = vrcp.f32 %v2649_v60  ;;  %v674_v16 = vadd.f32 %v673_v53, %v609_v48  ;;  %v915_v27 = vmin.f32 %v2659_v49, 0.0  ;;  %v1176_v28 = vand.u32 2147483647, %v2649_v60 }
  0xe7   : > { %v1504_v57 = vadd.f32 %v1503_v24, %v1439_v50  ;;  %v1532_v58 = vmul.f32 %v1439_v50, %v1439_v50  ;;  %v1155_v59 = vmul.f32 %v2131_v36, %v1154_v51  ;;  %v1025_v0 = vsub.f32 0.0, %v871_v56 }
  0xe8   : > { %v2673_v29 = vadd.f32 %v2562_v37, %v674_v16  ;;  %v1178_v34 = vand.u32 2147483648, %v2649_v60  ;;  %v943_v39 = vmul.f32 1.442695, %v915_v27  ;;  %vm1172_vm6 = vweird.f32 %v2649_v60 }
  0xe9   : > { %v1553_v2 = vadd.f32 %v1552_v32, %v1532_v58  ;;  %v1156_v3 = vadd.f32 %v2131_v36, %v1155_v59  ;;  %v737_v4 = vpop.f32.mrf.mxu2  ;;  %v1053_v11 = vmul.f32 1.442695, %v1025_v0  ;;  %vm2683_vm8 = vcmp.eq.f32.partialorder %v1176_v28, 8.507059e+37 }
  0xea   : > { %v2135_v5 = vpop.eup %2134  ;;  %v801_v7 = vpop.f32.mrf.mxu3  ;;  %v1179_v1 = vor.u32 1.1754944e-38, %v1178_v34  ;;  %vm893_vm15 = vcmp.gt.f32.partialorder %v2659_v49, 0.0 }
  0xeb   : > { %v2137_v8 = vpop.eup %2136  ;;  %v1160_v9 = vsel %vm1159_vm2, %v2131_v36, %v1156_v3  ;;  %v2656_v10 = vadd.f32 1.0, %v2135_v5  ;;  %v802_v19 = vadd.f32 %v801_v7, %v737_v4 }
  0xec   : > { %v1165_v13 = vsel %vm1162_vm3, %v1164_v6, %v1160_v9  ;;  %v612_v14 = vpop.f32.mrf.mxu0  ;;  %v1941_v18 = vadd.f32 -1.0, %v2137_v8  ;;  %v2139_v20 = vpop.eup %2138  ;;  %vm894_vm3 = vcmp.gt.f32.partialorder %v2673_v29, 0.0 }
  0xed   : > { %v1440_v15 = vmul.f32 %v1165_v13, %v1000_v46  ;;  %2140 = vrcp.f32 %v2656_v10  ;;  %v676_v17 = vpop.f32.mrf.mxu1  ;;  %v1168_v24 = vmul.f32 %v2139_v20, %v2649_v60  ;;  %v872_v30 = vadd.f32 %v2552_v25, %v802_v19 }
  0xee   : > { %2142 = vpow2.f32 %v1053_v11  ;;  %v1001_v32 = vsel %vm891_vm4, %v2615_v61, %v1941_v18  ;;  %v677_v41 = vadd.f32 %v676_v17, %v612_v14  ;;  %vm1173_vm7 = vweird.f32 %v2139_v20 }
  0xef   : > { %v2023_v21 = vpack.c.bf16 %v1440_v15, %v1439_v50  ;;  %v1505_v22 = vadd.f32 %v1504_v57, %v1440_v15  ;;  %v1533_v23 = vmul.f32 %v1440_v15, %v1440_v15  ;;  %2144 = vpow2.f32 %v941_v12  ;;  %vm1174_vm9 = vmor %vm1172_vm6, %vm1173_vm7 }
  0xf0   : > { %v1169_v33 = vsub.f32 1.0, %v1168_v24  ;;  %v1026_v40 = vsub.f32 0.0, %v872_v30  ;;  %v916_v50 = vmin.f32 %v2673_v29, 0.0  ;;  %v1191_v57 = vand.u32 2147483647, %v2656_v10 }
  0xf1   : > { %2070 = vst [vmem:[%s2631_s26 + $0x8] sm:$0xff] %v2023_v21   ;;  %v2669_v26 = vadd.f32 %v1553_v2, %v1533_v23  ;;  %v740_v31 = vpop.f32.mrf.mxu2  ;;  %v1193_v58 = vand.u32 2147483648, %v2656_v10  ;;  %v2695_v59 = vadd.f32 %v2562_v37, %v677_v41  ;;  %vm1187_vm11 = vweird.f32 %v2656_v10 }
  0xf2   : > { %v804_v35 = vpop.f32.mrf.mxu3  ;;  %v1170_v44 = vmul.f32 %v2139_v20, %v1169_v33  ;;  %v1055_v51 = vmul.f32 1.442695, %v1026_v40  ;;  %v945_v2 = vmul.f32 1.442695, %v916_v50  ;;  %vm1192_vm13 = vcmp.eq.f32.partialorder %v1191_v57, 8.507059e+37 }
  0xf3   : > { %v2141_v36 = vpop.eup %2140  ;;  %v805_v42 = vadd.f32 %v804_v35, %v740_v31  ;;  %v1194_v8 = vor.u32 1.1754944e-38, %v1193_v58  ;;  %v917_v9 = vmin.f32 %v2695_v59, 0.0 }
  0xf4   : > { %v2143_v43 = vpop.eup %2142  ;;  %v1183_v45 = vmul.f32 %v2141_v36, %v2656_v10  ;;  %v614_v38 = vpop.f32.mrf.mxu0  ;;  %v1171_v54 = vadd.f32 %v2139_v20, %v1170_v44  ;;  %vm1188_vm10 = vweird.f32 %v2141_v36 }
  0xf5   : > { %v2687_v48 = vadd.f32 1.0, %v2143_v43  ;;  %v678_v52 = vpop.f32.mrf.mxu1  ;;  %v2145_v53 = vpop.eup %2144  ;;  %v873_v56 = vadd.f32 %v2552_v25, %v805_v42  ;;  %vm1189_vm12 = vmor %vm1187_vm11, %vm1188_vm10  ;;  %v947_v30 = vmul.f32 1.442695, %v917_v9 }
  0xf6   : > { %v1184_v55 = vsub.f32 1.0, %v1183_v45  ;;  %v1175_v60 = vsel %vm1174_vm9, %v2139_v20, %v1171_v54  ;;  %v1942_v0 = vadd.f32 -1.0, %v2145_v53  ;;  %v679_v27 = vadd.f32 %v678_v52, %v614_v38 }
  0xf7   : > { %2146 = vrcp.f32 %v2687_v48  ;;  %v1180_v63 = vsel %vm2683_vm8, %v1179_v1, %v1175_v60  ;;  %v1027_v6 = vsub.f32 0.0, %v873_v56  ;;  %v1206_v35 = vand.u32 2147483647, %v2687_v48 }
  0xf8   : > { %v1185_v62 = vmul.f32 %v2141_v36, %v1184_v55  ;;  %2148 = vpow2.f32 %v1055_v51  ;;  %v1441_v4 = vmul.f32 %v1180_v63, %v1001_v32  ;;  %v1002_v17 = vsel %vm892_vm5, %v2644_v47, %v1942_v0 }
  0xf9   : > { %2150 = vpow2.f32 %v943_v39  ;;  %v742_v3 = vpop.f32.mrf.mxu2  ;;  %v1057_v14 = vmul.f32 1.442695, %v1027_v6  ;;  %v2716_v41 = vadd.f32 %v2562_v37, %v679_v27  ;;  %vm1202_vm0 = vweird.f32 %v2687_v48 }
  0xfa   : > { %v1186_v5 = vadd.f32 %v2141_v36, %v1185_v62  ;;  %v806_v7 = vpop.f32.mrf.mxu3  ;;  %v1506_v46 = vadd.f32 %v1505_v22, %v1441_v4  ;;  %v1534_v13 = vmul.f32 %v1441_v4, %v1441_v4  ;;  %2152 = vpow2.f32 %v945_v2 }
  0xfb   : > { %v807_v11 = vadd.f32 %v806_v7, %v742_v3  ;;  %2154 = vpow2.f32 %v1057_v14  ;;  %vm1207_vm2 = vcmp.eq.f32.partialorder %v1206_v35, 8.507059e+37  ;;  %v918_v55 = vmin.f32 %v2716_v41, 0.0 }
  0xfc   : > { %v1190_v12 = vsel %vm1189_vm12, %v2141_v36, %v1186_v5  ;;  %v2701_v15 = vpop.f32.mrf.mxu0  ;;  %v1555_v21 = vadd.f32 %v2669_v26, %v1534_v13  ;;  %v1208_v36 = vand.u32 2147483648, %v2687_v48  ;;  %vm895_vm5 = vcmp.gt.f32.partialorder %v2695_v59, 0.0 }
  0xfd   : > { %v2147_v16 = vpop.eup %2146  ;;  %v1195_v10 = vsel %vm1192_vm13, %v1194_v8, %v1190_v12  ;;  %v874_v18 = vadd.f32 %v2552_v25, %v807_v11  ;;  %v681_v19 = vpop.f32.mrf.mxu1  ;;  %v949_v5 = vmul.f32 1.442695, %v918_v55 }
  0xfe   : > { %v2149_v20 = vpop.eup %2148  ;;  %v1442_v23 = vmul.f32 %v1195_v10, %v1002_v17  ;;  %v1198_v22 = vmul.f32 %v2147_v16, %v2687_v48  ;;  %vm1203_vm14 = vweird.f32 %v2147_v16  ;;  %v1209_v52 = vor.u32 1.1754944e-38, %v1208_v36 }
  0xff   : > { %v2151_v24 = vpop.eup %2150  ;;  %v2709_v28 = vadd.f32 1.0, %v2149_v20  ;;  %v1028_v31 = vsub.f32 0.0, %v874_v18  ;;  %vm1204_vm1 = vmor %vm1202_vm0, %vm1203_vm14  ;;  %v682_v11 = vadd.f32 %v681_v19, %v2701_v15  ;;  %vm896_vm14 = vcmp.gt.f32.partialorder %v2716_v41, 0.0 }
 0x100   : > { %v2028_v47 = vpack.c.bf16 %v1442_v23, %v1441_v4  ;;  %v1507_v32 = vadd.f32 %v1506_v46, %v1442_v23  ;;  %v1535_v33 = vmul.f32 %v1442_v23, %v1442_v23  ;;  %v1199_v34 = vsub.f32 1.0, %v1198_v22  ;;  %v2153_v43 = vpop.eup %2152 }
 0x101   : > { %2156 = vrcp.f32 %v2709_v28  ;;  %v745_v26 = vpop.f32.mrf.mxu2  ;;  %v1943_v44 = vadd.f32 -1.0, %v2151_v24  ;;  %v1059_v45 = vmul.f32 1.442695, %v1028_v31  ;;  %v2155_v51 = vpop.eup %2154  ;;  %v1944_v63 = vadd.f32 -1.0, %v2153_v43 }
 0x102   : > { %2071 = vst [vmem:[%s2631_s26 + $0x10] sm:$0xff] %v2028_v47   ;;  %v1556_v39 = vadd.f32 %v1555_v21, %v1535_v33  ;;  %v1200_v40 = vmul.f32 %v2147_v16, %v1199_v34  ;;  %v809_v42 = vpop.f32.mrf.mxu3  ;;  %2158 = vpow2.f32 %v947_v30  ;;  %v2720_v1 = vadd.f32 1.0, %v2155_v51 }
 0x103   : > { %v810_v61 = vadd.f32 %v809_v42, %v745_v26  ;;  %2160 = vpow2.f32 %v1059_v45  ;;  %v1003_v57 = vsel %vm893_vm15, %v2659_v49, %v1943_v44  ;;  %v1221_v8 = vand.u32 2147483647, %v2709_v28 }
 0x104   : > { %v1201_v38 = vadd.f32 %v2147_v16, %v1200_v40  ;;  %v619_v50 = vpop.f32.mrf.mxu0  ;;  %2162 = vrcp.f32 %v2720_v1  ;;  %v1223_v9 = vand.u32 2147483648, %v2709_v28  ;;  %vm1217_vm6 = vweird.f32 %v2709_v28 }
 0x105   : > { %v683_v53 = vpop.f32.mrf.mxu1  ;;  %v875_v58 = vadd.f32 %v2552_v25, %v810_v61  ;;  %v1004_v15 = vsel %vm894_vm3, %v2673_v29, %v1944_v63  ;;  %vm1222_vm8 = vcmp.eq.f32.partialorder %v1221_v8, 8.507059e+37  ;;  %v2752_v24 = vadd.f32 %v2562_v37, %v682_v11 }
 0x106   : > { %v1205_v54 = vsel %vm1204_vm1, %v2147_v16, %v1201_v38  ;;  %v1224_v19 = vor.u32 1.1754944e-38, %v1223_v9  ;;  %v1236_v31 = vand.u32 2147483647, %v2720_v1  ;;  %v1238_v34 = vand.u32 2147483648, %v2720_v1 }
 0x107   : > { %v2157_v56 = vpop.eup %2156  ;;  %v1210_v48 = vsel %vm1207_vm2, %v1209_v52, %v1205_v54  ;;  %v1029_v46 = vsub.f32 0.0, %v875_v58  ;;  %v684_v35 = vadd.f32 %v683_v53, %v619_v50  ;;  %v919_v38 = vmin.f32 %v2752_v24, 0.0 }
 0x108   : > { %v2727_v60 = vmul.f32 %v1210_v48, %v1003_v57  ;;  %v1213_v62 = vmul.f32 %v2157_v56, %v2709_v28  ;;  %v2159_v2 = vpop.eup %2158  ;;  %vm1218_vm4 = vweird.f32 %v2157_v56  ;;  %vm1232_vm10 = vweird.f32 %v2720_v1 }
 0x109   : > { %v747_v0 = vpop.f32.mrf.mxu2  ;;  %v2161_v7 = vpop.eup %2160  ;;  %v1061_v17 = vmul.f32 1.442695, %v1029_v46  ;;  %v1945_v23 = vadd.f32 -1.0, %v2159_v2  ;;  %vm1219_vm7 = vmor %vm1217_vm6, %vm1218_vm4  ;;  %vm1237_vm11 = vcmp.eq.f32.partialorder %v1236_v31, 8.507059e+37  ;;  %v1239_v55 = vor.u32 1.1754944e-38, %v1238_v34 }
 0x10a   : > { %v1508_v3 = vadd.f32 %v1507_v32, %v2727_v60  ;;  %v1536_v4 = vmul.f32 %v2727_v60, %v2727_v60  ;;  %v1214_v49 = vsub.f32 1.0, %v1213_v62  ;;  %v811_v6 = vpop.f32.mrf.mxu3  ;;  %v2738_v14 = vadd.f32 1.0, %v2161_v7  ;;  %v2163_v20 = vpop.eup %2162 }
 0x10b   : > { %v812_v10 = vadd.f32 %v811_v6, %v747_v0  ;;  %v1228_v22 = vmul.f32 %v2163_v20, %v2720_v1  ;;  %v1005_v29 = vsel %vm895_vm5, %v2695_v59, %v1945_v23  ;;  %vm1233_vm9 = vweird.f32 %v2163_v20 }
 0x10c   : > { %v1557_v13 = vadd.f32 %v1556_v39, %v1536_v4  ;;  %v1215_v12 = vmul.f32 %v2157_v56, %v1214_v49  ;;  %v2740_v16 = vpop.f32.mrf.mxu0  ;;  %2164 = vrcp.f32 %v2738_v14  ;;  %vm1234_vm12 = vmor %vm1232_vm10, %vm1233_vm9  ;;  %v1251_v63 = vand.u32 2147483647, %v2738_v14 }
 0x10d   : > { %v2743_v18 = vpop.f32.mrf.mxu1  ;;  %2166 = vpow2.f32 %v1061_v17  ;;  %v1229_v28 = vsub.f32 1.0, %v1228_v22  ;;  %v876_v47 = vadd.f32 %v2552_v25, %v812_v10  ;;  %v1253_v0 = vand.u32 2147483648, %v2738_v14 }
 0x10e   : > { %v1216_v21 = vadd.f32 %v2157_v56, %v1215_v12  ;;  %2168 = vpow2.f32 %v949_v5  ;;  %v687_v5 = vadd.f32 %v2743_v18, %v2740_v16  ;;  %vm1247_vm15 = vweird.f32 %v2738_v14 }
 0x10f   : > { %v1230_v26 = vmul.f32 %v2163_v20, %v1229_v28  ;;  %v1030_v39 = vsub.f32 0.0, %v876_v47  ;;  %v1254_v46 = vor.u32 1.1754944e-38, %v1253_v0  ;;  %vm1252_vm1 = vcmp.eq.f32.partialorder %v1251_v63, 8.507059e+37 }
 0x110   : > { %v1220_v27 = vsel %vm1219_vm7, %v2157_v56, %v1216_v21  ;;  %vm897_vm2 = vcmp.gt.f32.partialorder %v2752_v24, 0.0 }
 0x111   : > { %v1225_v30 = vsel %vm1222_vm8, %v1224_v19, %v1220_v27  ;;  %v750_v32 = vpop.f32.mrf.mxu2  ;;  %v1231_v52 = vadd.f32 %v2163_v20, %v1230_v26  ;;  %v1063_v57 = vmul.f32 1.442695, %v1030_v39  ;;  %v2788_v19 = vadd.f32 %v2562_v37, %v687_v5 }
 0x112   : > { %v1444_v33 = vmul.f32 %v1225_v30, %v1004_v15  ;;  %v814_v36 = vpop.f32.mrf.mxu3  ;;  %v2165_v42 = vpop.eup %2164 }
 0x113   : > { %v815_v40 = vadd.f32 %v814_v36, %v750_v32  ;;  %v2167_v51 = vpop.eup %2166  ;;  %v1243_v59 = vmul.f32 %v2165_v42, %v2738_v14  ;;  %v1235_v48 = vsel %vm1234_vm12, %v2163_v20, %v1231_v52  ;;  %vm1248_vm13 = vweird.f32 %v2165_v42 }
 0x114   : > { %v2033_v43 = vpack.c.bf16 %v1444_v33, %v2727_v60  ;;  %v1509_v44 = vadd.f32 %v1508_v3, %v1444_v33  ;;  %v1537_v45 = vmul.f32 %v1444_v33, %v1444_v33  ;;  %v624_v61 = vpop.f32.mrf.mxu0  ;;  %v2169_v53 = vpop.eup %2168  ;;  %v2766_v56 = vadd.f32 1.0, %v2167_v51  ;;  %vm1249_vm0 = vmor %vm1247_vm15, %vm1248_vm13 }
 0x115   : > { %v688_v50 = vpop.f32.mrf.mxu1  ;;  %v1244_v58 = vsub.f32 1.0, %v1243_v59  ;;  %v2769_v60 = vadd.f32 %v2562_v37, %v684_v35  ;;  %v877_v1 = vadd.f32 %v2552_v25, %v815_v40  ;;  %v1240_v62 = vsel %vm1237_vm11, %v1239_v55, %v1235_v48 }
 0x116   : > { %2072 = vst [vmem:[%s2631_s26 + $0x18] sm:$0xff] %v2033_v43   ;;  %v1558_v54 = vadd.f32 %v1557_v13, %v1537_v45  ;;  %2170 = vrcp.f32 %v2766_v56  ;;  %v1445_v2 = vmul.f32 %v1240_v62, %v1005_v29  ;;  %v1946_v49 = vadd.f32 -1.0, %v2169_v53 }
 0x117   : > { %v1245_v3 = vmul.f32 %v2165_v42, %v1244_v58  ;;  %2172 = vpow2.f32 %v1063_v57  ;;  %v1031_v6 = vsub.f32 0.0, %v877_v1  ;;  %v951_v13 = vmul.f32 1.442695, %v919_v38 }
 0x118   : > { %v1510_v8 = vadd.f32 %v1509_v44, %v1445_v2  ;;  %v1538_v9 = vmul.f32 %v1445_v2, %v1445_v2  ;;  %v920_v12 = vmin.f32 %v2769_v60, 0.0  ;;  %v1006_v15 = vsel %vm896_vm14, %v2716_v41, %v1946_v49 }
 0x119   : > { %v752_v4 = vpop.f32.mrf.mxu2  ;;  %v1246_v11 = vadd.f32 %v2165_v42, %v1245_v3  ;;  %v1065_v17 = vmul.f32 1.442695, %v1031_v6  ;;  %v689_v28 = vadd.f32 %v688_v50, %v624_v61  ;;  %v921_v39 = vmin.f32 %v2788_v19, 0.0 }
 0x11a   : > { %v816_v7 = vpop.f32.mrf.mxu3  ;;  %v1559_v20 = vadd.f32 %v1558_v54, %v1538_v9  ;;  %v953_v31 = vmul.f32 1.442695, %v920_v12  ;;  %v1266_v53 = vand.u32 2147483647, %v2766_v56  ;;  %vm898_vm4 = vcmp.gt.f32.partialorder %v2769_v60, 0.0 }
 0x11b   : > { %v1250_v21 = vsel %vm1249_vm0, %v2165_v42, %v1246_v11  ;;  %v817_v23 = vadd.f32 %v816_v7, %v752_v4  ;;  %2174 = vpow2.f32 %v1065_v17  ;;  %v2803_v40 = vadd.f32 %v2562_v37, %v689_v28 }
 0x11c   : > { %v2780_v10 = vpop.f32.mrf.mxu0  ;;  %v2782_v18 = vpop.eup %2170  ;;  %v1255_v14 = vsel %vm1252_vm1, %v1254_v46, %v1250_v21  ;;  %2176 = vpow2.f32 %v951_v13  ;;  %v955_v37 = vmul.f32 1.442695, %v921_v39  ;;  %vm1262_vm5 = vweird.f32 %v2766_v56 }
 0x11d   : > { %v691_v16 = vpop.f32.mrf.mxu1  ;;  %v2173_v22 = vpop.eup %2172  ;;  %v1446_v27 = vmul.f32 %v1255_v14, %v1006_v15  ;;  %v1258_v30 = vmul.f32 %v2782_v18, %v2766_v56  ;;  %v878_v32 = vadd.f32 %v2552_v25, %v817_v23  ;;  %v922_v54 = vmin.f32 %v2803_v40, 0.0  ;;  %v2852_v14 = vld [vmem:[%s3135_s2] ss:$0 sm:$0xff] }
 0x11e   : > { %v2792_v47 = vadd.f32 1.0, %v2173_v22  ;;  %vm1263_vm3 = vweird.f32 %v2782_v18  ;;  %v1268_v1 = vand.u32 2147483648, %v2766_v56  ;;  %vm2823_vm6 = vcmp.eq.f32.partialorder %v1266_v53, 8.507059e+37 }
 0x11f   : > { %v2038_v33 = vpack.c.bf16 %v1446_v27, %v1445_v2  ;;  %v2795_v41 = vadd.f32 %v1510_v8, %v1446_v27  ;;  %v1539_v29 = vmul.f32 %v1446_v27, %v1446_v27  ;;  %v1259_v34 = vsub.f32 1.0, %v1258_v30  ;;  %vm2827_vm7 = vmor %vm1262_vm5, %vm1263_vm3 }
 0x120   : > { %2178 = vrcp.f32 %v2792_v47  ;;  %v1032_v42 = vsub.f32 0.0, %v878_v32  ;;  %v957_v4 = vmul.f32 1.442695, %v922_v54  ;;  %v1281_v5 = vand.u32 2147483647, %v2792_v47 }
 0x121   : > { %v755_v35 = vpop.f32.mrf.mxu2  ;;  %2073 = vst [vmem:[%s2631_s26 + $0x20] sm:$0xff] %v2038_v33   ;;  %v2799_v26 = vadd.f32 %v1559_v20, %v1539_v29  ;;  %v2175_v45 = vpop.eup %2174  ;;  %v1260_v38 = vmul.f32 %v2782_v18, %v1259_v34  ;;  %2180 = vpow2.f32 %v953_v31  ;;  %v1283_v6 = vand.u32 2147483648, %v2792_v47  ;;  %v2860_v31 = vld [vmem:[%s3135_s2 + $0x1] ss:$0 sm:$0xff] }
 0x122   : > { %v819_v36 = vpop.f32.mrf.mxu3  ;;  %v1067_v61 = vmul.f32 1.442695, %v1032_v42  ;;  %v2177_v52 = vpop.eup %2176  ;;  %v2810_v59 = vadd.f32 1.0, %v2175_v45  ;;  %v692_v56 = vadd.f32 %v691_v16, %v2780_v10  ;;  %v1269_v12 = vor.u32 1.1754944e-38, %v1268_v1 }
 0x123   : > { %v820_v43 = vadd.f32 %v819_v36, %v755_v35  ;;  %v1261_v57 = vadd.f32 %v2782_v18, %v1260_v38  ;;  %v1947_v58 = vadd.f32 -1.0, %v2177_v52  ;;  %vm1277_vm9 = vweird.f32 %v2792_v47 }
 0x124   : > { %v2805_v44 = vpop.f32.mrf.mxu0  ;;  %2182 = vpow2.f32 %v1067_v61  ;;  %v1284_v15 = vor.u32 1.1754944e-38, %v1283_v6  ;;  %v2855_v22 = vadd.f32 %v2852_v14, %v692_v56  ;;  %vm1282_vm11 = vcmp.eq.f32.partialorder %v1281_v5, 8.507059e+37 }
 0x125   : > { %v2808_v51 = vpop.f32.mrf.mxu1  ;;  %v879_v50 = vadd.f32 %v2552_v25, %v820_v43  ;;  %2184 = vrcp.f32 %v2810_v59  ;;  %v1265_v9 = vsel %vm2827_vm7, %v2782_v18, %v1261_v57  ;;  %v1007_v33 = vsel %vm897_vm2, %v2752_v24, %v1947_v58 }
 0x126   : > { %v2179_v55 = vpop.eup %2178  ;;  %2186 = vpow2.f32 %v955_v37  ;;  %v1270_v18 = vsel %vm2823_vm6, %v1269_v12, %v1265_v9  ;;  %vm899_vm12 = vcmp.gt.f32.partialorder %v2788_v19, 0.0  ;;  %v923_v38 = vmin.f32 %v2855_v22, 0.0 }
 0x127   : > { %v1273_v48 = vmul.f32 %v2179_v55, %v2792_v47  ;;  %v1033_v62 = vsub.f32 0.0, %v879_v50  ;;  %v2181_v0 = vpop.eup %2180  ;;  %vm1278_vm8 = vweird.f32 %v2179_v55  ;;  %v2869_v36 = vmul.f32 %v1270_v18, %v1007_v33 }
 0x128   : > { %v1948_v17 = vadd.f32 -1.0, %v2181_v0  ;;  %vm1279_vm10 = vmor %vm1277_vm9, %vm1278_vm8  ;;  %v694_v52 = vadd.f32 %v2808_v51, %v2805_v44  ;;  %v1298_v57 = vand.u32 2147483648, %v2810_v59  ;;  %vm900_vm14 = vcmp.gt.f32.partialorder %v2803_v40, 0.0 }
 0x129   : > { %v757_v25 = vpop.f32.mrf.mxu2  ;;  %v1274_v3 = vsub.f32 1.0, %v1273_v48  ;;  %v1069_v7 = vmul.f32 1.442695, %v1033_v62  ;;  %vm1292_vm15 = vweird.f32 %v2810_v59  ;;  %v959_v58 = vmul.f32 1.442695, %v923_v38 }
 0x12a   : > { %v821_v63 = vpop.f32.mrf.mxu3  ;;  %v2183_v8 = vpop.eup %2182  ;;  %v1008_v29 = vsel %vm898_vm4, %v2769_v60, %v1948_v17  ;;  %v2901_v0 = vadd.f32 %v2852_v14, %v694_v52  ;;  %v1299_v5 = vor.u32 1.1754944e-38, %v1298_v57  ;;  %vm901_vm6 = vcmp.gt.f32.partialorder %v2855_v22, 0.0 }
 0x12b   : > { %v1275_v11 = vmul.f32 %v2179_v55, %v1274_v3  ;;  %v822_v46 = vadd.f32 %v821_v63, %v757_v25  ;;  %v2837_v13 = vpop.eup %2184  ;;  %v2839_v20 = vadd.f32 1.0, %v2183_v8  ;;  %2188 = vpow2.f32 %v1069_v7 }
 0x12c   : > { %v2841_v21 = vpop.f32.mrf.mxu0  ;;  %v1288_v10 = vmul.f32 %v2837_v13, %v2810_v59  ;;  %2190 = vpow2.f32 %v957_v4  ;;  %v2187_v27 = vpop.eup %2186  ;;  %vm1293_vm13 = vweird.f32 %v2837_v13  ;;  %v1296_v25 = vand.u32 2147483647, %v2810_v59 }
 0x12d   : > { %v1276_v23 = vadd.f32 %v2179_v55, %v1275_v11  ;;  %v696_v16 = vpop.f32.mrf.mxu1  ;;  %2192 = vrcp.f32 %v2839_v20  ;;  %v880_v47 = vadd.f32 %v2860_v31, %v822_v46  ;;  %v1949_v60 = vadd.f32 -1.0, %v2187_v27  ;;  %vm2896_vm0 = vmor %vm1292_vm15, %vm1293_vm13 }
 0x12e   : > { %v1289_v28 = vsub.f32 1.0, %v1288_v10  ;;  %v1313_v4 = vand.u32 2147483648, %v2839_v20  ;;  %v1311_v56 = vand.u32 2147483647, %v2839_v20  ;;  %vm1297_vm2 = vcmp.eq.f32.partialorder %v1296_v25, 8.507059e+37 }
 0x12f   : > { %v1280_v30 = vsel %vm1279_vm10, %v2179_v55, %v1276_v23  ;;  %v1034_v43 = vsub.f32 0.0, %v880_v47  ;;  %v1009_v51 = vsel %vm899_vm12, %v2788_v19, %v1949_v60  ;;  %v697_v7 = vadd.f32 %v696_v16, %v2841_v21 }
 0x130   : > { %v1285_v34 = vsel %vm1282_vm11, %v1284_v15, %v1280_v30  ;;  %v1290_v42 = vmul.f32 %v2837_v13, %v1289_v28  ;;  %vm1307_vm3 = vweird.f32 %v2839_v20  ;;  %v1314_v17 = vor.u32 1.1754944e-38, %v1313_v4 }
 0x131   : > { %v760_v32 = vpop.f32.mrf.mxu2  ;;  %v2871_v39 = vmul.f32 %v1285_v34, %v1008_v29  ;;  %v2189_v45 = vpop.eup %2188  ;;  %v1071_v54 = vmul.f32 1.442695, %v1034_v43  ;;  %v924_v23 = vmin.f32 %v2901_v0, 0.0  ;;  %vm1312_vm5 = vcmp.eq.f32.partialorder %v1311_v56, 8.507059e+37 }
 0x132   : > { %v824_v35 = vpop.f32.mrf.mxu3  ;;  %v2191_v24 = vpop.eup %2190  ;;  %v1291_v53 = vadd.f32 %v2837_v13, %v1290_v42  ;;  %v2882_v37 = vadd.f32 1.0, %v2189_v45  ;;  %v2923_v30 = vadd.f32 %v2852_v14, %v697_v7  ;;  %vm902_vm7 = vcmp.gt.f32.partialorder %v2901_v0, 0.0 }
 0x133   : > { %v2043_v61 = vpack.c.bf16 %v2871_v39, %v2869_v36  ;;  %v2193_v50 = vpop.eup %2192  ;;  %v825_v55 = vadd.f32 %v824_v35, %v760_v32  ;;  %v1950_v62 = vadd.f32 -1.0, %v2191_v24  ;;  %v961_v34 = vmul.f32 1.442695, %v924_v23 }
 0x134   : > { %v1303_v48 = vmul.f32 %v2193_v50, %v2839_v20  ;;  %2194 = vrcp.f32 %v2882_v37  ;;  %v634_v44 = vpop.f32.mrf.mxu0  ;;  %v1295_v3 = vsel %vm2896_vm0, %v2837_v13, %v1291_v53  ;;  %vm1308_vm1 = vweird.f32 %v2193_v50 }
 0x135   : > { %2074 = vst [vmem:[%s2631_s26 + $0x28] sm:$0xff] %v2043_v61   ;;  %v698_v59 = vpop.f32.mrf.mxu1  ;;  %2196 = vpow2.f32 %v1071_v54  ;;  %v881_v19 = vadd.f32 %v2860_v31, %v825_v55  ;;  %v1300_v9 = vsel %vm1297_vm2, %v1299_v5, %v1295_v3  ;;  %v1010_v12 = vsel %vm900_vm14, %v2803_v40, %v1950_v62  ;;  %vm1309_vm4 = vmor %vm1307_vm3, %vm1308_vm1 }
 0x136   : > { %v1304_v63 = vsub.f32 1.0, %v1303_v48  ;;  %2198 = vpow2.f32 %v959_v58  ;;  %v2920_v15 = vmul.f32 %v1300_v9, %v1009_v51  ;;  %v699_v47 = vadd.f32 %v698_v59, %v634_v44 }
 0x137   : > { %v1035_v8 = vsub.f32 0.0, %v881_v19  ;;  %v925_v24 = vmin.f32 %v2923_v30, 0.0  ;;  %v2946_v51 = vmul.f32 %v2869_v36, %v2869_v36  ;;  %vm1322_vm9 = vweird.f32 %v2882_v37 }
 0x138   : > { %v1305_v6 = vmul.f32 %v2193_v50, %v1304_v63  ;;  %v2935_v61 = vadd.f32 %v2852_v14, %v699_v47  ;;  %v1326_v4 = vand.u32 2147483647, %v2882_v37  ;;  %v1328_v19 = vand.u32 2147483648, %v2882_v37 }
 0x139   : > { %v762_v2 = vpop.f32.mrf.mxu2  ;;  %v1073_v10 = vmul.f32 1.442695, %v1035_v8  ;;  %v963_v48 = vmul.f32 1.442695, %v925_v24  ;;  %vm903_vm0 = vcmp.gt.f32.partialorder %v2923_v30, 0.0 }
 0x13a   : > { %v826_v49 = vpop.f32.mrf.mxu3  ;;  %v1306_v11 = vadd.f32 %v2193_v50, %v1305_v6  ;;  %v2911_v13 = vpop.eup %2194  ;;  %v926_v25 = vmin.f32 %v2935_v61, 0.0  ;;  %vm1327_vm12 = vcmp.eq.f32.partialorder %v1326_v4, 8.507059e+37  ;;  %vm904_vm3 = vcmp.gt.f32.partialorder %v2935_v61, 0.0 }
 0x13b   : > { %v827_v46 = vadd.f32 %v826_v49, %v762_v2  ;;  %v1318_v21 = vmul.f32 %v2911_v13, %v2882_v37  ;;  %v2197_v20 = vpop.eup %2196  ;;  %2200 = vpow2.f32 %v1073_v10  ;;  %vm1323_vm8 = vweird.f32 %v2911_v13 }
 0x13c   : > { %v1310_v18 = vsel %vm1309_vm4, %v2193_v50, %v1306_v11  ;;  %v2927_v28 = vadd.f32 1.0, %v2197_v20  ;;  %v2199_v29 = vpop.eup %2198  ;;  %v637_v45 = vpop.f32.mrf.mxu0  ;;  %v965_v56 = vmul.f32 1.442695, %v926_v25  ;;  %vm2956_vm10 = vmor %vm1322_vm9, %vm1323_vm8 }
 0x13d   : > { %v882_v16 = vadd.f32 %v2860_v31, %v827_v46  ;;  %v1315_v27 = vsel %vm1312_vm5, %v1314_v17, %v1310_v18  ;;  %v1319_v43 = vsub.f32 1.0, %v1318_v21  ;;  %v701_v38 = vpop.f32.mrf.mxu1  ;;  %v1951_v53 = vadd.f32 -1.0, %v2199_v29 }
 0x13e   : > { %v2925_v40 = vmul.f32 %v1315_v27, %v1010_v12  ;;  %2202 = vrcp.f32 %v2927_v28  ;;  %v702_v7 = vadd.f32 %v701_v38, %v637_v45  ;;  %v1343_v11 = vand.u32 2147483648, %v2927_v28 }
 0x13f   : > { %v1036_v32 = vsub.f32 0.0, %v882_v16  ;;  %2204 = vpow2.f32 %v961_v34  ;;  %v1320_v54 = vmul.f32 %v2911_v13, %v1319_v43  ;;  %v1011_v63 = vsel %vm901_vm6, %v2855_v22, %v1951_v53 }
 0x140   : > { %v2048_v42 = vpack.c.bf16 %v2925_v40, %v2920_v15  ;;  %v1341_v10 = vand.u32 2147483647, %v2927_v28  ;;  %v1329_v18 = vor.u32 1.1754944e-38, %v1328_v19  ;;  %vm1337_vm13 = vweird.f32 %v2927_v28 }
 0x141   : > { %v765_v33 = vpop.f32.mrf.mxu2  ;;  %v1075_v60 = vmul.f32 1.442695, %v1036_v32  ;;  %v2201_v52 = vpop.eup %2200  ;;  %v1321_v59 = vadd.f32 %v2911_v13, %v1320_v54  ;;  %v2974_v27 = vadd.f32 %v2852_v14, %v702_v7  ;;  %v1344_v32 = vor.u32 1.1754944e-38, %v1343_v11 }
 0x142   : > { %v829_v35 = vpop.f32.mrf.mxu3  ;;  %2075 = vst [vmem:[%s2631_s26 + $0x30] sm:$0xff] %v2048_v42   ;;  %v2938_v55 = vadd.f32 1.0, %v2201_v52  ;;  %vm1342_vm15 = vcmp.eq.f32.partialorder %v1341_v10, 8.507059e+37 }
 0x143   : > { %v830_v50 = vadd.f32 %v829_v35, %v765_v33  ;;  %2206 = vpow2.f32 %v1075_v60  ;;  %v1325_v37 = vsel %vm2956_vm10, %v2911_v13, %v1321_v59  ;;  %vm905_vm10 = vcmp.gt.f32.partialorder %v2974_v27, 0.0 }
 0x144   : > { %2208 = vrcp.f32 %v2938_v55  ;;  %v2203_v44 = vpop.eup %2202  ;;  %v639_v22 = vpop.f32.mrf.mxu0  ;;  %v1330_v13 = vsel %vm1327_vm12, %v1329_v18, %v1325_v37  ;;  %vm1352_vm2 = vweird.f32 %v2938_v55 }
 0x145   : > { %v883_v57 = vadd.f32 %v2860_v31, %v830_v50  ;;  %v1333_v2 = vmul.f32 %v2203_v44, %v2927_v28  ;;  %v2205_v3 = vpop.eup %2204  ;;  %2210 = vpow2.f32 %v963_v48  ;;  %v703_v8 = vpop.f32.mrf.mxu1  ;;  %vm1338_vm11 = vweird.f32 %v2203_v44 }
 0x146   : > { %v1952_v21 = vadd.f32 -1.0, %v2205_v3  ;;  %vm1339_vm14 = vmor %vm1337_vm13, %vm1338_vm11  ;;  %v2981_v52 = vmul.f32 %v1330_v13, %v1011_v63  ;;  %v704_v54 = vadd.f32 %v703_v8, %v639_v22  ;;  %v927_v48 = vmin.f32 %v2974_v27, 0.0 }
 0x147   : > { %v1037_v1 = vsub.f32 0.0, %v883_v57  ;;  %v1334_v6 = vsub.f32 1.0, %v1333_v2  ;;  %v1356_v2 = vand.u32 2147483647, %v2938_v55  ;;  %v1358_v3 = vand.u32 2147483648, %v2938_v55 }
 0x148   : > { %v1012_v28 = vsel %vm902_vm7, %v2901_v0, %v1952_v21  ;;  %v967_v7 = vmul.f32 1.442695, %v927_v48 }
 0x149   : > { %v767_v58 = vpop.f32.mrf.mxu2  ;;  %v1077_v49 = vmul.f32 1.442695, %v1037_v1  ;;  %v2207_v5 = vpop.eup %2206  ;;  %v1335_v23 = vmul.f32 %v2203_v44, %v1334_v6  ;;  %vm1357_vm6 = vcmp.eq.f32.partialorder %v1356_v2, 8.507059e+37  ;;  %v1359_v37 = vor.u32 1.1754944e-38, %v1358_v3 }
 0x14a   : > { %v831_v62 = vpop.f32.mrf.mxu3  ;;  %v2961_v46 = vadd.f32 1.0, %v2207_v5  ;;  %v2963_v17 = vpop.eup %2208 }
 0x14b   : > { %2212 = vpow2.f32 %v1077_v49  ;;  %v832_v12 = vadd.f32 %v831_v62, %v767_v58  ;;  %v1348_v16 = vmul.f32 %v2963_v17, %v2938_v55  ;;  %v1336_v20 = vadd.f32 %v2203_v44, %v1335_v23  ;;  %v2211_v35 = vpop.eup %2210 }
 0x14c   : > { %2214 = vrcp.f32 %v2961_v46  ;;  %vm1353_vm1 = vweird.f32 %v2963_v17  ;;  %v642_v1 = vpop.f32.mrf.mxu0  ;;  %v1953_v59 = vadd.f32 -1.0, %v2211_v35  ;;  %v3002_v49 = vadd.f32 %v2852_v14, %v704_v54 }
 0x14d   : > { %v1349_v33 = vsub.f32 1.0, %v1348_v16  ;;  %v884_v29 = vadd.f32 %v2860_v31, %v832_v12  ;;  %v1340_v42 = vsel %vm1339_vm14, %v2203_v44, %v1336_v20  ;;  %2216 = vpow2.f32 %v965_v56  ;;  %v706_v62 = vpop.f32.mrf.mxu1  ;;  %vm3006_vm4 = vmor %vm1352_vm2, %vm1353_vm1 }
 0x14e   : > { %v1345_v38 = vsel %vm1342_vm15, %v1344_v32, %v1340_v42  ;;  %v1371_v6 = vand.u32 2147483647, %v2961_v46  ;;  %v1373_v56 = vand.u32 2147483648, %v2961_v46  ;;  %v1013_v12 = vsel %vm903_vm0, %v2923_v30, %v1953_v59 }
 0x14f   : > { %v1350_v24 = vmul.f32 %v2963_v17, %v1349_v33  ;;  %v1038_v60 = vsub.f32 0.0, %v884_v29  ;;  %v2983_v50 = vmul.f32 %v1345_v38, %v1012_v28  ;;  %vm1367_vm7 = vweird.f32 %v2961_v46 }
 0x150   : > { %v928_v18 = vmin.f32 %v3002_v49, 0.0  ;;  %v1374_v20 = vor.u32 1.1754944e-38, %v1373_v56  ;;  %vm1372_vm9 = vcmp.eq.f32.partialorder %v1371_v6, 8.507059e+37  ;;  %v1543_v59 = vmul.f32 %v2925_v40, %v2925_v40 }
 0x151   : > { %v770_v47 = vpop.f32.mrf.mxu2  ;;  %v2213_v45 = vpop.eup %2212  ;;  %v1079_v0 = vmul.f32 1.442695, %v1038_v60  ;;  %v2053_v25 = vpack.c.bf16 %v2983_v50, %v2981_v52  ;;  %v1351_v58 = vadd.f32 %v2963_v17, %v1350_v24  ;;  %vm906_vm12 = vcmp.gt.f32.partialorder %v3002_v49, 0.0 }
 0x152   : > { %v834_v34 = vpop.f32.mrf.mxu3  ;;  %v2985_v53 = vadd.f32 1.0, %v2213_v45  ;;  %v2215_v57 = vpop.eup %2214 }
 0x153   : > { %v835_v43 = vadd.f32 %v834_v34, %v770_v47  ;;  %v1363_v44 = vmul.f32 %v2215_v57, %v2961_v46  ;;  %v2217_v4 = vpop.eup %2216  ;;  %2076 = vst [vmem:[%s2631_s26 + $0x38] sm:$0xff] %v2053_v25   ;;  %v1355_v55 = vsel %vm3006_vm4, %v2963_v17, %v1351_v58  ;;  %vm1368_vm5 = vweird.f32 %v2215_v57 }
 0x154   : > { %2218 = vrcp.f32 %v2985_v53  ;;  %v1954_v23 = vadd.f32 -1.0, %v2217_v4  ;;  %v1360_v17 = vsel %vm1357_vm6, %v1359_v37, %v1355_v55  ;;  %vm1369_vm8 = vmor %vm1367_vm7, %vm1368_vm5  ;;  %v707_v47 = vadd.f32 %v706_v62, %v642_v1  ;;  %v644_v28 = vpop.f32.mrf.mxu0 }
 0x155   : > { %v885_v63 = vadd.f32 %v2860_v31, %v835_v43  ;;  %v1364_v19 = vsub.f32 1.0, %v1363_v44  ;;  %2220 = vpow2.f32 %v1079_v0  ;;  %v3028_v35 = vmul.f32 %v1360_v17, %v1013_v12  ;;  %v708_v38 = vpop.f32.mrf.mxu1 }
 0x156   : > { %v1014_v46 = vsel %vm904_vm3, %v2935_v61, %v1954_v23  ;;  %v969_v43 = vmul.f32 1.442695, %v928_v18  ;;  %v3035_v24 = vadd.f32 %v2852_v14, %v707_v47  ;;  %v1541_v61 = vmul.f32 %v2871_v39, %v2871_v39 }
 0x157   : > { %v1365_v22 = vmul.f32 %v2215_v57, %v1364_v19  ;;  %v1039_v8 = vsub.f32 0.0, %v885_v63  ;;  %v709_v48 = vadd.f32 %v708_v38, %v644_v28  ;;  %v1561_v25 = vadd.f32 %v2799_v26, %v2946_v51 }
 0x158   : > { %v1542_v58 = vmul.f32 %v2920_v15, %v2920_v15  ;;  %v929_v62 = vmin.f32 %v3035_v24, 0.0  ;;  %v1388_v55 = vand.u32 2147483648, %v2985_v53  ;;  %vm1382_vm13 = vweird.f32 %v2985_v53 }
 0x159   : > { %v772_v9 = vpop.f32.mrf.mxu2  ;;  %v1366_v10 = vadd.f32 %v2215_v57, %v1365_v22  ;;  %v1081_v21 = vmul.f32 1.442695, %v1039_v8  ;;  %v3059_v51 = vadd.f32 %v2852_v14, %v709_v48  ;;  %v1544_v14 = vmul.f32 %v2981_v52, %v2981_v52 }
 0x15a   : > { %v836_v11 = vpop.f32.mrf.mxu3  ;;  %v3020_v16 = vpop.eup %2218  ;;  %v971_v5 = vmul.f32 1.442695, %v929_v62  ;;  %v1386_v8 = vand.u32 2147483647, %v2985_v53  ;;  %v1545_v17 = vmul.f32 %v2983_v50, %v2983_v50  ;;  %v1546_v48 = vmul.f32 %v3028_v35, %v3028_v35 }
 0x15b   : > { %v837_v13 = vadd.f32 %v836_v11, %v772_v9  ;;  %v1370_v32 = vsel %vm1369_vm8, %v2215_v57, %v1366_v10  ;;  %v1378_v30 = vmul.f32 %v3020_v16, %v2985_v53  ;;  %2222 = vpow2.f32 %v1081_v21  ;;  %v2221_v33 = vpop.eup %2220 }
 0x15c   : > { %v1375_v29 = vsel %vm1372_vm9, %v1374_v20, %v1370_v32  ;;  %2224 = vpow2.f32 %v967_v7  ;;  %v3032_v45 = vadd.f32 1.0, %v2221_v33  ;;  %v1512_v57 = vadd.f32 %v2795_v41, %v2869_v36 }
 0x15d   : > { %v886_v34 = vadd.f32 %v2860_v31, %v837_v13  ;;  %v3030_v42 = vmul.f32 %v1375_v29, %v1014_v46  ;;  %v1379_v54 = vsub.f32 1.0, %v1378_v30  ;;  %v1562_v36 = vadd.f32 %v1561_v25, %v1541_v61 }
 0x15e   : > { %2226 = vrcp.f32 %v3032_v45  ;;  %v1513_v1 = vadd.f32 %v1512_v57, %v2871_v39  ;;  %vm1383_vm11 = vweird.f32 %v3020_v16  ;;  %v1401_v23 = vand.u32 2147483647, %v3032_v45 }
 0x15f   : > { %v1040_v60 = vsub.f32 0.0, %v886_v34  ;;  %v2058_v31 = vpack.c.bf16 %v3030_v42, %v3028_v35  ;;  %2228 = vpow2.f32 %v969_v43  ;;  %v1380_v2 = vmul.f32 %v3020_v16, %v1379_v54  ;;  %vm3074_vm14 = vmor %vm1382_vm13, %vm1383_vm11 }
 0x160   : > { %v1514_v26 = vadd.f32 %v1513_v1, %v2920_v15  ;;  %v1563_v3 = vadd.f32 %v1562_v36, %v1542_v58  ;;  %v1403_v10 = vand.u32 2147483648, %v3032_v45  ;;  %v1389_v20 = vor.u32 1.1754944e-38, %v1388_v55 }
 0x161   : > { %v2223_v0 = vpop.eup %2222  ;;  %2077 = vst [vmem:[%s2631_s26 + $0x40] sm:$0xff] %v2058_v31   ;;  %v1083_v41 = vmul.f32 1.442695, %v1040_v60  ;;  %v1381_v7 = vadd.f32 %v3020_v16, %v1380_v2  ;;  %vm1387_vm0 = vcmp.eq.f32.partialorder %v1386_v8, 8.507059e+37  ;;  %vm1397_vm1 = vweird.f32 %v3032_v45 }
 0x162   : > { %v2225_v44 = vpop.eup %2224  ;;  %v3051_v63 = vadd.f32 1.0, %v2223_v0  ;;  %v1515_v19 = vadd.f32 %v1514_v26, %v2925_v40  ;;  %v1564_v56 = vadd.f32 %v1563_v3, %v1543_v59  ;;  %v930_v40 = vmin.f32 %v3059_v51, 0.0 }
 0x163   : > { %v1955_v39 = vadd.f32 -1.0, %v2225_v44  ;;  %v1404_v46 = vor.u32 1.1754944e-38, %v1403_v10  ;;  %vm1402_vm3 = vcmp.eq.f32.partialorder %v1401_v23, 8.507059e+37  ;;  %vm907_vm7 = vcmp.gt.f32.partialorder %v3035_v24, 0.0 }
 0x164   : > { %2230 = vrcp.f32 %v3051_v63  ;;  %v2227_v4 = vpop.eup %2226  ;;  %v973_v47 = vmul.f32 1.442695, %v930_v40  ;;  %vm1412_vm5 = vweird.f32 %v3051_v63  ;;  %v1516_v31 = vadd.f32 %v1515_v19, %v2981_v52 }
 0x165   : > { %2232 = vpow2.f32 %v1083_v41  ;;  %v2229_v6 = vpop.eup %2228  ;;  %v1393_v15 = vmul.f32 %v2227_v4, %v3032_v45  ;;  %v1015_v22 = vsel %vm905_vm10, %v2974_v27, %v1955_v39  ;;  %v1385_v27 = vsel %vm3074_vm14, %v3020_v16, %v1381_v7 }
 0x166   : > { %v1956_v37 = vadd.f32 -1.0, %v2229_v6  ;;  %2234 = vpow2.f32 %v971_v5  ;;  %vm1398_vm15 = vweird.f32 %v2227_v4  ;;  %v1390_v33 = vsel %vm1387_vm0, %v1389_v20, %v1385_v27 }
 0x167   : > { %v1394_v9 = vsub.f32 1.0, %v1393_v15  ;;  %vm1399_vm2 = vmor %vm1397_vm1, %vm1398_vm15  ;;  %v1418_v45 = vand.u32 2147483648, %v3051_v63  ;;  %v1455_v38 = vmul.f32 %v1390_v33, %v1015_v22  ;;  %v1565_v57 = vadd.f32 %v1564_v56, %v1544_v14 }
 0x168   : > { %v1016_v16 = vsel %vm906_vm12, %v3002_v49, %v1956_v37  ;;  %v1416_v49 = vand.u32 2147483647, %v3051_v63  ;;  %v1517_v44 = vadd.f32 %v1516_v31, %v2983_v50  ;;  %v1547_v59 = vmul.f32 %v3030_v42, %v3030_v42 }
 0x169   : > { %v1395_v21 = vmul.f32 %v2227_v4, %v1394_v9  ;;  %v1419_v62 = vor.u32 1.1754944e-38, %v1418_v45  ;;  %v1548_v39 = vmul.f32 %v1455_v38, %v1455_v38  ;;  %vm908_vm10 = vcmp.gt.f32.partialorder %v3059_v51, 0.0 }
 0x16a   : > { %v2231_v11 = vpop.eup %2230  ;;  %vm1417_vm8 = vcmp.eq.f32.partialorder %v1416_v49, 8.507059e+37  ;;  %v1518_v36 = vadd.f32 %v1517_v44, %v3028_v35  ;;  %vm1579_vm14 = vcmask 1040384  }
 0x16b   : > { %v2233_v18 = vpop.eup %2232  ;;  %v1408_v53 = vmul.f32 %v2231_v11, %v3051_v63  ;;  %v1396_v32 = vadd.f32 %v2227_v4, %v1395_v21  ;;  %vm1413_vm4 = vweird.f32 %v2231_v11  ;;  %v1566_v63 = vadd.f32 %v1565_v57, %v1545_v17 }
 0x16c   : > { %v3086_v13 = vadd.f32 1.0, %v2233_v18  ;;  %v2235_v43 = vpop.eup %2234  ;;  %vm3097_vm6 = vmor %vm1412_vm5, %vm1413_vm4  ;;  %v1519_v50 = vadd.f32 %v1518_v36, %v3030_v42 }
 0x16d   : > { %v1409_v30 = vsub.f32 1.0, %v1408_v53  ;;  %v1400_v29 = vsel %vm1399_vm2, %v2227_v4, %v1396_v32  ;;  %v1957_v1 = vadd.f32 -1.0, %v2235_v43  ;;  %v1567_v26 = vadd.f32 %v1566_v63, %v1546_v48 }
 0x16e   : > { %2236 = vrcp.f32 %v3086_v13  ;;  %v1405_v28 = vsel %vm1402_vm3, %v1404_v46, %v1400_v29  ;;  %v1433_v19 = vand.u32 2147483648, %v3086_v13  ;;  %v1431_v56 = vand.u32 2147483647, %v3086_v13 }
 0x16f   : > { %v1410_v34 = vmul.f32 %v2231_v11, %v1409_v30  ;;  %2238 = vpow2.f32 %v973_v47  ;;  %v1456_v60 = vmul.f32 %v1405_v28, %v1016_v16  ;;  %v1017_v4 = vsel %vm907_vm7, %v3035_v24, %v1957_v1 }
 0x170   : > { %v1568_v7 = vadd.f32 %v1567_v26, %v1547_v59  ;;  %v1520_v15 = vadd.f32 %v1519_v50, %v1455_v38  ;;  %vm1427_vm11 = vweird.f32 %v3086_v13  ;;  %v1434_v24 = vor.u32 1.1754944e-38, %v1433_v19 }
 0x171   : > { %v1411_v61 = vadd.f32 %v2231_v11, %v1410_v34  ;;  %v2063_v0 = vpack.c.bf16 %v1456_v60, %v1455_v38  ;;  %v1549_v14 = vmul.f32 %v1456_v60, %v1456_v60  ;;  %vm1432_vm13 = vcmp.eq.f32.partialorder %v1431_v56, 8.507059e+37 }
 0x172   : > { %v1569_v42 = vadd.f32 %v1568_v7, %v1548_v39  ;;  %v1521_v40 = vadd.f32 %v1520_v15, %v1456_v60 }
 0x173   : > { %v1415_v25 = vsel %vm3097_vm6, %v2231_v11, %v1411_v61  ;;  %2078 = vst [vmem:[%s2631_s26 + $0x48] sm:$0xff] %v2063_v0  }
 0x174   : > { %v2237_v58 = vpop.eup %2236  ;;  %v1420_v2 = vsel %vm1417_vm8, %v1419_v62, %v1415_v25  ;;  %v1570_v12 = vadd.f32 %v1569_v42, %v1549_v14 }
 0x175   : > { %v1423_v52 = vmul.f32 %v2237_v58, %v3086_v13  ;;  %v2239_v41 = vpop.eup %2238  ;;  %v1457_v5 = vmul.f32 %v1420_v2, %v1017_v4  ;;  %vm1428_vm9 = vweird.f32 %v2237_v58 }
 0x176   : > { %v1958_v35 = vadd.f32 -1.0, %v2239_v41  ;;  %vm1429_vm12 = vmor %vm1427_vm11, %vm1428_vm9 }
 0x177   : > { %v1424_v3 = vsub.f32 1.0, %v1423_v52  ;;  %v1550_v22 = vmul.f32 %v1457_v5, %v1457_v5  ;;  %v1522_v37 = vadd.f32 %v1521_v40, %v1457_v5 }
 0x178   : > { %v1018_v9 = vsel %vm908_vm10, %v3059_v51, %v1958_v35 }
 0x179   : > { %v1425_v6 = vmul.f32 %v2237_v58, %v1424_v3  ;;  %v1571_v10 = vadd.f32 %v1570_v12, %v1550_v22 }
 0x17b   : > { %v1426_v55 = vadd.f32 %v2237_v58, %v1425_v6 }
 0x17d   : > { %v1430_v8 = vsel %vm1429_vm12, %v2237_v58, %v1426_v55 }
 0x17e   : > { %v1435_v11 = vsel %vm1432_vm13, %v1434_v24, %v1430_v8 }
 0x17f   : > { %v1458_v23 = vmul.f32 %v1435_v11, %v1018_v9 }
 0x181   : > { %v2068_v18 = vpack.c.bf16 %v1458_v23, %v1457_v5  ;;  %v1523_v27 = vadd.f32 %v1522_v37, %v1458_v23  ;;  %v1551_v21 = vmul.f32 %v1458_v23, %v1458_v23 }
 0x183   : > { %2079 = vst [vmem:[%s2631_s26 + $0x50] sm:$0xff] %v2068_v18   ;;  %v1524_v53 = vrot.slane %v1523_v27, 4  ;;  %v1572_v17 = vadd.f32 %v1571_v10, %v1551_v21 }
 0x185   : > { %v1525_v20 = vadd.f32 %v1524_v53, %v1523_v27  ;;  %v1573_v47 = vrot.slane %v1572_v17, 4 }
 0x187   : > { %v1526_v13 = vrot.slane %v1525_v20, 2  ;;  %v1574_v32 = vadd.f32 %v1573_v47, %v1572_v17 }
 0x189   : > { %v1527_v30 = vadd.f32 %v1526_v13, %v1525_v20  ;;  %v1575_v33 = vrot.slane %v1574_v32, 2 }
 0x18b   : > { %v1528_v16 = vrot.slane %v1527_v30, 1  ;;  %v1576_v51 = vadd.f32 %v1575_v33, %v1574_v32 }
 0x18d   : > { %v1577_v46 = vrot.slane %v1576_v51, 1  ;;  %v1529_v29 = vadd.f32 %v1528_v16, %v1527_v30 }
 0x18f   : > { %v1578_v34 = vadd.f32 %v1577_v46, %v1576_v51 }
 0x191   : > { %v1580_v43 = vsel %vm1579_vm14, %v1529_v29, %v1578_v34 }
 0x192   : > { %1581 = vst [vmem:[%s258_s8] sm:$0x3] %v1580_v43 }
 0x193 PF: > { %s15_s17 = sadd.s32 1, %s2264_s17   ;;  %s3156_s15 = smov %s2260_s16 }
 0x194   : > { %p12_p5 = scmp.ge.s32.totalorder %s15_s17, 4   ;;  %s3157_s16 = smov %s3159_s18 }
 0x196   :  { %14 = sbr.rel (!%p12_p5) target bundleno = 2 (0x2), region = 74 }

// kernel: gated_coarse2fine_forward.46
= control target key start
LH: loop header
LB: loop body
LE: loop exit
PB: predicated region body
PF: predicated region fallthrough
CT: control target
= control target key end

     0   :  { %s1897_s15 = smov 0   ;;  %s1899_s16 = smov 0   ;;  %s2816_s0 = inlined_call_operand.vmem [shape: bf16[2,176,128], index: 0, kind: input, shape index: {}]   ;;  %s2817_s1 = inlined_call_operand.vmem [shape: bf16[128,256], index: 1, kind: input, shape index: {}]   ;;  %s2818_s2 = inlined_call_operand.vmem [shape: f32[2,128], index: 2, kind: input, shape index: {}]   ;;  %s2819_s3 = inlined_call_operand.vmem [shape: bf16[2,176,128], index: 3, kind: output, shape index: {0}]   ;;  %s2820_s4 = inlined_call_operand.vmem [shape: f32[2,1,2,128], index: 4, kind: output, shape index: {1}]  }
   0x1   :  { %s1901_s17 = smov 0  }
   0x2 LB: > { %s27_s18 = sadd.s32 1, %s1866_s16  ;;  %p1443_p0 = scmp.ge.s32.totalorder %s1870_s17, 1  ;;  %s1870_s17 = sphi %s1901_s17, %s15_s17   ;;  %s1866_s16 = sphi %s1899_s16, %s2870_s16   ;;  %s1862_s15 = sphi %s1897_s15, %s2869_s15  }
   0x3   : > { %p29_p1 = scmp.ge.s32.totalorder %s27_s18, 2  ;;  %p188_p2 = scmp.lt.s32.totalorder %s1870_s17, 3 }
   0x5   : > { %s2872_s18 = smov (%p29_p1, %s27_s18), 0  ;;  %p189_p3 = pnand %p1443_p0, %p188_p2 }
   0x6   : > { %p230_p4 = scmp.lt.s32.totalorder (!%p189_p3), %s1862_s15, 1 }
   0x7   : > { %192 = sbr.rel (%p189_p3) target bundleno = 378 (0x17a), region = 32 }
   0xc   : > { %v1604_v0 = vld [vmem:[%s2817_s1 + $0x74] sm:$0xf]  ;;  %v1551_v1 = vld [vmem:[%s2817_s1 + $0x78] sm:$0xf0]  ;;  %v1602_v2 = vld [vmem:[%s2817_s1 + $0x64] sm:$0xf] }
   0xd   : > { %v1554_v3 = vor.u32 %v1604_v0, %v1551_v1  ;;  %v1543_v4 = vld [vmem:[%s2817_s1 + $0x68] sm:$0xf0]  ;;  %v1549_v5 = vld [vmem:[%s2817_s1 + $0x70] sm:$0xf]  ;;  %v1605_v6 = vld [vmem:[%s2817_s1 + $0x74] sm:$0xf0] }
   0xe   : > { %v1550_v7 = vor.u32 %v1605_v6, %v1549_v5  ;;  %v1541_v8 = vld [vmem:[%s2817_s1 + $0x60] sm:$0xf]  ;;  %v1546_v9 = vor.u32 %v1602_v2, %v1543_v4  ;;  %v1603_v10 = vld [vmem:[%s2817_s1 + $0x64] sm:$0xf0]  ;;  %v1600_v11 = vld [vmem:[%s2817_s1 + $0x54] sm:$0xf] }
   0xf   : > { %504 = vmatpush.bf16.msra.mxu1 %v1554_v3  ;;  %1679 = vmatpush.bf16.msra.mxu3 %v1554_v3  ;;  %v1535_v12 = vld [vmem:[%s2817_s1 + $0x58] sm:$0xf0]  ;;  %v1542_v13 = vor.u32 %v1603_v10, %v1541_v8  ;;  %v1533_v14 = vld [vmem:[%s2817_s1 + $0x50] sm:$0xf]  ;;  %v1601_v15 = vld [vmem:[%s2817_s1 + $0x54] sm:$0xf0] }
  0x10   : > { %440 = vmatpush.bf16.msra.mxu0 %v1550_v7  ;;  %1671 = vmatpush.bf16.msra.mxu2 %v1550_v7  ;;  %v1538_v16 = vor.u32 %v1600_v11, %v1535_v12  ;;  %v1598_v17 = vld [vmem:[%s2817_s1 + $0x44] sm:$0xf]  ;;  %v1527_v18 = vld [vmem:[%s2817_s1 + $0x48] sm:$0xf0]  ;;  %v1534_v19 = vor.u32 %v1601_v15, %v1533_v14  ;;  %v1525_v20 = vld [vmem:[%s2817_s1 + $0x40] sm:$0xf] }
  0x11   : > { %v1599_v21 = vld [vmem:[%s2817_s1 + $0x44] sm:$0xf0]  ;;  %v1530_v22 = vor.u32 %v1598_v17, %v1527_v18  ;;  %v1596_v23 = vld [vmem:[%s2817_s1 + $0x34] sm:$0xf]  ;;  %v1519_v24 = vld [vmem:[%s2817_s1 + $0x38] sm:$0xf0] }
  0x12   : > { %v1526_v25 = vor.u32 %v1599_v21, %v1525_v20  ;;  %v1517_v26 = vld [vmem:[%s2817_s1 + $0x30] sm:$0xf]  ;;  %v1597_v27 = vld [vmem:[%s2817_s1 + $0x34] sm:$0xf0]  ;;  %v1522_v28 = vor.u32 %v1596_v23, %v1519_v24  ;;  %v1594_v29 = vld [vmem:[%s2817_s1 + $0x24] sm:$0xf] }
  0x13   : > { %505 = vmatpush.bf16.msra.mxu1 %v1546_v9  ;;  %1680 = vmatpush.bf16.msra.mxu3 %v1546_v9  ;;  %v1511_v30 = vld [vmem:[%s2817_s1 + $0x28] sm:$0xf0]  ;;  %v1518_v31 = vor.u32 %v1597_v27, %v1517_v26  ;;  %v1509_v32 = vld [vmem:[%s2817_s1 + $0x20] sm:$0xf]  ;;  %v1595_v33 = vld [vmem:[%s2817_s1 + $0x24] sm:$0xf0] }
  0x14   : > { %441 = vmatpush.bf16.msra.mxu0 %v1542_v13  ;;  %1672 = vmatpush.bf16.msra.mxu2 %v1542_v13  ;;  %v1514_v34 = vor.u32 %v1594_v29, %v1511_v30  ;;  %s2874_s15 = smov (!%p230_p4, %s1862_s15), 1  ;;  %v1592_v35 = vld [vmem:[%s2817_s1 + $0x14] sm:$0xf]  ;;  %v1503_v36 = vld [vmem:[%s2817_s1 + $0x18] sm:$0xf0]  ;;  %v1510_v37 = vor.u32 %v1595_v33, %v1509_v32 }
  0x15   : > { %v1501_v38 = vld [vmem:[%s2817_s1 + $0x10] sm:$0xf]  ;;  %v1593_v39 = vld [vmem:[%s2817_s1 + $0x14] sm:$0xf0]  ;;  %v1506_v40 = vor.u32 %v1592_v35, %v1503_v36  ;;  %s1687_s5 = smul.u32 88, %s2874_s15  ;;  %s1446_s6 = sshll.u32 %s2874_s15, 1 }
  0x16   : > { %v1590_v41 = vld [vmem:[%s2817_s1 + $0x4] sm:$0xf]  ;;  %v1495_v42 = vld [vmem:[%s2817_s1 + $0x8] sm:$0xf0]  ;;  %v1502_v43 = vor.u32 %v1593_v39, %v1501_v38  ;;  %v1493_v44 = vld [vmem:[%s2817_s1] sm:$0xf]  ;;  %s255_s9 = scalar_lea.vmem %s2820_s4, %s1446_s6 }
  0x17   : > { %506 = vmatpush.bf16.msra.mxu1 %v1538_v16  ;;  %1681 = vmatpush.bf16.msra.mxu3 %v1538_v16  ;;  %v1591_v45 = vld [vmem:[%s2817_s1 + $0x4] sm:$0xf0]  ;;  %v1498_v46 = vor.u32 %v1590_v41, %v1495_v42  ;;  %s2023_s20 = scalar_lea.vmem %s2816_s0, %s1687_s5  ;;  %v2039_v59 = vld [vmem:[%s2818_s2 + $0x1] ss:$0 sm:$0xff]  ;;  %v2044_v60 = vld [vmem:[%s2818_s2] ss:$0 sm:$0xff]  ;;  %s2142_s27 = scalar_lea.vmem %s2819_s3, %s1687_s5 }
  0x18   : > { %442 = vmatpush.bf16.msra.mxu0 %v1534_v19  ;;  %1673 = vmatpush.bf16.msra.mxu2 %v1534_v19  ;;  %v1494_v47 = vor.u32 %v1591_v45, %v1493_v44  ;;  %v1579_v48 = vld [vmem:[%s2023_s20] sm:$0xff]  ;;  %v1585_v49 = vld [vmem:[%s2023_s20 + $0x30] sm:$0xff]  ;;  %v1584_v50 = vld [vmem:[%s2023_s20 + $0x28] sm:$0xff] }
  0x19   : > { %v1580_v51 = vld [vmem:[%s2023_s20 + $0x8] sm:$0xff]  ;;  %v1586_v52 = vld [vmem:[%s2023_s20 + $0x38] sm:$0xff]  ;;  %v1581_v53 = vld [vmem:[%s2023_s20 + $0x10] sm:$0xff] }
  0x1a   : > { %v1587_v54 = vld [vmem:[%s2023_s20 + $0x40] sm:$0xff]  ;;  %v1582_v55 = vld [vmem:[%s2023_s20 + $0x18] sm:$0xff]  ;;  %v1588_v56 = vld [vmem:[%s2023_s20 + $0x48] sm:$0xff] }
  0x1b   : > { %507 = vmatpush.bf16.msra.mxu1 %v1530_v22  ;;  %1682 = vmatpush.bf16.msra.mxu3 %v1530_v22  ;;  %v1583_v57 = vld [vmem:[%s2023_s20 + $0x20] sm:$0xff]  ;;  %v1589_v58 = vld [vmem:[%s2023_s20 + $0x50] sm:$0xff] }
  0x1c   : > { %443 = vmatpush.bf16.msra.mxu0 %v1526_v25  ;;  %1674 = vmatpush.bf16.msra.mxu2 %v1526_v25 }
  0x1f   : > { %508 = vmatpush.bf16.msra.mxu1 %v1522_v28  ;;  %1683 = vmatpush.bf16.msra.mxu3 %v1522_v28 }
  0x20   : > { %444 = vmatpush.bf16.msra.mxu0 %v1518_v31  ;;  %1675 = vmatpush.bf16.msra.mxu2 %v1518_v31 }
  0x23   : > { %509 = vmatpush.bf16.msra.mxu1 %v1514_v34  ;;  %1684 = vmatpush.bf16.msra.mxu3 %v1514_v34 }
  0x24   : > { %445 = vmatpush.bf16.msra.mxu0 %v1510_v37  ;;  %1676 = vmatpush.bf16.msra.mxu2 %v1510_v37 }
  0x27   : > { %510 = vmatpush.bf16.msra.mxu1 %v1506_v40  ;;  %1685 = vmatpush.bf16.msra.mxu3 %v1506_v40 }
  0x28   : > { %446 = vmatpush.bf16.msra.mxu0 %v1502_v43  ;;  %1677 = vmatpush.bf16.msra.mxu2 %v1502_v43 }
  0x2b   : > { %511 = vmatpush.bf16.msra.mxu1 %v1498_v46  ;;  %1686 = vmatpush.bf16.msra.mxu3 %v1498_v46 }
  0x2c   : > { %447 = vmatpush.bf16.msra.mxu0 %v1494_v47  ;;  %1678 = vmatpush.bf16.msra.mxu2 %v1494_v47 }
  0x2e   : > { %512 = vmatmul.bf16.vlgmr.msra.gmra.mxu1 %v1579_v48  ;;  %542 = vmatmul.bf16.vlgmr.msra.gmra.mxu3 %v1585_v49 }
  0x2f   : > { %448 = vmatmul.bf16.vlgmr.msra.gmra.mxu0 %v1579_v48  ;;  %473 = vmatmul.bf16.vlgmr.msra.gmra.mxu2 %v1584_v50 }
  0x3e   : > { %517 = vmatmul.bf16.gmra.mxu1 %v1580_v51  ;;  %547 = vmatmul.bf16.gmra.mxu3 %v1586_v52 }
  0x3f   : > { %453 = vmatmul.bf16.gmra.mxu0 %v1580_v51  ;;  %478 = vmatmul.bf16.gmra.mxu2 %v1585_v49 }
  0x4e   : > { %522 = vmatmul.bf16.gmra.mxu1 %v1581_v53  ;;  %552 = vmatmul.bf16.gmra.mxu3 %v1587_v54 }
  0x4f   : > { %458 = vmatmul.bf16.gmra.mxu0 %v1581_v53  ;;  %483 = vmatmul.bf16.gmra.mxu2 %v1586_v52 }
  0x5e   : > { %527 = vmatmul.bf16.gmra.mxu1 %v1582_v55  ;;  %557 = vmatmul.bf16.gmra.mxu3 %v1588_v56 }
  0x5f   : > { %463 = vmatmul.bf16.gmra.mxu0 %v1582_v55  ;;  %488 = vmatmul.bf16.gmra.mxu2 %v1587_v54 }
  0x6e   : > { %532 = vmatmul.bf16.gmra.mxu1 %v1583_v57  ;;  %562 = vmatmul.bf16.gmra.mxu3 %v1589_v58 }
  0x6f   : > { %468 = vmatmul.bf16.gmra.mxu0 %v1583_v57  ;;  %493 = vmatmul.bf16.gmra.mxu2 %v1588_v56 }
  0x7e   : > { %537 = vmatmul.bf16.gmra.mxu1 %v1584_v50 }
  0x7f   : > { %498 = vmatmul.bf16.gmra.mxu2 %v1589_v58 }
  0xab   : > { %v513_v61 = vpop.f32.mrf.mxu1 }
  0xac   : > { %v594_v62 = vadd.f32 %v2039_v59, %v513_v61  ;;  %v449_v63 = vpop.f32.mrf.mxu0 }
  0xad   : > { %v2048_v0 = vadd.f32 %v2044_v60, %v449_v63 }
  0xae   : > { %v748_v1 = vsub.f32 0.0, %v594_v62 }
  0xaf   : > { %v638_v3 = vmin.f32 %v2048_v0, 0.0  ;;  %vm616_vm0 = vcmp.gt.f32.partialorder %v2048_v0, 0.0 }
  0xb0   : > { %v770_v2 = vmul.f32 1.442695, %v748_v1 }
  0xb1   : > { %v543_v4 = vpop.f32.mrf.mxu3  ;;  %v660_v11 = vmul.f32 1.442695, %v638_v3 }
  0xb2   : > { %1714 = vpow2.f32 %v770_v2  ;;  %v606_v5 = vadd.f32 %v2039_v59, %v543_v4  ;;  %v2053_v9 = vpop.f32.mrf.mxu2 }
  0xb3   : > { %v515_v6 = vpop.f32.mrf.mxu1 }
  0xb4   : > { %v595_v7 = vadd.f32 %v2039_v59, %v515_v6  ;;  %v451_v8 = vpop.f32.mrf.mxu0  ;;  %v760_v10 = vsub.f32 0.0, %v606_v5 }
  0xb5   : > { %v2056_v12 = vadd.f32 %v2044_v60, %v451_v8 }
  0xb6   : > { %v749_v13 = vsub.f32 0.0, %v595_v7  ;;  %v794_v14 = vmul.f32 1.442695, %v760_v10 }
  0xb7   : > { %v639_v15 = vmin.f32 %v2056_v12, 0.0  ;;  %vm617_vm4 = vcmp.gt.f32.partialorder %v2056_v12, 0.0 }
  0xb8   : > { %v1715_v16 = vpop.eup %1714  ;;  %v772_v17 = vmul.f32 1.442695, %v749_v13  ;;  %1716 = vpow2.f32 %v794_v14 }
  0xb9   : > { %v814_v18 = vadd.f32 1.0, %v1715_v16  ;;  %1718 = vpow2.f32 %v660_v11  ;;  %v545_v19 = vpop.f32.mrf.mxu3  ;;  %v662_v21 = vmul.f32 1.442695, %v639_v15 }
  0xba   : > { %1720 = vpow2.f32 %v772_v17  ;;  %v607_v20 = vadd.f32 %v2039_v59, %v545_v19  ;;  %v2064_v28 = vpop.f32.mrf.mxu2 }
  0xbb   : > { %1722 = vrcp.f32 %v814_v18  ;;  %v518_v22 = vpop.f32.mrf.mxu1  ;;  %v845_v41 = vand.u32 2147483647, %v814_v18  ;;  %v847_v47 = vand.u32 2147483648, %v814_v18  ;;  %vm841_vm2 = vweird.f32 %v814_v18 }
  0xbc   : > { %v596_v23 = vadd.f32 %v2039_v59, %v518_v22  ;;  %v454_v24 = vpop.f32.mrf.mxu0  ;;  %v761_v29 = vsub.f32 0.0, %v607_v20  ;;  %1724 = vpow2.f32 %v662_v21 }
  0xbd   : > { %v2062_v25 = vadd.f32 %v2044_v60, %v454_v24  ;;  %vm2081_vm3 = vcmp.eq.f32.partialorder %v845_v41, 8.507059e+37  ;;  %v848_v63 = vor.u32 1.1754944e-38, %v847_v47 }
  0xbe   : > { %v1717_v26 = vpop.eup %1716  ;;  %v750_v27 = vsub.f32 0.0, %v596_v23  ;;  %v796_v39 = vmul.f32 1.442695, %v761_v29 }
  0xbf   : > { %v1719_v30 = vpop.eup %1718  ;;  %v2066_v31 = vadd.f32 1.0, %v1717_v26  ;;  %v640_v32 = vmin.f32 %v2062_v25, 0.0  ;;  %vm618_vm6 = vcmp.gt.f32.partialorder %v2062_v25, 0.0 }
  0xc0   : > { %v1721_v33 = vpop.eup %1720  ;;  %v774_v34 = vmul.f32 1.442695, %v750_v27  ;;  %v1555_v40 = vadd.f32 -1.0, %v1719_v30 }
  0xc1   : > { %v1723_v35 = vpop.eup %1722  ;;  %v2069_v36 = vadd.f32 1.0, %v1721_v33  ;;  %1726 = vrcp.f32 %v2066_v31  ;;  %v664_v37 = vmul.f32 1.442695, %v640_v32  ;;  %vm1021_vm10 = vweird.f32 %v2066_v31  ;;  %v548_v29 = vpop.f32.mrf.mxu3 }
  0xc2   : > { %v837_v38 = vmul.f32 %v1723_v35, %v814_v18  ;;  %1728 = vpow2.f32 %v774_v34  ;;  %v1725_v46 = vpop.eup %1724  ;;  %vm842_vm1 = vweird.f32 %v1723_v35  ;;  %v726_v52 = vsel %vm616_vm0, %v2048_v0, %v1555_v40  ;;  %v479_v61 = vpop.f32.mrf.mxu2 }
  0xc3   : > { %1730 = vrcp.f32 %v2069_v36  ;;  %v520_v42 = vpop.f32.mrf.mxu1  ;;  %v1556_v56 = vadd.f32 -1.0, %v1725_v46  ;;  %v860_v57 = vand.u32 2147483647, %v2069_v36  ;;  %vm843_vm5 = vmor %vm841_vm2, %vm842_vm1  ;;  %v2093_v2 = vadd.f32 %v2044_v60, %v479_v61 }
  0xc4   : > { %v838_v43 = vsub.f32 1.0, %v837_v38  ;;  %1732 = vpow2.f32 %v664_v37  ;;  %v597_v44 = vadd.f32 %v2039_v59, %v520_v42  ;;  %v456_v45 = vpop.f32.mrf.mxu0  ;;  %vm856_vm7 = vweird.f32 %v2069_v36 }
  0xc5   : > { %1734 = vpow2.f32 %v796_v39  ;;  %v2076_v50 = vadd.f32 %v2044_v60, %v456_v45  ;;  %v862_v8 = vand.u32 2147483648, %v2069_v36  ;;  %v727_v13 = vsel %vm617_vm4, %v2056_v12, %v1556_v56 }
  0xc6   : > { %v839_v48 = vmul.f32 %v1723_v35, %v838_v43  ;;  %v751_v49 = vsub.f32 0.0, %v597_v44  ;;  %vm2106_vm8 = vcmp.eq.f32.partialorder %v860_v57, 8.507059e+37  ;;  %v650_v18 = vmin.f32 %v2093_v2, 0.0 }
  0xc7   : > { %v2078_v51 = vpop.eup %1726  ;;  %v641_v6 = vmin.f32 %v2076_v50, 0.0  ;;  %v863_v23 = vor.u32 1.1754944e-38, %v862_v8  ;;  %v608_v34 = vadd.f32 %v2039_v59, %v548_v29  ;;  %v1025_v41 = vand.u32 2147483647, %v2066_v31 }
  0xc8   : > { %v1729_v54 = vpop.eup %1728  ;;  %v840_v55 = vadd.f32 %v1723_v35, %v839_v48  ;;  %v1017_v58 = vmul.f32 %v2078_v51, %v2066_v31  ;;  %v776_v1 = vmul.f32 1.442695, %v751_v49  ;;  %vm1022_vm11 = vweird.f32 %v2078_v51 }
  0xc9   : > { %v1731_v62 = vpop.eup %1730  ;;  %v2090_v0 = vadd.f32 1.0, %v1729_v54  ;;  %v666_v21 = vmul.f32 1.442695, %v641_v6  ;;  %v684_v33 = vmul.f32 1.442695, %v650_v18  ;;  %v1027_v42 = vand.u32 2147483648, %v2066_v31  ;;  %vm2148_vm15 = vmor %vm1021_vm10, %vm1022_vm11 }
  0xca   : > { %v1733_v3 = vpop.eup %1732  ;;  %v844_v4 = vsel %vm843_vm5, %v1723_v35, %v840_v55  ;;  %v852_v5 = vmul.f32 %v1731_v62, %v2069_v36  ;;  %v1018_v15 = vsub.f32 1.0, %v1017_v58  ;;  %vm857_vm9 = vweird.f32 %v1731_v62  ;;  %v481_v58 = vpop.f32.mrf.mxu2 }
  0xcb   : > { %v849_v7 = vsel %vm2081_vm3, %v848_v63, %v844_v4  ;;  %1736 = vrcp.f32 %v2090_v0  ;;  %v1735_v10 = vpop.eup %1734  ;;  %v1557_v16 = vadd.f32 -1.0, %v1733_v3  ;;  %v523_v22 = vpop.f32.mrf.mxu1  ;;  %vm871_vm12 = vweird.f32 %v2090_v0  ;;  %vm858_vm13 = vmor %vm856_vm7, %vm857_vm9 }
  0xcc   : > { %v853_v11 = vsub.f32 1.0, %v852_v5  ;;  %v2110_v17 = vadd.f32 1.0, %v1735_v10  ;;  %1738 = vpow2.f32 %v776_v1  ;;  %v1166_v19 = vmul.f32 %v849_v7, %v726_v52  ;;  %v459_v57 = vpop.f32.mrf.mxu0 }
  0xcd   : > { %v875_v24 = vand.u32 2147483647, %v2090_v0  ;;  %v877_v26 = vand.u32 2147483648, %v2090_v0  ;;  %v1019_v27 = vmul.f32 %v2078_v51, %v1018_v15  ;;  %v728_v32 = vsel %vm618_vm6, %v2062_v25, %v1557_v16 }
  0xce   : > { %v854_v20 = vmul.f32 %v1731_v62, %v853_v11  ;;  %1740 = vrcp.f32 %v2110_v17  ;;  %v598_v35 = vadd.f32 %v2039_v59, %v523_v22  ;;  %v1259_v37 = vmul.f32 %v1166_v19, %v1166_v19 }
  0xcf   : > { %1742 = vpow2.f32 %v666_v21  ;;  %v762_v25 = vsub.f32 0.0, %v608_v34  ;;  %v1020_v46 = vadd.f32 %v2078_v51, %v1019_v27  ;;  %v2156_v31 = vadd.f32 %v2044_v60, %v459_v57 }
  0xd0   : > { %v855_v12 = vadd.f32 %v1731_v62, %v854_v20  ;;  %1744 = vpow2.f32 %v684_v33  ;;  %v752_v52 = vsub.f32 0.0, %v598_v35  ;;  %vm1026_vm0 = vcmp.eq.f32.partialorder %v1025_v41, 8.507059e+37 }
  0xd1   : > { %v1737_v30 = vpop.eup %1736  ;;  %v798_v49 = vmul.f32 1.442695, %v762_v25  ;;  %v1024_v4 = vsel %vm2148_vm15, %v2078_v51, %v1020_v46  ;;  %v878_v5 = vor.u32 1.1754944e-38, %v877_v26  ;;  %v2166_v7 = vadd.f32 %v2044_v60, %v481_v58  ;;  %v550_v26 = vpop.f32.mrf.mxu3 }
  0xd2   : > { %v859_v38 = vsel %vm858_vm13, %v1731_v62, %v855_v12  ;;  %v867_v39 = vmul.f32 %v1737_v30, %v2090_v0  ;;  %v1739_v40 = vpop.eup %1738  ;;  %vm872_vm14 = vweird.f32 %v1737_v30  ;;  %v1028_v62 = vor.u32 1.1754944e-38, %v1027_v42  ;;  %v484_v58 = vpop.f32.mrf.mxu2 }
  0xd3   : > { %v864_v36 = vsel %vm2106_vm8, %v863_v23, %v859_v38  ;;  %v2132_v45 = vadd.f32 1.0, %v1739_v40  ;;  %vm873_vm1 = vmor %vm871_vm12, %vm872_vm14  ;;  %vm876_vm2 = vcmp.eq.f32.partialorder %v875_v24, 8.507059e+37  ;;  %vm619_vm3 = vcmp.gt.f32.partialorder %v2076_v50, 0.0  ;;  %v525_v33 = vpop.f32.mrf.mxu1 }
  0xd4   : > { %v1167_v43 = vmul.f32 %v864_v36, %v727_v13  ;;  %v868_v44 = vsub.f32 1.0, %v867_v39  ;;  %v2135_v47 = vpop.eup %1740  ;;  %v778_v10 = vmul.f32 1.442695, %v752_v52  ;;  %vm628_vm4 = vcmp.gt.f32.partialorder %v2093_v2, 0.0 }
  0xd5   : > { %v1032_v61 = vmul.f32 %v2135_v47, %v2110_v17  ;;  %1746 = vrcp.f32 %v2132_v45  ;;  %v1743_v63 = vpop.eup %1742  ;;  %v2170_v51 = vsel %vm1026_vm0, %v1028_v62, %v1024_v4  ;;  %v642_v0 = vmin.f32 %v2156_v31, 0.0 }
  0xd6   : > { %v1609_v53 = vpack.c.bf16 %v1167_v43, %v1166_v19  ;;  %v1232_v54 = vadd.f32 %v1167_v43, %v1166_v19  ;;  %v1260_v55 = vmul.f32 %v1167_v43, %v1167_v43  ;;  %v869_v56 = vmul.f32 %v1737_v30, %v868_v44  ;;  %v1745_v11 = vpop.eup %1744  ;;  %v461_v43 = vpop.f32.mrf.mxu0 }
  0xd7   : > { %v1033_v6 = vsub.f32 1.0, %v1032_v61  ;;  %1748 = vpow2.f32 %v798_v49  ;;  %v1558_v15 = vadd.f32 -1.0, %v1743_v63  ;;  %vm886_vm5 = vweird.f32 %v2132_v45 }
  0xd8   : > { %1610 = vst [vmem:[%s2142_s27] sm:$0xff] %v1609_v53   ;;  %v1281_v1 = vadd.f32 %v1260_v55, %v1259_v37  ;;  %v870_v3 = vadd.f32 %v1737_v30, %v869_v56  ;;  %1750 = vpow2.f32 %v778_v10  ;;  %v890_v18 = vand.u32 2147483647, %v2132_v45 }
  0xd9   : > { %v892_v19 = vand.u32 2147483648, %v2132_v45  ;;  %v651_v20 = vmin.f32 %v2166_v7, 0.0  ;;  %v1034_v21 = vmul.f32 %v2135_v47, %v1033_v6  ;;  %v1567_v24 = vadd.f32 -1.0, %v1745_v11 }
  0xda   : > { %v874_v8 = vsel %vm873_vm1, %v1737_v30, %v870_v3  ;;  %v668_v29 = vmul.f32 1.442695, %v642_v0  ;;  %vm1036_vm6 = vweird.f32 %v2110_v17  ;;  %vm1037_vm7 = vweird.f32 %v2135_v47 }
  0xdb   : > { %v879_v13 = vsel %vm876_vm2, %v878_v5, %v874_v8  ;;  %v1747_v16 = vpop.eup %1746  ;;  %v686_v30 = vmul.f32 1.442695, %v651_v20  ;;  %v1040_v38 = vand.u32 2147483647, %v2110_v17  ;;  %v1042_v39 = vand.u32 2147483648, %v2110_v17  ;;  %vm2193_vm9 = vmor %vm1036_vm6, %vm1037_vm7 }
  0xdc   : > { %v2173_v14 = vmul.f32 %v879_v13, %v728_v32  ;;  %v882_v12 = vmul.f32 %v1747_v16, %v2132_v45  ;;  %v1035_v32 = vadd.f32 %v2135_v47, %v1034_v21  ;;  %v609_v40 = vadd.f32 %v2039_v59, %v550_v26 }
  0xdd   : > { %v1749_v27 = vpop.eup %1748  ;;  %1752 = vpow2.f32 %v686_v30  ;;  %vm887_vm8 = vweird.f32 %v1747_v16  ;;  %v599_v25 = vadd.f32 %v2039_v59, %v525_v33  ;;  %v729_v44 = vsel %vm619_vm3, %v2076_v50, %v1558_v15 }
  0xde   : > { %v1233_v22 = vadd.f32 %v1232_v54, %v2173_v14  ;;  %v1261_v23 = vmul.f32 %v2173_v14, %v2173_v14  ;;  %v883_v35 = vsub.f32 1.0, %v882_v12  ;;  %v2186_v37 = vadd.f32 1.0, %v1749_v27  ;;  %v1751_v36 = vpop.eup %1750  ;;  %vm888_vm10 = vmor %vm886_vm5, %vm887_vm8 }
  0xdf   : > { %v893_v46 = vor.u32 1.1754944e-38, %v892_v19  ;;  %v2201_v17 = vadd.f32 1.0, %v1751_v36  ;;  %v763_v48 = vsub.f32 0.0, %v609_v40  ;;  %v1043_v52 = vor.u32 1.1754944e-38, %v1042_v39 }
  0xe0   : > { %v1282_v34 = vadd.f32 %v1281_v1, %v1261_v23  ;;  %v884_v41 = vmul.f32 %v1747_v16, %v883_v35  ;;  %1754 = vrcp.f32 %v2186_v37  ;;  %v753_v53 = vsub.f32 0.0, %v599_v25 }
  0xe1   : > { %1756 = vpow2.f32 %v668_v29  ;;  %v1039_v54 = vsel %vm2193_vm9, %v2135_v47, %v1035_v32  ;;  %vm1041_vm11 = vcmp.eq.f32.partialorder %v1040_v38, 8.507059e+37  ;;  %v2210_v50 = vadd.f32 %v2044_v60, %v461_v43  ;;  %v553_v32 = vpop.f32.mrf.mxu3  ;;  %v528_v38 = vpop.f32.mrf.mxu1 }
  0xe2   : > { %v885_v49 = vadd.f32 %v1747_v16, %v884_v41  ;;  %1758 = vrcp.f32 %v2201_v17  ;;  %vm891_vm12 = vcmp.eq.f32.partialorder %v890_v18, 8.507059e+37  ;;  %v738_v56 = vsel %vm628_vm4, %v2093_v2, %v1567_v24 }
  0xe3   : > { %v800_v57 = vmul.f32 1.442695, %v763_v48  ;;  %v1753_v45 = vpop.eup %1752  ;;  %vm629_vm13 = vcmp.gt.f32.partialorder %v2166_v7, 0.0  ;;  %v780_v62 = vmul.f32 1.442695, %v753_v53  ;;  %v2217_v63 = vadd.f32 %v2044_v60, %v484_v58  ;;  %v486_v48 = vpop.f32.mrf.mxu2 }
  0xe4   : > { %v889_v55 = vsel %vm888_vm10, %v1747_v16, %v885_v49  ;;  %v1568_v3 = vadd.f32 -1.0, %v1753_v45  ;;  %v1044_v4 = vsel %vm1041_vm11, %v1043_v52, %v1039_v54  ;;  %v2222_v5 = vmul.f32 %v2170_v51, %v738_v56  ;;  %v464_v45 = vpop.f32.mrf.mxu0 }
  0xe5   : > { %v894_v61 = vsel %vm891_vm12, %v893_v46, %v889_v55  ;;  %1760 = vpow2.f32 %v800_v57  ;;  %v643_v6 = vmin.f32 %v2210_v50, 0.0  ;;  %v2237_v19 = vadd.f32 %v2044_v60, %v2053_v9 }
  0xe6   : > { %v2219_v47 = vpop.eup %1754  ;;  %v1169_v1 = vmul.f32 %v894_v61, %v729_v44  ;;  %1762 = vpow2.f32 %v780_v62  ;;  %v739_v0 = vsel %vm629_vm13, %v2166_v7, %v1568_v3  ;;  %v652_v21 = vmin.f32 %v2217_v63, 0.0 }
  0xe7   : > { %v1047_v2 = vmul.f32 %v2219_v47, %v2186_v37  ;;  %v1757_v8 = vpop.eup %1756  ;;  %v2233_v51 = vmul.f32 %v1044_v4, %v739_v0  ;;  %v670_v18 = vmul.f32 1.442695, %v643_v6  ;;  %vm620_vm14 = vcmp.gt.f32.partialorder %v2156_v31, 0.0 }
  0xe8   : > { %v1614_v10 = vpack.c.bf16 %v1169_v1, %v2173_v14  ;;  %v2228_v11 = vadd.f32 %v1233_v22, %v1169_v1  ;;  %v1262_v13 = vmul.f32 %v1169_v1, %v1169_v1  ;;  %v1759_v15 = vpop.eup %1758  ;;  %v905_v7 = vand.u32 2147483647, %v2201_v17 }
  0xe9   : > { %v1048_v16 = vsub.f32 1.0, %v1047_v2  ;;  %v897_v14 = vmul.f32 %v1759_v15, %v2201_v17  ;;  %v907_v22 = vand.u32 2147483648, %v2201_v17  ;;  %v1639_v23 = vpack.c.bf16 %v2233_v51, %v2222_v5 }
  0xea   : > { %1661 = vst [vmem:[%s2142_s27 + $0x8] sm:$0xff] %v1614_v10   ;;  %v2240_v20 = vadd.f32 %v1282_v34, %v1262_v13  ;;  %v1559_v9 = vadd.f32 -1.0, %v1757_v8  ;;  %vm902_vm15 = vweird.f32 %v1759_v15  ;;  %1764 = vpow2.f32 %v670_v18  ;;  %v555_v18 = vpop.f32.mrf.mxu3 }
  0xeb   : > { %v1761_v12 = vpop.eup %1760  ;;  %v898_v24 = vsub.f32 1.0, %v897_v14  ;;  %v1049_v26 = vmul.f32 %v2219_v47, %v1048_v16  ;;  %1666 = vst [vmem:[%s2142_s27 + $0x30] sm:$0xff] %v1639_v23   ;;  %v688_v30 = vmul.f32 1.442695, %v652_v21  ;;  %vm1051_vm0 = vweird.f32 %v2186_v37  ;;  %v530_v23 = vpop.f32.mrf.mxu1 }
  0xec   : > { %v1763_v27 = vpop.eup %1762  ;;  %v2251_v29 = vadd.f32 1.0, %v1761_v12  ;;  %vm1052_vm1 = vweird.f32 %v2219_v47  ;;  %v610_v35 = vadd.f32 %v2039_v59, %v553_v32  ;;  %v648_v39 = vmin.f32 %v2237_v19, 0.0  ;;  %v489_v6 = vpop.f32.mrf.mxu2 }
  0xed   : > { %v899_v33 = vmul.f32 %v1759_v15, %v898_v24  ;;  %v2254_v34 = vadd.f32 1.0, %v1763_v27  ;;  %vm901_vm2 = vweird.f32 %v2201_v17  ;;  %v908_v36 = vor.u32 1.1754944e-38, %v907_v22  ;;  %vm2271_vm4 = vmor %vm1051_vm0, %vm1052_vm1 }
  0xee   : > { %1766 = vrcp.f32 %v2251_v29  ;;  %vm903_vm3 = vmor %vm901_vm2, %vm902_vm15  ;;  %v2264_v41 = vadd.f32 %v2219_v47, %v1049_v26  ;;  %v730_v42 = vsel %vm620_vm14, %v2156_v31, %v1559_v9  ;;  %v764_v43 = vsub.f32 0.0, %v610_v35 }
  0xef   : > { %v900_v40 = vadd.f32 %v1759_v15, %v899_v33  ;;  %1768 = vrcp.f32 %v2254_v34  ;;  %v600_v44 = vadd.f32 %v2039_v59, %v528_v38  ;;  %vm906_vm5 = vcmp.eq.f32.partialorder %v905_v7, 8.507059e+37 }
  0xf0   : > { %1770 = vpow2.f32 %v688_v30  ;;  %v1055_v17 = vand.u32 2147483647, %v2186_v37  ;;  %v1765_v49 = vpop.eup %1764  ;;  %v1057_v53 = vand.u32 2147483648, %v2186_v37  ;;  %v802_v31 = vmul.f32 1.442695, %v764_v43 }
  0xf1   : > { %v904_v46 = vsel %vm903_vm3, %v1759_v15, %v900_v40  ;;  %v754_v54 = vsub.f32 0.0, %v600_v44  ;;  %v2278_v55 = vmul.f32 1.442695, %v648_v39  ;;  %v922_v57 = vand.u32 2147483648, %v2254_v34 }
  0xf2   : > { %v909_v52 = vsel %vm906_vm5, %v908_v36, %v904_v46  ;;  %v1054_v58 = vsel %vm2271_vm4, %v2219_v47, %v2264_v41  ;;  %vm621_vm6 = vcmp.gt.f32.partialorder %v2210_v50, 0.0  ;;  %1772 = vpow2.f32 %v802_v31 }
  0xf3   : > { %v2280_v56 = vmul.f32 %v909_v52, %v730_v42  ;;  %v782_v37 = vmul.f32 1.442695, %v754_v54  ;;  %v2291_v62 = vadd.f32 %v2044_v60, %v464_v45  ;;  %v2294_v1 = vadd.f32 %v2044_v60, %v486_v48  ;;  %v466_v48 = vpop.f32.mrf.mxu0 }
  0xf4   : > { %v2287_v61 = vpop.eup %1766  ;;  %vm2304_vm7 = vcmp.eq.f32.partialorder %v1055_v17, 8.507059e+37  ;;  %vm916_vm8 = vweird.f32 %v2254_v34  ;;  %vm630_vm9 = vcmp.gt.f32.partialorder %v2217_v63, 0.0  ;;  %v1058_v13 = vor.u32 1.1754944e-38, %v1057_v53 }
  0xf5   : > { %v1769_v3 = vpop.eup %1768  ;;  %v2298_v4 = vadd.f32 %v2228_v11, %v2280_v56  ;;  %v1263_v47 = vmul.f32 %v2280_v56, %v2280_v56  ;;  %v1062_v2 = vmul.f32 %v2287_v61, %v2251_v29  ;;  %1774 = vpow2.f32 %v782_v37 }
  0xf6   : > { %v1771_v8 = vpop.eup %1770  ;;  %v912_v10 = vmul.f32 %v1769_v3, %v2254_v34  ;;  %v1560_v15 = vadd.f32 -1.0, %v1765_v49  ;;  %v920_v16 = vand.u32 2147483647, %v2254_v34  ;;  %v923_v21 = vor.u32 1.1754944e-38, %v922_v57 }
  0xf7   : > { %v2312_v11 = vadd.f32 %v2240_v20, %v1263_v47  ;;  %v1063_v0 = vsub.f32 1.0, %v1062_v2  ;;  %v644_v7 = vmin.f32 %v2291_v62, 0.0  ;;  %v653_v22 = vmin.f32 %v2294_v1, 0.0 }
  0xf8   : > { %v913_v14 = vsub.f32 1.0, %v912_v10  ;;  %vm917_vm10 = vweird.f32 %v1769_v3  ;;  %v1569_v12 = vadd.f32 -1.0, %v1771_v8  ;;  %vm1066_vm11 = vweird.f32 %v2251_v29  ;;  %v1773_v20 = vpop.eup %1772 }
  0xf9   : > { %v1064_v24 = vmul.f32 %v2287_v61, %v1063_v0  ;;  %v690_v26 = vmul.f32 1.442695, %v653_v22  ;;  %vm1067_vm12 = vweird.f32 %v2287_v61  ;;  %v611_v27 = vadd.f32 %v2039_v59, %v555_v18  ;;  %vm2329_vm13 = vmor %vm916_vm8, %vm917_vm10 }
  0xfa   : > { %v914_v9 = vmul.f32 %v1769_v3, %v913_v14  ;;  %v2321_v30 = vadd.f32 1.0, %v1773_v20  ;;  %v1070_v32 = vand.u32 2147483647, %v2251_v29  ;;  %v1072_v33 = vand.u32 2147483648, %v2251_v29  ;;  %vm2341_vm14 = vmor %vm1066_vm11, %vm1067_vm12 }
  0xfb   : > { %v601_v35 = vadd.f32 %v2039_v59, %v530_v23  ;;  %v1775_v38 = vpop.eup %1774  ;;  %1776 = vpow2.f32 %v690_v26  ;;  %v1065_v36 = vadd.f32 %v2287_v61, %v1064_v24  ;;  %v765_v41 = vsub.f32 0.0, %v611_v27  ;;  %v533_v24 = vpop.f32.mrf.mxu1 }
  0xfc   : > { %v915_v39 = vadd.f32 %v1769_v3, %v914_v9  ;;  %1778 = vrcp.f32 %v2321_v30  ;;  %v2335_v42 = vadd.f32 1.0, %v1775_v38  ;;  %v672_v25 = vmul.f32 1.442695, %v644_v7 }
  0xfd   : > { %v755_v34 = vsub.f32 0.0, %v601_v35  ;;  %vm921_vm15 = vcmp.eq.f32.partialorder %v920_v16, 8.507059e+37  ;;  %v1059_v46 = vsel %vm2304_vm7, %v1058_v13, %v1054_v58  ;;  %v804_v17 = vmul.f32 1.442695, %v765_v41 }
  0xfe   : > { %v919_v44 = vsel %vm2329_vm13, %v1769_v3, %v915_v39  ;;  %v731_v49 = vsel %vm621_vm6, %v2210_v50, %v1560_v15  ;;  %1780 = vrcp.f32 %v2335_v42  ;;  %v1073_v29 = vor.u32 1.1754944e-38, %v1072_v33 }
  0xff   : > { %v924_v52 = vsel %vm921_vm15, %v923_v21, %v919_v44  ;;  %v1069_v31 = vsel %vm2341_vm14, %v2287_v61, %v1065_v36  ;;  %vm1071_vm0 = vcmp.eq.f32.partialorder %v1070_v32, 8.507059e+37  ;;  %1782 = vpow2.f32 %v804_v17 }
 0x100   : > { %v1171_v53 = vmul.f32 %v924_v52, %v731_v49  ;;  %v740_v54 = vsel %vm630_vm9, %v2217_v63, %v1569_v12  ;;  %1784 = vpow2.f32 %v672_v25  ;;  %v784_v57 = vmul.f32 1.442695, %v755_v34  ;;  %v558_v12 = vpop.f32.mrf.mxu3  ;;  %v491_v34 = vpop.f32.mrf.mxu2 }
 0x101   : > { %v2360_v50 = vadd.f32 %v2044_v60, %v466_v48  ;;  %v1777_v58 = vpop.eup %1776  ;;  %vm631_vm1 = vcmp.gt.f32.partialorder %v2294_v1, 0.0  ;;  %v1074_v2 = vsel %vm1071_vm0, %v1073_v29, %v1069_v31  ;;  %v2374_v10 = vmul.f32 %v1059_v46, %v740_v54  ;;  %v469_v31 = vpop.f32.mrf.mxu0 }
 0x102   : > { %v1619_v45 = vpack.c.bf16 %v1171_v53, %v2280_v56  ;;  %v2364_v37 = vadd.f32 %v2298_v4, %v1171_v53  ;;  %v1264_v3 = vmul.f32 %v1171_v53, %v1171_v53  ;;  %v2367_v61 = vpop.eup %1778  ;;  %v1570_v47 = vadd.f32 -1.0, %v1777_v58 }
 0x103   : > { %1786 = vpow2.f32 %v784_v57  ;;  %v645_v63 = vmin.f32 %v2360_v50, 0.0  ;;  %v1077_v56 = vmul.f32 %v2367_v61, %v2321_v30  ;;  %v2379_v4 = vadd.f32 %v2044_v60, %v489_v6 }
 0x104   : > { %1662 = vst [vmem:[%s2142_s27 + $0x10] sm:$0xff] %v1619_v45   ;;  %v2372_v8 = vadd.f32 %v2312_v11, %v1264_v3  ;;  %v2381_v13 = vpop.eup %1780  ;;  %v741_v0 = vsel %vm631_vm1, %v2294_v1, %v1570_v47  ;;  %1788 = vpow2.f32 %v2278_v55  ;;  %v612_v9 = vadd.f32 %v2039_v59, %v558_v12  ;;  %v535_v12 = vpop.f32.mrf.mxu1 }
 0x105   : > { %v1783_v15 = vpop.eup %1782  ;;  %v927_v16 = vmul.f32 %v2381_v13, %v2335_v42  ;;  %v2386_v18 = vmul.f32 %v1074_v2, %v741_v0  ;;  %v674_v21 = vmul.f32 1.442695, %v645_v63  ;;  %v1078_v7 = vsub.f32 1.0, %v1077_v56 }
 0x106   : > { %v1785_v11 = vpop.eup %1784  ;;  %v2389_v14 = vadd.f32 1.0, %v1783_v15  ;;  %v654_v1 = vmin.f32 %v2379_v4, 0.0  ;;  %v2398_v55 = vadd.f32 %v2044_v60, %v2064_v28  ;;  %vm622_vm2 = vcmp.gt.f32.partialorder %v2291_v62, 0.0 }
 0x107   : > { %v928_v22 = vsub.f32 1.0, %v927_v16  ;;  %v1644_v23 = vpack.c.bf16 %v2386_v18, %v2374_v10  ;;  %v1561_v32 = vadd.f32 -1.0, %v1785_v11  ;;  %v766_v33 = vsub.f32 0.0, %v612_v9 }
 0x108   : > { %1790 = vrcp.f32 %v2389_v14  ;;  %v602_v35 = vadd.f32 %v2039_v59, %v533_v24  ;;  %v935_v38 = vand.u32 2147483647, %v2335_v42  ;;  %v692_v39 = vmul.f32 1.442695, %v654_v1  ;;  %v560_v11 = vpop.f32.mrf.mxu3 }
 0x109   : > { %v1787_v20 = vpop.eup %1786  ;;  %v929_v26 = vmul.f32 %v2381_v13, %v928_v22  ;;  %1667 = vst [vmem:[%s2142_s27 + $0x38] sm:$0xff] %v1644_v23   ;;  %1792 = vpow2.f32 %v674_v21  ;;  %v1079_v28 = vmul.f32 %v2367_v61, %v1078_v7  ;;  %vm1081_vm3 = vweird.f32 %v2321_v30 }
 0x10a   : > { %v2403_v27 = vadd.f32 1.0, %v1787_v20  ;;  %v2409_v40 = vpop.eup %1788  ;;  %vm1082_vm4 = vweird.f32 %v2367_v61  ;;  %v806_v36 = vmul.f32 1.442695, %v766_v33  ;;  %v756_v41 = vsub.f32 0.0, %v602_v35 }
 0x10b   : > { %v930_v25 = vadd.f32 %v2381_v13, %v929_v26  ;;  %vm931_vm5 = vweird.f32 %v2335_v42  ;;  %vm932_vm6 = vweird.f32 %v2381_v13  ;;  %v937_v43 = vand.u32 2147483648, %v2335_v42  ;;  %vm2433_vm7 = vmor %vm1081_vm3, %vm1082_vm4 }
 0x10c   : > { %1794 = vrcp.f32 %v2403_v27  ;;  %v1085_v46 = vand.u32 2147483647, %v2321_v30  ;;  %v1087_v17 = vand.u32 2147483648, %v2321_v30  ;;  %v786_v48 = vmul.f32 1.442695, %v756_v41  ;;  %vm2441_vm8 = vmor %vm931_vm5, %vm932_vm6 }
 0x10d   : > { %1796 = vpow2.f32 %v806_v36  ;;  %v732_v49 = vsel %vm622_vm2, %v2291_v62, %v1561_v32  ;;  %v2427_v29 = vadd.f32 %v2367_v61, %v1079_v28  ;;  %vm2445_vm9 = vcmp.eq.f32.partialorder %v935_v38, 8.507059e+37  ;;  %v2571_v36 = vld [vmem:[%s2818_s2 + $0x1] ss:$0 sm:$0xff] }
 0x10e   : > { %v2417_v44 = vpop.eup %1790  ;;  %1798 = vpow2.f32 %v692_v39  ;;  %v2450_v30 = vadd.f32 %v2044_v60, %v469_v31  ;;  %v2453_v58 = vadd.f32 %v2044_v60, %v491_v34  ;;  %v934_v42 = vsel %vm2441_vm8, %v2381_v13, %v930_v25 }
 0x10f   : > { %v1092_v52 = vmul.f32 %v2417_v44, %v2389_v14  ;;  %v1793_v54 = vpop.eup %1792  ;;  %1800 = vpow2.f32 %v786_v48  ;;  %v938_v3 = vor.u32 1.1754944e-38, %v937_v43  ;;  %vm623_vm10 = vcmp.gt.f32.partialorder %v2360_v50, 0.0 }
 0x110   : > { %vm946_vm11 = vweird.f32 %v2403_v27  ;;  %v950_v63 = vand.u32 2147483647, %v2403_v27  ;;  %vm632_vm12 = vcmp.gt.f32.partialorder %v2379_v4, 0.0  ;;  %vm2463_vm13 = vcmp.eq.f32.partialorder %v1085_v46, 8.507059e+37 }
 0x111   : > { %v1093_v47 = vsub.f32 1.0, %v1092_v52  ;;  %v1088_v56 = vor.u32 1.1754944e-38, %v1087_v17  ;;  %v1562_v0 = vadd.f32 -1.0, %v1793_v54  ;;  %v952_v13 = vand.u32 2147483648, %v2403_v27  ;;  %v494_v52 = vpop.f32.mrf.mxu2 }
 0x112   : > { %v1795_v45 = vpop.eup %1794  ;;  %v1084_v15 = vsel %vm2433_vm7, %v2367_v61, %v2427_v29  ;;  %v655_v16 = vmin.f32 %v2453_v58, 0.0  ;;  %v939_v7 = vsel %vm2445_vm9, %v938_v3, %v934_v42  ;;  %v646_v23 = vmin.f32 %v2450_v30, 0.0 }
 0x113   : > { %v942_v2 = vmul.f32 %v1795_v45, %v2403_v27  ;;  %v1797_v21 = vpop.eup %1796  ;;  %v1094_v1 = vmul.f32 %v2417_v44, %v1093_v47  ;;  %vm947_vm14 = vweird.f32 %v1795_v45  ;;  %vm1096_vm15 = vweird.f32 %v2389_v14  ;;  %v471_v27 = vpop.f32.mrf.mxu0 }
 0x114   : > { %v1799_v24 = vpop.eup %1798  ;;  %v2477_v20 = vadd.f32 1.0, %v1797_v21  ;;  %v694_v9 = vmul.f32 1.442695, %v655_v16  ;;  %vm1097_vm0 = vweird.f32 %v2417_v44  ;;  %v1100_v32 = vand.u32 2147483647, %v2389_v14  ;;  %vm2490_vm1 = vmor %vm946_vm11, %vm947_vm14  ;;  %v563_v16 = vpop.f32.mrf.mxu3 }
 0x115   : > { %v943_v22 = vsub.f32 1.0, %v942_v2  ;;  %v1801_v61 = vpop.eup %1800  ;;  %v613_v33 = vadd.f32 %v2039_v59, %v560_v11  ;;  %v1102_v38 = vand.u32 2147483648, %v2389_v14  ;;  %v603_v39 = vadd.f32 %v2039_v59, %v535_v12  ;;  %vm2502_vm3 = vmor %vm1096_vm15, %vm1097_vm0 }
 0x116   : > { %1802 = vrcp.f32 %v2477_v20  ;;  %v2484_v35 = vadd.f32 1.0, %v1801_v61  ;;  %vm951_vm2 = vcmp.eq.f32.partialorder %v950_v63, 8.507059e+37  ;;  %v1095_v41 = vadd.f32 %v2417_v44, %v1094_v1  ;;  %v538_v61 = vpop.f32.mrf.mxu1 }
 0x117   : > { %v944_v26 = vmul.f32 %v1795_v45, %v943_v22  ;;  %1804 = vpow2.f32 %v694_v9  ;;  %v2495_v25 = vmul.f32 %v939_v7, %v732_v49  ;;  %v953_v43 = vor.u32 1.1754944e-38, %v952_v13 }
 0x118   : > { %v1571_v34 = vadd.f32 -1.0, %v1799_v24  ;;  %1806 = vrcp.f32 %v2484_v35  ;;  %v733_v46 = vsel %vm623_vm10, %v2360_v50, %v1562_v0  ;;  %v767_v48 = vsub.f32 0.0, %v613_v33  ;;  %v2539_v0 = vld [vmem:[%s2818_s2] ss:$0 sm:$0xff] }
 0x119   : > { %v945_v28 = vadd.f32 %v1795_v45, %v944_v26  ;;  %v757_v49 = vsub.f32 0.0, %v603_v39  ;;  %v676_v53 = vmul.f32 1.442695, %v646_v23  ;;  %vm2511_vm4 = vcmp.eq.f32.partialorder %v1100_v32, 8.507059e+37  ;;  %v496_v39 = vpop.f32.mrf.mxu2 }
 0x11a   : > { %v1103_v14 = vor.u32 1.1754944e-38, %v1102_v38  ;;  %v1099_v62 = vsel %vm2502_vm3, %v2417_v44, %v1095_v41  ;;  %v808_v50 = vmul.f32 1.442695, %v767_v48  ;;  %v2521_v57 = vadd.f32 %v2044_v60, %v471_v27 }
 0x11b   : > { %v949_v17 = vsel %vm2490_vm1, %v1795_v45, %v945_v28  ;;  %v649_v42 = vmin.f32 %v2398_v55, 0.0  ;;  %v742_v3 = vsel %vm632_vm12, %v2379_v4, %v1571_v34  ;;  %v1089_v47 = vsel %vm2463_vm13, %v1088_v56, %v1084_v15 }
 0x11c   : > { %v954_v29 = vsel %vm951_vm2, %v953_v43, %v949_v17  ;;  %v2523_v45 = vpop.eup %1802  ;;  %v788_v2 = vmul.f32 1.442695, %v757_v49  ;;  %vm633_vm5 = vcmp.gt.f32.partialorder %v2453_v58, 0.0  ;;  %v2542_v4 = vadd.f32 %v2539_v0, %v494_v52 }
 0x11d   : > { %v2515_v54 = vmul.f32 %v954_v29, %v733_v46  ;;  %v1805_v63 = vpop.eup %1804  ;;  %v1107_v60 = vmul.f32 %v2523_v45, %v2477_v20  ;;  %v1104_v13 = vsel %vm2511_vm4, %v1103_v14, %v1099_v62  ;;  %1808 = vpow2.f32 %v808_v50 }
 0x11e   : > { %v2544_v6 = vpop.eup %1806  ;;  %v1572_v56 = vadd.f32 -1.0, %v1805_v63  ;;  %v647_v15 = vmin.f32 %v2521_v57, 0.0  ;;  %v2550_v11 = vmul.f32 %v1089_v47, %v742_v3  ;;  %1810 = vpow2.f32 %v676_v53  ;;  %v565_v3 = vpop.f32.mrf.mxu3 }
 0x11f   : > { %v1624_v44 = vpack.c.bf16 %v2515_v54, %v2495_v25  ;;  %v1108_v21 = vsub.f32 1.0, %v1107_v60  ;;  %v957_v7 = vmul.f32 %v2544_v6, %v2484_v35  ;;  %1812 = vpow2.f32 %v788_v2 }
 0x120   : > { %v743_v22 = vsel %vm633_vm5, %v2453_v58, %v1572_v56  ;;  %v678_v23 = vmul.f32 1.442695, %v647_v15  ;;  %v656_v24 = vmin.f32 %v2542_v4, 0.0  ;;  %vm626_vm6 = vcmp.gt.f32.partialorder %v2237_v19, 0.0 }
 0x121   : > { %1663 = vst [vmem:[%s2142_s27 + $0x18] sm:$0xff] %v1624_v44   ;;  %v958_v1 = vsub.f32 1.0, %v957_v7  ;;  %v2555_v12 = vmul.f32 %v1104_v13, %v743_v22  ;;  %v1109_v9 = vmul.f32 %v2523_v45, %v1108_v21  ;;  %v1565_v26 = vadd.f32 -1.0, %v2409_v40 }
 0x122   : > { %v2561_v32 = vmul.f32 1.442695, %v649_v42  ;;  %v696_v33 = vmul.f32 1.442695, %v656_v24  ;;  %vm1111_vm7 = vweird.f32 %v2477_v20  ;;  %v1115_v38 = vand.u32 2147483647, %v2477_v20 }
 0x123   : > { %v1649_v58 = vpack.c.bf16 %v2555_v12, %v2550_v11  ;;  %v1809_v28 = vpop.eup %1808  ;;  %1814 = vpow2.f32 %v678_v23  ;;  %vm1112_vm8 = vweird.f32 %v2523_v45  ;;  %v614_v40 = vadd.f32 %v2571_v36, %v563_v16 }
 0x124   : > { %v604_v41 = vadd.f32 %v2571_v36, %v538_v61  ;;  %v1811_v43 = vpop.eup %1810  ;;  %v959_v34 = vmul.f32 %v2544_v6, %v958_v1  ;;  %v2577_v59 = vadd.f32 1.0, %v1809_v28  ;;  %v1110_v27 = vadd.f32 %v2523_v45, %v1109_v9  ;;  %vm2593_vm10 = vmor %vm1111_vm7, %vm1112_vm8  ;;  %v540_v1 = vpop.f32.mrf.mxu1 }
 0x125   : > { %1668 = vst [vmem:[%s2142_s27 + $0x40] sm:$0xff] %v1649_v58   ;;  %v1117_v46 = vand.u32 2147483648, %v2477_v20  ;;  %v1813_v17 = vpop.eup %1812  ;;  %1816 = vpow2.f32 %v696_v33  ;;  %v768_v48 = vsub.f32 0.0, %v614_v40  ;;  %v2582_v52 = vadd.f32 %v2539_v0, %v496_v39 }
 0x126   : > { %v758_v49 = vsub.f32 0.0, %v604_v41  ;;  %vm624_vm9 = vcmp.gt.f32.partialorder %v2450_v30, 0.0  ;;  %v965_v29 = vand.u32 2147483647, %v2484_v35  ;;  %1818 = vrcp.f32 %v2577_v59 }
 0x127   : > { %v2587_v53 = vadd.f32 1.0, %v1813_v17  ;;  %v1563_v14 = vadd.f32 -1.0, %v1811_v43  ;;  %v967_v62 = vand.u32 2147483648, %v2484_v35  ;;  %v810_v50 = vmul.f32 1.442695, %v768_v48  ;;  %v499_v43 = vpop.f32.mrf.mxu2 }
 0x128   : > { %v790_v42 = vmul.f32 1.442695, %v758_v49  ;;  %v2599_v47 = vadd.f32 %v2544_v6, %v959_v34  ;;  %vm962_vm11 = vweird.f32 %v2544_v6  ;;  %v1118_v2 = vor.u32 1.1754944e-38, %v1117_v46 }
 0x129   : > { %1820 = vrcp.f32 %v2587_v53  ;;  %v1815_v63 = vpop.eup %1814  ;;  %v1114_v20 = vsel %vm2593_vm10, %v2523_v45, %v1110_v27  ;;  %vm2606_vm12 = vcmp.eq.f32.partialorder %v1115_v38, 8.507059e+37  ;;  %v657_v60 = vmin.f32 %v2582_v52, 0.0 }
 0x12a   : > { %1822 = vpow2.f32 %v810_v50  ;;  %v2614_v56 = vsel %vm626_vm6, %v2237_v19, %v1565_v26  ;;  %vm961_vm13 = vweird.f32 %v2484_v35  ;;  %v615_v13 = vadd.f32 %v2571_v36, %v565_v3 }
 0x12b   : > { %1824 = vpow2.f32 %v790_v42  ;;  %v1817_v15 = vpop.eup %1816  ;;  %v2620_v45 = vmul.f32 %v2495_v25, %v2495_v25  ;;  %v2625_v16 = vsel %vm624_vm9, %v2450_v30, %v1563_v14  ;;  %vm2629_vm14 = vmor %vm961_vm13, %vm962_vm11  ;;  %v968_v35 = vor.u32 1.1754944e-38, %v967_v62 }
 0x12c   : > { %v698_v21 = vmul.f32 1.442695, %v657_v60  ;;  %v1819_v7 = vpop.eup %1818  ;;  %v964_v22 = vsel %vm2629_vm14, %v2544_v6, %v2599_v47  ;;  %vm2637_vm15 = vcmp.eq.f32.partialorder %v965_v29, 8.507059e+37  ;;  %vm634_vm0 = vcmp.gt.f32.partialorder %v2542_v4, 0.0 }
 0x12d   : > { %v1119_v30 = vsel %vm2606_vm12, %v1118_v2, %v1114_v20  ;;  %vm635_vm1 = vcmp.gt.f32.partialorder %v2582_v52, 0.0  ;;  %v1122_v24 = vmul.f32 %v1819_v7, %v2577_v59  ;;  %vm625_vm2 = vcmp.gt.f32.partialorder %v2521_v57, 0.0 }
 0x12e   : > { %v1564_v9 = vadd.f32 -1.0, %v1815_v63  ;;  %v980_v61 = vand.u32 2147483647, %v2587_v53  ;;  %1826 = vpow2.f32 %v698_v21  ;;  %v1573_v26 = vadd.f32 -1.0, %v1817_v15 }
 0x12f   : > { %v1821_v6 = vpop.eup %1820  ;;  %vm1126_vm3 = vweird.f32 %v2577_v59  ;;  %v1130_v58 = vand.u32 2147483647, %v2577_v59  ;;  %v769_v33 = vsub.f32 0.0, %v615_v13  ;;  %v1123_v39 = vsub.f32 1.0, %v1122_v24 }
 0x130   : > { %v1823_v38 = vpop.eup %1822  ;;  %v972_v28 = vmul.f32 %v1821_v6, %v2587_v53  ;;  %v1132_v40 = vand.u32 2147483648, %v2577_v59  ;;  %v605_v41 = vadd.f32 %v2571_v36, %v540_v1  ;;  %vm1127_vm4 = vweird.f32 %v1819_v7 }
 0x131   : > { %v1825_v34 = vpop.eup %1824  ;;  %v2653_v27 = vadd.f32 1.0, %v1823_v38  ;;  %v812_v46 = vmul.f32 1.442695, %v769_v33  ;;  %v2656_v17 = vadd.f32 %v2539_v0, %v499_v43  ;;  %v1124_v29 = vmul.f32 %v1819_v7, %v1123_v39  ;;  %vm2673_vm7 = vmor %vm1126_vm3, %vm1127_vm4 }
 0x132   : > { %v973_v48 = vsub.f32 1.0, %v972_v28  ;;  %v2658_v49 = vadd.f32 1.0, %v1825_v34  ;;  %v759_v31 = vsub.f32 0.0, %v605_v41  ;;  %v982_v14 = vand.u32 2147483648, %v2587_v53 }
 0x133   : > { %v744_v36 = vsel %vm634_vm0, %v2542_v4, %v1573_v26  ;;  %1828 = vrcp.f32 %v2653_v27  ;;  %vm2665_vm5 = vcmp.eq.f32.partialorder %v1130_v58, 8.507059e+37  ;;  %vm977_vm6 = vweird.f32 %v1821_v6  ;;  %v501_v26 = vpop.f32.mrf.mxu2 }
 0x134   : > { %v1827_v50 = vpop.eup %1826  ;;  %v974_v42 = vmul.f32 %v1821_v6, %v973_v48  ;;  %1830 = vrcp.f32 %v2658_v49  ;;  %v1133_v47 = vor.u32 1.1754944e-38, %v1132_v40  ;;  %v1125_v2 = vadd.f32 %v1819_v7, %v1124_v29 }
 0x135   : > { %v1574_v4 = vadd.f32 -1.0, %v1827_v50  ;;  %1832 = vpow2.f32 %v812_v46  ;;  %v658_v63 = vmin.f32 %v2656_v17, 0.0  ;;  %v969_v20 = vsel %vm2637_vm15, %v968_v35, %v964_v22 }
 0x136   : > { %v975_v44 = vadd.f32 %v1821_v6, %v974_v42  ;;  %vm976_vm8 = vweird.f32 %v2587_v53  ;;  %v792_v60 = vmul.f32 1.442695, %v759_v31  ;;  %v983_v13 = vor.u32 1.1754944e-38, %v982_v14 }
 0x137   : > { %vm978_vm9 = vmor %vm976_vm8, %vm977_vm6  ;;  %v2681_v59 = vmul.f32 %v1119_v30, %v744_v36  ;;  %v745_v15 = vsel %vm635_vm1, %v2582_v52, %v1574_v4  ;;  %v1129_v19 = vsel %vm2673_vm7, %v1819_v7, %v1125_v2  ;;  %vm981_vm10 = vcmp.eq.f32.partialorder %v980_v61, 8.507059e+37 }
 0x138   : > { %v979_v21 = vsel %vm978_vm9, %v1821_v6, %v975_v44  ;;  %v1134_v35 = vsel %vm2665_vm5, %v1133_v47, %v1129_v19  ;;  %1834 = vpow2.f32 %v792_v60  ;;  %v735_v53 = vsel %vm625_vm2, %v2521_v57, %v1564_v9 }
 0x139   : > { %v2690_v22 = vpop.eup %1828  ;;  %v984_v23 = vsel %vm981_vm10, %v983_v13, %v979_v21  ;;  %v2695_v30 = vmul.f32 %v1134_v35, %v745_v15  ;;  %v700_v1 = vmul.f32 1.442695, %v658_v63  ;;  %v1237_v7 = vadd.f32 %v2364_v37, %v2495_v25 }
 0x13a   : > { %v1831_v52 = vpop.eup %1830  ;;  %v1174_v24 = vmul.f32 %v969_v20, %v2625_v16  ;;  %v1175_v61 = vmul.f32 %v984_v23, %v735_v53  ;;  %v1137_v6 = vmul.f32 %v2690_v22, %v2653_v27  ;;  %1836 = vpow2.f32 %v2561_v32 }
 0x13b   : > { %v1833_v58 = vpop.eup %1832  ;;  %v1286_v57 = vadd.f32 %v2372_v8, %v2620_v45  ;;  %v987_v9 = vmul.f32 %v1831_v52, %v2658_v49  ;;  %v1654_v33 = vpack.c.bf16 %v2695_v30, %v2681_v59  ;;  %v1238_v37 = vadd.f32 %v1237_v7, %v2515_v54 }
 0x13c   : > { %v1266_v25 = vmul.f32 %v2515_v54, %v2515_v54  ;;  %v1629_v16 = vpack.c.bf16 %v1175_v61, %v1174_v24  ;;  %v1138_v38 = vsub.f32 1.0, %v1137_v6  ;;  %v2712_v28 = vadd.f32 1.0, %v1833_v58 }
 0x13d   : > { %v988_v39 = vsub.f32 1.0, %v987_v9  ;;  %1669 = vst [vmem:[%s2142_s27 + $0x48] sm:$0xff] %v1654_v33   ;;  %1838 = vpow2.f32 %v700_v1  ;;  %v2715_v32 = vadd.f32 %v2539_v0, %v501_v26  ;;  %v1267_v45 = vmul.f32 %v1174_v24, %v1174_v24 }
 0x13e   : > { %v1835_v8 = vpop.eup %1834  ;;  %1664 = vst [vmem:[%s2142_s27 + $0x20] sm:$0xff] %v1629_v16   ;;  %vm992_vm11 = vweird.f32 %v1831_v52  ;;  %v995_v40 = vand.u32 2147483647, %v2658_v49  ;;  %v997_v41 = vand.u32 2147483648, %v2658_v49  ;;  %1840 = vrcp.f32 %v2712_v28 }
 0x13f   : > { %v989_v43 = vmul.f32 %v1831_v52, %v988_v39  ;;  %v2721_v54 = vadd.f32 1.0, %v1835_v8  ;;  %v1139_v34 = vmul.f32 %v2690_v22, %v1138_v38  ;;  %vm991_vm12 = vweird.f32 %v2658_v49 }
 0x140   : > { %vm1141_vm13 = vweird.f32 %v2653_v27  ;;  %v1145_v0 = vand.u32 2147483647, %v2653_v27  ;;  %v659_v46 = vmin.f32 %v2715_v32, 0.0  ;;  %v1837_v48 = vpop.eup %1836  ;;  %vm1142_vm14 = vweird.f32 %v2690_v22  ;;  %vm993_vm15 = vmor %vm991_vm12, %vm992_vm11 }
 0x141   : > { %v990_v29 = vadd.f32 %v1831_v52, %v989_v43  ;;  %1842 = vrcp.f32 %v2721_v54  ;;  %v1147_v31 = vand.u32 2147483648, %v2653_v27  ;;  %v1287_v14 = vadd.f32 %v1286_v57, %v1266_v25  ;;  %vm2738_vm2 = vmor %vm1141_vm13, %vm1142_vm14 }
 0x142   : > { %v1268_v36 = vmul.f32 %v1175_v61, %v1175_v61  ;;  %v998_v62 = vor.u32 1.1754944e-38, %v997_v41  ;;  %v702_v49 = vmul.f32 1.442695, %v659_v46  ;;  %v1239_v42 = vadd.f32 %v1238_v37, %v1174_v24 }
 0x143   : > { %v1839_v50 = vpop.eup %1838  ;;  %v994_v3 = vsel %vm993_vm15, %v1831_v52, %v990_v29  ;;  %vm996_vm0 = vcmp.eq.f32.partialorder %v995_v40, 8.507059e+37  ;;  %v1140_v47 = vadd.f32 %v2690_v22, %v1139_v34  ;;  %v1288_v4 = vadd.f32 %v1287_v14, %v1267_v45 }
 0x144   : > { %v999_v2 = vsel %vm996_vm0, %v998_v62, %v994_v3  ;;  %vm636_vm1 = vcmp.gt.f32.partialorder %v2656_v17, 0.0  ;;  %1844 = vpow2.f32 %v702_v49  ;;  %v1841_v20 = vpop.eup %1840  ;;  %v1240_v44 = vadd.f32 %v1239_v42, %v1175_v61 }
 0x145   : > { %v1176_v60 = vmul.f32 %v999_v2, %v2614_v56  ;;  %vm2743_vm3 = vcmp.eq.f32.partialorder %v1145_v0, 8.507059e+37  ;;  %v1148_v15 = vor.u32 1.1754944e-38, %v1147_v31  ;;  %v1289_v19 = vadd.f32 %v1288_v4, %v1268_v36 }
 0x146   : > { %v1152_v21 = vmul.f32 %v1841_v20, %v2712_v28  ;;  %v1575_v35 = vadd.f32 -1.0, %v1839_v50  ;;  %vm1156_vm4 = vweird.f32 %v2712_v28  ;;  %v1144_v1 = vsel %vm2738_vm2, %v2690_v22, %v1140_v47 }
 0x147   : > { %v1843_v27 = vpop.eup %1842  ;;  %v1241_v53 = vadd.f32 %v1240_v44, %v1176_v60  ;;  %v1269_v23 = vmul.f32 %v1176_v60, %v1176_v60  ;;  %v1162_v56 = vand.u32 2147483648, %v2712_v28  ;;  %vm1157_vm5 = vweird.f32 %v1841_v20 }
 0x148   : > { %v1153_v52 = vsub.f32 1.0, %v1152_v21  ;;  %v1002_v7 = vmul.f32 %v1843_v27, %v2721_v54  ;;  %v1160_v24 = vand.u32 2147483647, %v2712_v28  ;;  %vm637_vm6 = vcmp.gt.f32.partialorder %v2715_v32, 0.0  ;;  %vm2765_vm7 = vmor %vm1156_vm4, %vm1157_vm5 }
 0x149   : > { %v1290_v61 = vadd.f32 %v1289_v19, %v1269_v23  ;;  %v1010_v58 = vand.u32 2147483647, %v2721_v54  ;;  %v1012_v57 = vand.u32 2147483648, %v2721_v54  ;;  %v746_v22 = vsel %vm636_vm1, %v2656_v17, %v1575_v35 }
 0x14a   : > { %v1845_v6 = vpop.eup %1844  ;;  %v1003_v26 = vsub.f32 1.0, %v1002_v7  ;;  %v1154_v9 = vmul.f32 %v1841_v20, %v1153_v52  ;;  %v1149_v33 = vsel %vm2743_vm3, %v1148_v15, %v1144_v1  ;;  %v1163_v16 = vor.u32 1.1754944e-38, %v1162_v56 }
 0x14b   : > { %v1576_v37 = vadd.f32 -1.0, %v1845_v6  ;;  %vm1007_vm8 = vweird.f32 %v1843_v27  ;;  %vm1161_vm9 = vcmp.eq.f32.partialorder %v1160_v24, 8.507059e+37  ;;  %vm627_vm10 = vcmp.gt.f32.partialorder %v2398_v55, 0.0 }
 0x14c   : > { %v1004_v38 = vmul.f32 %v1843_v27, %v1003_v26  ;;  %v1155_v39 = vadd.f32 %v1841_v20, %v1154_v9  ;;  %v1566_v8 = vadd.f32 -1.0, %v1837_v48  ;;  %vm1006_vm11 = vweird.f32 %v2721_v54 }
 0x14d   : > { %v747_v17 = vsel %vm637_vm6, %v2715_v32, %v1576_v37  ;;  %v1186_v28 = vmul.f32 %v1149_v33, %v746_v22  ;;  %vm1008_vm12 = vmor %vm1006_vm11, %vm1007_vm8  ;;  %v1013_v41 = vor.u32 1.1754944e-38, %v1012_v57  ;;  %vm1011_vm13 = vcmp.eq.f32.partialorder %v1010_v58, 8.507059e+37 }
 0x14e   : > { %v1005_v45 = vadd.f32 %v1843_v27, %v1004_v38  ;;  %v1159_v40 = vsel %vm2765_vm7, %v1841_v20, %v1155_v39  ;;  %v737_v46 = vsel %vm627_vm10, %v2398_v55, %v1566_v8  ;;  %v1271_v36 = vmul.f32 %v2222_v5, %v2222_v5 }
 0x14f   : > { %v1164_v43 = vsel %vm1161_vm9, %v1163_v16, %v1159_v40  ;;  %v1272_v50 = vmul.f32 %v2233_v51, %v2233_v51  ;;  %v1273_v3 = vmul.f32 %v2374_v10, %v2374_v10  ;;  %v1274_v2 = vmul.f32 %v2386_v18, %v2386_v18 }
 0x150   : > { %v1009_v34 = vsel %vm1008_vm12, %v1843_v27, %v1005_v45  ;;  %v1187_v0 = vmul.f32 %v1164_v43, %v747_v17  ;;  %vm1308_vm14 = vcmask 1040384  }
 0x151   : > { %v1014_v48 = vsel %vm1011_vm13, %v1013_v41, %v1009_v34 }
 0x152   : > { %v1177_v29 = vmul.f32 %v1014_v48, %v737_v46  ;;  %v1659_v32 = vpack.c.bf16 %v1187_v0, %v1186_v28 }
 0x154   : > { %v1634_v31 = vpack.c.bf16 %v1177_v29, %v1176_v60  ;;  %v1242_v14 = vadd.f32 %v1241_v53, %v1177_v29  ;;  %v1270_v54 = vmul.f32 %v1177_v29, %v1177_v29  ;;  %1670 = vst [vmem:[%s2142_s27 + $0x50] sm:$0xff] %v1659_v32   ;;  %v1279_v53 = vmul.f32 %v1186_v28, %v1186_v28 }
 0x156   : > { %1665 = vst [vmem:[%s2142_s27 + $0x28] sm:$0xff] %v1634_v31   ;;  %v1291_v62 = vadd.f32 %v1290_v61, %v1270_v54  ;;  %v1243_v49 = vadd.f32 %v1242_v14, %v2222_v5  ;;  %v1275_v5 = vmul.f32 %v2550_v11, %v2550_v11 }
 0x158   : > { %v1244_v42 = vadd.f32 %v1243_v49, %v2233_v51  ;;  %v1292_v55 = vadd.f32 %v1291_v62, %v1271_v36  ;;  %v1276_v51 = vmul.f32 %v2555_v12, %v2555_v12 }
 0x15a   : > { %v1245_v47 = vadd.f32 %v1244_v42, %v2374_v10  ;;  %v1293_v4 = vadd.f32 %v1292_v55, %v1272_v50  ;;  %v1277_v10 = vmul.f32 %v2681_v59, %v2681_v59 }
 0x15c   : > { %v1246_v63 = vadd.f32 %v1245_v47, %v2386_v18  ;;  %v1294_v20 = vadd.f32 %v1293_v4, %v1273_v3  ;;  %v1278_v18 = vmul.f32 %v2695_v30, %v2695_v30 }
 0x15e   : > { %v1247_v44 = vadd.f32 %v1246_v63, %v2550_v11  ;;  %v1295_v60 = vadd.f32 %v1294_v20, %v1274_v2 }
 0x160   : > { %v1248_v13 = vadd.f32 %v1247_v44, %v2555_v12  ;;  %v1296_v15 = vadd.f32 %v1295_v60, %v1275_v5  ;;  %v1280_v12 = vmul.f32 %v1187_v0, %v1187_v0 }
 0x162   : > { %v1249_v19 = vadd.f32 %v1248_v13, %v2681_v59  ;;  %v1297_v21 = vadd.f32 %v1296_v15, %v1276_v51 }
 0x164   : > { %v1250_v35 = vadd.f32 %v1249_v19, %v2695_v30  ;;  %v1298_v27 = vadd.f32 %v1297_v21, %v1277_v10 }
 0x166   : > { %v1251_v11 = vadd.f32 %v1250_v35, %v1186_v28  ;;  %v1299_v23 = vadd.f32 %v1298_v27, %v1278_v18 }
 0x168   : > { %v1300_v1 = vadd.f32 %v1299_v23, %v1279_v53  ;;  %v1252_v56 = vadd.f32 %v1251_v11, %v1187_v0 }
 0x16a   : > { %v1253_v52 = vrot.slane %v1252_v56, 4  ;;  %v1301_v7 = vadd.f32 %v1300_v1, %v1280_v12 }
 0x16c   : > { %v1254_v24 = vadd.f32 %v1253_v52, %v1252_v56  ;;  %v1302_v61 = vrot.slane %v1301_v7, 4 }
 0x16e   : > { %v1255_v6 = vrot.slane %v1254_v24, 2  ;;  %v1303_v59 = vadd.f32 %v1302_v61, %v1301_v7 }
 0x170   : > { %v1256_v26 = vadd.f32 %v1255_v6, %v1254_v24  ;;  %v1304_v58 = vrot.slane %v1303_v59, 2 }
 0x172   : > { %v1257_v57 = vrot.slane %v1256_v26, 1  ;;  %v1305_v9 = vadd.f32 %v1304_v58, %v1303_v59 }
 0x174   : > { %v1306_v30 = vrot.slane %v1305_v9, 1  ;;  %v1258_v22 = vadd.f32 %v1257_v57, %v1256_v26 }
 0x176   : > { %v1307_v33 = vadd.f32 %v1306_v30, %v1305_v9 }
 0x178   : > { %v1309_v37 = vsel %vm1308_vm14, %v1258_v22, %v1307_v33 }
 0x179   : > { %1310 = vst [vmem:[%s255_s9] sm:$0x3] %v1309_v37 }
 0x17a PF: > { %s15_s17 = sadd.s32 1, %s1870_s17   ;;  %s2869_s15 = smov %s1866_s16 }
 0x17b   : > { %p12_p5 = scmp.ge.s32.totalorder %s15_s17, 4   ;;  %s2870_s16 = smov %s2872_s18 }
 0x17d   :  { %14 = sbr.rel (!%p12_p5) target bundleno = 2 (0x2), region = 74 }

// kernel: gated_coarse2fine_forward.47
= control target key start
LH: loop header
LB: loop body
LE: loop exit
PB: predicated region body
PF: predicated region fallthrough
CT: control target
= control target key end

     0   :  { %s804_s12 = smov 0   ;;  %s806_s13 = smov 0   ;;  %s920_s0 = inlined_call_operand.vmem [shape: bf16[2,176,128], index: 0, kind: input, shape index: {}]   ;;  %s921_s1 = inlined_call_operand.vmem [shape: bf16[128,128], index: 1, kind: input, shape index: {}]   ;;  %s922_s2 = inlined_call_operand.vmem [shape: f32[1,128], index: 2, kind: input, shape index: {}]   ;;  %s923_s3 = inlined_call_operand.vmem [shape: f32[2,176,128], index: 3, kind: output, shape index: {}]  }
   0x1   :  { %s808_s14 = smov 0  }
   0x2 LB: > { %s25_s15 = sadd.s32 1, %s778_s13  ;;  %p565_p0 = scmp.ge.s32.totalorder %s782_s14, 1  ;;  %s782_s14 = sphi %s808_s14, %s13_s14   ;;  %s778_s13 = sphi %s806_s13, %s925_s13   ;;  %s774_s12 = sphi %s804_s12, %s924_s12  }
   0x3   : > { %p27_p1 = scmp.ge.s32.totalorder %s25_s15, 2  ;;  %p158_p2 = scmp.lt.s32.totalorder %s782_s14, 3 }
   0x5   : > { %s927_s15 = smov (%p27_p1, %s25_s15), 0  ;;  %p159_p3 = pnand %p565_p0, %p158_p2 }
   0x6   : > { %p191_p4 = scmp.lt.s32.totalorder (!%p159_p3), %s774_s12, 1 }
   0x7   : > { %162 = sbr.rel (%p159_p3) target bundleno = 227 (0xe3), region = 32 }
   0xc   : > { %v664_v0 = vld [vmem:[%s921_s1 + $0x38] sm:$0xff]  ;;  %v663_v1 = vld [vmem:[%s921_s1 + $0x30] sm:$0xff]  ;;  %v662_v2 = vld [vmem:[%s921_s1 + $0x28] sm:$0xff]  ;;  %s929_s12 = smov (!%p191_p4, %s774_s12), 1 }
   0xd   : > { %665 = vmatpush.bf16.msra.mxu1 %v664_v0  ;;  %666 = vmatpush.bf16.msra.mxu2 %v664_v0  ;;  %v661_v3 = vld [vmem:[%s921_s1 + $0x20] sm:$0xff]  ;;  %v660_v4 = vld [vmem:[%s921_s1 + $0x18] sm:$0xff]  ;;  %v659_v5 = vld [vmem:[%s921_s1 + $0x10] sm:$0xff]  ;;  %s689_s30 = smul.u32 88, %s929_s12 }
   0xe   : > { %667 = vmatpush.bf16.msra.mxu3 %v664_v0  ;;  %366 = vmatpush.bf16.msra.mxu0 %v664_v0  ;;  %v658_v6 = vld [vmem:[%s921_s1 + $0x8] sm:$0xff]  ;;  %v657_v7 = vld [vmem:[%s921_s1] sm:$0xff]  ;;  %s690_s11 = smul.u32 176, %s929_s12 }
   0xf   : > { %s198_s8 = scalar_lea.vmem %s920_s0, %s689_s30  ;;  %v859_v19 = vld [vmem:[%s922_s2] ss:$0 sm:$0xff] }
  0x10   : > { %v648_v8 = vld [vmem:[%s198_s8 + $0x10] sm:$0xff]  ;;  %v651_v9 = vld [vmem:[%s198_s8 + $0x28] sm:$0xff]  ;;  %v654_v10 = vld [vmem:[%s198_s8 + $0x40] sm:$0xff]  ;;  %s867_s18 = scalar_lea.vmem %s923_s3, %s690_s11 }
  0x11   : > { %668 = vmatpush.bf16.msra.mxu1 %v663_v1  ;;  %669 = vmatpush.bf16.msra.mxu2 %v663_v1  ;;  %v646_v11 = vld [vmem:[%s198_s8] sm:$0xff]  ;;  %v649_v12 = vld [vmem:[%s198_s8 + $0x18] sm:$0xff]  ;;  %v652_v13 = vld [vmem:[%s198_s8 + $0x30] sm:$0xff] }
  0x12   : > { %670 = vmatpush.bf16.msra.mxu3 %v663_v1  ;;  %367 = vmatpush.bf16.msra.mxu0 %v663_v1  ;;  %v655_v14 = vld [vmem:[%s198_s8 + $0x48] sm:$0xff]  ;;  %v650_v16 = vld [vmem:[%s198_s8 + $0x20] sm:$0xff]  ;;  %v653_v17 = vld [vmem:[%s198_s8 + $0x38] sm:$0xff] }
  0x13   : > { %v647_v15 = vld [vmem:[%s198_s8 + $0x8] sm:$0xff]  ;;  %v656_v18 = vld [vmem:[%s198_s8 + $0x50] sm:$0xff] }
  0x15   : > { %671 = vmatpush.bf16.msra.mxu1 %v662_v2  ;;  %672 = vmatpush.bf16.msra.mxu2 %v662_v2 }
  0x16   : > { %673 = vmatpush.bf16.msra.mxu3 %v662_v2  ;;  %368 = vmatpush.bf16.msra.mxu0 %v662_v2 }
  0x19   : > { %674 = vmatpush.bf16.msra.mxu1 %v661_v3  ;;  %675 = vmatpush.bf16.msra.mxu2 %v661_v3 }
  0x1a   : > { %676 = vmatpush.bf16.msra.mxu3 %v661_v3  ;;  %369 = vmatpush.bf16.msra.mxu0 %v661_v3 }
  0x1d   : > { %677 = vmatpush.bf16.msra.mxu1 %v660_v4  ;;  %678 = vmatpush.bf16.msra.mxu2 %v660_v4 }
  0x1e   : > { %679 = vmatpush.bf16.msra.mxu3 %v660_v4  ;;  %370 = vmatpush.bf16.msra.mxu0 %v660_v4 }
  0x21   : > { %680 = vmatpush.bf16.msra.mxu1 %v659_v5  ;;  %681 = vmatpush.bf16.msra.mxu2 %v659_v5 }
  0x22   : > { %682 = vmatpush.bf16.msra.mxu3 %v659_v5  ;;  %371 = vmatpush.bf16.msra.mxu0 %v659_v5 }
  0x25   : > { %683 = vmatpush.bf16.msra.mxu1 %v658_v6  ;;  %684 = vmatpush.bf16.msra.mxu2 %v658_v6 }
  0x26   : > { %685 = vmatpush.bf16.msra.mxu3 %v658_v6  ;;  %372 = vmatpush.bf16.msra.mxu0 %v658_v6 }
  0x29   : > { %686 = vmatpush.bf16.msra.mxu1 %v657_v7  ;;  %687 = vmatpush.bf16.msra.mxu2 %v657_v7 }
  0x2a   : > { %688 = vmatpush.bf16.msra.mxu3 %v657_v7  ;;  %373 = vmatpush.bf16.msra.mxu0 %v657_v7 }
  0x2c   : > { %384 = vmatmul.bf16.vlgmr.msra.gmra.mxu1 %v648_v8  ;;  %399 = vmatmul.bf16.vlgmr.msra.gmra.mxu2 %v651_v9 }
  0x2d   : > { %414 = vmatmul.bf16.vlgmr.msra.gmra.mxu3 %v654_v10  ;;  %374 = vmatmul.bf16.vlgmr.msra.gmra.mxu0 %v646_v11 }
  0x3c   : > { %389 = vmatmul.bf16.gmra.mxu1 %v649_v12  ;;  %404 = vmatmul.bf16.gmra.mxu2 %v652_v13 }
  0x3d   : > { %419 = vmatmul.bf16.gmra.mxu3 %v655_v14  ;;  %379 = vmatmul.bf16.gmra.mxu0 %v647_v15 }
  0x4c   : > { %394 = vmatmul.bf16.gmra.mxu1 %v650_v16  ;;  %409 = vmatmul.bf16.gmra.mxu2 %v653_v17 }
  0x4d   : > { %424 = vmatmul.bf16.gmra.mxu3 %v656_v18 }
  0xa9   : > { %v385_v20 = vpop.f32.mrf.mxu1 }
  0xaa   : > { %v386_v21 = vadd.f32 %v859_v19, %v385_v20  ;;  %v375_v22 = vpop.f32.mrf.mxu0 }
  0xab   : > { %v376_v23 = vadd.f32 %v859_v19, %v375_v22 }
  0xac   : > { %716 = vtanh.f32 %v386_v21 }
  0xad   : > { %718 = vtanh.f32 %v376_v23 }
  0xaf   : > { %v400_v24 = vpop.f32.mrf.mxu2 }
  0xb0   : > { %v401_v25 = vadd.f32 %v859_v19, %v400_v24  ;;  %v415_v26 = vpop.f32.mrf.mxu3 }
  0xb1   : > { %v416_v27 = vadd.f32 %v859_v19, %v415_v26  ;;  %v387_v28 = vpop.f32.mrf.mxu1 }
  0xb2   : > { %v717_v29 = vpop.eup %716  ;;  %720 = vtanh.f32 %v401_v25  ;;  %v388_v30 = vadd.f32 %v859_v19, %v387_v28  ;;  %v377_v31 = vpop.f32.mrf.mxu0 }
  0xb3   : > { %v719_v32 = vpop.eup %718  ;;  %456 = vst [vmem:[%s867_s18 + $0x20] sm:$0xff] %v717_v29  ;;  %722 = vtanh.f32 %v416_v27  ;;  %v378_v33 = vadd.f32 %v859_v19, %v377_v31 }
  0xb4   : > { %724 = vtanh.f32 %v388_v30  ;;  %452 = vst [vmem:[%s867_s18] sm:$0xff] %v719_v32 }
  0xb5   : > { %726 = vtanh.f32 %v378_v33 }
  0xb7   : > { %v402_v34 = vpop.f32.mrf.mxu2 }
  0xb8   : > { %v721_v35 = vpop.eup %720  ;;  %v403_v36 = vadd.f32 %v859_v19, %v402_v34  ;;  %v417_v37 = vpop.f32.mrf.mxu3 }
  0xb9   : > { %v723_v38 = vpop.eup %722  ;;  %462 = vst [vmem:[%s867_s18 + $0x50] sm:$0xff] %v721_v35  ;;  %v418_v39 = vadd.f32 %v859_v19, %v417_v37  ;;  %v390_v40 = vpop.f32.mrf.mxu1 }
  0xba   : > { %v725_v41 = vpop.eup %724  ;;  %468 = vst [vmem:[%s867_s18 + $0x80] sm:$0xff] %v723_v38  ;;  %728 = vtanh.f32 %v403_v36  ;;  %v391_v42 = vadd.f32 %v859_v19, %v390_v40  ;;  %v380_v43 = vpop.f32.mrf.mxu0 }
  0xbb   : > { %v727_v44 = vpop.eup %726  ;;  %457 = vst [vmem:[%s867_s18 + $0x28] sm:$0xff] %v725_v41  ;;  %730 = vtanh.f32 %v418_v39  ;;  %v381_v45 = vadd.f32 %v859_v19, %v380_v43 }
  0xbc   : > { %732 = vtanh.f32 %v391_v42  ;;  %453 = vst [vmem:[%s867_s18 + $0x8] sm:$0xff] %v727_v44 }
  0xbd   : > { %734 = vtanh.f32 %v381_v45 }
  0xbf   : > { %v405_v46 = vpop.f32.mrf.mxu2 }
  0xc0   : > { %v729_v47 = vpop.eup %728  ;;  %v406_v48 = vadd.f32 %v859_v19, %v405_v46  ;;  %v420_v49 = vpop.f32.mrf.mxu3 }
  0xc1   : > { %v731_v50 = vpop.eup %730  ;;  %463 = vst [vmem:[%s867_s18 + $0x58] sm:$0xff] %v729_v47  ;;  %v421_v51 = vadd.f32 %v859_v19, %v420_v49  ;;  %v392_v52 = vpop.f32.mrf.mxu1 }
  0xc2   : > { %v733_v53 = vpop.eup %732  ;;  %469 = vst [vmem:[%s867_s18 + $0x88] sm:$0xff] %v731_v50  ;;  %736 = vtanh.f32 %v406_v48  ;;  %v393_v54 = vadd.f32 %v859_v19, %v392_v52  ;;  %v382_v55 = vpop.f32.mrf.mxu0 }
  0xc3   : > { %v735_v56 = vpop.eup %734  ;;  %458 = vst [vmem:[%s867_s18 + $0x30] sm:$0xff] %v733_v53  ;;  %738 = vtanh.f32 %v421_v51  ;;  %v383_v57 = vadd.f32 %v859_v19, %v382_v55 }
  0xc4   : > { %740 = vtanh.f32 %v393_v54  ;;  %454 = vst [vmem:[%s867_s18 + $0x10] sm:$0xff] %v735_v56 }
  0xc5   : > { %742 = vtanh.f32 %v383_v57 }
  0xc7   : > { %v407_v58 = vpop.f32.mrf.mxu2 }
  0xc8   : > { %v737_v59 = vpop.eup %736  ;;  %v408_v60 = vadd.f32 %v859_v19, %v407_v58  ;;  %v422_v61 = vpop.f32.mrf.mxu3 }
  0xc9   : > { %v739_v62 = vpop.eup %738  ;;  %464 = vst [vmem:[%s867_s18 + $0x60] sm:$0xff] %v737_v59  ;;  %v423_v63 = vadd.f32 %v859_v19, %v422_v61  ;;  %v395_v0 = vpop.f32.mrf.mxu1 }
  0xca   : > { %v741_v1 = vpop.eup %740  ;;  %470 = vst [vmem:[%s867_s18 + $0x90] sm:$0xff] %v739_v62  ;;  %744 = vtanh.f32 %v408_v60  ;;  %v396_v2 = vadd.f32 %v859_v19, %v395_v0 }
  0xcb   : > { %v743_v3 = vpop.eup %742  ;;  %459 = vst [vmem:[%s867_s18 + $0x38] sm:$0xff] %v741_v1  ;;  %746 = vtanh.f32 %v423_v63 }
  0xcc   : > { %748 = vtanh.f32 %v396_v2  ;;  %455 = vst [vmem:[%s867_s18 + $0x18] sm:$0xff] %v743_v3 }
  0xcf   : > { %v410_v4 = vpop.f32.mrf.mxu2 }
  0xd0   : > { %v745_v5 = vpop.eup %744  ;;  %v411_v6 = vadd.f32 %v859_v19, %v410_v4  ;;  %v425_v7 = vpop.f32.mrf.mxu3 }
  0xd1   : > { %v747_v8 = vpop.eup %746  ;;  %465 = vst [vmem:[%s867_s18 + $0x68] sm:$0xff] %v745_v5  ;;  %v426_v9 = vadd.f32 %v859_v19, %v425_v7  ;;  %v397_v10 = vpop.f32.mrf.mxu1 }
  0xd2   : > { %v749_v11 = vpop.eup %748  ;;  %471 = vst [vmem:[%s867_s18 + $0x98] sm:$0xff] %v747_v8  ;;  %750 = vtanh.f32 %v411_v6  ;;  %v398_v12 = vadd.f32 %v859_v19, %v397_v10 }
  0xd3   : > { %460 = vst [vmem:[%s867_s18 + $0x40] sm:$0xff] %v749_v11  ;;  %752 = vtanh.f32 %v426_v9 }
  0xd4   : > { %754 = vtanh.f32 %v398_v12 }
  0xd7   : > { %v412_v13 = vpop.f32.mrf.mxu2 }
  0xd8   : > { %v751_v14 = vpop.eup %750  ;;  %v413_v15 = vadd.f32 %v859_v19, %v412_v13  ;;  %v427_v16 = vpop.f32.mrf.mxu3 }
  0xd9   : > { %v753_v17 = vpop.eup %752  ;;  %466 = vst [vmem:[%s867_s18 + $0x70] sm:$0xff] %v751_v14  ;;  %v428_v18 = vadd.f32 %v859_v19, %v427_v16 }
  0xda   : > { %v755_v20 = vpop.eup %754  ;;  %472 = vst [vmem:[%s867_s18 + $0xa0] sm:$0xff] %v753_v17  ;;  %756 = vtanh.f32 %v413_v15 }
  0xdb   : > { %461 = vst [vmem:[%s867_s18 + $0x48] sm:$0xff] %v755_v20  ;;  %758 = vtanh.f32 %v428_v18 }
  0xe0   : > { %v757_v21 = vpop.eup %756 }
  0xe1   : > { %v759_v22 = vpop.eup %758  ;;  %467 = vst [vmem:[%s867_s18 + $0x78] sm:$0xff] %v757_v21 }
  0xe2   : > { %473 = vst [vmem:[%s867_s18 + $0xa8] sm:$0xff] %v759_v22 }
  0xe3 PF: > { %s13_s14 = sadd.s32 1, %s782_s14   ;;  %s924_s12 = smov %s778_s13 }
  0xe4   : > { %p10_p5 = scmp.ge.s32.totalorder %s13_s14, 4   ;;  %s925_s13 = smov %s927_s15 }
  0xe6   :  { %12 = sbr.rel (!%p10_p5) target bundleno = 2 (0x2), region = 62 }

</bundles_post_ra>
